<compile_context>
chip_gen: v7x
topology: tpu7x:2x2x1
jax: 0.10.0
libtpu: 0.0.40
codegen_flags: <defaults>
</compile_context>

<pallas_src>
import functools
import math

import jax
import jax.numpy as jnp
from jax import lax
from jax.experimental import pallas as pl
from jax.experimental.pallas import tpu as pltpu

BN_EPS = 1e-5
LANE = 128


def _round_up(x, m):
    return (x + m - 1) // m * m


def _cpad(c):
    return _round_up(c, LANE)


# ---------------------------------------------------------------------------
# Pallas kernel: tiled matmul with fused bias / residual / ReLU epilogue
# ---------------------------------------------------------------------------

def _fused_matmul_kernel(*refs, relu, has_res):
    if has_res:
        x_ref, w_ref, b_ref, r_ref, o_ref, acc_ref = refs
    else:
        x_ref, w_ref, b_ref, o_ref, acc_ref = refs
        r_ref = None

    k = pl.program_id(2)

    @pl.when(k == 0)
    def _():
        acc_ref[...] = jnp.zeros_like(acc_ref)

    acc_ref[...] += jnp.dot(x_ref[...], w_ref[...],
                            preferred_element_type=jnp.float32)

    @pl.when(k == pl.num_programs(2) - 1)
    def _():
        out = acc_ref[...] + b_ref[...]
        if r_ref is not None:
            out = out + r_ref[...].astype(jnp.float32)
        if relu:
            out = jnp.maximum(out, 0.0)
        o_ref[...] = out.astype(o_ref.dtype)


def _pick_tm(m):
    mp = _round_up(max(m, 8), 8)
    if mp >= 256:
        return 256, _round_up(mp, 256)
    return mp, mp


def _pick_tk(kp):
    for cand in (768, 640, 512, 384, 256, 128):
        if kp % cand == 0:
            return cand
    return 128  # unreachable: kp is always a multiple of 128


def fused_matmul(x, w, bias, residual=None, relu=False, out_dtype=jnp.bfloat16):
    """out = act((x @ w) + bias [+ residual]) as a tiled, pipelined MXU matmul.

    x: (M, K) bf16.  w: (Kp, Np) bf16 with Kp >= K (zero-padded), Kp, Np % 128 == 0.
    bias: (Np,) f32.  residual: (M, Np) or None.  Returns (M, Np).
    """
    M, K = x.shape
    Kp, Np = w.shape
    assert Kp % LANE == 0 and Np % LANE == 0 and Kp >= K

    tm, Mp = _pick_tm(M)
    tn = 256 if Np % 256 == 0 else LANE
    tk = _pick_tk(Kp)

    if (Mp, Kp) != (M, K):
        x = jnp.pad(x, ((0, Mp - M), (0, Kp - K)))
    if residual is not None and Mp != M:
        residual = jnp.pad(residual, ((0, Mp - M), (0, 0)))

    bias2d = bias.reshape(1, Np).astype(jnp.float32)

    in_specs = [
        pl.BlockSpec((tm, tk), lambda i, j, k: (i, k)),
        pl.BlockSpec((tk, tn), lambda i, j, k: (k, j)),
        pl.BlockSpec((1, tn), lambda i, j, k: (0, j)),
    ]
    args = [x.astype(jnp.bfloat16), w.astype(jnp.bfloat16), bias2d]
    if residual is not None:
        # index_map independent of k -> block stays resident across the K loop.
        in_specs.append(pl.BlockSpec((tm, tn), lambda i, j, k: (i, j)))
        args.append(residual.astype(jnp.bfloat16))

    out = pl.pallas_call(
        functools.partial(_fused_matmul_kernel, relu=relu,
                          has_res=residual is not None),
        out_shape=jax.ShapeDtypeStruct((Mp, Np), out_dtype),
        grid=(Mp // tm, Np // tn, Kp // tk),
        in_specs=in_specs,
        out_specs=pl.BlockSpec((tm, tn), lambda i, j, k: (i, j)),
        scratch_shapes=[pltpu.VMEM((tm, tn), jnp.float32)],
        compiler_params=pltpu.CompilerParams(
            dimension_semantics=("parallel", "parallel", "arbitrary")),
    )(*args)

    if Mp != M:
        out = out[:M]
    return out


# ---------------------------------------------------------------------------
# JAX glue: im2col, conv(+BN folded)(+ReLU)(+residual), pooling
# ---------------------------------------------------------------------------

def _im2col(x, kh, kw, stride, pad):
    # TODO(synk): patches are materialized in HBM (bf16); an in-kernel window
    # gather (taps as an extra reduction grid axis) would remove the kh*kw
    # read amplification.
    B, H, W, C = x.shape
    oh = (H + 2 * pad - kh) // stride + 1
    ow = (W + 2 * pad - kw) // stride + 1
    xp = jnp.pad(x, ((0, 0), (pad, pad), (pad, pad), (0, 0)))
    cols = []
    for i in range(kh):
        for j in range(kw):
            sl = lax.slice(
                xp,
                (0, i, j, 0),
                (B, i + stride * (oh - 1) + 1, j + stride * (ow - 1) + 1, C),
                (1, stride, stride, 1),
            )
            cols.append(sl.reshape(B * oh * ow, C))
    return jnp.concatenate(cols, axis=-1), oh, ow


def conv_bn(x, wmat, bias, kh, kw, stride, pad, relu=False, residual=None):
    """Conv2d(bias=False) + folded-BN affine (+residual) (+ReLU)."""
    B = x.shape[0]
    patches, oh, ow = _im2col(x, kh, kw, stride, pad)
    res2d = None
    if residual is not None:
        res2d = residual.reshape(B * oh * ow, residual.shape[-1])
    out = fused_matmul(patches, wmat, bias, residual=res2d, relu=relu)
    return out.reshape(B, oh, ow, wmat.shape[1])


def maxpool_3x3_s2_p1(x):
    # Inputs are post-ReLU (>= 0) so zero-padding is equivalent to -inf padding.
    B, H, W, C = x.shape
    oh = (H + 2 - 3) // 2 + 1
    ow = (W + 2 - 3) // 2 + 1
    xp = jnp.pad(x, ((0, 0), (1, 1), (1, 1), (0, 0)))
    out = None
    for i in range(3):
        for j in range(3):
            sl = lax.slice(
                xp, (0, i, j, 0),
                (B, i + 2 * (oh - 1) + 1, j + 2 * (ow - 1) + 1, C),
                (1, 2, 2, 1))
            out = sl if out is None else jnp.maximum(out, sl)
    return out


# ---------------------------------------------------------------------------
# Parameter init (ResNet18 backbone + two heads), BN scale folded into weights
# ---------------------------------------------------------------------------

def _bn_affine(c):
    # Eval-mode BN with fresh stats: y = x / sqrt(1 + eps).
    scale = jnp.full((c,), 1.0 / math.sqrt(1.0 + BN_EPS), jnp.float32)
    shift = jnp.zeros((c,), jnp.float32)
    return scale, shift


def _folded_conv(key, outc, inc, kh, kw, inc_pad, outc_pad):
    # kaiming_normal_(mode='fan_out', nonlinearity='relu')
    std = math.sqrt(2.0 / (outc * kh * kw))
    w = std * jax.random.normal(key, (outc, inc, kh, kw), jnp.float32)
    scale, shift = _bn_affine(outc)
    w = w * scale[:, None, None, None]               # fold BN scale into weights
    wm = jnp.transpose(w, (2, 3, 1, 0))              # (kh, kw, inc, outc)
    wm = jnp.pad(wm, ((0, 0), (0, 0), (0, inc_pad - inc), (0, outc_pad - outc)))
    wm = wm.reshape(kh * kw * inc_pad, outc_pad)
    kp = _round_up(wm.shape[0], LANE)
    wm = jnp.pad(wm, ((0, kp - wm.shape[0]), (0, 0)))
    bias = jnp.pad(shift, (0, outc_pad - outc))      # BN shift (zeros here)
    return wm.astype(jnp.bfloat16), bias.astype(jnp.float32)


def init_params(key, dim_prod):
    keys = iter(jax.random.split(key, 64))
    p = {}
    # Modified conv1: 6 input channels, 7x7, stride 2, pad 3, bias=False.
    p["conv1"] = _folded_conv(next(keys), 64, 6, 7, 7, inc_pad=6,
                              outc_pad=_cpad(64))
    layer_cfg = [(64, 64, 1), (64, 128, 2), (128, 256, 2), (256, 512, 2)]
    layers = []
    for inc, outc, stride in layer_cfg:
        blocks = []
        for bi in range(2):
            s = stride if bi == 0 else 1
            bin_c = inc if bi == 0 else outc
            blk = {"stride": s}
            blk["conv1"] = _folded_conv(next(keys), outc, bin_c, 3, 3,
                                        inc_pad=_cpad(bin_c), outc_pad=_cpad(outc))
            blk["conv2"] = _folded_conv(next(keys), outc, outc, 3, 3,
                                        inc_pad=_cpad(outc), outc_pad=_cpad(outc))
            if s != 1 or bin_c != outc:
                blk["down"] = _folded_conv(next(keys), outc, bin_c, 1, 1,
                                           inc_pad=_cpad(bin_c), outc_pad=_cpad(outc))
            blocks.append(blk)
        layers.append(blocks)
    p["layers"] = layers

    # Heads: nn.Linear(512, dim_prod) and nn.Linear(512, 1), merged into one matmul.
    k1, k2, k3, k4 = jax.random.split(next(keys), 4)
    bound = 1.0 / math.sqrt(512.0)
    tw = jax.random.uniform(k1, (dim_prod, 512), jnp.float32, -bound, bound)
    tb = jax.random.uniform(k2, (dim_prod,), jnp.float32, -bound, bound)
    sw = jax.random.uniform(k3, (1, 512), jnp.float32, -bound, bound)
    sb = jax.random.uniform(k4, (1,), jnp.float32, -bound, bound)
    n_head = dim_prod + 1
    np_head = _round_up(n_head, LANE)
    wh = jnp.concatenate([tw, sw], axis=0).T          # (512, dim_prod + 1)
    wh = jnp.pad(wh, ((0, 0), (0, np_head - n_head)))
    bh = jnp.pad(jnp.concatenate([tb, sb]), (0, np_head - n_head))
    p["head_w"] = wh.astype(jnp.bfloat16)
    p["head_b"] = bh.astype(jnp.float32)
    p["dim_prod"] = dim_prod
    return p


# ---------------------------------------------------------------------------
# Forward pass
# ---------------------------------------------------------------------------

def _basic_block(x, blk):
    h = conv_bn(x, *blk["conv1"], 3, 3, blk["stride"], 1, relu=True)
    if "down" in blk:
        identity = conv_bn(x, *blk["down"], 1, 1, blk["stride"], 0, relu=False)
    else:
        identity = x
    # conv2 + BN + residual add + ReLU fused into one matmul epilogue.
    return conv_bn(h, *blk["conv2"], 3, 3, 1, 1, relu=True, residual=identity)


def latent_shift_predictor(params, x1, x2):
    """x1, x2: NCHW float32. Returns (logits (B, dim_prod), shift (B,))."""
    # TODO(synk): downsample (F.interpolate) pre-resize not implemented.
    if x1.shape[1] == 1 and x2.shape[1] == 1:
        x1 = jnp.tile(x1, (1, 3, 1, 1))
        x2 = jnp.tile(x2, (1, 3, 1, 1))
    x = jnp.concatenate([x1, x2], axis=1)                     # (B, 6, H, W)
    x = jnp.transpose(x, (0, 2, 3, 1)).astype(jnp.bfloat16)   # NCHW -> NHWC, bf16 MXU feed

    x = conv_bn(x, *params["conv1"], 7, 7, 2, 3, relu=True)
    x = maxpool_3x3_s2_p1(x)
    for layer in params["layers"]:
        for blk in layer:
            x = _basic_block(x, blk)

    feats = jnp.mean(x.astype(jnp.float32), axis=(1, 2))      # adaptive avgpool -> (B, 512)
    head = fused_matmul(feats.astype(jnp.bfloat16), params["head_w"],
                        params["head_b"], relu=False, out_dtype=jnp.float32)
    dp = params["dim_prod"]
    logits = head[:, :dp]
    shift = jnp.squeeze(head[:, dp:dp + 1])
    return logits, shift


# ---------------------------------------------------------------------------
# Main
# ---------------------------------------------------------------------------

if __name__ == "__main__":
    key = jax.random.PRNGKey(0)
    kp, k1, k2 = jax.random.split(key, 3)

    dim = (4,)                       # nn.Linear(512, np.product(dim)) -> 4 logits
    params = init_params(kp, int(math.prod(dim)))

    x1 = jax.random.normal(k1, (2, 3, 16, 16), jnp.float32)
    x2 = jax.random.normal(k2, (2, 3, 16, 16), jnp.float32)

    fwd = jax.jit(lambda a, b: latent_shift_predictor(params, a, b))
    logits, shift = fwd(x1, x2)
    jax.block_until_ready((logits, shift))

    assert logits.shape == (2, int(math.prod(dim))), logits.shape
    assert shift.shape == (2,), shift.shape
    assert bool(jnp.all(jnp.isfinite(logits))) and bool(jnp.all(jnp.isfinite(shift)))
    print("KERNEL_OK")
</pallas_src>

<mosaic_0001>
module attributes {stable_mosaic.version = 11 : i64} {
  func.func @_fused_matmul_kernel(%arg0: i32, %arg1: i32, %arg2: i32, %arg3: memref<128x384xbf16, #tpu.memory_space<vmem>>, %arg4: memref<384x128xbf16, #tpu.memory_space<vmem>>, %arg5: memref<1x128xf32, #tpu.memory_space<vmem>>, %arg6: memref<128x128xbf16, #tpu.memory_space<vmem>>, %arg7: memref<128x128xf32, #tpu.memory_space<vmem>>) attributes {dimension_semantics = [#tpu.dimension_semantics<parallel>, #tpu.dimension_semantics<parallel>, #tpu.dimension_semantics<arbitrary>], iteration_bounds = array<i64: 1, 1, 1>, scalar_prefetch = 0 : i64, scratch_operands = 1 : i64, tpu.core_type = #tpu.core_type<tc>, window_params = [{transform_indices = @transform_0, window_bounds = array<i64: 128, 384>}, {transform_indices = @transform_1, window_bounds = array<i64: 384, 128>}, {transform_indices = @transform_2, window_bounds = array<i64: 1, 128>}, {transform_indices = @transform_3, window_bounds = array<i64: 128, 128>}]} {
    %c0_i32 = arith.constant 0 : i32
    %0 = arith.cmpi eq, %arg2, %c0_i32 : i32
    %1 = arith.extui %0 : i1 to i32
    %c0_i32_0 = arith.constant 0 : i32
    %2 = arith.cmpi ne, %1, %c0_i32_0 : i32
    scf.if %2 {
      %cst_10 = arith.constant 0.000000e+00 : f32
      %12 = vector.broadcast %cst_10 : f32 to vector<128x128xf32>
      %c0_11 = arith.constant 0 : index
      %c0_12 = arith.constant 0 : index
      %13 = vector.load %arg7[%c0_11, %c0_12] : memref<128x128xf32, #tpu.memory_space<vmem>>, vector<128x128xf32>
      tpu.vector_store %arg7[%c0_11, %c0_12], %12 {strides = array<i32>} : memref<128x128xf32, #tpu.memory_space<vmem>>, vector<128x128xf32>,
    } else {
    }
    %c0 = arith.constant 0 : index
    %c0_1 = arith.constant 0 : index
    %3 = vector.load %arg7[%c0, %c0_1] : memref<128x128xf32, #tpu.memory_space<vmem>>, vector<128x128xf32>
    %c0_2 = arith.constant 0 : index
    %c0_3 = arith.constant 0 : index
    %4 = vector.load %arg3[%c0_2, %c0_3] : memref<128x384xbf16, #tpu.memory_space<vmem>>, vector<128x384xbf16>
    %c0_4 = arith.constant 0 : index
    %c0_5 = arith.constant 0 : index
    %5 = vector.load %arg4[%c0_4, %c0_5] : memref<384x128xbf16, #tpu.memory_space<vmem>>, vector<384x128xbf16>
    %cst = arith.constant dense<0.000000e+00> : vector<128x128xf32>
    %6 = tpu.matmul %4, %5, %cst {dimension_numbers = #tpu.dot_dimension_numbers<[1], [0], [0], [1], [0, 0, 1, 1], [], []>} : vector<128x384xbf16>, vector<384x128xbf16>, vector<128x128xf32> -> vector<128x128xf32>
    %7 = arith.addf %3, %6 : vector<128x128xf32>
    %c0_6 = arith.constant 0 : index
    %c0_7 = arith.constant 0 : index
    %8 = vector.load %arg7[%c0_6, %c0_7] : memref<128x128xf32, #tpu.memory_space<vmem>>, vector<128x128xf32>
    tpu.vector_store %arg7[%c0_6, %c0_7], %7 {strides = array<i32>} : memref<128x128xf32, #tpu.memory_space<vmem>>, vector<128x128xf32>,
    %c0_i32_8 = arith.constant 0 : i32
    %9 = arith.cmpi eq, %arg2, %c0_i32_8 : i32
    %10 = arith.extui %9 : i1 to i32
    %c0_i32_9 = arith.constant 0 : i32
    %11 = arith.cmpi ne, %10, %c0_i32_9 : i32
    scf.if %11 {
      %c0_10 = arith.constant 0 : index
      %c0_11 = arith.constant 0 : index
      %12 = vector.load %arg7[%c0_10, %c0_11] : memref<128x128xf32, #tpu.memory_space<vmem>>, vector<128x128xf32>
      %c0_12 = arith.constant 0 : index
      %c0_13 = arith.constant 0 : index
      %13 = vector.load %arg5[%c0_12, %c0_13] : memref<1x128xf32, #tpu.memory_space<vmem>>, vector<1x128xf32>
      %14 = vector.broadcast %13 : vector<1x128xf32> to vector<128x128xf32>
      %15 = arith.addf %12, %14 : vector<128x128xf32>
      %cst_14 = arith.constant 0.000000e+00 : f32
      %16 = vector.broadcast %cst_14 : f32 to vector<128x128xf32>
      %17 = arith.maximumf %15, %16 : vector<128x128xf32>
      %18 = arith.truncf %17 : vector<128x128xf32> to vector<128x128xbf16>
      %c0_15 = arith.constant 0 : index
      %c0_16 = arith.constant 0 : index
      %19 = vector.load %arg6[%c0_15, %c0_16] : memref<128x128xbf16, #tpu.memory_space<vmem>>, vector<128x128xbf16>
      tpu.vector_store %arg6[%c0_15, %c0_16], %18 {strides = array<i32>} : memref<128x128xbf16, #tpu.memory_space<vmem>>, vector<128x128xbf16>,
    } else {
    }
    return
  }
  func.func @transform_0(%arg0: i32, %arg1: i32, %arg2: i32) -> (i32, i32) {
    %c0_i32 = arith.constant 0 : i32
    return %arg0, %arg2 : i32, i32
  }
  func.func @transform_1(%arg0: i32, %arg1: i32, %arg2: i32) -> (i32, i32) {
    %c0_i32 = arith.constant 0 : i32
    return %arg2, %arg1 : i32, i32
  }
  func.func @transform_2(%arg0: i32, %arg1: i32, %arg2: i32) -> (i32, i32) {
    %c0_i32 = arith.constant 0 : i32
    %c0_i32_0 = arith.constant 0 : i32
    return %c0_i32, %arg1 : i32, i32
  }
  func.func @transform_3(%arg0: i32, %arg1: i32, %arg2: i32) -> (i32, i32) {
    %c0_i32 = arith.constant 0 : i32
    return %arg0, %arg1 : i32, i32
  }
}

module attributes {stable_mosaic.version = 11 : i64} {
  func.func @_fused_matmul_kernel(%arg0: i32, %arg1: i32, %arg2: i32, %arg3: memref<32x384xbf16, #tpu.memory_space<vmem>>, %arg4: memref<384x128xbf16, #tpu.memory_space<vmem>>, %arg5: memref<1x128xf32, #tpu.memory_space<vmem>>, %arg6: memref<32x128xbf16, #tpu.memory_space<vmem>>, %arg7: memref<32x128xf32, #tpu.memory_space<vmem>>) attributes {dimension_semantics = [#tpu.dimension_semantics<parallel>, #tpu.dimension_semantics<parallel>, #tpu.dimension_semantics<arbitrary>], iteration_bounds = array<i64: 1, 1, 3>, scalar_prefetch = 0 : i64, scratch_operands = 1 : i64, tpu.core_type = #tpu.core_type<tc>, window_params = [{transform_indices = @transform_0, window_bounds = array<i64: 32, 384>}, {transform_indices = @transform_1, window_bounds = array<i64: 384, 128>}, {transform_indices = @transform_2, window_bounds = array<i64: 1, 128>}, {transform_indices = @transform_3, window_bounds = array<i64: 32, 128>}]} {
    %c0_i32 = arith.constant 0 : i32
    %0 = arith.cmpi eq, %arg2, %c0_i32 : i32
    %1 = arith.extui %0 : i1 to i32
    %c0_i32_0 = arith.constant 0 : i32
    %2 = arith.cmpi ne, %1, %c0_i32_0 : i32
    scf.if %2 {
      %cst_9 = arith.constant 0.000000e+00 : f32
      %12 = vector.broadcast %cst_9 : f32 to vector<32x128xf32>
      %c0_10 = arith.constant 0 : index
      %c0_11 = arith.constant 0 : index
      %13 = vector.load %arg7[%c0_10, %c0_11] : memref<32x128xf32, #tpu.memory_space<vmem>>, vector<32x128xf32>
      tpu.vector_store %arg7[%c0_10, %c0_11], %12 {strides = array<i32>} : memref<32x128xf32, #tpu.memory_space<vmem>>, vector<32x128xf32>,
    } else {
    }
    %c0 = arith.constant 0 : index
    %c0_1 = arith.constant 0 : index
    %3 = vector.load %arg7[%c0, %c0_1] : memref<32x128xf32, #tpu.memory_space<vmem>>, vector<32x128xf32>
    %c0_2 = arith.constant 0 : index
    %c0_3 = arith.constant 0 : index
    %4 = vector.load %arg3[%c0_2, %c0_3] : memref<32x384xbf16, #tpu.memory_space<vmem>>, vector<32x384xbf16>
    %c0_4 = arith.constant 0 : index
    %c0_5 = arith.constant 0 : index
    %5 = vector.load %arg4[%c0_4, %c0_5] : memref<384x128xbf16, #tpu.memory_space<vmem>>, vector<384x128xbf16>
    %cst = arith.constant dense<0.000000e+00> : vector<32x128xf32>
    %6 = tpu.matmul %4, %5, %cst {dimension_numbers = #tpu.dot_dimension_numbers<[1], [0], [0], [1], [0, 0, 1, 1], [], []>} : vector<32x384xbf16>, vector<384x128xbf16>, vector<32x128xf32> -> vector<32x128xf32>
    %7 = arith.addf %3, %6 : vector<32x128xf32>
    %c0_6 = arith.constant 0 : index
    %c0_7 = arith.constant 0 : index
    %8 = vector.load %arg7[%c0_6, %c0_7] : memref<32x128xf32, #tpu.memory_space<vmem>>, vector<32x128xf32>
    tpu.vector_store %arg7[%c0_6, %c0_7], %7 {strides = array<i32>} : memref<32x128xf32, #tpu.memory_space<vmem>>, vector<32x128xf32>,
    %c2_i32 = arith.constant 2 : i32
    %9 = arith.cmpi eq, %arg2, %c2_i32 : i32
    %10 = arith.extui %9 : i1 to i32
    %c0_i32_8 = arith.constant 0 : i32
    %11 = arith.cmpi ne, %10, %c0_i32_8 : i32
    scf.if %11 {
      %c0_9 = arith.constant 0 : index
      %c0_10 = arith.constant 0 : index
      %12 = vector.load %arg7[%c0_9, %c0_10] : memref<32x128xf32, #tpu.memory_space<vmem>>, vector<32x128xf32>
      %c0_11 = arith.constant 0 : index
      %c0_12 = arith.constant 0 : index
      %13 = vector.load %arg5[%c0_11, %c0_12] : memref<1x128xf32, #tpu.memory_space<vmem>>, vector<1x128xf32>
      %14 = vector.broadcast %13 : vector<1x128xf32> to vector<32x128xf32>
      %15 = arith.addf %12, %14 : vector<32x128xf32>
      %cst_13 = arith.constant 0.000000e+00 : f32
      %16 = vector.broadcast %cst_13 : f32 to vector<32x128xf32>
      %17 = arith.maximumf %15, %16 : vector<32x128xf32>
      %18 = arith.truncf %17 : vector<32x128xf32> to vector<32x128xbf16>
      %c0_14 = arith.constant 0 : index
      %c0_15 = arith.constant 0 : index
      %19 = vector.load %arg6[%c0_14, %c0_15] : memref<32x128xbf16, #tpu.memory_space<vmem>>, vector<32x128xbf16>
      tpu.vector_store %arg6[%c0_14, %c0_15], %18 {strides = array<i32>} : memref<32x128xbf16, #tpu.memory_space<vmem>>, vector<32x128xbf16>,
    } else {
    }
    return
  }
  func.func @transform_0(%arg0: i32, %arg1: i32, %arg2: i32) -> (i32, i32) {
    %c0_i32 = arith.constant 0 : i32
    return %arg0, %arg2 : i32, i32
  }
  func.func @transform_1(%arg0: i32, %arg1: i32, %arg2: i32) -> (i32, i32) {
    %c0_i32 = arith.constant 0 : i32
    return %arg2, %arg1 : i32, i32
  }
  func.func @transform_2(%arg0: i32, %arg1: i32, %arg2: i32) -> (i32, i32) {
    %c0_i32 = arith.constant 0 : i32
    %c0_i32_0 = arith.constant 0 : i32
    return %c0_i32, %arg1 : i32, i32
  }
  func.func @transform_3(%arg0: i32, %arg1: i32, %arg2: i32) -> (i32, i32) {
    %c0_i32 = arith.constant 0 : i32
    return %arg0, %arg1 : i32, i32
  }
}

module attributes {stable_mosaic.version = 11 : i64} {
  func.func @_fused_matmul_kernel(%arg0: i32, %arg1: i32, %arg2: i32, %arg3: memref<32x384xbf16, #tpu.memory_space<vmem>>, %arg4: memref<384x128xbf16, #tpu.memory_space<vmem>>, %arg5: memref<1x128xf32, #tpu.memory_space<vmem>>, %arg6: memref<32x128xbf16, #tpu.memory_space<vmem>>, %arg7: memref<32x128xbf16, #tpu.memory_space<vmem>>, %arg8: memref<32x128xf32, #tpu.memory_space<vmem>>) attributes {dimension_semantics = [#tpu.dimension_semantics<parallel>, #tpu.dimension_semantics<parallel>, #tpu.dimension_semantics<arbitrary>], iteration_bounds = array<i64: 1, 1, 3>, scalar_prefetch = 0 : i64, scratch_operands = 1 : i64, tpu.core_type = #tpu.core_type<tc>, window_params = [{transform_indices = @transform_0, window_bounds = array<i64: 32, 384>}, {transform_indices = @transform_1, window_bounds = array<i64: 384, 128>}, {transform_indices = @transform_2, window_bounds = array<i64: 1, 128>}, {transform_indices = @transform_3, window_bounds = array<i64: 32, 128>}, {transform_indices = @transform_4, window_bounds = array<i64: 32, 128>}]} {
    %c0_i32 = arith.constant 0 : i32
    %0 = arith.cmpi eq, %arg2, %c0_i32 : i32
    %1 = arith.extui %0 : i1 to i32
    %c0_i32_0 = arith.constant 0 : i32
    %2 = arith.cmpi ne, %1, %c0_i32_0 : i32
    scf.if %2 {
      %cst_9 = arith.constant 0.000000e+00 : f32
      %12 = vector.broadcast %cst_9 : f32 to vector<32x128xf32>
      %c0_10 = arith.constant 0 : index
      %c0_11 = arith.constant 0 : index
      %13 = vector.load %arg8[%c0_10, %c0_11] : memref<32x128xf32, #tpu.memory_space<vmem>>, vector<32x128xf32>
      tpu.vector_store %arg8[%c0_10, %c0_11], %12 {strides = array<i32>} : memref<32x128xf32, #tpu.memory_space<vmem>>, vector<32x128xf32>,
    } else {
    }
    %c0 = arith.constant 0 : index
    %c0_1 = arith.constant 0 : index
    %3 = vector.load %arg8[%c0, %c0_1] : memref<32x128xf32, #tpu.memory_space<vmem>>, vector<32x128xf32>
    %c0_2 = arith.constant 0 : index
    %c0_3 = arith.constant 0 : index
    %4 = vector.load %arg3[%c0_2, %c0_3] : memref<32x384xbf16, #tpu.memory_space<vmem>>, vector<32x384xbf16>
    %c0_4 = arith.constant 0 : index
    %c0_5 = arith.constant 0 : index
    %5 = vector.load %arg4[%c0_4, %c0_5] : memref<384x128xbf16, #tpu.memory_space<vmem>>, vector<384x128xbf16>
    %cst = arith.constant dense<0.000000e+00> : vector<32x128xf32>
    %6 = tpu.matmul %4, %5, %cst {dimension_numbers = #tpu.dot_dimension_numbers<[1], [0], [0], [1], [0, 0, 1, 1], [], []>} : vector<32x384xbf16>, vector<384x128xbf16>, vector<32x128xf32> -> vector<32x128xf32>
    %7 = arith.addf %3, %6 : vector<32x128xf32>
    %c0_6 = arith.constant 0 : index
    %c0_7 = arith.constant 0 : index
    %8 = vector.load %arg8[%c0_6, %c0_7] : memref<32x128xf32, #tpu.memory_space<vmem>>, vector<32x128xf32>
    tpu.vector_store %arg8[%c0_6, %c0_7], %7 {strides = array<i32>} : memref<32x128xf32, #tpu.memory_space<vmem>>, vector<32x128xf32>,
    %c2_i32 = arith.constant 2 : i32
    %9 = arith.cmpi eq, %arg2, %c2_i32 : i32
    %10 = arith.extui %9 : i1 to i32
    %c0_i32_8 = arith.constant 0 : i32
    %11 = arith.cmpi ne, %10, %c0_i32_8 : i32
    scf.if %11 {
      %c0_9 = arith.constant 0 : index
      %c0_10 = arith.constant 0 : index
      %12 = vector.load %arg8[%c0_9, %c0_10] : memref<32x128xf32, #tpu.memory_space<vmem>>, vector<32x128xf32>
      %c0_11 = arith.constant 0 : index
      %c0_12 = arith.constant 0 : index
      %13 = vector.load %arg5[%c0_11, %c0_12] : memref<1x128xf32, #tpu.memory_space<vmem>>, vector<1x128xf32>
      %14 = vector.broadcast %13 : vector<1x128xf32> to vector<32x128xf32>
      %15 = arith.addf %12, %14 : vector<32x128xf32>
      %c0_13 = arith.constant 0 : index
      %c0_14 = arith.constant 0 : index
      %16 = vector.load %arg6[%c0_13, %c0_14] : memref<32x128xbf16, #tpu.memory_space<vmem>>, vector<32x128xbf16>
      %17 = arith.extf %16 : vector<32x128xbf16> to vector<32x128xf32>
      %18 = arith.addf %15, %17 : vector<32x128xf32>
      %cst_15 = arith.constant 0.000000e+00 : f32
      %19 = vector.broadcast %cst_15 : f32 to vector<32x128xf32>
      %20 = arith.maximumf %18, %19 : vector<32x128xf32>
      %21 = arith.truncf %20 : vector<32x128xf32> to vector<32x128xbf16>
      %c0_16 = arith.constant 0 : index
      %c0_17 = arith.constant 0 : index
      %22 = vector.load %arg7[%c0_16, %c0_17] : memref<32x128xbf16, #tpu.memory_space<vmem>>, vector<32x128xbf16>
      tpu.vector_store %arg7[%c0_16, %c0_17], %21 {strides = array<i32>} : memref<32x128xbf16, #tpu.memory_space<vmem>>, vector<32x128xbf16>,
    } else {
    }
    return
  }
  func.func @transform_0(%arg0: i32, %arg1: i32, %arg2: i32) -> (i32, i32) {
    %c0_i32 = arith.constant 0 : i32
    return %arg0, %arg2 : i32, i32
  }
  func.func @transform_1(%arg0: i32, %arg1: i32, %arg2: i32) -> (i32, i32) {
    %c0_i32 = arith.constant 0 : i32
    return %arg2, %arg1 : i32, i32
  }
  func.func @transform_2(%arg0: i32, %arg1: i32, %arg2: i32) -> (i32, i32) {
    %c0_i32 = arith.constant 0 : i32
    %c0_i32_0 = arith.constant 0 : i32
    return %c0_i32, %arg1 : i32, i32
  }
  func.func @transform_3(%arg0: i32, %arg1: i32, %arg2: i32) -> (i32, i32) {
    %c0_i32 = arith.constant 0 : i32
    return %arg0, %arg1 : i32, i32
  }
  func.func @transform_4(%arg0: i32, %arg1: i32, %arg2: i32) -> (i32, i32) {
    %c0_i32 = arith.constant 0 : i32
    return %arg0, %arg1 : i32, i32
  }
}

module attributes {stable_mosaic.version = 11 : i64} {
  func.func @_fused_matmul_kernel(%arg0: i32, %arg1: i32, %arg2: i32, %arg3: memref<8x384xbf16, #tpu.memory_space<vmem>>, %arg4: memref<384x128xbf16, #tpu.memory_space<vmem>>, %arg5: memref<1x128xf32, #tpu.memory_space<vmem>>, %arg6: memref<8x128xbf16, #tpu.memory_space<vmem>>, %arg7: memref<8x128xf32, #tpu.memory_space<vmem>>) attributes {dimension_semantics = [#tpu.dimension_semantics<parallel>, #tpu.dimension_semantics<parallel>, #tpu.dimension_semantics<arbitrary>], iteration_bounds = array<i64: 1, 1, 3>, scalar_prefetch = 0 : i64, scratch_operands = 1 : i64, tpu.core_type = #tpu.core_type<tc>, window_params = [{transform_indices = @transform_0, window_bounds = array<i64: 8, 384>}, {transform_indices = @transform_1, window_bounds = array<i64: 384, 128>}, {transform_indices = @transform_2, window_bounds = array<i64: 1, 128>}, {transform_indices = @transform_3, window_bounds = array<i64: 8, 128>}]} {
    %c0_i32 = arith.constant 0 : i32
    %0 = arith.cmpi eq, %arg2, %c0_i32 : i32
    %1 = arith.extui %0 : i1 to i32
    %c0_i32_0 = arith.constant 0 : i32
    %2 = arith.cmpi ne, %1, %c0_i32_0 : i32
    scf.if %2 {
      %cst_9 = arith.constant 0.000000e+00 : f32
      %12 = vector.broadcast %cst_9 : f32 to vector<8x128xf32>
      %c0_10 = arith.constant 0 : index
      %c0_11 = arith.constant 0 : index
      %13 = vector.load %arg7[%c0_10, %c0_11] : memref<8x128xf32, #tpu.memory_space<vmem>>, vector<8x128xf32>
      tpu.vector_store %arg7[%c0_10, %c0_11], %12 {strides = array<i32>} : memref<8x128xf32, #tpu.memory_space<vmem>>, vector<8x128xf32>,
    } else {
    }
    %c0 = arith.constant 0 : index
    %c0_1 = arith.constant 0 : index
    %3 = vector.load %arg7[%c0, %c0_1] : memref<8x128xf32, #tpu.memory_space<vmem>>, vector<8x128xf32>
    %c0_2 = arith.constant 0 : index
    %c0_3 = arith.constant 0 : index
    %4 = vector.load %arg3[%c0_2, %c0_3] : memref<8x384xbf16, #tpu.memory_space<vmem>>, vector<8x384xbf16>
    %c0_4 = arith.constant 0 : index
    %c0_5 = arith.constant 0 : index
    %5 = vector.load %arg4[%c0_4, %c0_5] : memref<384x128xbf16, #tpu.memory_space<vmem>>, vector<384x128xbf16>
    %cst = arith.constant dense<0.000000e+00> : vector<8x128xf32>
    %6 = tpu.matmul %4, %5, %cst {dimension_numbers = #tpu.dot_dimension_numbers<[1], [0], [0], [1], [0, 0, 1, 1], [], []>} : vector<8x384xbf16>, vector<384x128xbf16>, vector<8x128xf32> -> vector<8x128xf32>
    %7 = arith.addf %3, %6 : vector<8x128xf32>
    %c0_6 = arith.constant 0 : index
    %c0_7 = arith.constant 0 : index
    %8 = vector.load %arg7[%c0_6, %c0_7] : memref<8x128xf32, #tpu.memory_space<vmem>>, vector<8x128xf32>
    tpu.vector_store %arg7[%c0_6, %c0_7], %7 {strides = array<i32>} : memref<8x128xf32, #tpu.memory_space<vmem>>, vector<8x128xf32>,
    %c2_i32 = arith.constant 2 : i32
    %9 = arith.cmpi eq, %arg2, %c2_i32 : i32
    %10 = arith.extui %9 : i1 to i32
    %c0_i32_8 = arith.constant 0 : i32
    %11 = arith.cmpi ne, %10, %c0_i32_8 : i32
    scf.if %11 {
      %c0_9 = arith.constant 0 : index
      %c0_10 = arith.constant 0 : index
      %12 = vector.load %arg7[%c0_9, %c0_10] : memref<8x128xf32, #tpu.memory_space<vmem>>, vector<8x128xf32>
      %c0_11 = arith.constant 0 : index
      %c0_12 = arith.constant 0 : index
      %13 = vector.load %arg5[%c0_11, %c0_12] : memref<1x128xf32, #tpu.memory_space<vmem>>, vector<1x128xf32>
      %14 = vector.broadcast %13 : vector<1x128xf32> to vector<8x128xf32>
      %15 = arith.addf %12, %14 : vector<8x128xf32>
      %cst_13 = arith.constant 0.000000e+00 : f32
      %16 = vector.broadcast %cst_13 : f32 to vector<8x128xf32>
      %17 = arith.maximumf %15, %16 : vector<8x128xf32>
      %18 = arith.truncf %17 : vector<8x128xf32> to vector<8x128xbf16>
      %c0_14 = arith.constant 0 : index
      %c0_15 = arith.constant 0 : index
      %19 = vector.load %arg6[%c0_14, %c0_15] : memref<8x128xbf16, #tpu.memory_space<vmem>>, vector<8x128xbf16>
      tpu.vector_store %arg6[%c0_14, %c0_15], %18 {strides = array<i32>} : memref<8x128xbf16, #tpu.memory_space<vmem>>, vector<8x128xbf16>,
    } else {
    }
    return
  }
  func.func @transform_0(%arg0: i32, %arg1: i32, %arg2: i32) -> (i32, i32) {
    %c0_i32 = arith.constant 0 : i32
    return %arg0, %arg2 : i32, i32
  }
  func.func @transform_1(%arg0: i32, %arg1: i32, %arg2: i32) -> (i32, i32) {
    %c0_i32 = arith.constant 0 : i32
    return %arg2, %arg1 : i32, i32
  }
  func.func @transform_2(%arg0: i32, %arg1: i32, %arg2: i32) -> (i32, i32) {
    %c0_i32 = arith.constant 0 : i32
    %c0_i32_0 = arith.constant 0 : i32
    return %c0_i32, %arg1 : i32, i32
  }
  func.func @transform_3(%arg0: i32, %arg1: i32, %arg2: i32) -> (i32, i32) {
    %c0_i32 = arith.constant 0 : i32
    return %arg0, %arg1 : i32, i32
  }
}

module attributes {stable_mosaic.version = 11 : i64} {
  func.func @_fused_matmul_kernel(%arg0: i32, %arg1: i32, %arg2: i32, %arg3: memref<8x128xbf16, #tpu.memory_space<vmem>>, %arg4: memref<128x128xbf16, #tpu.memory_space<vmem>>, %arg5: memref<1x128xf32, #tpu.memory_space<vmem>>, %arg6: memref<8x128xbf16, #tpu.memory_space<vmem>>, %arg7: memref<8x128xf32, #tpu.memory_space<vmem>>) attributes {dimension_semantics = [#tpu.dimension_semantics<parallel>, #tpu.dimension_semantics<parallel>, #tpu.dimension_semantics<arbitrary>], iteration_bounds = array<i64: 1, 1, 1>, scalar_prefetch = 0 : i64, scratch_operands = 1 : i64, tpu.core_type = #tpu.core_type<tc>, window_params = [{transform_indices = @transform_0, window_bounds = array<i64: 8, 128>}, {transform_indices = @transform_1, window_bounds = array<i64: 128, 128>}, {transform_indices = @transform_2, window_bounds = array<i64: 1, 128>}, {transform_indices = @transform_3, window_bounds = array<i64: 8, 128>}]} {
    %c0_i32 = arith.constant 0 : i32
    %0 = arith.cmpi eq, %arg2, %c0_i32 : i32
    %1 = arith.extui %0 : i1 to i32
    %c0_i32_0 = arith.constant 0 : i32
    %2 = arith.cmpi ne, %1, %c0_i32_0 : i32
    scf.if %2 {
      %cst_10 = arith.constant 0.000000e+00 : f32
      %12 = vector.broadcast %cst_10 : f32 to vector<8x128xf32>
      %c0_11 = arith.constant 0 : index
      %c0_12 = arith.constant 0 : index
      %13 = vector.load %arg7[%c0_11, %c0_12] : memref<8x128xf32, #tpu.memory_space<vmem>>, vector<8x128xf32>
      tpu.vector_store %arg7[%c0_11, %c0_12], %12 {strides = array<i32>} : memref<8x128xf32, #tpu.memory_space<vmem>>, vector<8x128xf32>,
    } else {
    }
    %c0 = arith.constant 0 : index
    %c0_1 = arith.constant 0 : index
    %3 = vector.load %arg7[%c0, %c0_1] : memref<8x128xf32, #tpu.memory_space<vmem>>, vector<8x128xf32>
    %c0_2 = arith.constant 0 : index
    %c0_3 = arith.constant 0 : index
    %4 = vector.load %arg3[%c0_2, %c0_3] : memref<8x128xbf16, #tpu.memory_space<vmem>>, vector<8x128xbf16>
    %c0_4 = arith.constant 0 : index
    %c0_5 = arith.constant 0 : index
    %5 = vector.load %arg4[%c0_4, %c0_5] : memref<128x128xbf16, #tpu.memory_space<vmem>>, vector<128x128xbf16>
    %cst = arith.constant dense<0.000000e+00> : vector<8x128xf32>
    %6 = tpu.matmul %4, %5, %cst {dimension_numbers = #tpu.dot_dimension_numbers<[1], [0], [0], [1], [0, 0, 1, 1], [], []>} : vector<8x128xbf16>, vector<128x128xbf16>, vector<8x128xf32> -> vector<8x128xf32>
    %7 = arith.addf %3, %6 : vector<8x128xf32>
    %c0_6 = arith.constant 0 : index
    %c0_7 = arith.constant 0 : index
    %8 = vector.load %arg7[%c0_6, %c0_7] : memref<8x128xf32, #tpu.memory_space<vmem>>, vector<8x128xf32>
    tpu.vector_store %arg7[%c0_6, %c0_7], %7 {strides = array<i32>} : memref<8x128xf32, #tpu.memory_space<vmem>>, vector<8x128xf32>,
    %c0_i32_8 = arith.constant 0 : i32
    %9 = arith.cmpi eq, %arg2, %c0_i32_8 : i32
    %10 = arith.extui %9 : i1 to i32
    %c0_i32_9 = arith.constant 0 : i32
    %11 = arith.cmpi ne, %10, %c0_i32_9 : i32
    scf.if %11 {
      %c0_10 = arith.constant 0 : index
      %c0_11 = arith.constant 0 : index
      %12 = vector.load %arg7[%c0_10, %c0_11] : memref<8x128xf32, #tpu.memory_space<vmem>>, vector<8x128xf32>
      %c0_12 = arith.constant 0 : index
      %c0_13 = arith.constant 0 : index
      %13 = vector.load %arg5[%c0_12, %c0_13] : memref<1x128xf32, #tpu.memory_space<vmem>>, vector<1x128xf32>
      %14 = vector.broadcast %13 : vector<1x128xf32> to vector<8x128xf32>
      %15 = arith.addf %12, %14 : vector<8x128xf32>
      %16 = arith.truncf %15 : vector<8x128xf32> to vector<8x128xbf16>
      %c0_14 = arith.constant 0 : index
      %c0_15 = arith.constant 0 : index
      %17 = vector.load %arg6[%c0_14, %c0_15] : memref<8x128xbf16, #tpu.memory_space<vmem>>, vector<8x128xbf16>
      tpu.vector_store %arg6[%c0_14, %c0_15], %16 {strides = array<i32>} : memref<8x128xbf16, #tpu.memory_space<vmem>>, vector<8x128xbf16>,
    } else {
    }
    return
  }
  func.func @transform_0(%arg0: i32, %arg1: i32, %arg2: i32) -> (i32, i32) {
    %c0_i32 = arith.constant 0 : i32
    return %arg0, %arg2 : i32, i32
  }
  func.func @transform_1(%arg0: i32, %arg1: i32, %arg2: i32) -> (i32, i32) {
    %c0_i32 = arith.constant 0 : i32
    return %arg2, %arg1 : i32, i32
  }
  func.func @transform_2(%arg0: i32, %arg1: i32, %arg2: i32) -> (i32, i32) {
    %c0_i32 = arith.constant 0 : i32
    %c0_i32_0 = arith.constant 0 : i32
    return %c0_i32, %arg1 : i32, i32
  }
  func.func @transform_3(%arg0: i32, %arg1: i32, %arg2: i32) -> (i32, i32) {
    %c0_i32 = arith.constant 0 : i32
    return %arg0, %arg1 : i32, i32
  }
}

module attributes {stable_mosaic.version = 11 : i64} {
  func.func @_fused_matmul_kernel(%arg0: i32, %arg1: i32, %arg2: i32, %arg3: memref<8x384xbf16, #tpu.memory_space<vmem>>, %arg4: memref<384x128xbf16, #tpu.memory_space<vmem>>, %arg5: memref<1x128xf32, #tpu.memory_space<vmem>>, %arg6: memref<8x128xbf16, #tpu.memory_space<vmem>>, %arg7: memref<8x128xbf16, #tpu.memory_space<vmem>>, %arg8: memref<8x128xf32, #tpu.memory_space<vmem>>) attributes {dimension_semantics = [#tpu.dimension_semantics<parallel>, #tpu.dimension_semantics<parallel>, #tpu.dimension_semantics<arbitrary>], iteration_bounds = array<i64: 1, 1, 3>, scalar_prefetch = 0 : i64, scratch_operands = 1 : i64, tpu.core_type = #tpu.core_type<tc>, window_params = [{transform_indices = @transform_0, window_bounds = array<i64: 8, 384>}, {transform_indices = @transform_1, window_bounds = array<i64: 384, 128>}, {transform_indices = @transform_2, window_bounds = array<i64: 1, 128>}, {transform_indices = @transform_3, window_bounds = array<i64: 8, 128>}, {transform_indices = @transform_4, window_bounds = array<i64: 8, 128>}]} {
    %c0_i32 = arith.constant 0 : i32
    %0 = arith.cmpi eq, %arg2, %c0_i32 : i32
    %1 = arith.extui %0 : i1 to i32
    %c0_i32_0 = arith.constant 0 : i32
    %2 = arith.cmpi ne, %1, %c0_i32_0 : i32
    scf.if %2 {
      %cst_9 = arith.constant 0.000000e+00 : f32
      %12 = vector.broadcast %cst_9 : f32 to vector<8x128xf32>
      %c0_10 = arith.constant 0 : index
      %c0_11 = arith.constant 0 : index
      %13 = vector.load %arg8[%c0_10, %c0_11] : memref<8x128xf32, #tpu.memory_space<vmem>>, vector<8x128xf32>
      tpu.vector_store %arg8[%c0_10, %c0_11], %12 {strides = array<i32>} : memref<8x128xf32, #tpu.memory_space<vmem>>, vector<8x128xf32>,
    } else {
    }
    %c0 = arith.constant 0 : index
    %c0_1 = arith.constant 0 : index
    %3 = vector.load %arg8[%c0, %c0_1] : memref<8x128xf32, #tpu.memory_space<vmem>>, vector<8x128xf32>
    %c0_2 = arith.constant 0 : index
    %c0_3 = arith.constant 0 : index
    %4 = vector.load %arg3[%c0_2, %c0_3] : memref<8x384xbf16, #tpu.memory_space<vmem>>, vector<8x384xbf16>
    %c0_4 = arith.constant 0 : index
    %c0_5 = arith.constant 0 : index
    %5 = vector.load %arg4[%c0_4, %c0_5] : memref<384x128xbf16, #tpu.memory_space<vmem>>, vector<384x128xbf16>
    %cst = arith.constant dense<0.000000e+00> : vector<8x128xf32>
    %6 = tpu.matmul %4, %5, %cst {dimension_numbers = #tpu.dot_dimension_numbers<[1], [0], [0], [1], [0, 0, 1, 1], [], []>} : vector<8x384xbf16>, vector<384x128xbf16>, vector<8x128xf32> -> vector<8x128xf32>
    %7 = arith.addf %3, %6 : vector<8x128xf32>
    %c0_6 = arith.constant 0 : index
    %c0_7 = arith.constant 0 : index
    %8 = vector.load %arg8[%c0_6, %c0_7] : memref<8x128xf32, #tpu.memory_space<vmem>>, vector<8x128xf32>
    tpu.vector_store %arg8[%c0_6, %c0_7], %7 {strides = array<i32>} : memref<8x128xf32, #tpu.memory_space<vmem>>, vector<8x128xf32>,
    %c2_i32 = arith.constant 2 : i32
    %9 = arith.cmpi eq, %arg2, %c2_i32 : i32
    %10 = arith.extui %9 : i1 to i32
    %c0_i32_8 = arith.constant 0 : i32
    %11 = arith.cmpi ne, %10, %c0_i32_8 : i32
    scf.if %11 {
      %c0_9 = arith.constant 0 : index
      %c0_10 = arith.constant 0 : index
      %12 = vector.load %arg8[%c0_9, %c0_10] : memref<8x128xf32, #tpu.memory_space<vmem>>, vector<8x128xf32>
      %c0_11 = arith.constant 0 : index
      %c0_12 = arith.constant 0 : index
      %13 = vector.load %arg5[%c0_11, %c0_12] : memref<1x128xf32, #tpu.memory_space<vmem>>, vector<1x128xf32>
      %14 = vector.broadcast %13 : vector<1x128xf32> to vector<8x128xf32>
      %15 = arith.addf %12, %14 : vector<8x128xf32>
      %c0_13 = arith.constant 0 : index
      %c0_14 = arith.constant 0 : index
      %16 = vector.load %arg6[%c0_13, %c0_14] : memref<8x128xbf16, #tpu.memory_space<vmem>>, vector<8x128xbf16>
      %17 = arith.extf %16 : vector<8x128xbf16> to vector<8x128xf32>
      %18 = arith.addf %15, %17 : vector<8x128xf32>
      %cst_15 = arith.constant 0.000000e+00 : f32
      %19 = vector.broadcast %cst_15 : f32 to vector<8x128xf32>
      %20 = arith.maximumf %18, %19 : vector<8x128xf32>
      %21 = arith.truncf %20 : vector<8x128xf32> to vector<8x128xbf16>
      %c0_16 = arith.constant 0 : index
      %c0_17 = arith.constant 0 : index
      %22 = vector.load %arg7[%c0_16, %c0_17] : memref<8x128xbf16, #tpu.memory_space<vmem>>, vector<8x128xbf16>
      tpu.vector_store %arg7[%c0_16, %c0_17], %21 {strides = array<i32>} : memref<8x128xbf16, #tpu.memory_space<vmem>>, vector<8x128xbf16>,
    } else {
    }
    return
  }
  func.func @transform_0(%arg0: i32, %arg1: i32, %arg2: i32) -> (i32, i32) {
    %c0_i32 = arith.constant 0 : i32
    return %arg0, %arg2 : i32, i32
  }
  func.func @transform_1(%arg0: i32, %arg1: i32, %arg2: i32) -> (i32, i32) {
    %c0_i32 = arith.constant 0 : i32
    return %arg2, %arg1 : i32, i32
  }
  func.func @transform_2(%arg0: i32, %arg1: i32, %arg2: i32) -> (i32, i32) {
    %c0_i32 = arith.constant 0 : i32
    %c0_i32_0 = arith.constant 0 : i32
    return %c0_i32, %arg1 : i32, i32
  }
  func.func @transform_3(%arg0: i32, %arg1: i32, %arg2: i32) -> (i32, i32) {
    %c0_i32 = arith.constant 0 : i32
    return %arg0, %arg1 : i32, i32
  }
  func.func @transform_4(%arg0: i32, %arg1: i32, %arg2: i32) -> (i32, i32) {
    %c0_i32 = arith.constant 0 : i32
    return %arg0, %arg1 : i32, i32
  }
}

module attributes {stable_mosaic.version = 11 : i64} {
  func.func @_fused_matmul_kernel(%arg0: i32, %arg1: i32, %arg2: i32, %arg3: memref<8x384xbf16, #tpu.memory_space<vmem>>, %arg4: memref<384x256xbf16, #tpu.memory_space<vmem>>, %arg5: memref<1x256xf32, #tpu.memory_space<vmem>>, %arg6: memref<8x256xbf16, #tpu.memory_space<vmem>>, %arg7: memref<8x256xf32, #tpu.memory_space<vmem>>) attributes {dimension_semantics = [#tpu.dimension_semantics<parallel>, #tpu.dimension_semantics<parallel>, #tpu.dimension_semantics<arbitrary>], iteration_bounds = array<i64: 1, 1, 3>, scalar_prefetch = 0 : i64, scratch_operands = 1 : i64, tpu.core_type = #tpu.core_type<tc>, window_params = [{transform_indices = @transform_0, window_bounds = array<i64: 8, 384>}, {transform_indices = @transform_1, window_bounds = array<i64: 384, 256>}, {transform_indices = @transform_2, window_bounds = array<i64: 1, 256>}, {transform_indices = @transform_3, window_bounds = array<i64: 8, 256>}]} {
    %c0_i32 = arith.constant 0 : i32
    %0 = arith.cmpi eq, %arg2, %c0_i32 : i32
    %1 = arith.extui %0 : i1 to i32
    %c0_i32_0 = arith.constant 0 : i32
    %2 = arith.cmpi ne, %1, %c0_i32_0 : i32
    scf.if %2 {
      %cst_9 = arith.constant 0.000000e+00 : f32
      %12 = vector.broadcast %cst_9 : f32 to vector<8x256xf32>
      %c0_10 = arith.constant 0 : index
      %c0_11 = arith.constant 0 : index
      %13 = vector.load %arg7[%c0_10, %c0_11] : memref<8x256xf32, #tpu.memory_space<vmem>>, vector<8x256xf32>
      tpu.vector_store %arg7[%c0_10, %c0_11], %12 {strides = array<i32>} : memref<8x256xf32, #tpu.memory_space<vmem>>, vector<8x256xf32>,
    } else {
    }
    %c0 = arith.constant 0 : index
    %c0_1 = arith.constant 0 : index
    %3 = vector.load %arg7[%c0, %c0_1] : memref<8x256xf32, #tpu.memory_space<vmem>>, vector<8x256xf32>
    %c0_2 = arith.constant 0 : index
    %c0_3 = arith.constant 0 : index
    %4 = vector.load %arg3[%c0_2, %c0_3] : memref<8x384xbf16, #tpu.memory_space<vmem>>, vector<8x384xbf16>
    %c0_4 = arith.constant 0 : index
    %c0_5 = arith.constant 0 : index
    %5 = vector.load %arg4[%c0_4, %c0_5] : memref<384x256xbf16, #tpu.memory_space<vmem>>, vector<384x256xbf16>
    %cst = arith.constant dense<0.000000e+00> : vector<8x256xf32>
    %6 = tpu.matmul %4, %5, %cst {dimension_numbers = #tpu.dot_dimension_numbers<[1], [0], [0], [1], [0, 0, 1, 1], [], []>} : vector<8x384xbf16>, vector<384x256xbf16>, vector<8x256xf32> -> vector<8x256xf32>
    %7 = arith.addf %3, %6 : vector<8x256xf32>
    %c0_6 = arith.constant 0 : index
    %c0_7 = arith.constant 0 : index
    %8 = vector.load %arg7[%c0_6, %c0_7] : memref<8x256xf32, #tpu.memory_space<vmem>>, vector<8x256xf32>
    tpu.vector_store %arg7[%c0_6, %c0_7], %7 {strides = array<i32>} : memref<8x256xf32, #tpu.memory_space<vmem>>, vector<8x256xf32>,
    %c2_i32 = arith.constant 2 : i32
    %9 = arith.cmpi eq, %arg2, %c2_i32 : i32
    %10 = arith.extui %9 : i1 to i32
    %c0_i32_8 = arith.constant 0 : i32
    %11 = arith.cmpi ne, %10, %c0_i32_8 : i32
    scf.if %11 {
      %c0_9 = arith.constant 0 : index
      %c0_10 = arith.constant 0 : index
      %12 = vector.load %arg7[%c0_9, %c0_10] : memref<8x256xf32, #tpu.memory_space<vmem>>, vector<8x256xf32>
      %c0_11 = arith.constant 0 : index
      %c0_12 = arith.constant 0 : index
      %13 = vector.load %arg5[%c0_11, %c0_12] : memref<1x256xf32, #tpu.memory_space<vmem>>, vector<1x256xf32>
      %14 = vector.broadcast %13 : vector<1x256xf32> to vector<8x256xf32>
      %15 = arith.addf %12, %14 : vector<8x256xf32>
      %cst_13 = arith.constant 0.000000e+00 : f32
      %16 = vector.broadcast %cst_13 : f32 to vector<8x256xf32>
      %17 = arith.maximumf %15, %16 : vector<8x256xf32>
      %18 = arith.truncf %17 : vector<8x256xf32> to vector<8x256xbf16>
      %c0_14 = arith.constant 0 : index
      %c0_15 = arith.constant 0 : index
      %19 = vector.load %arg6[%c0_14, %c0_15] : memref<8x256xbf16, #tpu.memory_space<vmem>>, vector<8x256xbf16>
      tpu.vector_store %arg6[%c0_14, %c0_15], %18 {strides = array<i32>} : memref<8x256xbf16, #tpu.memory_space<vmem>>, vector<8x256xbf16>,
    } else {
    }
    return
  }
  func.func @transform_0(%arg0: i32, %arg1: i32, %arg2: i32) -> (i32, i32) {
    %c0_i32 = arith.constant 0 : i32
    return %arg0, %arg2 : i32, i32
  }
  func.func @transform_1(%arg0: i32, %arg1: i32, %arg2: i32) -> (i32, i32) {
    %c0_i32 = arith.constant 0 : i32
    return %arg2, %arg1 : i32, i32
  }
  func.func @transform_2(%arg0: i32, %arg1: i32, %arg2: i32) -> (i32, i32) {
    %c0_i32 = arith.constant 0 : i32
    %c0_i32_0 = arith.constant 0 : i32
    return %c0_i32, %arg1 : i32, i32
  }
  func.func @transform_3(%arg0: i32, %arg1: i32, %arg2: i32) -> (i32, i32) {
    %c0_i32 = arith.constant 0 : i32
    return %arg0, %arg1 : i32, i32
  }
}

module attributes {stable_mosaic.version = 11 : i64} {
  func.func @_fused_matmul_kernel(%arg0: i32, %arg1: i32, %arg2: i32, %arg3: memref<8x128xbf16, #tpu.memory_space<vmem>>, %arg4: memref<128x256xbf16, #tpu.memory_space<vmem>>, %arg5: memref<1x256xf32, #tpu.memory_space<vmem>>, %arg6: memref<8x256xbf16, #tpu.memory_space<vmem>>, %arg7: memref<8x256xf32, #tpu.memory_space<vmem>>) attributes {dimension_semantics = [#tpu.dimension_semantics<parallel>, #tpu.dimension_semantics<parallel>, #tpu.dimension_semantics<arbitrary>], iteration_bounds = array<i64: 1, 1, 1>, scalar_prefetch = 0 : i64, scratch_operands = 1 : i64, tpu.core_type = #tpu.core_type<tc>, window_params = [{transform_indices = @transform_0, window_bounds = array<i64: 8, 128>}, {transform_indices = @transform_1, window_bounds = array<i64: 128, 256>}, {transform_indices = @transform_2, window_bounds = array<i64: 1, 256>}, {transform_indices = @transform_3, window_bounds = array<i64: 8, 256>}]} {
    %c0_i32 = arith.constant 0 : i32
    %0 = arith.cmpi eq, %arg2, %c0_i32 : i32
    %1 = arith.extui %0 : i1 to i32
    %c0_i32_0 = arith.constant 0 : i32
    %2 = arith.cmpi ne, %1, %c0_i32_0 : i32
    scf.if %2 {
      %cst_10 = arith.constant 0.000000e+00 : f32
      %12 = vector.broadcast %cst_10 : f32 to vector<8x256xf32>
      %c0_11 = arith.constant 0 : index
      %c0_12 = arith.constant 0 : index
      %13 = vector.load %arg7[%c0_11, %c0_12] : memref<8x256xf32, #tpu.memory_space<vmem>>, vector<8x256xf32>
      tpu.vector_store %arg7[%c0_11, %c0_12], %12 {strides = array<i32>} : memref<8x256xf32, #tpu.memory_space<vmem>>, vector<8x256xf32>,
    } else {
    }
    %c0 = arith.constant 0 : index
    %c0_1 = arith.constant 0 : index
    %3 = vector.load %arg7[%c0, %c0_1] : memref<8x256xf32, #tpu.memory_space<vmem>>, vector<8x256xf32>
    %c0_2 = arith.constant 0 : index
    %c0_3 = arith.constant 0 : index
    %4 = vector.load %arg3[%c0_2, %c0_3] : memref<8x128xbf16, #tpu.memory_space<vmem>>, vector<8x128xbf16>
    %c0_4 = arith.constant 0 : index
    %c0_5 = arith.constant 0 : index
    %5 = vector.load %arg4[%c0_4, %c0_5] : memref<128x256xbf16, #tpu.memory_space<vmem>>, vector<128x256xbf16>
    %cst = arith.constant dense<0.000000e+00> : vector<8x256xf32>
    %6 = tpu.matmul %4, %5, %cst {dimension_numbers = #tpu.dot_dimension_numbers<[1], [0], [0], [1], [0, 0, 1, 1], [], []>} : vector<8x128xbf16>, vector<128x256xbf16>, vector<8x256xf32> -> vector<8x256xf32>
    %7 = arith.addf %3, %6 : vector<8x256xf32>
    %c0_6 = arith.constant 0 : index
    %c0_7 = arith.constant 0 : index
    %8 = vector.load %arg7[%c0_6, %c0_7] : memref<8x256xf32, #tpu.memory_space<vmem>>, vector<8x256xf32>
    tpu.vector_store %arg7[%c0_6, %c0_7], %7 {strides = array<i32>} : memref<8x256xf32, #tpu.memory_space<vmem>>, vector<8x256xf32>,
    %c0_i32_8 = arith.constant 0 : i32
    %9 = arith.cmpi eq, %arg2, %c0_i32_8 : i32
    %10 = arith.extui %9 : i1 to i32
    %c0_i32_9 = arith.constant 0 : i32
    %11 = arith.cmpi ne, %10, %c0_i32_9 : i32
    scf.if %11 {
      %c0_10 = arith.constant 0 : index
      %c0_11 = arith.constant 0 : index
      %12 = vector.load %arg7[%c0_10, %c0_11] : memref<8x256xf32, #tpu.memory_space<vmem>>, vector<8x256xf32>
      %c0_12 = arith.constant 0 : index
      %c0_13 = arith.constant 0 : index
      %13 = vector.load %arg5[%c0_12, %c0_13] : memref<1x256xf32, #tpu.memory_space<vmem>>, vector<1x256xf32>
      %14 = vector.broadcast %13 : vector<1x256xf32> to vector<8x256xf32>
      %15 = arith.addf %12, %14 : vector<8x256xf32>
      %16 = arith.truncf %15 : vector<8x256xf32> to vector<8x256xbf16>
      %c0_14 = arith.constant 0 : index
      %c0_15 = arith.constant 0 : index
      %17 = vector.load %arg6[%c0_14, %c0_15] : memref<8x256xbf16, #tpu.memory_space<vmem>>, vector<8x256xbf16>
      tpu.vector_store %arg6[%c0_14, %c0_15], %16 {strides = array<i32>} : memref<8x256xbf16, #tpu.memory_space<vmem>>, vector<8x256xbf16>,
    } else {
    }
    return
  }
  func.func @transform_0(%arg0: i32, %arg1: i32, %arg2: i32) -> (i32, i32) {
    %c0_i32 = arith.constant 0 : i32
    return %arg0, %arg2 : i32, i32
  }
  func.func @transform_1(%arg0: i32, %arg1: i32, %arg2: i32) -> (i32, i32) {
    %c0_i32 = arith.constant 0 : i32
    return %arg2, %arg1 : i32, i32
  }
  func.func @transform_2(%arg0: i32, %arg1: i32, %arg2: i32) -> (i32, i32) {
    %c0_i32 = arith.constant 0 : i32
    %c0_i32_0 = arith.constant 0 : i32
    return %c0_i32, %arg1 : i32, i32
  }
  func.func @transform_3(%arg0: i32, %arg1: i32, %arg2: i32) -> (i32, i32) {
    %c0_i32 = arith.constant 0 : i32
    return %arg0, %arg1 : i32, i32
  }
}

module attributes {stable_mosaic.version = 11 : i64} {
  func.func @_fused_matmul_kernel(%arg0: i32, %arg1: i32, %arg2: i32, %arg3: memref<8x768xbf16, #tpu.memory_space<vmem>>, %arg4: memref<768x256xbf16, #tpu.memory_space<vmem>>, %arg5: memref<1x256xf32, #tpu.memory_space<vmem>>, %arg6: memref<8x256xbf16, #tpu.memory_space<vmem>>, %arg7: memref<8x256xbf16, #tpu.memory_space<vmem>>, %arg8: memref<8x256xf32, #tpu.memory_space<vmem>>) attributes {dimension_semantics = [#tpu.dimension_semantics<parallel>, #tpu.dimension_semantics<parallel>, #tpu.dimension_semantics<arbitrary>], iteration_bounds = array<i64: 1, 1, 3>, scalar_prefetch = 0 : i64, scratch_operands = 1 : i64, tpu.core_type = #tpu.core_type<tc>, window_params = [{transform_indices = @transform_0, window_bounds = array<i64: 8, 768>}, {transform_indices = @transform_1, window_bounds = array<i64: 768, 256>}, {transform_indices = @transform_2, window_bounds = array<i64: 1, 256>}, {transform_indices = @transform_3, window_bounds = array<i64: 8, 256>}, {transform_indices = @transform_4, window_bounds = array<i64: 8, 256>}]} {
    %c0_i32 = arith.constant 0 : i32
    %0 = arith.cmpi eq, %arg2, %c0_i32 : i32
    %1 = arith.extui %0 : i1 to i32
    %c0_i32_0 = arith.constant 0 : i32
    %2 = arith.cmpi ne, %1, %c0_i32_0 : i32
    scf.if %2 {
      %cst_9 = arith.constant 0.000000e+00 : f32
      %12 = vector.broadcast %cst_9 : f32 to vector<8x256xf32>
      %c0_10 = arith.constant 0 : index
      %c0_11 = arith.constant 0 : index
      %13 = vector.load %arg8[%c0_10, %c0_11] : memref<8x256xf32, #tpu.memory_space<vmem>>, vector<8x256xf32>
      tpu.vector_store %arg8[%c0_10, %c0_11], %12 {strides = array<i32>} : memref<8x256xf32, #tpu.memory_space<vmem>>, vector<8x256xf32>,
    } else {
    }
    %c0 = arith.constant 0 : index
    %c0_1 = arith.constant 0 : index
    %3 = vector.load %arg8[%c0, %c0_1] : memref<8x256xf32, #tpu.memory_space<vmem>>, vector<8x256xf32>
    %c0_2 = arith.constant 0 : index
    %c0_3 = arith.constant 0 : index
    %4 = vector.load %arg3[%c0_2, %c0_3] : memref<8x768xbf16, #tpu.memory_space<vmem>>, vector<8x768xbf16>
    %c0_4 = arith.constant 0 : index
    %c0_5 = arith.constant 0 : index
    %5 = vector.load %arg4[%c0_4, %c0_5] : memref<768x256xbf16, #tpu.memory_space<vmem>>, vector<768x256xbf16>
    %cst = arith.constant dense<0.000000e+00> : vector<8x256xf32>
    %6 = tpu.matmul %4, %5, %cst {dimension_numbers = #tpu.dot_dimension_numbers<[1], [0], [0], [1], [0, 0, 1, 1], [], []>} : vector<8x768xbf16>, vector<768x256xbf16>, vector<8x256xf32> -> vector<8x256xf32>
    %7 = arith.addf %3, %6 : vector<8x256xf32>
    %c0_6 = arith.constant 0 : index
    %c0_7 = arith.constant 0 : index
    %8 = vector.load %arg8[%c0_6, %c0_7] : memref<8x256xf32, #tpu.memory_space<vmem>>, vector<8x256xf32>
    tpu.vector_store %arg8[%c0_6, %c0_7], %7 {strides = array<i32>} : memref<8x256xf32, #tpu.memory_space<vmem>>, vector<8x256xf32>,
    %c2_i32 = arith.constant 2 : i32
    %9 = arith.cmpi eq, %arg2, %c2_i32 : i32
    %10 = arith.extui %9 : i1 to i32
    %c0_i32_8 = arith.constant 0 : i32
    %11 = arith.cmpi ne, %10, %c0_i32_8 : i32
    scf.if %11 {
      %c0_9 = arith.constant 0 : index
      %c0_10 = arith.constant 0 : index
      %12 = vector.load %arg8[%c0_9, %c0_10] : memref<8x256xf32, #tpu.memory_space<vmem>>, vector<8x256xf32>
      %c0_11 = arith.constant 0 : index
      %c0_12 = arith.constant 0 : index
      %13 = vector.load %arg5[%c0_11, %c0_12] : memref<1x256xf32, #tpu.memory_space<vmem>>, vector<1x256xf32>
      %14 = vector.broadcast %13 : vector<1x256xf32> to vector<8x256xf32>
      %15 = arith.addf %12, %14 : vector<8x256xf32>
      %c0_13 = arith.constant 0 : index
      %c0_14 = arith.constant 0 : index
      %16 = vector.load %arg6[%c0_13, %c0_14] : memref<8x256xbf16, #tpu.memory_space<vmem>>, vector<8x256xbf16>
      %17 = arith.extf %16 : vector<8x256xbf16> to vector<8x256xf32>
      %18 = arith.addf %15, %17 : vector<8x256xf32>
      %cst_15 = arith.constant 0.000000e+00 : f32
      %19 = vector.broadcast %cst_15 : f32 to vector<8x256xf32>
      %20 = arith.maximumf %18, %19 : vector<8x256xf32>
      %21 = arith.truncf %20 : vector<8x256xf32> to vector<8x256xbf16>
      %c0_16 = arith.constant 0 : index
      %c0_17 = arith.constant 0 : index
      %22 = vector.load %arg7[%c0_16, %c0_17] : memref<8x256xbf16, #tpu.memory_space<vmem>>, vector<8x256xbf16>
      tpu.vector_store %arg7[%c0_16, %c0_17], %21 {strides = array<i32>} : memref<8x256xbf16, #tpu.memory_space<vmem>>, vector<8x256xbf16>,
    } else {
    }
    return
  }
  func.func @transform_0(%arg0: i32, %arg1: i32, %arg2: i32) -> (i32, i32) {
    %c0_i32 = arith.constant 0 : i32
    return %arg0, %arg2 : i32, i32
  }
  func.func @transform_1(%arg0: i32, %arg1: i32, %arg2: i32) -> (i32, i32) {
    %c0_i32 = arith.constant 0 : i32
    return %arg2, %arg1 : i32, i32
  }
  func.func @transform_2(%arg0: i32, %arg1: i32, %arg2: i32) -> (i32, i32) {
    %c0_i32 = arith.constant 0 : i32
    %c0_i32_0 = arith.constant 0 : i32
    return %c0_i32, %arg1 : i32, i32
  }
  func.func @transform_3(%arg0: i32, %arg1: i32, %arg2: i32) -> (i32, i32) {
    %c0_i32 = arith.constant 0 : i32
    return %arg0, %arg1 : i32, i32
  }
  func.func @transform_4(%arg0: i32, %arg1: i32, %arg2: i32) -> (i32, i32) {
    %c0_i32 = arith.constant 0 : i32
    return %arg0, %arg1 : i32, i32
  }
}

module attributes {stable_mosaic.version = 11 : i64} {
  func.func @_fused_matmul_kernel(%arg0: i32, %arg1: i32, %arg2: i32, %arg3: memref<8x768xbf16, #tpu.memory_space<vmem>>, %arg4: memref<768x256xbf16, #tpu.memory_space<vmem>>, %arg5: memref<1x256xf32, #tpu.memory_space<vmem>>, %arg6: memref<8x256xbf16, #tpu.memory_space<vmem>>, %arg7: memref<8x256xf32, #tpu.memory_space<vmem>>) attributes {dimension_semantics = [#tpu.dimension_semantics<parallel>, #tpu.dimension_semantics<parallel>, #tpu.dimension_semantics<arbitrary>], iteration_bounds = array<i64: 1, 1, 3>, scalar_prefetch = 0 : i64, scratch_operands = 1 : i64, tpu.core_type = #tpu.core_type<tc>, window_params = [{transform_indices = @transform_0, window_bounds = array<i64: 8, 768>}, {transform_indices = @transform_1, window_bounds = array<i64: 768, 256>}, {transform_indices = @transform_2, window_bounds = array<i64: 1, 256>}, {transform_indices = @transform_3, window_bounds = array<i64: 8, 256>}]} {
    %c0_i32 = arith.constant 0 : i32
    %0 = arith.cmpi eq, %arg2, %c0_i32 : i32
    %1 = arith.extui %0 : i1 to i32
    %c0_i32_0 = arith.constant 0 : i32
    %2 = arith.cmpi ne, %1, %c0_i32_0 : i32
    scf.if %2 {
      %cst_9 = arith.constant 0.000000e+00 : f32
      %12 = vector.broadcast %cst_9 : f32 to vector<8x256xf32>
      %c0_10 = arith.constant 0 : index
      %c0_11 = arith.constant 0 : index
      %13 = vector.load %arg7[%c0_10, %c0_11] : memref<8x256xf32, #tpu.memory_space<vmem>>, vector<8x256xf32>
      tpu.vector_store %arg7[%c0_10, %c0_11], %12 {strides = array<i32>} : memref<8x256xf32, #tpu.memory_space<vmem>>, vector<8x256xf32>,
    } else {
    }
    %c0 = arith.constant 0 : index
    %c0_1 = arith.constant 0 : index
    %3 = vector.load %arg7[%c0, %c0_1] : memref<8x256xf32, #tpu.memory_space<vmem>>, vector<8x256xf32>
    %c0_2 = arith.constant 0 : index
    %c0_3 = arith.constant 0 : index
    %4 = vector.load %arg3[%c0_2, %c0_3] : memref<8x768xbf16, #tpu.memory_space<vmem>>, vector<8x768xbf16>
    %c0_4 = arith.constant 0 : index
    %c0_5 = arith.constant 0 : index
    %5 = vector.load %arg4[%c0_4, %c0_5] : memref<768x256xbf16, #tpu.memory_space<vmem>>, vector<768x256xbf16>
    %cst = arith.constant dense<0.000000e+00> : vector<8x256xf32>
    %6 = tpu.matmul %4, %5, %cst {dimension_numbers = #tpu.dot_dimension_numbers<[1], [0], [0], [1], [0, 0, 1, 1], [], []>} : vector<8x768xbf16>, vector<768x256xbf16>, vector<8x256xf32> -> vector<8x256xf32>
    %7 = arith.addf %3, %6 : vector<8x256xf32>
    %c0_6 = arith.constant 0 : index
    %c0_7 = arith.constant 0 : index
    %8 = vector.load %arg7[%c0_6, %c0_7] : memref<8x256xf32, #tpu.memory_space<vmem>>, vector<8x256xf32>
    tpu.vector_store %arg7[%c0_6, %c0_7], %7 {strides = array<i32>} : memref<8x256xf32, #tpu.memory_space<vmem>>, vector<8x256xf32>,
    %c2_i32 = arith.constant 2 : i32
    %9 = arith.cmpi eq, %arg2, %c2_i32 : i32
    %10 = arith.extui %9 : i1 to i32
    %c0_i32_8 = arith.constant 0 : i32
    %11 = arith.cmpi ne, %10, %c0_i32_8 : i32
    scf.if %11 {
      %c0_9 = arith.constant 0 : index
      %c0_10 = arith.constant 0 : index
      %12 = vector.load %arg7[%c0_9, %c0_10] : memref<8x256xf32, #tpu.memory_space<vmem>>, vector<8x256xf32>
      %c0_11 = arith.constant 0 : index
      %c0_12 = arith.constant 0 : index
      %13 = vector.load %arg5[%c0_11, %c0_12] : memref<1x256xf32, #tpu.memory_space<vmem>>, vector<1x256xf32>
      %14 = vector.broadcast %13 : vector<1x256xf32> to vector<8x256xf32>
      %15 = arith.addf %12, %14 : vector<8x256xf32>
      %cst_13 = arith.constant 0.000000e+00 : f32
      %16 = vector.broadcast %cst_13 : f32 to vector<8x256xf32>
      %17 = arith.maximumf %15, %16 : vector<8x256xf32>
      %18 = arith.truncf %17 : vector<8x256xf32> to vector<8x256xbf16>
      %c0_14 = arith.constant 0 : index
      %c0_15 = arith.constant 0 : index
      %19 = vector.load %arg6[%c0_14, %c0_15] : memref<8x256xbf16, #tpu.memory_space<vmem>>, vector<8x256xbf16>
      tpu.vector_store %arg6[%c0_14, %c0_15], %18 {strides = array<i32>} : memref<8x256xbf16, #tpu.memory_space<vmem>>, vector<8x256xbf16>,
    } else {
    }
    return
  }
  func.func @transform_0(%arg0: i32, %arg1: i32, %arg2: i32) -> (i32, i32) {
    %c0_i32 = arith.constant 0 : i32
    return %arg0, %arg2 : i32, i32
  }
  func.func @transform_1(%arg0: i32, %arg1: i32, %arg2: i32) -> (i32, i32) {
    %c0_i32 = arith.constant 0 : i32
    return %arg2, %arg1 : i32, i32
  }
  func.func @transform_2(%arg0: i32, %arg1: i32, %arg2: i32) -> (i32, i32) {
    %c0_i32 = arith.constant 0 : i32
    %c0_i32_0 = arith.constant 0 : i32
    return %c0_i32, %arg1 : i32, i32
  }
  func.func @transform_3(%arg0: i32, %arg1: i32, %arg2: i32) -> (i32, i32) {
    %c0_i32 = arith.constant 0 : i32
    return %arg0, %arg1 : i32, i32
  }
}

module attributes {stable_mosaic.version = 11 : i64} {
  func.func @_fused_matmul_kernel(%arg0: i32, %arg1: i32, %arg2: i32, %arg3: memref<8x768xbf16, #tpu.memory_space<vmem>>, %arg4: memref<768x256xbf16, #tpu.memory_space<vmem>>, %arg5: memref<1x256xf32, #tpu.memory_space<vmem>>, %arg6: memref<8x256xbf16, #tpu.memory_space<vmem>>, %arg7: memref<8x256xf32, #tpu.memory_space<vmem>>) attributes {dimension_semantics = [#tpu.dimension_semantics<parallel>, #tpu.dimension_semantics<parallel>, #tpu.dimension_semantics<arbitrary>], iteration_bounds = array<i64: 1, 2, 3>, scalar_prefetch = 0 : i64, scratch_operands = 1 : i64, tpu.core_type = #tpu.core_type<tc>, window_params = [{transform_indices = @transform_0, window_bounds = array<i64: 8, 768>}, {transform_indices = @transform_1, window_bounds = array<i64: 768, 256>}, {transform_indices = @transform_2, window_bounds = array<i64: 1, 256>}, {transform_indices = @transform_3, window_bounds = array<i64: 8, 256>}]} {
    %c0_i32 = arith.constant 0 : i32
    %0 = arith.cmpi eq, %arg2, %c0_i32 : i32
    %1 = arith.extui %0 : i1 to i32
    %c0_i32_0 = arith.constant 0 : i32
    %2 = arith.cmpi ne, %1, %c0_i32_0 : i32
    scf.if %2 {
      %cst_9 = arith.constant 0.000000e+00 : f32
      %12 = vector.broadcast %cst_9 : f32 to vector<8x256xf32>
      %c0_10 = arith.constant 0 : index
      %c0_11 = arith.constant 0 : index
      %13 = vector.load %arg7[%c0_10, %c0_11] : memref<8x256xf32, #tpu.memory_space<vmem>>, vector<8x256xf32>
      tpu.vector_store %arg7[%c0_10, %c0_11], %12 {strides = array<i32>} : memref<8x256xf32, #tpu.memory_space<vmem>>, vector<8x256xf32>,
    } else {
    }
    %c0 = arith.constant 0 : index
    %c0_1 = arith.constant 0 : index
    %3 = vector.load %arg7[%c0, %c0_1] : memref<8x256xf32, #tpu.memory_space<vmem>>, vector<8x256xf32>
    %c0_2 = arith.constant 0 : index
    %c0_3 = arith.constant 0 : index
    %4 = vector.load %arg3[%c0_2, %c0_3] : memref<8x768xbf16, #tpu.memory_space<vmem>>, vector<8x768xbf16>
    %c0_4 = arith.constant 0 : index
    %c0_5 = arith.constant 0 : index
    %5 = vector.load %arg4[%c0_4, %c0_5] : memref<768x256xbf16, #tpu.memory_space<vmem>>, vector<768x256xbf16>
    %cst = arith.constant dense<0.000000e+00> : vector<8x256xf32>
    %6 = tpu.matmul %4, %5, %cst {dimension_numbers = #tpu.dot_dimension_numbers<[1], [0], [0], [1], [0, 0, 1, 1], [], []>} : vector<8x768xbf16>, vector<768x256xbf16>, vector<8x256xf32> -> vector<8x256xf32>
    %7 = arith.addf %3, %6 : vector<8x256xf32>
    %c0_6 = arith.constant 0 : index
    %c0_7 = arith.constant 0 : index
    %8 = vector.load %arg7[%c0_6, %c0_7] : memref<8x256xf32, #tpu.memory_space<vmem>>, vector<8x256xf32>
    tpu.vector_store %arg7[%c0_6, %c0_7], %7 {strides = array<i32>} : memref<8x256xf32, #tpu.memory_space<vmem>>, vector<8x256xf32>,
    %c2_i32 = arith.constant 2 : i32
    %9 = arith.cmpi eq, %arg2, %c2_i32 : i32
    %10 = arith.extui %9 : i1 to i32
    %c0_i32_8 = arith.constant 0 : i32
    %11 = arith.cmpi ne, %10, %c0_i32_8 : i32
    scf.if %11 {
      %c0_9 = arith.constant 0 : index
      %c0_10 = arith.constant 0 : index
      %12 = vector.load %arg7[%c0_9, %c0_10] : memref<8x256xf32, #tpu.memory_space<vmem>>, vector<8x256xf32>
      %c0_11 = arith.constant 0 : index
      %c0_12 = arith.constant 0 : index
      %13 = vector.load %arg5[%c0_11, %c0_12] : memref<1x256xf32, #tpu.memory_space<vmem>>, vector<1x256xf32>
      %14 = vector.broadcast %13 : vector<1x256xf32> to vector<8x256xf32>
      %15 = arith.addf %12, %14 : vector<8x256xf32>
      %cst_13 = arith.constant 0.000000e+00 : f32
      %16 = vector.broadcast %cst_13 : f32 to vector<8x256xf32>
      %17 = arith.maximumf %15, %16 : vector<8x256xf32>
      %18 = arith.truncf %17 : vector<8x256xf32> to vector<8x256xbf16>
      %c0_14 = arith.constant 0 : index
      %c0_15 = arith.constant 0 : index
      %19 = vector.load %arg6[%c0_14, %c0_15] : memref<8x256xbf16, #tpu.memory_space<vmem>>, vector<8x256xbf16>
      tpu.vector_store %arg6[%c0_14, %c0_15], %18 {strides = array<i32>} : memref<8x256xbf16, #tpu.memory_space<vmem>>, vector<8x256xbf16>,
    } else {
    }
    return
  }
  func.func @transform_0(%arg0: i32, %arg1: i32, %arg2: i32) -> (i32, i32) {
    %c0_i32 = arith.constant 0 : i32
    return %arg0, %arg2 : i32, i32
  }
  func.func @transform_1(%arg0: i32, %arg1: i32, %arg2: i32) -> (i32, i32) {
    %c0_i32 = arith.constant 0 : i32
    return %arg2, %arg1 : i32, i32
  }
  func.func @transform_2(%arg0: i32, %arg1: i32, %arg2: i32) -> (i32, i32) {
    %c0_i32 = arith.constant 0 : i32
    %c0_i32_0 = arith.constant 0 : i32
    return %c0_i32, %arg1 : i32, i32
  }
  func.func @transform_3(%arg0: i32, %arg1: i32, %arg2: i32) -> (i32, i32) {
    %c0_i32 = arith.constant 0 : i32
    return %arg0, %arg1 : i32, i32
  }
}

module attributes {stable_mosaic.version = 11 : i64} {
  func.func @_fused_matmul_kernel(%arg0: i32, %arg1: i32, %arg2: i32, %arg3: memref<8x256xbf16, #tpu.memory_space<vmem>>, %arg4: memref<256x256xbf16, #tpu.memory_space<vmem>>, %arg5: memref<1x256xf32, #tpu.memory_space<vmem>>, %arg6: memref<8x256xbf16, #tpu.memory_space<vmem>>, %arg7: memref<8x256xf32, #tpu.memory_space<vmem>>) attributes {dimension_semantics = [#tpu.dimension_semantics<parallel>, #tpu.dimension_semantics<parallel>, #tpu.dimension_semantics<arbitrary>], iteration_bounds = array<i64: 1, 2, 1>, scalar_prefetch = 0 : i64, scratch_operands = 1 : i64, tpu.core_type = #tpu.core_type<tc>, window_params = [{transform_indices = @transform_0, window_bounds = array<i64: 8, 256>}, {transform_indices = @transform_1, window_bounds = array<i64: 256, 256>}, {transform_indices = @transform_2, window_bounds = array<i64: 1, 256>}, {transform_indices = @transform_3, window_bounds = array<i64: 8, 256>}]} {
    %c0_i32 = arith.constant 0 : i32
    %0 = arith.cmpi eq, %arg2, %c0_i32 : i32
    %1 = arith.extui %0 : i1 to i32
    %c0_i32_0 = arith.constant 0 : i32
    %2 = arith.cmpi ne, %1, %c0_i32_0 : i32
    scf.if %2 {
      %cst_10 = arith.constant 0.000000e+00 : f32
      %12 = vector.broadcast %cst_10 : f32 to vector<8x256xf32>
      %c0_11 = arith.constant 0 : index
      %c0_12 = arith.constant 0 : index
      %13 = vector.load %arg7[%c0_11, %c0_12] : memref<8x256xf32, #tpu.memory_space<vmem>>, vector<8x256xf32>
      tpu.vector_store %arg7[%c0_11, %c0_12], %12 {strides = array<i32>} : memref<8x256xf32, #tpu.memory_space<vmem>>, vector<8x256xf32>,
    } else {
    }
    %c0 = arith.constant 0 : index
    %c0_1 = arith.constant 0 : index
    %3 = vector.load %arg7[%c0, %c0_1] : memref<8x256xf32, #tpu.memory_space<vmem>>, vector<8x256xf32>
    %c0_2 = arith.constant 0 : index
    %c0_3 = arith.constant 0 : index
    %4 = vector.load %arg3[%c0_2, %c0_3] : memref<8x256xbf16, #tpu.memory_space<vmem>>, vector<8x256xbf16>
    %c0_4 = arith.constant 0 : index
    %c0_5 = arith.constant 0 : index
    %5 = vector.load %arg4[%c0_4, %c0_5] : memref<256x256xbf16, #tpu.memory_space<vmem>>, vector<256x256xbf16>
    %cst = arith.constant dense<0.000000e+00> : vector<8x256xf32>
    %6 = tpu.matmul %4, %5, %cst {dimension_numbers = #tpu.dot_dimension_numbers<[1], [0], [0], [1], [0, 0, 1, 1], [], []>} : vector<8x256xbf16>, vector<256x256xbf16>, vector<8x256xf32> -> vector<8x256xf32>
    %7 = arith.addf %3, %6 : vector<8x256xf32>
    %c0_6 = arith.constant 0 : index
    %c0_7 = arith.constant 0 : index
    %8 = vector.load %arg7[%c0_6, %c0_7] : memref<8x256xf32, #tpu.memory_space<vmem>>, vector<8x256xf32>
    tpu.vector_store %arg7[%c0_6, %c0_7], %7 {strides = array<i32>} : memref<8x256xf32, #tpu.memory_space<vmem>>, vector<8x256xf32>,
    %c0_i32_8 = arith.constant 0 : i32
    %9 = arith.cmpi eq, %arg2, %c0_i32_8 : i32
    %10 = arith.extui %9 : i1 to i32
    %c0_i32_9 = arith.constant 0 : i32
    %11 = arith.cmpi ne, %10, %c0_i32_9 : i32
    scf.if %11 {
      %c0_10 = arith.constant 0 : index
      %c0_11 = arith.constant 0 : index
      %12 = vector.load %arg7[%c0_10, %c0_11] : memref<8x256xf32, #tpu.memory_space<vmem>>, vector<8x256xf32>
      %c0_12 = arith.constant 0 : index
      %c0_13 = arith.constant 0 : index
      %13 = vector.load %arg5[%c0_12, %c0_13] : memref<1x256xf32, #tpu.memory_space<vmem>>, vector<1x256xf32>
      %14 = vector.broadcast %13 : vector<1x256xf32> to vector<8x256xf32>
      %15 = arith.addf %12, %14 : vector<8x256xf32>
      %16 = arith.truncf %15 : vector<8x256xf32> to vector<8x256xbf16>
      %c0_14 = arith.constant 0 : index
      %c0_15 = arith.constant 0 : index
      %17 = vector.load %arg6[%c0_14, %c0_15] : memref<8x256xbf16, #tpu.memory_space<vmem>>, vector<8x256xbf16>
      tpu.vector_store %arg6[%c0_14, %c0_15], %16 {strides = array<i32>} : memref<8x256xbf16, #tpu.memory_space<vmem>>, vector<8x256xbf16>,
    } else {
    }
    return
  }
  func.func @transform_0(%arg0: i32, %arg1: i32, %arg2: i32) -> (i32, i32) {
    %c0_i32 = arith.constant 0 : i32
    return %arg0, %arg2 : i32, i32
  }
  func.func @transform_1(%arg0: i32, %arg1: i32, %arg2: i32) -> (i32, i32) {
    %c0_i32 = arith.constant 0 : i32
    return %arg2, %arg1 : i32, i32
  }
  func.func @transform_2(%arg0: i32, %arg1: i32, %arg2: i32) -> (i32, i32) {
    %c0_i32 = arith.constant 0 : i32
    %c0_i32_0 = arith.constant 0 : i32
    return %c0_i32, %arg1 : i32, i32
  }
  func.func @transform_3(%arg0: i32, %arg1: i32, %arg2: i32) -> (i32, i32) {
    %c0_i32 = arith.constant 0 : i32
    return %arg0, %arg1 : i32, i32
  }
}

module attributes {stable_mosaic.version = 11 : i64} {
  func.func @_fused_matmul_kernel(%arg0: i32, %arg1: i32, %arg2: i32, %arg3: memref<8x768xbf16, #tpu.memory_space<vmem>>, %arg4: memref<768x256xbf16, #tpu.memory_space<vmem>>, %arg5: memref<1x256xf32, #tpu.memory_space<vmem>>, %arg6: memref<8x256xbf16, #tpu.memory_space<vmem>>, %arg7: memref<8x256xbf16, #tpu.memory_space<vmem>>, %arg8: memref<8x256xf32, #tpu.memory_space<vmem>>) attributes {dimension_semantics = [#tpu.dimension_semantics<parallel>, #tpu.dimension_semantics<parallel>, #tpu.dimension_semantics<arbitrary>], iteration_bounds = array<i64: 1, 2, 6>, scalar_prefetch = 0 : i64, scratch_operands = 1 : i64, tpu.core_type = #tpu.core_type<tc>, window_params = [{transform_indices = @transform_0, window_bounds = array<i64: 8, 768>}, {transform_indices = @transform_1, window_bounds = array<i64: 768, 256>}, {transform_indices = @transform_2, window_bounds = array<i64: 1, 256>}, {transform_indices = @transform_3, window_bounds = array<i64: 8, 256>}, {transform_indices = @transform_4, window_bounds = array<i64: 8, 256>}]} {
    %c0_i32 = arith.constant 0 : i32
    %0 = arith.cmpi eq, %arg2, %c0_i32 : i32
    %1 = arith.extui %0 : i1 to i32
    %c0_i32_0 = arith.constant 0 : i32
    %2 = arith.cmpi ne, %1, %c0_i32_0 : i32
    scf.if %2 {
      %cst_9 = arith.constant 0.000000e+00 : f32
      %12 = vector.broadcast %cst_9 : f32 to vector<8x256xf32>
      %c0_10 = arith.constant 0 : index
      %c0_11 = arith.constant 0 : index
      %13 = vector.load %arg8[%c0_10, %c0_11] : memref<8x256xf32, #tpu.memory_space<vmem>>, vector<8x256xf32>
      tpu.vector_store %arg8[%c0_10, %c0_11], %12 {strides = array<i32>} : memref<8x256xf32, #tpu.memory_space<vmem>>, vector<8x256xf32>,
    } else {
    }
    %c0 = arith.constant 0 : index
    %c0_1 = arith.constant 0 : index
    %3 = vector.load %arg8[%c0, %c0_1] : memref<8x256xf32, #tpu.memory_space<vmem>>, vector<8x256xf32>
    %c0_2 = arith.constant 0 : index
    %c0_3 = arith.constant 0 : index
    %4 = vector.load %arg3[%c0_2, %c0_3] : memref<8x768xbf16, #tpu.memory_space<vmem>>, vector<8x768xbf16>
    %c0_4 = arith.constant 0 : index
    %c0_5 = arith.constant 0 : index
    %5 = vector.load %arg4[%c0_4, %c0_5] : memref<768x256xbf16, #tpu.memory_space<vmem>>, vector<768x256xbf16>
    %cst = arith.constant dense<0.000000e+00> : vector<8x256xf32>
    %6 = tpu.matmul %4, %5, %cst {dimension_numbers = #tpu.dot_dimension_numbers<[1], [0], [0], [1], [0, 0, 1, 1], [], []>} : vector<8x768xbf16>, vector<768x256xbf16>, vector<8x256xf32> -> vector<8x256xf32>
    %7 = arith.addf %3, %6 : vector<8x256xf32>
    %c0_6 = arith.constant 0 : index
    %c0_7 = arith.constant 0 : index
    %8 = vector.load %arg8[%c0_6, %c0_7] : memref<8x256xf32, #tpu.memory_space<vmem>>, vector<8x256xf32>
    tpu.vector_store %arg8[%c0_6, %c0_7], %7 {strides = array<i32>} : memref<8x256xf32, #tpu.memory_space<vmem>>, vector<8x256xf32>,
    %c5_i32 = arith.constant 5 : i32
    %9 = arith.cmpi eq, %arg2, %c5_i32 : i32
    %10 = arith.extui %9 : i1 to i32
    %c0_i32_8 = arith.constant 0 : i32
    %11 = arith.cmpi ne, %10, %c0_i32_8 : i32
    scf.if %11 {
      %c0_9 = arith.constant 0 : index
      %c0_10 = arith.constant 0 : index
      %12 = vector.load %arg8[%c0_9, %c0_10] : memref<8x256xf32, #tpu.memory_space<vmem>>, vector<8x256xf32>
      %c0_11 = arith.constant 0 : index
      %c0_12 = arith.constant 0 : index
      %13 = vector.load %arg5[%c0_11, %c0_12] : memref<1x256xf32, #tpu.memory_space<vmem>>, vector<1x256xf32>
      %14 = vector.broadcast %13 : vector<1x256xf32> to vector<8x256xf32>
      %15 = arith.addf %12, %14 : vector<8x256xf32>
      %c0_13 = arith.constant 0 : index
      %c0_14 = arith.constant 0 : index
      %16 = vector.load %arg6[%c0_13, %c0_14] : memref<8x256xbf16, #tpu.memory_space<vmem>>, vector<8x256xbf16>
      %17 = arith.extf %16 : vector<8x256xbf16> to vector<8x256xf32>
      %18 = arith.addf %15, %17 : vector<8x256xf32>
      %cst_15 = arith.constant 0.000000e+00 : f32
      %19 = vector.broadcast %cst_15 : f32 to vector<8x256xf32>
      %20 = arith.maximumf %18, %19 : vector<8x256xf32>
      %21 = arith.truncf %20 : vector<8x256xf32> to vector<8x256xbf16>
      %c0_16 = arith.constant 0 : index
      %c0_17 = arith.constant 0 : index
      %22 = vector.load %arg7[%c0_16, %c0_17] : memref<8x256xbf16, #tpu.memory_space<vmem>>, vector<8x256xbf16>
      tpu.vector_store %arg7[%c0_16, %c0_17], %21 {strides = array<i32>} : memref<8x256xbf16, #tpu.memory_space<vmem>>, vector<8x256xbf16>,
    } else {
    }
    return
  }
  func.func @transform_0(%arg0: i32, %arg1: i32, %arg2: i32) -> (i32, i32) {
    %c0_i32 = arith.constant 0 : i32
    return %arg0, %arg2 : i32, i32
  }
  func.func @transform_1(%arg0: i32, %arg1: i32, %arg2: i32) -> (i32, i32) {
    %c0_i32 = arith.constant 0 : i32
    return %arg2, %arg1 : i32, i32
  }
  func.func @transform_2(%arg0: i32, %arg1: i32, %arg2: i32) -> (i32, i32) {
    %c0_i32 = arith.constant 0 : i32
    %c0_i32_0 = arith.constant 0 : i32
    return %c0_i32, %arg1 : i32, i32
  }
  func.func @transform_3(%arg0: i32, %arg1: i32, %arg2: i32) -> (i32, i32) {
    %c0_i32 = arith.constant 0 : i32
    return %arg0, %arg1 : i32, i32
  }
  func.func @transform_4(%arg0: i32, %arg1: i32, %arg2: i32) -> (i32, i32) {
    %c0_i32 = arith.constant 0 : i32
    return %arg0, %arg1 : i32, i32
  }
}

module attributes {stable_mosaic.version = 11 : i64} {
  func.func @_fused_matmul_kernel(%arg0: i32, %arg1: i32, %arg2: i32, %arg3: memref<8x768xbf16, #tpu.memory_space<vmem>>, %arg4: memref<768x256xbf16, #tpu.memory_space<vmem>>, %arg5: memref<1x256xf32, #tpu.memory_space<vmem>>, %arg6: memref<8x256xbf16, #tpu.memory_space<vmem>>, %arg7: memref<8x256xf32, #tpu.memory_space<vmem>>) attributes {dimension_semantics = [#tpu.dimension_semantics<parallel>, #tpu.dimension_semantics<parallel>, #tpu.dimension_semantics<arbitrary>], iteration_bounds = array<i64: 1, 2, 6>, scalar_prefetch = 0 : i64, scratch_operands = 1 : i64, tpu.core_type = #tpu.core_type<tc>, window_params = [{transform_indices = @transform_0, window_bounds = array<i64: 8, 768>}, {transform_indices = @transform_1, window_bounds = array<i64: 768, 256>}, {transform_indices = @transform_2, window_bounds = array<i64: 1, 256>}, {transform_indices = @transform_3, window_bounds = array<i64: 8, 256>}]} {
    %c0_i32 = arith.constant 0 : i32
    %0 = arith.cmpi eq, %arg2, %c0_i32 : i32
    %1 = arith.extui %0 : i1 to i32
    %c0_i32_0 = arith.constant 0 : i32
    %2 = arith.cmpi ne, %1, %c0_i32_0 : i32
    scf.if %2 {
      %cst_9 = arith.constant 0.000000e+00 : f32
      %12 = vector.broadcast %cst_9 : f32 to vector<8x256xf32>
      %c0_10 = arith.constant 0 : index
      %c0_11 = arith.constant 0 : index
      %13 = vector.load %arg7[%c0_10, %c0_11] : memref<8x256xf32, #tpu.memory_space<vmem>>, vector<8x256xf32>
      tpu.vector_store %arg7[%c0_10, %c0_11], %12 {strides = array<i32>} : memref<8x256xf32, #tpu.memory_space<vmem>>, vector<8x256xf32>,
    } else {
    }
    %c0 = arith.constant 0 : index
    %c0_1 = arith.constant 0 : index
    %3 = vector.load %arg7[%c0, %c0_1] : memref<8x256xf32, #tpu.memory_space<vmem>>, vector<8x256xf32>
    %c0_2 = arith.constant 0 : index
    %c0_3 = arith.constant 0 : index
    %4 = vector.load %arg3[%c0_2, %c0_3] : memref<8x768xbf16, #tpu.memory_space<vmem>>, vector<8x768xbf16>
    %c0_4 = arith.constant 0 : index
    %c0_5 = arith.constant 0 : index
    %5 = vector.load %arg4[%c0_4, %c0_5] : memref<768x256xbf16, #tpu.memory_space<vmem>>, vector<768x256xbf16>
    %cst = arith.constant dense<0.000000e+00> : vector<8x256xf32>
    %6 = tpu.matmul %4, %5, %cst {dimension_numbers = #tpu.dot_dimension_numbers<[1], [0], [0], [1], [0, 0, 1, 1], [], []>} : vector<8x768xbf16>, vector<768x256xbf16>, vector<8x256xf32> -> vector<8x256xf32>
    %7 = arith.addf %3, %6 : vector<8x256xf32>
    %c0_6 = arith.constant 0 : index
    %c0_7 = arith.constant 0 : index
    %8 = vector.load %arg7[%c0_6, %c0_7] : memref<8x256xf32, #tpu.memory_space<vmem>>, vector<8x256xf32>
    tpu.vector_store %arg7[%c0_6, %c0_7], %7 {strides = array<i32>} : memref<8x256xf32, #tpu.memory_space<vmem>>, vector<8x256xf32>,
    %c5_i32 = arith.constant 5 : i32
    %9 = arith.cmpi eq, %arg2, %c5_i32 : i32
    %10 = arith.extui %9 : i1 to i32
    %c0_i32_8 = arith.constant 0 : i32
    %11 = arith.cmpi ne, %10, %c0_i32_8 : i32
    scf.if %11 {
      %c0_9 = arith.constant 0 : index
      %c0_10 = arith.constant 0 : index
      %12 = vector.load %arg7[%c0_9, %c0_10] : memref<8x256xf32, #tpu.memory_space<vmem>>, vector<8x256xf32>
      %c0_11 = arith.constant 0 : index
      %c0_12 = arith.constant 0 : index
      %13 = vector.load %arg5[%c0_11, %c0_12] : memref<1x256xf32, #tpu.memory_space<vmem>>, vector<1x256xf32>
      %14 = vector.broadcast %13 : vector<1x256xf32> to vector<8x256xf32>
      %15 = arith.addf %12, %14 : vector<8x256xf32>
      %cst_13 = arith.constant 0.000000e+00 : f32
      %16 = vector.broadcast %cst_13 : f32 to vector<8x256xf32>
      %17 = arith.maximumf %15, %16 : vector<8x256xf32>
      %18 = arith.truncf %17 : vector<8x256xf32> to vector<8x256xbf16>
      %c0_14 = arith.constant 0 : index
      %c0_15 = arith.constant 0 : index
      %19 = vector.load %arg6[%c0_14, %c0_15] : memref<8x256xbf16, #tpu.memory_space<vmem>>, vector<8x256xbf16>
      tpu.vector_store %arg6[%c0_14, %c0_15], %18 {strides = array<i32>} : memref<8x256xbf16, #tpu.memory_space<vmem>>, vector<8x256xbf16>,
    } else {
    }
    return
  }
  func.func @transform_0(%arg0: i32, %arg1: i32, %arg2: i32) -> (i32, i32) {
    %c0_i32 = arith.constant 0 : i32
    return %arg0, %arg2 : i32, i32
  }
  func.func @transform_1(%arg0: i32, %arg1: i32, %arg2: i32) -> (i32, i32) {
    %c0_i32 = arith.constant 0 : i32
    return %arg2, %arg1 : i32, i32
  }
  func.func @transform_2(%arg0: i32, %arg1: i32, %arg2: i32) -> (i32, i32) {
    %c0_i32 = arith.constant 0 : i32
    %c0_i32_0 = arith.constant 0 : i32
    return %c0_i32, %arg1 : i32, i32
  }
  func.func @transform_3(%arg0: i32, %arg1: i32, %arg2: i32) -> (i32, i32) {
    %c0_i32 = arith.constant 0 : i32
    return %arg0, %arg1 : i32, i32
  }
}

module attributes {stable_mosaic.version = 11 : i64} {
  func.func @_fused_matmul_kernel(%arg0: i32, %arg1: i32, %arg2: i32, %arg3: memref<8x512xbf16, #tpu.memory_space<vmem>>, %arg4: memref<512x128xbf16, #tpu.memory_space<vmem>>, %arg5: memref<1x128xf32, #tpu.memory_space<vmem>>, %arg6: memref<8x128xf32, #tpu.memory_space<vmem>>, %arg7: memref<8x128xf32, #tpu.memory_space<vmem>>) attributes {dimension_semantics = [#tpu.dimension_semantics<parallel>, #tpu.dimension_semantics<parallel>, #tpu.dimension_semantics<arbitrary>], iteration_bounds = array<i64: 1, 1, 1>, scalar_prefetch = 0 : i64, scratch_operands = 1 : i64, tpu.core_type = #tpu.core_type<tc>, window_params = [{transform_indices = @transform_0, window_bounds = array<i64: 8, 512>}, {transform_indices = @transform_1, window_bounds = array<i64: 512, 128>}, {transform_indices = @transform_2, window_bounds = array<i64: 1, 128>}, {transform_indices = @transform_3, window_bounds = array<i64: 8, 128>}]} {
    %c0_i32 = arith.constant 0 : i32
    %0 = arith.cmpi eq, %arg2, %c0_i32 : i32
    %1 = arith.extui %0 : i1 to i32
    %c0_i32_0 = arith.constant 0 : i32
    %2 = arith.cmpi ne, %1, %c0_i32_0 : i32
    scf.if %2 {
      %cst_10 = arith.constant 0.000000e+00 : f32
      %12 = vector.broadcast %cst_10 : f32 to vector<8x128xf32>
      %c0_11 = arith.constant 0 : index
      %c0_12 = arith.constant 0 : index
      %13 = vector.load %arg7[%c0_11, %c0_12] : memref<8x128xf32, #tpu.memory_space<vmem>>, vector<8x128xf32>
      tpu.vector_store %arg7[%c0_11, %c0_12], %12 {strides = array<i32>} : memref<8x128xf32, #tpu.memory_space<vmem>>, vector<8x128xf32>,
    } else {
    }
    %c0 = arith.constant 0 : index
    %c0_1 = arith.constant 0 : index
    %3 = vector.load %arg7[%c0, %c0_1] : memref<8x128xf32, #tpu.memory_space<vmem>>, vector<8x128xf32>
    %c0_2 = arith.constant 0 : index
    %c0_3 = arith.constant 0 : index
    %4 = vector.load %arg3[%c0_2, %c0_3] : memref<8x512xbf16, #tpu.memory_space<vmem>>, vector<8x512xbf16>
    %c0_4 = arith.constant 0 : index
    %c0_5 = arith.constant 0 : index
    %5 = vector.load %arg4[%c0_4, %c0_5] : memref<512x128xbf16, #tpu.memory_space<vmem>>, vector<512x128xbf16>
    %cst = arith.constant dense<0.000000e+00> : vector<8x128xf32>
    %6 = tpu.matmul %4, %5, %cst {dimension_numbers = #tpu.dot_dimension_numbers<[1], [0], [0], [1], [0, 0, 1, 1], [], []>} : vector<8x512xbf16>, vector<512x128xbf16>, vector<8x128xf32> -> vector<8x128xf32>
    %7 = arith.addf %3, %6 : vector<8x128xf32>
    %c0_6 = arith.constant 0 : index
    %c0_7 = arith.constant 0 : index
    %8 = vector.load %arg7[%c0_6, %c0_7] : memref<8x128xf32, #tpu.memory_space<vmem>>, vector<8x128xf32>
    tpu.vector_store %arg7[%c0_6, %c0_7], %7 {strides = array<i32>} : memref<8x128xf32, #tpu.memory_space<vmem>>, vector<8x128xf32>,
    %c0_i32_8 = arith.constant 0 : i32
    %9 = arith.cmpi eq, %arg2, %c0_i32_8 : i32
    %10 = arith.extui %9 : i1 to i32
    %c0_i32_9 = arith.constant 0 : i32
    %11 = arith.cmpi ne, %10, %c0_i32_9 : i32
    scf.if %11 {
      %c0_10 = arith.constant 0 : index
      %c0_11 = arith.constant 0 : index
      %12 = vector.load %arg7[%c0_10, %c0_11] : memref<8x128xf32, #tpu.memory_space<vmem>>, vector<8x128xf32>
      %c0_12 = arith.constant 0 : index
      %c0_13 = arith.constant 0 : index
      %13 = vector.load %arg5[%c0_12, %c0_13] : memref<1x128xf32, #tpu.memory_space<vmem>>, vector<1x128xf32>
      %14 = vector.broadcast %13 : vector<1x128xf32> to vector<8x128xf32>
      %15 = arith.addf %12, %14 : vector<8x128xf32>
      %c0_14 = arith.constant 0 : index
      %c0_15 = arith.constant 0 : index
      %16 = vector.load %arg6[%c0_14, %c0_15] : memref<8x128xf32, #tpu.memory_space<vmem>>, vector<8x128xf32>
      tpu.vector_store %arg6[%c0_14, %c0_15], %15 {strides = array<i32>} : memref<8x128xf32, #tpu.memory_space<vmem>>, vector<8x128xf32>,
    } else {
    }
    return
  }
  func.func @transform_0(%arg0: i32, %arg1: i32, %arg2: i32) -> (i32, i32) {
    %c0_i32 = arith.constant 0 : i32
    return %arg0, %arg2 : i32, i32
  }
  func.func @transform_1(%arg0: i32, %arg1: i32, %arg2: i32) -> (i32, i32) {
    %c0_i32 = arith.constant 0 : i32
    return %arg2, %arg1 : i32, i32
  }
  func.func @transform_2(%arg0: i32, %arg1: i32, %arg2: i32) -> (i32, i32) {
    %c0_i32 = arith.constant 0 : i32
    %c0_i32_0 = arith.constant 0 : i32
    return %c0_i32, %arg1 : i32, i32
  }
  func.func @transform_3(%arg0: i32, %arg1: i32, %arg2: i32) -> (i32, i32) {
    %c0_i32 = arith.constant 0 : i32
    return %arg0, %arg1 : i32, i32
  }
}

</mosaic_0001>

<bundles_post_ra>
// kernel: _lambda_.21
= control target key start
LH: loop header
LB: loop body
LE: loop exit
PB: predicated region body
PF: predicated region fallthrough
CT: control target
= control target key end

     0   :  { %s1276_s1 = inlined_call_operand.vmem [shape: bf16[384,128], index: 1, kind: input, shape index: {}]   ;;  %s1277_s0 = inlined_call_operand.vmem [shape: bf16[128,384], index: 0, kind: input, shape index: {}]   ;;  %s1278_s2 = inlined_call_operand.vmem [shape: f32[1,128], index: 2, kind: input, shape index: {}]   ;;  %s1279_s3 = inlined_call_operand.vmem [shape: bf16[128,128], index: 3, kind: output, shape index: {}]  }
   0x1   :  { %v1011_v0 = vld [vmem:[%s1276_s1 + $0x40] sm:$0xff]   ;;  %v1014_v3 = vld [vmem:[%s1276_s1 + $0x48] sm:$0xff]   ;;  %v1017_v6 = vld [vmem:[%s1276_s1 + $0x50] sm:$0xff]  }
   0x2   :  { %v1012_v1 = vld [vmem:[%s1276_s1] sm:$0xff]   ;;  %899 = vmatprep.subr.bf16.mxu0 %v1011_v0  ;;  %v1015_v4 = vld [vmem:[%s1276_s1 + $0x8] sm:$0xff]   ;;  %v1018_v7 = vld [vmem:[%s1276_s1 + $0x10] sm:$0xff]  }
   0x3   :  { %v1013_v2 = vld [vmem:[%s1276_s1 + $0x80] sm:$0xff]   ;;  %900 = vmatpush3.bf16.msra.mxu0 %v1012_v1  ;;  %v1016_v5 = vld [vmem:[%s1276_s1 + $0x88] sm:$0xff]   ;;  %v1019_v8 = vld [vmem:[%s1276_s1 + $0x90] sm:$0xff]  }
   0x4   :  { %979 = vmatprep.subr.bf16.mxu1 %v1013_v2  ;;  %901 = vmatprep.subr.bf16.mxu0 %v1014_v3  ;;  %v1020_v9 = vld [vmem:[%s1276_s1 + $0x58] sm:$0xff]   ;;  %v1023_v12 = vld [vmem:[%s1276_s1 + $0x60] sm:$0xff]   ;;  %v1026_v15 = vld [vmem:[%s1276_s1 + $0x68] sm:$0xff]  }
   0x5   :  { %980 = vmatpush3.bf16.msra.mxu1 %v1013_v2  ;;  %v1021_v10 = vld [vmem:[%s1276_s1 + $0x18] sm:$0xff]   ;;  %v1025_v13 = vld [vmem:[%s1276_s1 + $0xa0] sm:$0xff]   ;;  %v1028_v16 = vld [vmem:[%s1276_s1 + $0xa8] sm:$0xff]  }
   0x6   :  { %981 = vmatprep.subr.bf16.mxu1 %v1016_v5  ;;  %v1022_v11 = vld [vmem:[%s1276_s1 + $0x98] sm:$0xff]   ;;  %v1024_v14 = vld [vmem:[%s1276_s1 + $0x20] sm:$0xff]   ;;  %v1027_v17 = vld [vmem:[%s1276_s1 + $0x28] sm:$0xff]  }
   0x7   :  { %902 = vmatpush3.bf16.msra.mxu0 %v1015_v4  ;;  %v1029_v18 = vld [vmem:[%s1276_s1 + $0x70] sm:$0xff]   ;;  %v1032_v21 = vld [vmem:[%s1276_s1 + $0x78] sm:$0xff]   ;;  %v1035_v26 = vld [vmem:[%s1277_s0] ss:$12 sps:$4 sm:$0xff]  }
   0x8   :  { %903 = vmatprep.subr.bf16.mxu0 %v1017_v6  ;;  %v1030_v19 = vld [vmem:[%s1276_s1 + $0x30] sm:$0xff]   ;;  %v1034_v22 = vld [vmem:[%s1276_s1 + $0xb8] sm:$0xff]   ;;  %v1039_v28 = vld [vmem:[%s1277_s0 + $0x20] ss:$12 sps:$4 sm:$0xff]  }
   0x9   :  { %982 = vmatpush3.bf16.msra.mxu1 %v1016_v5  ;;  %v1031_v20 = vld [vmem:[%s1276_s1 + $0xb0] sm:$0xff]   ;;  %v1033_v25 = vld [vmem:[%s1276_s1 + $0x38] sm:$0xff]   ;;  %v1055_v36 = vld [vmem:[%s1277_s0 + $0x80] ss:$12 sps:$4 sm:$0xff]  }
   0xa   :  { %983 = vmatprep.subr.bf16.mxu1 %v1019_v8  ;;  %v1037_v23 = vld [vmem:[%s1277_s0 + $0x4] ss:$12 sps:$4 sm:$0xff]   ;;  %v1038_v24 = vld [vmem:[%s1277_s0 + $0x8] ss:$12 sps:$4 sm:$0xff]   ;;  %v1048_v35 = vld [vmem:[%s1277_s0 + $0x4c] ss:$12 sps:$4 sm:$0xff]  }
   0xb   :  { %904 = vmatpush3.bf16.msra.mxu0 %v1018_v7  ;;  %435 = vmatprep.mubr.bf16.mxu0 %v1037_v23  ;;  %v1040_v27 = vld [vmem:[%s1277_s0 + $0x1c] ss:$12 sps:$4 sm:$0xff]   ;;  %v1046_v29 = vld [vmem:[%s1277_s0 + $0x38] ss:$12 sps:$4 sm:$0xff]   ;;  %v1043_v31 = vld [vmem:[%s1277_s0 + $0x34] ss:$12 sps:$4 sm:$0xff]  }
   0xc   :  { %905 = vmatprep.subr.bf16.mxu0 %v1020_v9  ;;  %995 = vmatprep.mubr.bf16.mxu1 %v1038_v24  ;;  %v1042_v30 = vld [vmem:[%s1277_s0 + $0x18] ss:$12 sps:$4 sm:$0xff]   ;;  %v1047_v32 = vld [vmem:[%s1277_s0 + $0x50] ss:$12 sps:$4 sm:$0xff]   ;;  %v1054_v33 = vld [vmem:[%s1277_s0 + $0x68] ss:$12 sps:$4 sm:$0xff]  }
   0xd   :  { %984 = vmatpush3.bf16.msra.mxu1 %v1019_v8  ;;  %v1045_v34 = vld [vmem:[%s1277_s0 + $0x30] ss:$12 sps:$4 sm:$0xff]   ;;  %v1062_v37 = vld [vmem:[%s1277_s0 + $0x98] ss:$12 sps:$4 sm:$0xff]   ;;  %v1050_v38 = vld [vmem:[%s1277_s0 + $0x48] ss:$12 sps:$4 sm:$0xff]  }
   0xe   :  { %985 = vmatprep.subr.bf16.mxu1 %v1022_v11  ;;  %v1051_v39 = vld [vmem:[%s1277_s0 + $0x64] ss:$12 sps:$4 sm:$0xff]   ;;  %v1053_v41 = vld [vmem:[%s1277_s0 + $0x60] ss:$12 sps:$4 sm:$0xff]   ;;  %v1056_v42 = vld [vmem:[%s1277_s0 + $0x7c] ss:$12 sps:$4 sm:$0xff]  }
   0xf   :  { %906 = vmatpush3.bf16.msra.mxu0 %v1021_v10  ;;  %v1063_v40 = vld [vmem:[%s1277_s0 + $0xb0] ss:$12 sps:$4 sm:$0xff]   ;;  %v1058_v43 = vld [vmem:[%s1277_s0 + $0x78] ss:$12 sps:$4 sm:$0xff]   ;;  %v1059_v44 = vld [vmem:[%s1277_s0 + $0x94] ss:$12 sps:$4 sm:$0xff]  }
  0x10   :  { %907 = vmatprep.subr.bf16.mxu0 %v1023_v12  ;;  %v1061_v45 = vld [vmem:[%s1277_s0 + $0x90] ss:$12 sps:$4 sm:$0xff]   ;;  %v1064_v46 = vld [vmem:[%s1277_s0 + $0xac] ss:$12 sps:$4 sm:$0xff]   ;;  %v1066_v47 = vld [vmem:[%s1277_s0 + $0xa8] ss:$12 sps:$4 sm:$0xff]  }
  0x11   :  { %986 = vmatpush3.bf16.msra.mxu1 %v1022_v11  ;;  %v1234_v55 = vld [vmem:[%s1278_s2] ss:$0 sm:$0xff] }
  0x12   :  { %987 = vmatprep.subr.bf16.mxu1 %v1025_v13 }
  0x13   :  { %908 = vmatpush3.bf16.msra.mxu0 %v1024_v14 }
  0x14   :  { %909 = vmatprep.subr.bf16.mxu0 %v1026_v15 }
  0x15   :  { %988 = vmatpush3.bf16.msra.mxu1 %v1025_v13 }
  0x16   :  { %989 = vmatprep.subr.bf16.mxu1 %v1028_v16 }
  0x17   :  { %910 = vmatpush3.bf16.msra.mxu0 %v1027_v17 }
  0x18   :  { %911 = vmatprep.subr.bf16.mxu0 %v1029_v18 }
  0x19   :  { %990 = vmatpush3.bf16.msra.mxu1 %v1028_v16 }
  0x1a   :  { %991 = vmatprep.subr.bf16.mxu1 %v1031_v20 }
  0x1b   :  { %912 = vmatpush3.bf16.msra.mxu0 %v1030_v19 }
  0x1c   :  { %913 = vmatprep.subr.bf16.mxu0 %v1032_v21 }
  0x1d   :  { %992 = vmatpush3.bf16.msra.mxu1 %v1031_v20 }
  0x1e   :  { %993 = vmatprep.subr.bf16.mxu1 %v1034_v22 }
  0x1f   :  { %914 = vmatpush3.bf16.msra.mxu0 %v1033_v25 }
  0x21   :  { %994 = vmatpush3.bf16.msra.mxu1 %v1034_v22 }
  0x22   :  { %436 = vmatmul.mubr.bf16.vlgmr.msra.gmra.mrb[0].mxu0 %v1035_v26 }
  0x23   :  { %443 = vmatprep.mubr.bf16.mxu0 %v1040_v27 }
  0x24   :  { %996 = vmatmul.mubr.bf16.vlgmr.msra.gmra.mrb[0].mxu1 %v1039_v28 }
  0x25   :  { %999 = vmatprep.mubr.bf16.mxu1 %v1046_v29 }
  0x2a   :  { %444 = vmatmul.mubr.bf16.gmra.mrb[4].mxu0 %v1042_v30 }
  0x2b   :  { %451 = vmatprep.mubr.bf16.mxu0 %v1043_v31 }
  0x2c   :  { %1000 = vmatmul.mubr.bf16.gmra.mrb[4].mxu1 %v1047_v32 }
  0x2d   :  { %1003 = vmatprep.mubr.bf16.mxu1 %v1054_v33 }
  0x32   :  { %452 = vmatmul.mubr.bf16.gmra.mrb[8].mxu0 %v1045_v34 }
  0x33   :  { %459 = vmatprep.mubr.bf16.mxu0 %v1048_v35 }
  0x34   :  { %1004 = vmatmul.mubr.bf16.gmra.mrb[8].mxu1 %v1055_v36 }
  0x35   :  { %1007 = vmatprep.mubr.bf16.mxu1 %v1062_v37 }
  0x3a   :  { %460 = vmatmul.mubr.bf16.gmra.mrb[12].mxu0 %v1050_v38 }
  0x3b   :  { %467 = vmatprep.mubr.bf16.mxu0 %v1051_v39 }
  0x3c   :  { %1008 = vmatmul.mubr.bf16.gmra.mrb[12].mxu1 %v1063_v40 }
  0x42   :  { %468 = vmatmul.mubr.bf16.gmra.mrb[16].mxu0 %v1053_v41 }
  0x43   :  { %475 = vmatprep.mubr.bf16.mxu0 %v1056_v42 }
  0x4a   :  { %476 = vmatmul.mubr.bf16.gmra.mrb[20].mxu0 %v1058_v43 }
  0x4b   :  { %483 = vmatprep.mubr.bf16.mxu0 %v1059_v44 }
  0x52   :  { %484 = vmatmul.mubr.bf16.gmra.mrb[24].mxu0 %v1061_v45 }
  0x53   :  { %491 = vmatprep.mubr.bf16.mxu0 %v1064_v46 }
  0x5a   :  { %492 = vmatmul.mubr.bf16.gmra.mrb[28].mxu0 %v1066_v47 }
  0xf5   :  { %v915_v48 = vpop.f32.mrb[0].mxu0 }
  0xf6   :  { %v916_v49 = vpop.f32.mrb[1].mxu0 }
  0xf7   :  { %v917_v50 = vadd.f32 %v916_v49, %v915_v48  ;;  %v918_v51 = vpop.f32.mrb[2].mxu0  ;;  %v997_v52 = vpop.f32.mrb[0].mxu1 }
  0xf8   :  { %v919_v53 = vpop.f32.mrb[3].mxu0  ;;  %v534_v54 = vpop.f32.mrb[1].mxu1 }
  0xf9   :  { %v920_v56 = vadd.f32 %v919_v53, %v918_v51  ;;  %v535_v57 = vadd.f32 %v917_v50, %v534_v54  ;;  %v998_v58 = vpop.f32.mrb[2].mxu1 }
  0xfa   :  { %v537_v59 = vpop.f32.mrb[3].mxu1 }
  0xfb   :  { %v655_v60 = vadd.f32 %v1234_v55, %v535_v57  ;;  %v538_v61 = vadd.f32 %v920_v56, %v537_v59 }
  0xfd   :  { %v656_v62 = vadd.f32 %v1234_v55, %v538_v61  ;;  %v921_v63 = vpop.f32.mrb[4].mxu0  ;;  %v671_v1 = vmax.f32 %v655_v60, 0.0 }
  0xfe   :  { %v922_v0 = vpop.f32.mrb[5].mxu0 }
  0xff   :  { %v672_v2 = vmax.f32 %v656_v62, 0.0  ;;  %v923_v3 = vadd.f32 %v922_v0, %v921_v63  ;;  %v924_v4 = vpop.f32.mrb[6].mxu0  ;;  %v1001_v5 = vpop.f32.mrb[4].mxu1 }
 0x100   :  { %v925_v6 = vpop.f32.mrb[7].mxu0  ;;  %v550_v7 = vpop.f32.mrb[5].mxu1 }
 0x101   :  { %v855_v8 = vpack.c.bf16 %v672_v2, %v671_v1  ;;  %v543_v9 = vadd.f32 %v997_v52, %v923_v3  ;;  %v926_v10 = vadd.f32 %v925_v6, %v924_v4  ;;  %v1002_v11 = vpop.f32.mrb[6].mxu1 }
 0x102   :  { %v553_v12 = vpop.f32.mrb[7].mxu1 }
 0x103   :  { %856 = vst [vmem:[%s1279_s3] sm:$0xff] %v855_v8   ;;  %v657_v13 = vadd.f32 %v1234_v55, %v543_v9  ;;  %v546_v14 = vadd.f32 %v998_v58, %v926_v10 }
 0x105   :  { %v658_v15 = vadd.f32 %v1234_v55, %v546_v14  ;;  %v927_v16 = vpop.f32.mrb[8].mxu0  ;;  %v673_v18 = vmax.f32 %v657_v13, 0.0 }
 0x106   :  { %v928_v17 = vpop.f32.mrb[9].mxu0 }
 0x107   :  { %v674_v19 = vmax.f32 %v658_v15, 0.0  ;;  %v929_v20 = vadd.f32 %v928_v17, %v927_v16  ;;  %v930_v21 = vpop.f32.mrb[10].mxu0  ;;  %v1005_v22 = vpop.f32.mrb[8].mxu1 }
 0x108   :  { %v931_v23 = vpop.f32.mrb[11].mxu0  ;;  %v566_v24 = vpop.f32.mrb[9].mxu1 }
 0x109   :  { %v860_v25 = vpack.c.bf16 %v674_v19, %v673_v18  ;;  %v932_v26 = vadd.f32 %v931_v23, %v930_v21  ;;  %v551_v27 = vadd.f32 %v929_v20, %v550_v7  ;;  %v1006_v28 = vpop.f32.mrb[10].mxu1 }
 0x10a   :  { %v569_v29 = vpop.f32.mrb[11].mxu1 }
 0x10b   :  { %892 = vst [vmem:[%s1279_s3 + $0x8] sm:$0xff] %v860_v25   ;;  %v659_v30 = vadd.f32 %v1234_v55, %v551_v27  ;;  %v554_v31 = vadd.f32 %v932_v26, %v553_v12 }
 0x10d   :  { %v660_v32 = vadd.f32 %v1234_v55, %v554_v31  ;;  %v933_v33 = vpop.f32.mrb[12].mxu0  ;;  %v675_v35 = vmax.f32 %v659_v30, 0.0 }
 0x10e   :  { %v934_v34 = vpop.f32.mrb[13].mxu0 }
 0x10f   :  { %v676_v36 = vmax.f32 %v660_v32, 0.0  ;;  %v935_v37 = vadd.f32 %v934_v34, %v933_v33  ;;  %v936_v38 = vpop.f32.mrb[14].mxu0  ;;  %v1009_v39 = vpop.f32.mrb[12].mxu1 }
 0x110   :  { %v937_v40 = vpop.f32.mrb[15].mxu0  ;;  %v582_v41 = vpop.f32.mrb[13].mxu1 }
 0x111   :  { %v865_v42 = vpack.c.bf16 %v676_v36, %v675_v35  ;;  %v559_v43 = vadd.f32 %v1001_v5, %v935_v37  ;;  %v938_v44 = vadd.f32 %v937_v40, %v936_v38  ;;  %v1010_v45 = vpop.f32.mrb[14].mxu1 }
 0x112   :  { %v585_v46 = vpop.f32.mrb[15].mxu1 }
 0x113   :  { %893 = vst [vmem:[%s1279_s3 + $0x10] sm:$0xff] %v865_v42   ;;  %v661_v47 = vadd.f32 %v1234_v55, %v559_v43  ;;  %v562_v48 = vadd.f32 %v1002_v11, %v938_v44 }
 0x115   :  { %v662_v49 = vadd.f32 %v1234_v55, %v562_v48  ;;  %v939_v50 = vpop.f32.mrb[16].mxu0  ;;  %v677_v52 = vmax.f32 %v661_v47, 0.0 }
 0x116   :  { %v940_v51 = vpop.f32.mrb[17].mxu0 }
 0x117   :  { %v678_v53 = vmax.f32 %v662_v49, 0.0  ;;  %v941_v54 = vadd.f32 %v940_v51, %v939_v50  ;;  %v942_v56 = vpop.f32.mrb[18].mxu0 }
 0x118   :  { %v943_v57 = vpop.f32.mrb[19].mxu0 }
 0x119   :  { %v870_v58 = vpack.c.bf16 %v678_v53, %v677_v52  ;;  %v944_v59 = vadd.f32 %v943_v57, %v942_v56  ;;  %v567_v60 = vadd.f32 %v941_v54, %v566_v24 }
 0x11b   :  { %894 = vst [vmem:[%s1279_s3 + $0x18] sm:$0xff] %v870_v58   ;;  %v663_v61 = vadd.f32 %v1234_v55, %v567_v60  ;;  %v570_v62 = vadd.f32 %v944_v59, %v569_v29 }
 0x11d   :  { %v664_v63 = vadd.f32 %v1234_v55, %v570_v62  ;;  %v945_v0 = vpop.f32.mrb[20].mxu0  ;;  %v679_v2 = vmax.f32 %v663_v61, 0.0 }
 0x11e   :  { %v946_v1 = vpop.f32.mrb[21].mxu0 }
 0x11f   :  { %v680_v3 = vmax.f32 %v664_v63, 0.0  ;;  %v947_v4 = vadd.f32 %v946_v1, %v945_v0  ;;  %v948_v5 = vpop.f32.mrb[22].mxu0 }
 0x120   :  { %v949_v6 = vpop.f32.mrb[23].mxu0 }
 0x121   :  { %v875_v7 = vpack.c.bf16 %v680_v3, %v679_v2  ;;  %v575_v8 = vadd.f32 %v1005_v22, %v947_v4  ;;  %v950_v9 = vadd.f32 %v949_v6, %v948_v5 }
 0x123   :  { %895 = vst [vmem:[%s1279_s3 + $0x20] sm:$0xff] %v875_v7   ;;  %v665_v10 = vadd.f32 %v1234_v55, %v575_v8  ;;  %v578_v11 = vadd.f32 %v1006_v28, %v950_v9 }
 0x125   :  { %v666_v12 = vadd.f32 %v1234_v55, %v578_v11  ;;  %v951_v13 = vpop.f32.mrb[24].mxu0  ;;  %v681_v15 = vmax.f32 %v665_v10, 0.0 }
 0x126   :  { %v952_v14 = vpop.f32.mrb[25].mxu0 }
 0x127   :  { %v682_v16 = vmax.f32 %v666_v12, 0.0  ;;  %v953_v17 = vadd.f32 %v952_v14, %v951_v13  ;;  %v954_v18 = vpop.f32.mrb[26].mxu0 }
 0x128   :  { %v955_v19 = vpop.f32.mrb[27].mxu0 }
 0x129   :  { %v880_v20 = vpack.c.bf16 %v682_v16, %v681_v15  ;;  %v956_v21 = vadd.f32 %v955_v19, %v954_v18  ;;  %v583_v22 = vadd.f32 %v953_v17, %v582_v41 }
 0x12b   :  { %896 = vst [vmem:[%s1279_s3 + $0x28] sm:$0xff] %v880_v20   ;;  %v667_v23 = vadd.f32 %v1234_v55, %v583_v22  ;;  %v586_v24 = vadd.f32 %v956_v21, %v585_v46 }
 0x12d   :  { %v668_v25 = vadd.f32 %v1234_v55, %v586_v24  ;;  %v957_v26 = vpop.f32.mrb[28].mxu0  ;;  %v683_v28 = vmax.f32 %v667_v23, 0.0 }
 0x12e   :  { %v958_v27 = vpop.f32.mrb[29].mxu0 }
 0x12f   :  { %v684_v29 = vmax.f32 %v668_v25, 0.0  ;;  %v959_v30 = vadd.f32 %v958_v27, %v957_v26  ;;  %v960_v31 = vpop.f32.mrb[30].mxu0 }
 0x130   :  { %v961_v32 = vpop.f32.mrb[31].mxu0 }
 0x131   :  { %v885_v33 = vpack.c.bf16 %v684_v29, %v683_v28  ;;  %v591_v34 = vadd.f32 %v1009_v39, %v959_v30  ;;  %v962_v35 = vadd.f32 %v961_v32, %v960_v31 }
 0x133   :  { %897 = vst [vmem:[%s1279_s3 + $0x30] sm:$0xff] %v885_v33   ;;  %v669_v36 = vadd.f32 %v1234_v55, %v591_v34  ;;  %v594_v37 = vadd.f32 %v1010_v45, %v962_v35 }
 0x135   :  { %v670_v38 = vadd.f32 %v1234_v55, %v594_v37  ;;  %v685_v40 = vmax.f32 %v669_v36, 0.0 }
 0x137   :  { %v686_v41 = vmax.f32 %v670_v38, 0.0 }
 0x139   :  { %v890_v42 = vpack.c.bf16 %v686_v41, %v685_v40 }
 0x13b   :  { %898 = vst [vmem:[%s1279_s3 + $0x38] sm:$0xff] %v890_v42  }

// kernel: _lambda_.22
= control target key start
LH: loop header
LB: loop body
LE: loop exit
PB: predicated region body
PF: predicated region fallthrough
CT: control target
= control target key end

     0   :  { %s1071_s12 = smov 0   ;;  %s1073_s13 = smov 0   ;;  %s1181_s0 = inlined_call_operand.vmem [shape: bf16[32,1152], index: 0, kind: input, shape index: {}]   ;;  %s1182_s1 = inlined_call_operand.vmem [shape: bf16[1152,128], index: 1, kind: input, shape index: {}]   ;;  %s1183_s2 = inlined_call_operand.vmem [shape: f32[1,128], index: 2, kind: input, shape index: {}]   ;;  %s1184_s3 = inlined_call_operand.vmem [shape: bf16[32,128], index: 3, kind: output, shape index: {}]  }
   0x1   :  { %s1075_s14 = smov 0   ;;  %s1077_s15 = smov 0  }
   0x2   :  { %s1079_s16 = smov 0  }
   0x3 LB: > { %s25_s17 = sadd.s32 1, %s1044_s15  ;;  %p48_p1 = scmp.ne.s32.totalorder %s1036_s13, %s1032_s12  ;;  %s1048_s16 = sphi %s1079_s16, %s13_s16   ;;  %s1044_s15 = sphi %s1077_s15, %s1188_s15   ;;  %s1040_s14 = sphi %s1075_s14, %s1187_s14   ;;  %s1036_s13 = sphi %s1073_s13, %s1186_s13   ;;  %s1032_s12 = sphi %s1071_s12, %s1185_s12  }
   0x4   : > { %p26_p0 = scmp.ge.s32.totalorder %s25_s17, 3  ;;  %p49_p2 = scmp.eq.s32.totalorder %s1048_s16, 0 }
   0x5   : > { %s41_s19 = sadd.s32 1, %s1036_s13  ;;  %p808_p5 = scmp.ge.s32.totalorder %s1048_s16, 3 }
   0x6   : > { %s1190_s17 = smov (%p26_p0, %s25_s17), 0  ;;  %p50_p3 = por %p49_p2, %p48_p1 }
   0x7   : > { %s37_s18 = ssub.s32 %s1044_s15, %s1190_s17  ;;  %162 = sbr.rel (%p808_p5) target bundleno = 23 (0x17), region = 20 }
   0x8   : > { %p39_p4 = scmp.eq.s32.totalorder %s37_s18, 0 }
   0xa   : > { %s1106_s20 = scalar_select %p39_p4, %s1036_s13, %s41_s19  }
   0xe   : > { %165 = sbr.rel (!%p50_p3) target bundleno = 23 (0x17), region = 24  ;;  %s167_s21 = sand.u32 (%p50_p3), 1, %s1036_s13  }
   0xf   : > { %s861_s22 = smul.u32 (%p50_p3), 12, %s1044_s15 }
  0x10   : > { %s935_s23 = smul.u32 (%p50_p3), 48, %s167_s21 }
  0x11   : > { %s175_s26 = scalar_lea.vmem (%p50_p3), %s1181_s0, %s861_s22 }
  0x12   : > { %v190_v0 = vld [vmem:[%s175_s26] sm:$0xff] (%p50_p3)  ;;  %v194_v2 = vld [vmem:[%s175_s26 + $0x48] sm:$0xff] (%p50_p3)  ;;  %s169_s27 = scalar_lea.vmem (%p50_p3), [#allocation3], %s935_s23  ;;  %v814_v6 = vld [vmem:[%s175_s26 + $0x50] sm:$0xf] (%p50_p3) }
  0x13   : > { %v192_v1 = vld [vmem:[%s175_s26 + $0x24] sm:$0xff] (%p50_p3)  ;;  %191 = vst [vmem:[%s169_s27] sm:$0xff] (%p50_p3), %v190_v0  ;;  %195 = vst [vmem:[%s169_s27 + $0x18] sm:$0xff] (%p50_p3), %v194_v2  ;;  %v196_v3 = vld [vmem:[%s175_s26 + $0x6c] sm:$0xff] (%p50_p3) }
  0x14   : > { %193 = vst [vmem:[%s169_s27 + $0xc] sm:$0xff] (%p50_p3), %v192_v1  ;;  %v810_v4 = vld [vmem:[%s175_s26 + $0x8] sm:$0xf] (%p50_p3)  ;;  %v812_v5 = vld [vmem:[%s175_s26 + $0x2c] sm:$0xf] (%p50_p3)  ;;  %197 = vst [vmem:[%s169_s27 + $0x24] sm:$0xff] (%p50_p3), %v196_v3 }
  0x15   : > { %811 = vst [vmem:[%s169_s27 + $0x8] sm:$0xf] %v810_v4  ;;  %813 = vst [vmem:[%s169_s27 + $0x14] sm:$0xf] %v812_v5  ;;  %v816_v7 = vld [vmem:[%s175_s26 + $0x74] sm:$0xf] }
  0x16   : > { %815 = vst [vmem:[%s169_s27 + $0x20] sm:$0xf] %v814_v6  ;;  %817 = vst [vmem:[%s169_s27 + $0x2c] sm:$0xf] %v816_v7 }
  0x17 PF: > { %p818_p6 = scmp.ge.s32.totalorder %s1048_s16, 1  ;;  %p229_p7 = scmp.lt.s32.totalorder %s1048_s16, 4 }
  0x19   : > { %p230_p8 = pnand %p818_p6, %p229_p7 }
  0x1a   : > { %s236_s28 = sand.u32 (!%p230_p8), 1, %s1032_s12   ;;  %s275_s29 = smul.u32 (!%p230_p8), 48, %s1040_s14 }
  0x1b   : > { %233 = sbr.rel (%p230_p8) target bundleno = 318 (0x13e), region = 54  ;;  %p820_p10 = scmp.ne.s32.totalorder (!%p230_p8), %s1040_s14, 0 }
  0x1c   : > { %s936_s30 = smul.u32 (!%p230_p8), 48, %s236_s28  ;;  %p276_p9 = scmp.lt.s32.totalorder (!%p230_p8), %s275_s29, 143 }
  0x1e   : > { %s1123_s8 = scalar_lea.vmem (!%p230_p8), [#allocation3], %s936_s30 }
  0x22   : > { %s1192_s29 = smov (!%p276_p9, %s275_s29), 143  ;;  %300 = sbr.rel (%p820_p10) target bundleno = 41 (0x29), region = 62 }
  0x23   : > { %s819_s4 = sshll.u32 %s1192_s29, 2  ;;  %v1050_v8 = vmov (!%p820_p10), 0.0  }
  0x24   : > { %s1121_s7 = scalar_lea.vmem %s1182_s1, %s819_s4  ;;  %301 = vst [vmem:[#allocation2] sm:$0xff] (!%p820_p10), %v1050_v8  ;;  %302 = vst [vmem:[#allocation2 + $0x8] sm:$0xff] (!%p820_p10), %v1050_v8 }
  0x25   : > { %303 = vst [vmem:[#allocation2 + $0x10] sm:$0xff] (!%p820_p10), %v1050_v8  ;;  %304 = vst [vmem:[#allocation2 + $0x18] sm:$0xff] (!%p820_p10), %v1050_v8 }
  0x29 PF: > { %v978_v9 = vld [vmem:[%s1121_s7 + $0x40] sm:$0xff]   ;;  %v981_v12 = vld [vmem:[%s1121_s7 + $0x48] sm:$0xff]   ;;  %v984_v15 = vld [vmem:[%s1121_s7 + $0x50] sm:$0xff]   ;;  %p851_p11 = scmp.ne.s32.totalorder %s1040_s14, 2 }
  0x2a   : > { %v979_v10 = vld [vmem:[%s1121_s7] sm:$0xff]   ;;  %877 = vmatprep.subr.bf16.mxu0 %v978_v9  ;;  %v982_v13 = vld [vmem:[%s1121_s7 + $0x8] sm:$0xff]   ;;  %v985_v16 = vld [vmem:[%s1121_s7 + $0x10] sm:$0xff]  }
  0x2b   : > { %v980_v11 = vld [vmem:[%s1121_s7 + $0x80] sm:$0xff]   ;;  %878 = vmatpush3.bf16.msra.mxu0 %v979_v10  ;;  %v983_v14 = vld [vmem:[%s1121_s7 + $0x88] sm:$0xff]   ;;  %v986_v17 = vld [vmem:[%s1121_s7 + $0x90] sm:$0xff]  }
  0x2c   : > { %915 = vmatprep.subr.bf16.mxu1 %v980_v11  ;;  %879 = vmatprep.subr.bf16.mxu0 %v981_v12  ;;  %v987_v18 = vld [vmem:[%s1121_s7 + $0x58] sm:$0xff]   ;;  %v990_v21 = vld [vmem:[%s1121_s7 + $0x60] sm:$0xff]   ;;  %v993_v24 = vld [vmem:[%s1121_s7 + $0x68] sm:$0xff]  }
  0x2d   : > { %916 = vmatpush3.bf16.msra.mxu1 %v980_v11  ;;  %v988_v19 = vld [vmem:[%s1121_s7 + $0x18] sm:$0xff]   ;;  %v992_v22 = vld [vmem:[%s1121_s7 + $0xa0] sm:$0xff]   ;;  %v995_v25 = vld [vmem:[%s1121_s7 + $0xa8] sm:$0xff]  }
  0x2e   : > { %917 = vmatprep.subr.bf16.mxu1 %v983_v14  ;;  %v989_v20 = vld [vmem:[%s1121_s7 + $0x98] sm:$0xff]   ;;  %v991_v23 = vld [vmem:[%s1121_s7 + $0x20] sm:$0xff]   ;;  %v994_v26 = vld [vmem:[%s1121_s7 + $0x28] sm:$0xff]  }
  0x2f   : > { %880 = vmatpush3.bf16.msra.mxu0 %v982_v13  ;;  %v996_v27 = vld [vmem:[%s1121_s7 + $0x70] sm:$0xff]   ;;  %v999_v30 = vld [vmem:[%s1121_s7 + $0x78] sm:$0xff]   ;;  %v305_v45 = vld [vmem:[#allocation2] sm:$0xff] }
  0x30   : > { %881 = vmatprep.subr.bf16.mxu0 %v984_v15  ;;  %v997_v28 = vld [vmem:[%s1121_s7 + $0x30] sm:$0xff]   ;;  %v1001_v31 = vld [vmem:[%s1121_s7 + $0xb8] sm:$0xff]   ;;  %v306_v50 = vld [vmem:[#allocation2 + $0x8] sm:$0xff] }
  0x31   : > { %918 = vmatpush3.bf16.msra.mxu1 %v983_v14  ;;  %v998_v29 = vld [vmem:[%s1121_s7 + $0xb0] sm:$0xff]   ;;  %v1000_v34 = vld [vmem:[%s1121_s7 + $0x38] sm:$0xff]   ;;  %v852_v5 = vld [vmem:[%s1183_s2] ss:$0 sm:$0xff] (!%p851_p11) }
  0x32   : > { %919 = vmatprep.subr.bf16.mxu1 %v986_v17  ;;  %v1004_v32 = vld [vmem:[%s1123_s8 + $0x4] ss:$12 sps:$4 sm:$0xff]   ;;  %v1005_v33 = vld [vmem:[%s1123_s8 + $0x8] ss:$12 sps:$4 sm:$0xff]   ;;  %v1002_v35 = vld [vmem:[%s1123_s8] ss:$12 sps:$4 sm:$0xff]  }
  0x33   : > { %882 = vmatpush3.bf16.msra.mxu0 %v985_v16  ;;  %573 = vmatprep.mubr.bf16.mxu0 %v1004_v32  ;;  %v1007_v36 = vld [vmem:[%s1123_s8 + $0x1c] ss:$12 sps:$4 sm:$0xff]   ;;  %v1006_v37 = vld [vmem:[%s1123_s8 + $0x20] ss:$12 sps:$4 sm:$0xff]   ;;  %v1009_v38 = vld [vmem:[%s1123_s8 + $0x18] ss:$12 sps:$4 sm:$0xff]  }
  0x34   : > { %883 = vmatprep.subr.bf16.mxu0 %v987_v18  ;;  %931 = vmatprep.mubr.bf16.mxu1 %v1005_v33  ;;  %v307_v59 = vld [vmem:[#allocation2 + $0x10] sm:$0xff]  ;;  %v308_v63 = vld [vmem:[#allocation2 + $0x18] sm:$0xff] }
  0x35   : > { %920 = vmatpush3.bf16.msra.mxu1 %v986_v17 }
  0x36   : > { %921 = vmatprep.subr.bf16.mxu1 %v989_v20 }
  0x37   : > { %884 = vmatpush3.bf16.msra.mxu0 %v988_v19 }
  0x38   : > { %885 = vmatprep.subr.bf16.mxu0 %v990_v21 }
  0x39   : > { %922 = vmatpush3.bf16.msra.mxu1 %v989_v20 }
  0x3a   : > { %923 = vmatprep.subr.bf16.mxu1 %v992_v22 }
  0x3b   : > { %886 = vmatpush3.bf16.msra.mxu0 %v991_v23 }
  0x3c   : > { %887 = vmatprep.subr.bf16.mxu0 %v993_v24 }
  0x3d   : > { %924 = vmatpush3.bf16.msra.mxu1 %v992_v22 }
  0x3e   : > { %925 = vmatprep.subr.bf16.mxu1 %v995_v25 }
  0x3f   : > { %888 = vmatpush3.bf16.msra.mxu0 %v994_v26 }
  0x40   : > { %889 = vmatprep.subr.bf16.mxu0 %v996_v27 }
  0x41   : > { %926 = vmatpush3.bf16.msra.mxu1 %v995_v25 }
  0x42   : > { %927 = vmatprep.subr.bf16.mxu1 %v998_v29 }
  0x43   : > { %890 = vmatpush3.bf16.msra.mxu0 %v997_v28 }
  0x44   : > { %891 = vmatprep.subr.bf16.mxu0 %v999_v30 }
  0x45   : > { %928 = vmatpush3.bf16.msra.mxu1 %v998_v29 }
  0x46   : > { %929 = vmatprep.subr.bf16.mxu1 %v1001_v31 }
  0x47   : > { %892 = vmatpush3.bf16.msra.mxu0 %v1000_v34 }
  0x49   : > { %930 = vmatpush3.bf16.msra.mxu1 %v1001_v31 }
  0x4a   : > { %574 = vmatmul.mubr.bf16.vlgmr.msra.gmra.mrb[0].mxu0 %v1002_v35 }
  0x4b   : > { %581 = vmatprep.mubr.bf16.mxu0 %v1007_v36 }
  0x4c   : > { %932 = vmatmul.mubr.bf16.vlgmr.msra.gmra.mrb[0].mxu1 %v1006_v37 }
  0x52   : > { %582 = vmatmul.mubr.bf16.gmra.mrb[4].mxu0 %v1009_v38 }
 0x11d   : > { %v893_v39 = vpop.f32.mrb[0].mxu0 }
 0x11e   : > { %v894_v40 = vpop.f32.mrb[1].mxu0 }
 0x11f   : > { %v895_v41 = vadd.f32 %v894_v40, %v893_v39  ;;  %v896_v42 = vpop.f32.mrb[2].mxu0  ;;  %v933_v43 = vpop.f32.mrb[0].mxu1 }
 0x120   : > { %v897_v44 = vpop.f32.mrb[3].mxu0  ;;  %v624_v46 = vpop.f32.mrb[1].mxu1 }
 0x121   : > { %v898_v47 = vadd.f32 %v897_v44, %v896_v42  ;;  %v625_v48 = vadd.f32 %v895_v41, %v624_v46  ;;  %v934_v49 = vpop.f32.mrb[2].mxu1 }
 0x122   : > { %v627_v51 = vpop.f32.mrb[3].mxu1 }
 0x123   : > { %v639_v52 = vadd.f32 %v625_v48, %v305_v45  ;;  %v628_v53 = vadd.f32 %v898_v47, %v627_v51 }
 0x125   : > { %643 = vst [vmem:[#allocation2] sm:$0xff] %v639_v52  ;;  %v640_v54 = vadd.f32 %v628_v53, %v306_v50  ;;  %v899_v55 = vpop.f32.mrb[4].mxu0 }
 0x126   : > { %v900_v56 = vpop.f32.mrb[5].mxu0 }
 0x127   : > { %644 = vst [vmem:[#allocation2 + $0x8] sm:$0xff] %v640_v54  ;;  %v901_v57 = vadd.f32 %v900_v56, %v899_v55  ;;  %v902_v58 = vpop.f32.mrb[6].mxu0 }
 0x128   : > { %v903_v60 = vpop.f32.mrb[7].mxu0 }
 0x129   : > { %v633_v61 = vadd.f32 %v933_v43, %v901_v57  ;;  %v904_v62 = vadd.f32 %v903_v60, %v902_v58  ;;  %650 = sbr.rel (%p851_p11) target bundleno = 318 (0x13e), region = 66 }
 0x12b   : > { %v641_v0 = vadd.f32 %v633_v61, %v307_v59  ;;  %v636_v1 = vadd.f32 %v934_v49, %v904_v62 }
 0x12c   : > { %v651_v3 = vld [vmem:[#allocation2] sm:$0xff] (!%p851_p11) }
 0x12d   : > { %645 = vst [vmem:[#allocation2 + $0x10] sm:$0xff] %v641_v0  ;;  %v642_v2 = vadd.f32 %v636_v1, %v308_v63  ;;  %v662_v6 = vadd.f32 (!%p851_p11), %v852_v5, %v651_v3 }
 0x12e   : > { %v652_v4 = vld [vmem:[#allocation2 + $0x8] sm:$0xff] (!%p851_p11) }
 0x12f   : > { %646 = vst [vmem:[#allocation2 + $0x18] sm:$0xff] %v642_v2  ;;  %v663_v7 = vadd.f32 (!%p851_p11), %v852_v5, %v652_v4  ;;  %v666_v12 = vmax.f32 (!%p851_p11), %v662_v6, 0.0 }
 0x131   : > { %v667_v13 = vmax.f32 %v663_v7, 0.0 }
 0x133   : > { %v869_v16 = vpack.c.bf16 %v667_v13, %v666_v12 }
 0x134   : > { %v653_v8 = vld [vmem:[#allocation2 + $0x10] sm:$0xff] }
 0x135   : > { %v664_v10 = vadd.f32 %v852_v5, %v653_v8  ;;  %870 = vst [vmem:[%s1184_s3] sm:$0xff] %v869_v16  }
 0x136   : > { %v654_v9 = vld [vmem:[#allocation2 + $0x18] sm:$0xff] }
 0x137   : > { %v665_v11 = vadd.f32 %v852_v5, %v654_v9  ;;  %v668_v14 = vmax.f32 %v664_v10, 0.0 }
 0x139   : > { %v669_v15 = vmax.f32 %v665_v11, 0.0 }
 0x13b   : > { %v874_v17 = vpack.c.bf16 %v669_v15, %v668_v14 }
 0x13d   : > { %876 = vst [vmem:[%s1184_s3 + $0x8] sm:$0xff] %v874_v17  }
 0x13e PF: > { %s13_s16 = sadd.s32 1, %s1048_s16   ;;  %s1185_s12 = smov %s1036_s13 }
 0x13f   : > { %p10_p12 = scmp.ge.s32.totalorder %s13_s16, 5   ;;  %s1186_s13 = smov %s1106_s20 }
 0x140   : > { %s1187_s14 = smov %s1044_s15  ;;  %s1188_s15 = smov %s1190_s17 }
 0x141   :  { %12 = sbr.rel (!%p10_p12) target bundleno = 3 (0x3), region = 113 }

// kernel: _lambda_.23
= control target key start
LH: loop header
LB: loop body
LE: loop exit
PB: predicated region body
PF: predicated region fallthrough
CT: control target
= control target key end

     0   :  { %s1176_s15 = smov 0   ;;  %s1178_s16 = smov 0   ;;  %s1292_s0 = inlined_call_operand.vmem [shape: bf16[32,1152], index: 0, kind: input, shape index: {}]   ;;  %s1293_s1 = inlined_call_operand.vmem [shape: bf16[1152,128], index: 1, kind: input, shape index: {}]   ;;  %s1294_s2 = inlined_call_operand.vmem [shape: f32[1,128], index: 2, kind: input, shape index: {}]   ;;  %s1295_s3 = inlined_call_operand.vmem [shape: bf16[32,128], index: 3, kind: input, shape index: {}]   ;;  %s1296_s4 = inlined_call_operand.vmem [shape: bf16[32,128], index: 4, kind: output, shape index: {}]  }
   0x1   :  { %s1180_s17 = smov 0   ;;  %s1182_s18 = smov 0  }
   0x2   :  { %s1184_s19 = smov 0  }
   0x3 LB: > { %s26_s20 = sadd.s32 1, %s1144_s18  ;;  %p49_p1 = scmp.ne.s32.totalorder %s1136_s16, %s1132_s15  ;;  %s1148_s19 = sphi %s1184_s19, %s14_s19   ;;  %s1144_s18 = sphi %s1182_s18, %s1300_s18   ;;  %s1140_s17 = sphi %s1180_s17, %s1299_s17   ;;  %s1136_s16 = sphi %s1178_s16, %s1298_s16   ;;  %s1132_s15 = sphi %s1176_s15, %s1297_s15  }
   0x4   : > { %p27_p0 = scmp.ge.s32.totalorder %s26_s20, 3  ;;  %p50_p2 = scmp.eq.s32.totalorder %s1148_s19, 0 }
   0x5   : > { %s42_s22 = sadd.s32 1, %s1136_s16  ;;  %p899_p5 = scmp.ge.s32.totalorder %s1148_s19, 3 }
   0x6   : > { %s1302_s20 = smov (%p27_p0, %s26_s20), 0  ;;  %p51_p3 = por %p50_p2, %p49_p1 }
   0x7   : > { %s38_s21 = ssub.s32 %s1144_s18, %s1302_s20  ;;  %203 = sbr.rel (%p899_p5) target bundleno = 23 (0x17), region = 24 }
   0x8   : > { %p40_p4 = scmp.eq.s32.totalorder %s38_s21, 0 }
   0xa   : > { %s1211_s23 = scalar_select %p40_p4, %s1136_s16, %s42_s22  }
   0xe   : > { %206 = sbr.rel (!%p51_p3) target bundleno = 23 (0x17), region = 28  ;;  %s208_s24 = sand.u32 (%p51_p3), 1, %s1136_s16  }
   0xf   : > { %s952_s25 = smul.u32 (%p51_p3), 12, %s1144_s18 }
  0x10   : > { %s1035_s26 = smul.u32 (%p51_p3), 48, %s208_s24 }
  0x11   : > { %s216_s29 = scalar_lea.vmem (%p51_p3), %s1292_s0, %s952_s25 }
  0x12   : > { %v231_v0 = vld [vmem:[%s216_s29] sm:$0xff] (%p51_p3)  ;;  %v235_v2 = vld [vmem:[%s216_s29 + $0x48] sm:$0xff] (%p51_p3)  ;;  %s210_s30 = scalar_lea.vmem (%p51_p3), [#allocation3], %s1035_s26  ;;  %v905_v6 = vld [vmem:[%s216_s29 + $0x50] sm:$0xf] (%p51_p3) }
  0x13   : > { %v233_v1 = vld [vmem:[%s216_s29 + $0x24] sm:$0xff] (%p51_p3)  ;;  %232 = vst [vmem:[%s210_s30] sm:$0xff] (%p51_p3), %v231_v0  ;;  %236 = vst [vmem:[%s210_s30 + $0x18] sm:$0xff] (%p51_p3), %v235_v2  ;;  %v237_v3 = vld [vmem:[%s216_s29 + $0x6c] sm:$0xff] (%p51_p3) }
  0x14   : > { %234 = vst [vmem:[%s210_s30 + $0xc] sm:$0xff] (%p51_p3), %v233_v1  ;;  %v901_v4 = vld [vmem:[%s216_s29 + $0x8] sm:$0xf] (%p51_p3)  ;;  %v903_v5 = vld [vmem:[%s216_s29 + $0x2c] sm:$0xf] (%p51_p3)  ;;  %238 = vst [vmem:[%s210_s30 + $0x24] sm:$0xff] (%p51_p3), %v237_v3 }
  0x15   : > { %902 = vst [vmem:[%s210_s30 + $0x8] sm:$0xf] %v901_v4  ;;  %904 = vst [vmem:[%s210_s30 + $0x14] sm:$0xf] %v903_v5  ;;  %v907_v7 = vld [vmem:[%s216_s29 + $0x74] sm:$0xf] }
  0x16   : > { %906 = vst [vmem:[%s210_s30 + $0x20] sm:$0xf] %v905_v6  ;;  %908 = vst [vmem:[%s210_s30 + $0x2c] sm:$0xf] %v907_v7 }
  0x17 PF: > { %p909_p6 = scmp.ge.s32.totalorder %s1148_s19, 1  ;;  %p270_p7 = scmp.lt.s32.totalorder %s1148_s19, 4 }
  0x19   : > { %p271_p8 = pnand %p909_p6, %p270_p7 }
  0x1a   : > { %s277_s5 = sand.u32 (!%p271_p8), 1, %s1132_s15   ;;  %s326_s6 = smul.u32 (!%p271_p8), 48, %s1140_s17 }
  0x1b   : > { %274 = sbr.rel (%p271_p8) target bundleno = 320 (0x140), region = 58  ;;  %p911_p10 = scmp.ne.s32.totalorder (!%p271_p8), %s1140_s17, 0 }
  0x1c   : > { %s1036_s7 = smul.u32 (!%p271_p8), 48, %s277_s5  ;;  %p327_p9 = scmp.lt.s32.totalorder (!%p271_p8), %s326_s6, 143 }
  0x1e   : > { %s1228_s12 = scalar_lea.vmem (!%p271_p8), [#allocation3], %s1036_s7 }
  0x22   : > { %s1304_s6 = smov (!%p327_p9, %s326_s6), 143  ;;  %360 = sbr.rel (%p911_p10) target bundleno = 41 (0x29), region = 66 }
  0x23   : > { %s910_s8 = sshll.u32 %s1304_s6, 2  ;;  %v1150_v8 = vmov (!%p911_p10), 0.0  }
  0x24   : > { %s1226_s11 = scalar_lea.vmem %s1293_s1, %s910_s8  ;;  %361 = vst [vmem:[#allocation2] sm:$0xff] (!%p911_p10), %v1150_v8  ;;  %362 = vst [vmem:[#allocation2 + $0x8] sm:$0xff] (!%p911_p10), %v1150_v8 }
  0x25   : > { %363 = vst [vmem:[#allocation2 + $0x10] sm:$0xff] (!%p911_p10), %v1150_v8  ;;  %364 = vst [vmem:[#allocation2 + $0x18] sm:$0xff] (!%p911_p10), %v1150_v8 }
  0x29 PF: > { %v1078_v9 = vld [vmem:[%s1226_s11 + $0x40] sm:$0xff]   ;;  %v1081_v12 = vld [vmem:[%s1226_s11 + $0x48] sm:$0xff]   ;;  %v1084_v15 = vld [vmem:[%s1226_s11 + $0x50] sm:$0xff]   ;;  %p942_p11 = scmp.ne.s32.totalorder %s1140_s17, 2 }
  0x2a   : > { %v1079_v10 = vld [vmem:[%s1226_s11] sm:$0xff]   ;;  %977 = vmatprep.subr.bf16.mxu0 %v1078_v9  ;;  %v1082_v13 = vld [vmem:[%s1226_s11 + $0x8] sm:$0xff]   ;;  %v1085_v16 = vld [vmem:[%s1226_s11 + $0x10] sm:$0xff]  }
  0x2b   : > { %v1080_v11 = vld [vmem:[%s1226_s11 + $0x80] sm:$0xff]   ;;  %978 = vmatpush3.bf16.msra.mxu0 %v1079_v10  ;;  %v1083_v14 = vld [vmem:[%s1226_s11 + $0x88] sm:$0xff]   ;;  %v1086_v17 = vld [vmem:[%s1226_s11 + $0x90] sm:$0xff]  }
  0x2c   : > { %1015 = vmatprep.subr.bf16.mxu1 %v1080_v11  ;;  %979 = vmatprep.subr.bf16.mxu0 %v1081_v12  ;;  %v1087_v18 = vld [vmem:[%s1226_s11 + $0x58] sm:$0xff]   ;;  %v1090_v21 = vld [vmem:[%s1226_s11 + $0x60] sm:$0xff]   ;;  %v1093_v24 = vld [vmem:[%s1226_s11 + $0x68] sm:$0xff]  }
  0x2d   : > { %1016 = vmatpush3.bf16.msra.mxu1 %v1080_v11  ;;  %v1088_v19 = vld [vmem:[%s1226_s11 + $0x18] sm:$0xff]   ;;  %v1092_v22 = vld [vmem:[%s1226_s11 + $0xa0] sm:$0xff]   ;;  %v1095_v25 = vld [vmem:[%s1226_s11 + $0xa8] sm:$0xff]  }
  0x2e   : > { %1017 = vmatprep.subr.bf16.mxu1 %v1083_v14  ;;  %v1089_v20 = vld [vmem:[%s1226_s11 + $0x98] sm:$0xff]   ;;  %v1091_v23 = vld [vmem:[%s1226_s11 + $0x20] sm:$0xff]   ;;  %v1094_v26 = vld [vmem:[%s1226_s11 + $0x28] sm:$0xff]  }
  0x2f   : > { %980 = vmatpush3.bf16.msra.mxu0 %v1082_v13  ;;  %v1096_v27 = vld [vmem:[%s1226_s11 + $0x70] sm:$0xff]   ;;  %v1099_v30 = vld [vmem:[%s1226_s11 + $0x78] sm:$0xff]   ;;  %v365_v45 = vld [vmem:[#allocation2] sm:$0xff] }
  0x30   : > { %981 = vmatprep.subr.bf16.mxu0 %v1084_v15  ;;  %v1097_v28 = vld [vmem:[%s1226_s11 + $0x30] sm:$0xff]   ;;  %v1101_v31 = vld [vmem:[%s1226_s11 + $0xb8] sm:$0xff]   ;;  %v366_v50 = vld [vmem:[#allocation2 + $0x8] sm:$0xff] }
  0x31   : > { %1018 = vmatpush3.bf16.msra.mxu1 %v1083_v14  ;;  %v1098_v29 = vld [vmem:[%s1226_s11 + $0xb0] sm:$0xff]   ;;  %v1100_v34 = vld [vmem:[%s1226_s11 + $0x38] sm:$0xff]   ;;  %v943_v5 = vld [vmem:[%s1294_s2] ss:$0 sm:$0xff] (!%p942_p11) }
  0x32   : > { %1019 = vmatprep.subr.bf16.mxu1 %v1086_v17  ;;  %v1104_v32 = vld [vmem:[%s1228_s12 + $0x4] ss:$12 sps:$4 sm:$0xff]   ;;  %v1105_v33 = vld [vmem:[%s1228_s12 + $0x8] ss:$12 sps:$4 sm:$0xff]   ;;  %v1102_v35 = vld [vmem:[%s1228_s12] ss:$12 sps:$4 sm:$0xff]  }
  0x33   : > { %982 = vmatpush3.bf16.msra.mxu0 %v1085_v16  ;;  %633 = vmatprep.mubr.bf16.mxu0 %v1104_v32  ;;  %v1107_v36 = vld [vmem:[%s1228_s12 + $0x1c] ss:$12 sps:$4 sm:$0xff]   ;;  %v1106_v37 = vld [vmem:[%s1228_s12 + $0x20] ss:$12 sps:$4 sm:$0xff]   ;;  %v1109_v38 = vld [vmem:[%s1228_s12 + $0x18] ss:$12 sps:$4 sm:$0xff]  }
  0x34   : > { %983 = vmatprep.subr.bf16.mxu0 %v1087_v18  ;;  %1031 = vmatprep.mubr.bf16.mxu1 %v1105_v33  ;;  %v367_v59 = vld [vmem:[#allocation2 + $0x10] sm:$0xff]  ;;  %v368_v63 = vld [vmem:[#allocation2 + $0x18] sm:$0xff]  ;;  %v958_v8 = vld [vmem:[%s1295_s3] sm:$0xff] (!%p942_p11)  }
  0x35   : > { %1020 = vmatpush3.bf16.msra.mxu1 %v1086_v17  ;;  %v959_v11 = vunpack.c.l.bf16 (!%p942_p11), %v958_v8  ;;  %v960_v12 = vunpack.c.h.bf16 (!%p942_p11), %v958_v8  ;;  %v975_v15 = vld [vmem:[%s1295_s3 + $0x8] sm:$0xff] (!%p942_p11)  }
  0x36   : > { %1021 = vmatprep.subr.bf16.mxu1 %v1089_v20  ;;  %v963_v16 = vunpack.c.l.bf16 (!%p942_p11), %v975_v15  ;;  %v964_v17 = vunpack.c.h.bf16 (!%p942_p11), %v975_v15 }
  0x37   : > { %984 = vmatpush3.bf16.msra.mxu0 %v1088_v19 }
  0x38   : > { %985 = vmatprep.subr.bf16.mxu0 %v1090_v21 }
  0x39   : > { %1022 = vmatpush3.bf16.msra.mxu1 %v1089_v20 }
  0x3a   : > { %1023 = vmatprep.subr.bf16.mxu1 %v1092_v22 }
  0x3b   : > { %986 = vmatpush3.bf16.msra.mxu0 %v1091_v23 }
  0x3c   : > { %987 = vmatprep.subr.bf16.mxu0 %v1093_v24 }
  0x3d   : > { %1024 = vmatpush3.bf16.msra.mxu1 %v1092_v22 }
  0x3e   : > { %1025 = vmatprep.subr.bf16.mxu1 %v1095_v25 }
  0x3f   : > { %988 = vmatpush3.bf16.msra.mxu0 %v1094_v26 }
  0x40   : > { %989 = vmatprep.subr.bf16.mxu0 %v1096_v27 }
  0x41   : > { %1026 = vmatpush3.bf16.msra.mxu1 %v1095_v25 }
  0x42   : > { %1027 = vmatprep.subr.bf16.mxu1 %v1098_v29 }
  0x43   : > { %990 = vmatpush3.bf16.msra.mxu0 %v1097_v28 }
  0x44   : > { %991 = vmatprep.subr.bf16.mxu0 %v1099_v30 }
  0x45   : > { %1028 = vmatpush3.bf16.msra.mxu1 %v1098_v29 }
  0x46   : > { %1029 = vmatprep.subr.bf16.mxu1 %v1101_v31 }
  0x47   : > { %992 = vmatpush3.bf16.msra.mxu0 %v1100_v34 }
  0x49   : > { %1030 = vmatpush3.bf16.msra.mxu1 %v1101_v31 }
  0x4a   : > { %634 = vmatmul.mubr.bf16.vlgmr.msra.gmra.mrb[0].mxu0 %v1102_v35 }
  0x4b   : > { %641 = vmatprep.mubr.bf16.mxu0 %v1107_v36 }
  0x4c   : > { %1032 = vmatmul.mubr.bf16.vlgmr.msra.gmra.mrb[0].mxu1 %v1106_v37 }
  0x52   : > { %642 = vmatmul.mubr.bf16.gmra.mrb[4].mxu0 %v1109_v38 }
 0x11d   : > { %v993_v39 = vpop.f32.mrb[0].mxu0 }
 0x11e   : > { %v994_v40 = vpop.f32.mrb[1].mxu0 }
 0x11f   : > { %v995_v41 = vadd.f32 %v994_v40, %v993_v39  ;;  %v996_v42 = vpop.f32.mrb[2].mxu0  ;;  %v1033_v43 = vpop.f32.mrb[0].mxu1 }
 0x120   : > { %v997_v44 = vpop.f32.mrb[3].mxu0  ;;  %v684_v46 = vpop.f32.mrb[1].mxu1 }
 0x121   : > { %v998_v47 = vadd.f32 %v997_v44, %v996_v42  ;;  %v685_v48 = vadd.f32 %v995_v41, %v684_v46  ;;  %v1034_v49 = vpop.f32.mrb[2].mxu1 }
 0x122   : > { %v687_v51 = vpop.f32.mrb[3].mxu1 }
 0x123   : > { %v699_v52 = vadd.f32 %v685_v48, %v365_v45  ;;  %v688_v53 = vadd.f32 %v998_v47, %v687_v51 }
 0x125   : > { %703 = vst [vmem:[#allocation2] sm:$0xff] %v699_v52  ;;  %v700_v54 = vadd.f32 %v688_v53, %v366_v50  ;;  %v999_v55 = vpop.f32.mrb[4].mxu0 }
 0x126   : > { %v1000_v56 = vpop.f32.mrb[5].mxu0 }
 0x127   : > { %704 = vst [vmem:[#allocation2 + $0x8] sm:$0xff] %v700_v54  ;;  %v1001_v57 = vadd.f32 %v1000_v56, %v999_v55  ;;  %v1002_v58 = vpop.f32.mrb[6].mxu0 }
 0x128   : > { %v1003_v60 = vpop.f32.mrb[7].mxu0 }
 0x129   : > { %v693_v61 = vadd.f32 %v1033_v43, %v1001_v57  ;;  %v1004_v62 = vadd.f32 %v1003_v60, %v1002_v58  ;;  %710 = sbr.rel (%p942_p11) target bundleno = 320 (0x140), region = 70 }
 0x12b   : > { %v701_v0 = vadd.f32 %v693_v61, %v367_v59  ;;  %v696_v1 = vadd.f32 %v1034_v49, %v1004_v62 }
 0x12c   : > { %v711_v3 = vld [vmem:[#allocation2] sm:$0xff] (!%p942_p11) }
 0x12d   : > { %705 = vst [vmem:[#allocation2 + $0x10] sm:$0xff] %v701_v0  ;;  %v702_v2 = vadd.f32 %v696_v1, %v368_v63  ;;  %v722_v6 = vadd.f32 (!%p942_p11), %v943_v5, %v711_v3 }
 0x12e   : > { %v712_v4 = vld [vmem:[#allocation2 + $0x8] sm:$0xff] (!%p942_p11) }
 0x12f   : > { %706 = vst [vmem:[#allocation2 + $0x18] sm:$0xff] %v702_v2  ;;  %v723_v7 = vadd.f32 (!%p942_p11), %v943_v5, %v712_v4  ;;  %v734_v18 = vadd.f32 (!%p942_p11), %v959_v11, %v722_v6 }
 0x131   : > { %v735_v19 = vadd.f32 %v960_v12, %v723_v7  ;;  %v738_v22 = vmax.f32 %v734_v18, 0.0 }
 0x133   : > { %v739_v23 = vmax.f32 %v735_v19, 0.0 }
 0x134   : > { %v713_v9 = vld [vmem:[#allocation2 + $0x10] sm:$0xff] }
 0x135   : > { %v724_v13 = vadd.f32 %v943_v5, %v713_v9  ;;  %v968_v26 = vpack.c.bf16 %v739_v23, %v738_v22 }
 0x136   : > { %v714_v10 = vld [vmem:[#allocation2 + $0x18] sm:$0xff] }
 0x137   : > { %v725_v14 = vadd.f32 %v943_v5, %v714_v10  ;;  %v736_v20 = vadd.f32 %v963_v16, %v724_v13  ;;  %969 = vst [vmem:[%s1296_s4] sm:$0xff] %v968_v26  }
 0x139   : > { %v737_v21 = vadd.f32 %v964_v17, %v725_v14  ;;  %v740_v24 = vmax.f32 %v736_v20, 0.0 }
 0x13b   : > { %v741_v25 = vmax.f32 %v737_v21, 0.0 }
 0x13d   : > { %v973_v27 = vpack.c.bf16 %v741_v25, %v740_v24 }
 0x13f   : > { %976 = vst [vmem:[%s1296_s4 + $0x8] sm:$0xff] %v973_v27  }
 0x140 PF: > { %s14_s19 = sadd.s32 1, %s1148_s19   ;;  %s1297_s15 = smov %s1136_s16 }
 0x141   : > { %p11_p12 = scmp.ge.s32.totalorder %s14_s19, 5   ;;  %s1298_s16 = smov %s1211_s23 }
 0x142   : > { %s1299_s17 = smov %s1144_s18  ;;  %s1300_s18 = smov %s1302_s20 }
 0x143   :  { %13 = sbr.rel (!%p11_p12) target bundleno = 3 (0x3), region = 120 }

// kernel: _lambda_.27
= control target key start
LH: loop header
LB: loop body
LE: loop exit
PB: predicated region body
PF: predicated region fallthrough
CT: control target
= control target key end

     0   :  { %v194_v0 = vmov 0.0   ;;  %vm195_vm0 = vmmov 0   ;;  %s249_s1 = inlined_call_operand.vmem [shape: bf16[128,128], index: 1, kind: input, shape index: {}]   ;;  %s250_s0 = inlined_call_operand.vmem [shape: bf16[8,128], index: 0, kind: input, shape index: {}]   ;;  %s251_s2 = inlined_call_operand.vmem [shape: f32[1,128], index: 2, kind: input, shape index: {}]   ;;  %s252_s3 = inlined_call_operand.vmem [shape: bf16[8,128], index: 3, kind: output, shape index: {}]  }
   0x1   :  { %164 = vmatprep.subr.bf16.mxu0 %v194_v0  ;;  %v186_v1 = vld [vmem:[%s249_s1] sm:$0xff]   ;;  %180 = vmatprep.mubr.msk.bf16.mxu0 %vm195_vm0, %v194_v0  ;;  %v187_v2 = vld [vmem:[%s249_s1 + $0x8] sm:$0xff]   ;;  %v188_v3 = vld [vmem:[%s249_s1 + $0x10] sm:$0xff]  }
   0x2   :  { %165 = vmatpush3.bf16.msra.mxu0 %v186_v1  ;;  %v189_v4 = vld [vmem:[%s249_s1 + $0x18] sm:$0xff]   ;;  %v190_v5 = vld [vmem:[%s249_s1 + $0x20] sm:$0xff]   ;;  %v191_v6 = vld [vmem:[%s249_s1 + $0x28] sm:$0xff]  }
   0x3   :  { %166 = vmatprep.subr.bf16.mxu0 %v194_v0  ;;  %v192_v7 = vld [vmem:[%s249_s1 + $0x30] sm:$0xff]   ;;  %v193_v8 = vld [vmem:[%s249_s1 + $0x38] sm:$0xff]   ;;  %v21_v9 = vld [vmem:[%s250_s0] sm:$0xf] }
   0x4   :  { %v154_v10 = vld [vmem:[%s251_s2] ss:$0 sm:$0xff] }
   0x6   :  { %167 = vmatpush3.bf16.msra.mxu0 %v187_v2 }
   0x7   :  { %168 = vmatprep.subr.bf16.mxu0 %v194_v0 }
   0xa   :  { %169 = vmatpush3.bf16.msra.mxu0 %v188_v3 }
   0xb   :  { %170 = vmatprep.subr.bf16.mxu0 %v194_v0 }
   0xe   :  { %171 = vmatpush3.bf16.msra.mxu0 %v189_v4 }
   0xf   :  { %172 = vmatprep.subr.bf16.mxu0 %v194_v0 }
  0x12   :  { %173 = vmatpush3.bf16.msra.mxu0 %v190_v5 }
  0x13   :  { %174 = vmatprep.subr.bf16.mxu0 %v194_v0 }
  0x16   :  { %175 = vmatpush3.bf16.msra.mxu0 %v191_v6 }
  0x17   :  { %176 = vmatprep.subr.bf16.mxu0 %v194_v0 }
  0x1a   :  { %177 = vmatpush3.bf16.msra.mxu0 %v192_v7 }
  0x1b   :  { %178 = vmatprep.subr.bf16.mxu0 %v194_v0 }
  0x1e   :  { %179 = vmatpush3.bf16.msra.mxu0 %v193_v8 }
  0x21   :  { %181 = vmatmul.mubr.bf16.vlgmr.msra.gmra.mrb[0].mxu0 %v21_v9 }
  0xf4   :  { %v120_v11 = vpop.f32.mrb[0].mxu0 }
  0xf5   :  { %v139_v12 = vadd.f32 %v154_v10, %v120_v11  ;;  %v182_v13 = vpop.f32.mrb[1].mxu0 }
  0xf6   :  { %v123_v14 = vpop.f32.mrb[2].mxu0 }
  0xf7   :  { %v140_v15 = vpack.c.bf16 %v139_v12, %v139_v12  ;;  %v183_v16 = vpop.f32.mrb[3].mxu0 }
  0xf9   :  { %141 = vst [vmem:[%s252_s3] sm:$0xf] %v140_v15 }

// kernel: _lambda_.26
= control target key start
LH: loop header
LB: loop body
LE: loop exit
PB: predicated region body
PF: predicated region fallthrough
CT: control target
= control target key end

     0   :  { %s866_s12 = smov 0   ;;  %s868_s13 = smov 0   ;;  %s941_s0 = inlined_call_operand.vmem [shape: bf16[8,1152], index: 0, kind: input, shape index: {}]   ;;  %s942_s1 = inlined_call_operand.vmem [shape: bf16[1152,128], index: 1, kind: input, shape index: {}]   ;;  %s943_s2 = inlined_call_operand.vmem [shape: f32[1,128], index: 2, kind: input, shape index: {}]   ;;  %s944_s3 = inlined_call_operand.vmem [shape: bf16[8,128], index: 3, kind: output, shape index: {}]  }
   0x1   :  { %s870_s14 = smov 0  }
   0x2 LB: > { %s25_s15 = sadd.s32 1, %s837_s13  ;;  %p678_p0 = scmp.ge.s32.totalorder %s841_s14, 1  ;;  %s841_s14 = sphi %s870_s14, %s13_s14   ;;  %s837_s13 = sphi %s868_s13, %s946_s13   ;;  %s833_s12 = sphi %s866_s12, %s945_s12  }
   0x3   : > { %p26_p1 = scmp.ge.s32.totalorder %s25_s15, 3  ;;  %p189_p2 = scmp.lt.s32.totalorder %s841_s14, 4 }
   0x5   : > { %s948_s15 = smov (%p26_p1, %s25_s15), 0  ;;  %p190_p3 = pnand %p678_p0, %p189_p2 }
   0x6   : > { %s230_s16 = smul.u32 (!%p190_p3), 3, %s833_s12  ;;  %p681_p6 = scmp.ne.s32.totalorder (!%p190_p3), %s833_s12, 0 }
   0x7   : > { %193 = sbr.rel (%p190_p3) target bundleno = 291 (0x123), region = 32 }
   0x8   : > { %s240_s17 = smul.u32 (!%p190_p3), 48, %s833_s12  ;;  %p233_p4 = scmp.lt.s32.totalorder (!%p190_p3), %s230_s16, 8 }
   0xa   : > { %p241_p5 = scmp.lt.s32.totalorder (!%p190_p3), %s240_s17, 143 }
   0xe   : > { %s950_s16 = smov (!%p233_p4, %s230_s16), 8  ;;  %s952_s17 = smov (!%p241_p5, %s240_s17), 143 }
   0xf   : > { %s679_s18 = sshll.u32 %s950_s16, 2  ;;  %s680_s22 = sshll.u32 %s952_s17, 2  ;;  %v843_v0 = vmov (!%p681_p6), 0.0  }
  0x10   : > { %s891_s21 = scalar_lea.vmem %s941_s0, %s679_s18  ;;  %s896_s25 = scalar_lea.vmem %s942_s1, %s680_s22  ;;  %264 = vst [vmem:[#allocation2] sm:$0xff] (!%p681_p6), %v843_v0 }
  0x11   : > { %263 = sbr.rel (%p681_p6) target bundleno = 24 (0x18), region = 36 }
  0x18 PF: > { %v792_v1 = vld [vmem:[%s896_s25 + $0x40] sm:$0xff]   ;;  %v844_v2 = vmov 0.0   ;;  %vm845_vm0 = vmmov 0   ;;  %v795_v5 = vld [vmem:[%s896_s25 + $0x48] sm:$0xff]   ;;  %v798_v8 = vld [vmem:[%s896_s25 + $0x50] sm:$0xff]   ;;  %p709_p7 = scmp.ne.s32.totalorder %s833_s12, 2 }
  0x19   : > { %745 = vmatprep.subr.bf16.mxu1 %v844_v2  ;;  %v793_v3 = vld [vmem:[%s896_s25] sm:$0xff]   ;;  %714 = vmatprep.subr.bf16.mxu0 %v792_v1  ;;  %v796_v6 = vld [vmem:[%s896_s25 + $0x8] sm:$0xff]   ;;  %v799_v9 = vld [vmem:[%s896_s25 + $0x10] sm:$0xff]  }
  0x1a   : > { %v794_v4 = vld [vmem:[%s896_s25 + $0x80] sm:$0xff]   ;;  %761 = vmatprep.mubr.msk.bf16.mxu1 %vm845_vm0, %v844_v2  ;;  %715 = vmatpush3.bf16.msra.mxu0 %v793_v3  ;;  %v797_v7 = vld [vmem:[%s896_s25 + $0x88] sm:$0xff]   ;;  %v800_v10 = vld [vmem:[%s896_s25 + $0x90] sm:$0xff]  }
  0x1b   : > { %746 = vmatpush3.bf16.msra.mxu1 %v794_v4  ;;  %716 = vmatprep.subr.bf16.mxu0 %v795_v5  ;;  %v801_v11 = vld [vmem:[%s896_s25 + $0x58] sm:$0xff]   ;;  %v804_v14 = vld [vmem:[%s896_s25 + $0x60] sm:$0xff]   ;;  %v807_v17 = vld [vmem:[%s896_s25 + $0x68] sm:$0xff]  }
  0x1c   : > { %747 = vmatprep.subr.bf16.mxu1 %v844_v2  ;;  %v802_v12 = vld [vmem:[%s896_s25 + $0x18] sm:$0xff]   ;;  %v805_v15 = vld [vmem:[%s896_s25 + $0x20] sm:$0xff]   ;;  %v808_v18 = vld [vmem:[%s896_s25 + $0x28] sm:$0xff]  }
  0x1d   : > { %v803_v13 = vld [vmem:[%s896_s25 + $0x98] sm:$0xff]   ;;  %v806_v16 = vld [vmem:[%s896_s25 + $0xa0] sm:$0xff]   ;;  %v809_v19 = vld [vmem:[%s896_s25 + $0xa8] sm:$0xff]  }
  0x1e   : > { %717 = vmatpush3.bf16.msra.mxu0 %v796_v6  ;;  %v810_v20 = vld [vmem:[%s896_s25 + $0x70] sm:$0xff]   ;;  %v813_v23 = vld [vmem:[%s896_s25 + $0x78] sm:$0xff]   ;;  %v266_v24 = vld [vmem:[%s891_s21] sm:$0xff] }
  0x1f   : > { %748 = vmatpush3.bf16.msra.mxu1 %v797_v7  ;;  %718 = vmatprep.subr.bf16.mxu0 %v798_v8  ;;  %v811_v21 = vld [vmem:[%s896_s25 + $0x30] sm:$0xff]   ;;  %v683_v25 = vcombine.high %v266_v24, %v266_v24  ;;  %v814_v26 = vld [vmem:[%s896_s25 + $0x38] sm:$0xff]   ;;  %v682_v28 = vcombine.low %v266_v24, %v266_v24  ;;  %v818_v29 = vld [vmem:[%s891_s21 + $0x8] ss:$0 sps:$4 sm:$0xff]  }
  0x20   : > { %749 = vmatprep.subr.bf16.mxu1 %v844_v2  ;;  %v812_v22 = vld [vmem:[%s896_s25 + $0xb0] sm:$0xff]   ;;  %v815_v27 = vld [vmem:[%s896_s25 + $0xb8] sm:$0xff]   ;;  %v265_v36 = vld [vmem:[#allocation2] sm:$0xff] }
  0x21   : > { %503 = vmatprep.mubr.bf16.mxu0 %v683_v25  ;;  %v710_v43 = vld [vmem:[%s943_s2] ss:$0 sm:$0xff] (!%p709_p7) }
  0x22   : > { %719 = vmatpush3.bf16.msra.mxu0 %v799_v9 }
  0x23   : > { %750 = vmatpush3.bf16.msra.mxu1 %v800_v10  ;;  %720 = vmatprep.subr.bf16.mxu0 %v801_v11 }
  0x24   : > { %751 = vmatprep.subr.bf16.mxu1 %v844_v2 }
  0x26   : > { %721 = vmatpush3.bf16.msra.mxu0 %v802_v12 }
  0x27   : > { %752 = vmatpush3.bf16.msra.mxu1 %v803_v13  ;;  %722 = vmatprep.subr.bf16.mxu0 %v804_v14 }
  0x28   : > { %753 = vmatprep.subr.bf16.mxu1 %v844_v2 }
  0x2a   : > { %723 = vmatpush3.bf16.msra.mxu0 %v805_v15 }
  0x2b   : > { %754 = vmatpush3.bf16.msra.mxu1 %v806_v16  ;;  %724 = vmatprep.subr.bf16.mxu0 %v807_v17 }
  0x2c   : > { %755 = vmatprep.subr.bf16.mxu1 %v844_v2 }
  0x2e   : > { %725 = vmatpush3.bf16.msra.mxu0 %v808_v18 }
  0x2f   : > { %756 = vmatpush3.bf16.msra.mxu1 %v809_v19  ;;  %726 = vmatprep.subr.bf16.mxu0 %v810_v20 }
  0x30   : > { %757 = vmatprep.subr.bf16.mxu1 %v844_v2 }
  0x32   : > { %727 = vmatpush3.bf16.msra.mxu0 %v811_v21 }
  0x33   : > { %758 = vmatpush3.bf16.msra.mxu1 %v812_v22  ;;  %728 = vmatprep.subr.bf16.mxu0 %v813_v23 }
  0x34   : > { %759 = vmatprep.subr.bf16.mxu1 %v844_v2 }
  0x36   : > { %729 = vmatpush3.bf16.msra.mxu0 %v814_v26 }
  0x37   : > { %760 = vmatpush3.bf16.msra.mxu1 %v815_v27 }
  0x39   : > { %504 = vmatmul.mubr.bf16.vlgmr.msra.gmra.mrb[0].mxu0 %v682_v28 }
  0x3a   : > { %762 = vmatmul.mubr.bf16.vlgmr.msra.gmra.mrb[0].mxu1 %v818_v29 }
 0x10c   : > { %v730_v30 = vpop.f32.mrb[0].mxu0 }
 0x10d   : > { %v545_v31 = vpop.f32.mrb[0].mxu1  ;;  %v731_v32 = vpop.f32.mrb[1].mxu0 }
 0x10e   : > { %v732_v33 = vadd.f32 %v731_v32, %v730_v30  ;;  %v763_v34 = vpop.f32.mrb[1].mxu1  ;;  %v733_v35 = vpop.f32.mrb[2].mxu0  ;;  %556 = sbr.rel (%p709_p7) target bundleno = 291 (0x123), region = 40 }
 0x10f   : > { %v548_v37 = vpop.f32.mrb[2].mxu1  ;;  %v734_v38 = vpop.f32.mrb[3].mxu0 }
 0x110   : > { %v546_v39 = vadd.f32 %v732_v33, %v545_v31  ;;  %v764_v40 = vpop.f32.mrb[3].mxu1 }
 0x112   : > { %v551_v41 = vadd.f32 %v546_v39, %v265_v36 }
 0x114   : > { %552 = vst [vmem:[#allocation2] sm:$0xff] %v551_v41 }
 0x11b   : > { %v557_v42 = vld [vmem:[#allocation2] sm:$0xff] }
 0x11c   : > { %v565_v44 = vadd.f32 %v710_v43, %v557_v42 }
 0x11e   : > { %v566_v45 = vmax.f32 %v565_v44, 0.0 }
 0x120   : > { %v567_v46 = vpack.c.bf16 %v566_v45, %v566_v45 }
 0x122   : > { %568 = vst [vmem:[%s944_s3] sm:$0xf] %v567_v46 }
 0x123 PF: > { %s13_s14 = sadd.s32 1, %s841_s14   ;;  %s945_s12 = smov %s837_s13 }
 0x124   : > { %p10_p8 = scmp.ge.s32.totalorder %s13_s14, 5   ;;  %s946_s13 = smov %s948_s15 }
 0x126   :  { %12 = sbr.rel (!%p10_p8) target bundleno = 2 (0x2), region = 76 }

// kernel: _lambda_.28
= control target key start
LH: loop header
LB: loop body
LE: loop exit
PB: predicated region body
PF: predicated region fallthrough
CT: control target
= control target key end

     0   :  { %s948_s15 = smov 0   ;;  %s950_s16 = smov 0   ;;  %s1026_s0 = inlined_call_operand.vmem [shape: bf16[8,1152], index: 0, kind: input, shape index: {}]   ;;  %s1027_s1 = inlined_call_operand.vmem [shape: bf16[1152,128], index: 1, kind: input, shape index: {}]   ;;  %s1028_s2 = inlined_call_operand.vmem [shape: f32[1,128], index: 2, kind: input, shape index: {}]   ;;  %s1029_s3 = inlined_call_operand.vmem [shape: bf16[8,128], index: 3, kind: input, shape index: {}]   ;;  %s1030_s4 = inlined_call_operand.vmem [shape: bf16[8,128], index: 4, kind: output, shape index: {}]  }
   0x1   :  { %s952_s17 = smov 0  }
   0x2 LB: > { %s26_s18 = sadd.s32 1, %s914_s16  ;;  %p755_p0 = scmp.ge.s32.totalorder %s918_s17, 1  ;;  %s918_s17 = sphi %s952_s17, %s14_s17   ;;  %s914_s16 = sphi %s950_s16, %s1032_s16   ;;  %s910_s15 = sphi %s948_s15, %s1031_s15  }
   0x3   : > { %p27_p1 = scmp.ge.s32.totalorder %s26_s18, 3  ;;  %p228_p2 = scmp.lt.s32.totalorder %s918_s17, 4 }
   0x5   : > { %s1034_s18 = smov (%p27_p1, %s26_s18), 0  ;;  %p229_p3 = pnand %p755_p0, %p228_p2 }
   0x6   : > { %s278_s19 = smul.u32 (!%p229_p3), 3, %s910_s15  ;;  %p758_p6 = scmp.ne.s32.totalorder (!%p229_p3), %s910_s15, 0 }
   0x7   : > { %232 = sbr.rel (%p229_p3) target bundleno = 293 (0x125), region = 36 }
   0x8   : > { %s288_s20 = smul.u32 (!%p229_p3), 48, %s910_s15  ;;  %p281_p4 = scmp.lt.s32.totalorder (!%p229_p3), %s278_s19, 8 }
   0xa   : > { %p289_p5 = scmp.lt.s32.totalorder (!%p229_p3), %s288_s20, 143 }
   0xe   : > { %s1036_s19 = smov (!%p281_p4, %s278_s19), 8  ;;  %s1038_s20 = smov (!%p289_p5, %s288_s20), 143 }
   0xf   : > { %s756_s21 = sshll.u32 %s1036_s19, 2  ;;  %s757_s25 = sshll.u32 %s1038_s20, 2  ;;  %v920_v0 = vmov (!%p758_p6), 0.0  }
  0x10   : > { %s973_s24 = scalar_lea.vmem %s1026_s0, %s756_s21  ;;  %s978_s28 = scalar_lea.vmem %s1027_s1, %s757_s25  ;;  %319 = vst [vmem:[#allocation2] sm:$0xff] (!%p758_p6), %v920_v0 }
  0x11   : > { %318 = sbr.rel (%p758_p6) target bundleno = 24 (0x18), region = 40 }
  0x18 PF: > { %v869_v1 = vld [vmem:[%s978_s28 + $0x40] sm:$0xff]   ;;  %v921_v2 = vmov 0.0   ;;  %vm922_vm0 = vmmov 0   ;;  %v872_v5 = vld [vmem:[%s978_s28 + $0x48] sm:$0xff]   ;;  %v875_v8 = vld [vmem:[%s978_s28 + $0x50] sm:$0xff]   ;;  %p786_p7 = scmp.ne.s32.totalorder %s910_s15, 2 }
  0x19   : > { %822 = vmatprep.subr.bf16.mxu1 %v921_v2  ;;  %v870_v3 = vld [vmem:[%s978_s28] sm:$0xff]   ;;  %791 = vmatprep.subr.bf16.mxu0 %v869_v1  ;;  %v873_v6 = vld [vmem:[%s978_s28 + $0x8] sm:$0xff]   ;;  %v876_v9 = vld [vmem:[%s978_s28 + $0x10] sm:$0xff]  }
  0x1a   : > { %v871_v4 = vld [vmem:[%s978_s28 + $0x80] sm:$0xff]   ;;  %838 = vmatprep.mubr.msk.bf16.mxu1 %vm922_vm0, %v921_v2  ;;  %792 = vmatpush3.bf16.msra.mxu0 %v870_v3  ;;  %v874_v7 = vld [vmem:[%s978_s28 + $0x88] sm:$0xff]   ;;  %v877_v10 = vld [vmem:[%s978_s28 + $0x90] sm:$0xff]  }
  0x1b   : > { %823 = vmatpush3.bf16.msra.mxu1 %v871_v4  ;;  %793 = vmatprep.subr.bf16.mxu0 %v872_v5  ;;  %v878_v11 = vld [vmem:[%s978_s28 + $0x58] sm:$0xff]   ;;  %v881_v14 = vld [vmem:[%s978_s28 + $0x60] sm:$0xff]   ;;  %v884_v17 = vld [vmem:[%s978_s28 + $0x68] sm:$0xff]  }
  0x1c   : > { %824 = vmatprep.subr.bf16.mxu1 %v921_v2  ;;  %v879_v12 = vld [vmem:[%s978_s28 + $0x18] sm:$0xff]   ;;  %v882_v15 = vld [vmem:[%s978_s28 + $0x20] sm:$0xff]   ;;  %v885_v18 = vld [vmem:[%s978_s28 + $0x28] sm:$0xff]  }
  0x1d   : > { %v880_v13 = vld [vmem:[%s978_s28 + $0x98] sm:$0xff]   ;;  %v883_v16 = vld [vmem:[%s978_s28 + $0xa0] sm:$0xff]   ;;  %v886_v19 = vld [vmem:[%s978_s28 + $0xa8] sm:$0xff]  }
  0x1e   : > { %794 = vmatpush3.bf16.msra.mxu0 %v873_v6  ;;  %v887_v20 = vld [vmem:[%s978_s28 + $0x70] sm:$0xff]   ;;  %v890_v23 = vld [vmem:[%s978_s28 + $0x78] sm:$0xff]   ;;  %v321_v24 = vld [vmem:[%s973_s24] sm:$0xff] }
  0x1f   : > { %825 = vmatpush3.bf16.msra.mxu1 %v874_v7  ;;  %795 = vmatprep.subr.bf16.mxu0 %v875_v8  ;;  %v888_v21 = vld [vmem:[%s978_s28 + $0x30] sm:$0xff]   ;;  %v760_v25 = vcombine.high %v321_v24, %v321_v24  ;;  %v891_v26 = vld [vmem:[%s978_s28 + $0x38] sm:$0xff]   ;;  %v759_v28 = vcombine.low %v321_v24, %v321_v24  ;;  %v895_v29 = vld [vmem:[%s973_s24 + $0x8] ss:$0 sps:$4 sm:$0xff]  }
  0x20   : > { %826 = vmatprep.subr.bf16.mxu1 %v921_v2  ;;  %v889_v22 = vld [vmem:[%s978_s28 + $0xb0] sm:$0xff]   ;;  %v892_v27 = vld [vmem:[%s978_s28 + $0xb8] sm:$0xff]   ;;  %v320_v36 = vld [vmem:[#allocation2] sm:$0xff] }
  0x21   : > { %558 = vmatprep.mubr.bf16.mxu0 %v760_v25  ;;  %v787_v43 = vld [vmem:[%s1028_s2] ss:$0 sm:$0xff] (!%p786_p7) }
  0x22   : > { %796 = vmatpush3.bf16.msra.mxu0 %v876_v9  ;;  %v621_v44 = vld [vmem:[%s1029_s3] sm:$0xf] (!%p786_p7) }
  0x23   : > { %827 = vmatpush3.bf16.msra.mxu1 %v877_v10  ;;  %797 = vmatprep.subr.bf16.mxu0 %v878_v11  ;;  %v622_v46 = vunpack.c.l.bf16 (!%p786_p7), %v621_v44 }
  0x24   : > { %828 = vmatprep.subr.bf16.mxu1 %v921_v2 }
  0x26   : > { %798 = vmatpush3.bf16.msra.mxu0 %v879_v12 }
  0x27   : > { %829 = vmatpush3.bf16.msra.mxu1 %v880_v13  ;;  %799 = vmatprep.subr.bf16.mxu0 %v881_v14 }
  0x28   : > { %830 = vmatprep.subr.bf16.mxu1 %v921_v2 }
  0x2a   : > { %800 = vmatpush3.bf16.msra.mxu0 %v882_v15 }
  0x2b   : > { %831 = vmatpush3.bf16.msra.mxu1 %v883_v16  ;;  %801 = vmatprep.subr.bf16.mxu0 %v884_v17 }
  0x2c   : > { %832 = vmatprep.subr.bf16.mxu1 %v921_v2 }
  0x2e   : > { %802 = vmatpush3.bf16.msra.mxu0 %v885_v18 }
  0x2f   : > { %833 = vmatpush3.bf16.msra.mxu1 %v886_v19  ;;  %803 = vmatprep.subr.bf16.mxu0 %v887_v20 }
  0x30   : > { %834 = vmatprep.subr.bf16.mxu1 %v921_v2 }
  0x32   : > { %804 = vmatpush3.bf16.msra.mxu0 %v888_v21 }
  0x33   : > { %835 = vmatpush3.bf16.msra.mxu1 %v889_v22  ;;  %805 = vmatprep.subr.bf16.mxu0 %v890_v23 }
  0x34   : > { %836 = vmatprep.subr.bf16.mxu1 %v921_v2 }
  0x36   : > { %806 = vmatpush3.bf16.msra.mxu0 %v891_v26 }
  0x37   : > { %837 = vmatpush3.bf16.msra.mxu1 %v892_v27 }
  0x39   : > { %559 = vmatmul.mubr.bf16.vlgmr.msra.gmra.mrb[0].mxu0 %v759_v28 }
  0x3a   : > { %839 = vmatmul.mubr.bf16.vlgmr.msra.gmra.mrb[0].mxu1 %v895_v29 }
 0x10c   : > { %v807_v30 = vpop.f32.mrb[0].mxu0 }
 0x10d   : > { %v600_v31 = vpop.f32.mrb[0].mxu1  ;;  %v808_v32 = vpop.f32.mrb[1].mxu0 }
 0x10e   : > { %v809_v33 = vadd.f32 %v808_v32, %v807_v30  ;;  %v840_v34 = vpop.f32.mrb[1].mxu1  ;;  %v810_v35 = vpop.f32.mrb[2].mxu0  ;;  %611 = sbr.rel (%p786_p7) target bundleno = 293 (0x125), region = 44 }
 0x10f   : > { %v603_v37 = vpop.f32.mrb[2].mxu1  ;;  %v811_v38 = vpop.f32.mrb[3].mxu0 }
 0x110   : > { %v601_v39 = vadd.f32 %v809_v33, %v600_v31  ;;  %v841_v40 = vpop.f32.mrb[3].mxu1 }
 0x112   : > { %v606_v41 = vadd.f32 %v601_v39, %v320_v36 }
 0x114   : > { %607 = vst [vmem:[#allocation2] sm:$0xff] %v606_v41 }
 0x11b   : > { %v612_v42 = vld [vmem:[#allocation2] sm:$0xff] }
 0x11c   : > { %v620_v45 = vadd.f32 %v787_v43, %v612_v42 }
 0x11e   : > { %v623_v47 = vadd.f32 %v622_v46, %v620_v45 }
 0x120   : > { %v624_v48 = vmax.f32 %v623_v47, 0.0 }
 0x122   : > { %v625_v49 = vpack.c.bf16 %v624_v48, %v624_v48 }
 0x124   : > { %626 = vst [vmem:[%s1030_s4] sm:$0xf] %v625_v49 }
 0x125 PF: > { %s14_s17 = sadd.s32 1, %s918_s17   ;;  %s1031_s15 = smov %s914_s16 }
 0x126   : > { %p11_p8 = scmp.ge.s32.totalorder %s14_s17, 5   ;;  %s1032_s16 = smov %s1034_s18 }
 0x128   :  { %13 = sbr.rel (!%p11_p8) target bundleno = 2 (0x2), region = 83 }

// kernel: _lambda_.31
= control target key start
LH: loop header
LB: loop body
LE: loop exit
PB: predicated region body
PF: predicated region fallthrough
CT: control target
= control target key end

     0   :  { %s1036_s12 = smov 0   ;;  %s1038_s13 = smov 0   ;;  %s1135_s0 = inlined_call_operand.vmem [shape: bf16[8,1152], index: 0, kind: input, shape index: {}]   ;;  %s1136_s1 = inlined_call_operand.vmem [shape: bf16[1152,256], index: 1, kind: input, shape index: {}]   ;;  %s1137_s2 = inlined_call_operand.vmem [shape: f32[1,256], index: 2, kind: input, shape index: {}]   ;;  %s1138_s3 = inlined_call_operand.vmem [shape: bf16[8,256], index: 3, kind: output, shape index: {}]  }
   0x1   :  { %s1040_s14 = smov 0  }
   0x2 LB: > { %s25_s15 = sadd.s32 1, %s1008_s13  ;;  %p825_p0 = scmp.ge.s32.totalorder %s1012_s14, 1  ;;  %s1012_s14 = sphi %s1040_s14, %s13_s14   ;;  %s1008_s13 = sphi %s1038_s13, %s1140_s13   ;;  %s1004_s12 = sphi %s1036_s12, %s1139_s12  }
   0x3   : > { %p26_p1 = scmp.ge.s32.totalorder %s25_s15, 3  ;;  %p194_p2 = scmp.lt.s32.totalorder %s1012_s14, 4 }
   0x5   : > { %s1142_s15 = smov (%p26_p1, %s25_s15), 0  ;;  %p195_p3 = pnand %p825_p0, %p194_p2 }
   0x6   : > { %s240_s16 = smul.u32 (!%p195_p3), 3, %s1004_s12  ;;  %p829_p6 = scmp.ne.s32.totalorder (!%p195_p3), %s1004_s12, 0 }
   0x7   : > { %198 = sbr.rel (%p195_p3) target bundleno = 321 (0x141), region = 32 }
   0x8   : > { %s250_s17 = smul.u32 (!%p195_p3), 48, %s1004_s12  ;;  %p243_p4 = scmp.lt.s32.totalorder (!%p195_p3), %s240_s16, 8 }
   0xa   : > { %p252_p5 = scmp.lt.s32.totalorder (!%p195_p3), %s250_s17, 143 }
   0xe   : > { %s1144_s16 = smov (!%p243_p4, %s240_s16), 8  ;;  %s1146_s17 = smov (!%p252_p5, %s250_s17), 143 }
   0xf   : > { %s826_s18 = sshll.u32 %s1144_s16, 2  ;;  %s887_s22 = sshll.u32 %s1146_s17, 3  ;;  %v1014_v0 = vmov (!%p829_p6), 0.0  }
  0x10   : > { %s1061_s21 = scalar_lea.vmem %s1135_s0, %s826_s18  ;;  %s1066_s25 = scalar_lea.vmem %s1136_s1, %s887_s22  ;;  %282 = vst [vmem:[#allocation2] sm:$0xff] (!%p829_p6), %v1014_v0  ;;  %283 = vst [vmem:[#allocation2 + $0x8] sm:$0xff] (!%p829_p6), %v1014_v0 }
  0x11   : > { %281 = sbr.rel (%p829_p6) target bundleno = 24 (0x18), region = 36 }
  0x18 PF: > { %v915_v1 = vld [vmem:[%s1066_s25 + $0x4] ss:$8 sps:$4 sm:$0xff]   ;;  %v917_v2 = vld [vmem:[%s1066_s25] ss:$8 sps:$4 sm:$0xff]   ;;  %v1015_v3 = vmov 0   ;;  %p881_p7 = scmp.ne.s32.totalorder %s1004_s12, 2 }
  0x19   : > { %660 = vmatprep.mubr.bf16.mxu1 %v1015_v3  ;;  %587 = vmatprep.subr.bf16.mxu0 %v915_v1  ;;  %v918_v4 = vld [vmem:[%s1066_s25 + $0x14] ss:$8 sps:$4 sm:$0xff]   ;;  %v920_v5 = vld [vmem:[%s1066_s25 + $0x10] ss:$8 sps:$4 sm:$0xff]   ;;  %v921_v6 = vld [vmem:[%s1066_s25 + $0x24] ss:$8 sps:$4 sm:$0xff]  }
  0x1a   : > { %588 = vmatpush1.bf16.msra.mxu0 %v917_v2  ;;  %v923_v7 = vld [vmem:[%s1066_s25 + $0x20] ss:$8 sps:$4 sm:$0xff]   ;;  %v924_v8 = vld [vmem:[%s1066_s25 + $0x34] ss:$8 sps:$4 sm:$0xff]   ;;  %v926_v9 = vld [vmem:[%s1066_s25 + $0x30] ss:$8 sps:$4 sm:$0xff]  }
  0x1b   : > { %589 = vmatprep.subr.bf16.mxu0 %v918_v4  ;;  %v939_v10 = vld [vmem:[%s1066_s25 + $0x104] ss:$8 sps:$4 sm:$0xff]   ;;  %v941_v11 = vld [vmem:[%s1066_s25 + $0x100] ss:$8 sps:$4 sm:$0xff]   ;;  %v945_v13 = vld [vmem:[%s1066_s25 + $0x114] ss:$8 sps:$4 sm:$0xff]   ;;  %v681_v4 = vlaneseq (!%p881_p7) }
  0x1c   : > { %v927_v12 = vld [vmem:[%s1066_s25 + $0x44] ss:$8 sps:$4 sm:$0xff]   ;;  %628 = vmatprep.subr.bf16.mxu1 %v939_v10  ;;  %v947_v14 = vld [vmem:[%s1066_s25 + $0x110] ss:$8 sps:$4 sm:$0xff]   ;;  %v929_v15 = vld [vmem:[%s1066_s25 + $0x40] ss:$8 sps:$4 sm:$0xff]  }
  0x1d   : > { %629 = vmatpush1.bf16.msra.mxu1 %v941_v11  ;;  %v930_v16 = vld [vmem:[%s1066_s25 + $0x54] ss:$8 sps:$4 sm:$0xff]   ;;  %v951_v17 = vld [vmem:[%s1066_s25 + $0x124] ss:$8 sps:$4 sm:$0xff]   ;;  %v953_v18 = vld [vmem:[%s1066_s25 + $0x120] ss:$8 sps:$4 sm:$0xff]  }
  0x1e   : > { %590 = vmatpush1.bf16.msra.mxu0 %v920_v5  ;;  %630 = vmatprep.subr.bf16.mxu1 %v945_v13  ;;  %v932_v19 = vld [vmem:[%s1066_s25 + $0x50] ss:$8 sps:$4 sm:$0xff]   ;;  %v957_v20 = vld [vmem:[%s1066_s25 + $0x134] ss:$8 sps:$4 sm:$0xff]   ;;  %v933_v21 = vld [vmem:[%s1066_s25 + $0x64] ss:$8 sps:$4 sm:$0xff]  }
  0x1f   : > { %591 = vmatprep.subr.bf16.mxu0 %v921_v6  ;;  %v959_v22 = vld [vmem:[%s1066_s25 + $0x130] ss:$8 sps:$4 sm:$0xff]   ;;  %v935_v23 = vld [vmem:[%s1066_s25 + $0x60] ss:$8 sps:$4 sm:$0xff]   ;;  %v963_v24 = vld [vmem:[%s1066_s25 + $0x144] ss:$8 sps:$4 sm:$0xff]  }
  0x20   : > { %v936_v25 = vld [vmem:[%s1066_s25 + $0x74] ss:$8 sps:$4 sm:$0xff]   ;;  %v965_v26 = vld [vmem:[%s1066_s25 + $0x140] ss:$8 sps:$4 sm:$0xff]   ;;  %v938_v27 = vld [vmem:[%s1066_s25 + $0x70] ss:$8 sps:$4 sm:$0xff]  }
  0x21   : > { %631 = vmatpush1.bf16.msra.mxu1 %v947_v14  ;;  %v969_v28 = vld [vmem:[%s1066_s25 + $0x154] ss:$8 sps:$4 sm:$0xff]   ;;  %v942_v29 = vld [vmem:[%s1066_s25 + $0x84] ss:$8 sps:$4 sm:$0xff]   ;;  %v971_v30 = vld [vmem:[%s1066_s25 + $0x150] ss:$8 sps:$4 sm:$0xff]  }
  0x22   : > { %592 = vmatpush1.bf16.msra.mxu0 %v923_v7  ;;  %632 = vmatprep.subr.bf16.mxu1 %v951_v17  ;;  %v944_v31 = vld [vmem:[%s1066_s25 + $0x80] ss:$8 sps:$4 sm:$0xff]   ;;  %v975_v32 = vld [vmem:[%s1066_s25 + $0x164] ss:$8 sps:$4 sm:$0xff]   ;;  %v948_v33 = vld [vmem:[%s1066_s25 + $0x94] ss:$8 sps:$4 sm:$0xff]  }
  0x23   : > { %593 = vmatprep.subr.bf16.mxu0 %v924_v8  ;;  %v286_v34 = vld [vmem:[%s1061_s21] sm:$0xff]  ;;  %v950_v37 = vld [vmem:[%s1066_s25 + $0x90] ss:$8 sps:$4 sm:$0xff]   ;;  %v981_v38 = vld [vmem:[%s1066_s25 + $0x174] ss:$8 sps:$4 sm:$0xff]   ;;  %v682_v5 = vshrl.u32 (!%p881_p7), %v681_v4, 7 }
  0x24   : > { %v831_v35 = vcombine.high %v286_v34, %v286_v34  ;;  %v977_v36 = vld [vmem:[%s1066_s25 + $0x160] ss:$8 sps:$4 sm:$0xff]   ;;  %v954_v39 = vld [vmem:[%s1066_s25 + $0xa4] ss:$8 sps:$4 sm:$0xff]   ;;  %v983_v40 = vld [vmem:[%s1066_s25 + $0x170] ss:$8 sps:$4 sm:$0xff]   ;;  %v830_v53 = vcombine.low %v286_v34, %v286_v34 }
  0x25   : > { %633 = vmatpush1.bf16.msra.mxu1 %v953_v18  ;;  %v956_v41 = vld [vmem:[%s1066_s25 + $0xa0] ss:$8 sps:$4 sm:$0xff]   ;;  %v960_v42 = vld [vmem:[%s1066_s25 + $0xb4] ss:$8 sps:$4 sm:$0xff]   ;;  %v962_v44 = vld [vmem:[%s1066_s25 + $0xb0] ss:$8 sps:$4 sm:$0xff]  }
  0x26   : > { %594 = vmatpush1.bf16.msra.mxu0 %v926_v9  ;;  %634 = vmatprep.subr.bf16.mxu1 %v957_v20  ;;  %v987_v43 = vld [vmem:[%s1061_s21 + $0x8] ss:$0 sps:$4 sm:$0xff]   ;;  %v966_v45 = vld [vmem:[%s1066_s25 + $0xc4] ss:$8 sps:$4 sm:$0xff]   ;;  %v972_v47 = vld [vmem:[%s1066_s25 + $0xd4] ss:$8 sps:$4 sm:$0xff]  }
  0x27   : > { %595 = vmatprep.subr.bf16.mxu0 %v927_v12  ;;  %619 = vmatprep.mubr.bf16.mxu0 %v831_v35  ;;  %v968_v46 = vld [vmem:[%s1066_s25 + $0xc0] ss:$8 sps:$4 sm:$0xff]   ;;  %v974_v48 = vld [vmem:[%s1066_s25 + $0xd0] ss:$8 sps:$4 sm:$0xff]   ;;  %v978_v49 = vld [vmem:[%s1066_s25 + $0xe4] ss:$8 sps:$4 sm:$0xff]  }
  0x28   : > { %v980_v50 = vld [vmem:[%s1066_s25 + $0xe0] ss:$8 sps:$4 sm:$0xff]   ;;  %v984_v51 = vld [vmem:[%s1066_s25 + $0xf4] ss:$8 sps:$4 sm:$0xff]   ;;  %v986_v52 = vld [vmem:[%s1066_s25 + $0xf0] ss:$8 sps:$4 sm:$0xff]  }
  0x29   : > { %635 = vmatpush1.bf16.msra.mxu1 %v959_v22  ;;  %v284_v58 = vld [vmem:[#allocation2] sm:$0xff]  ;;  %v285_v61 = vld [vmem:[#allocation2 + $0x8] sm:$0xff]  ;;  %v683_v7 = vsub.s32 (!%p881_p7), 0, %v682_v5  ;;  %v687_v8 = vsub.s32 (!%p881_p7), 1, %v682_v5 }
  0x2a   : > { %596 = vmatpush1.bf16.msra.mxu0 %v929_v15  ;;  %636 = vmatprep.subr.bf16.mxu1 %v963_v24  ;;  %v679_v6 = vld [vmem:[%s1137_s2] sm:$0x3] (!%p881_p7) }
  0x2b   : > { %597 = vmatprep.subr.bf16.mxu0 %v930_v16  ;;  %v684_v11 = vrot.slane (!%p881_p7), %v679_v6, %v683_v7  ;;  %v688_v12 = vrot.slane (!%p881_p7), %v679_v6, %v687_v8 }
  0x2d   : > { %637 = vmatpush1.bf16.msra.mxu1 %v965_v26 }
  0x2e   : > { %598 = vmatpush1.bf16.msra.mxu0 %v932_v19  ;;  %638 = vmatprep.subr.bf16.mxu1 %v969_v28 }
  0x2f   : > { %599 = vmatprep.subr.bf16.mxu0 %v933_v21 }
  0x31   : > { %639 = vmatpush1.bf16.msra.mxu1 %v971_v30 }
  0x32   : > { %600 = vmatpush1.bf16.msra.mxu0 %v935_v23  ;;  %640 = vmatprep.subr.bf16.mxu1 %v975_v32 }
  0x33   : > { %601 = vmatprep.subr.bf16.mxu0 %v936_v25 }
  0x35   : > { %641 = vmatpush1.bf16.msra.mxu1 %v977_v36 }
  0x36   : > { %602 = vmatpush1.bf16.msra.mxu0 %v938_v27  ;;  %642 = vmatprep.subr.bf16.mxu1 %v981_v38 }
  0x37   : > { %603 = vmatprep.subr.bf16.mxu0 %v942_v29 }
  0x39   : > { %643 = vmatpush1.bf16.msra.mxu1 %v983_v40 }
  0x3a   : > { %604 = vmatpush1.bf16.msra.mxu0 %v944_v31 }
  0x3b   : > { %605 = vmatprep.subr.bf16.mxu0 %v948_v33 }
  0x3c   : > { %661 = vmatmul.mubr.bf16.vlgmr.msra.gmra.mrb[0].mxu1 %v987_v43 }
  0x3e   : > { %606 = vmatpush1.bf16.msra.mxu0 %v950_v37 }
  0x3f   : > { %607 = vmatprep.subr.bf16.mxu0 %v954_v39 }
  0x42   : > { %608 = vmatpush1.bf16.msra.mxu0 %v956_v41 }
  0x43   : > { %609 = vmatprep.subr.bf16.mxu0 %v960_v42 }
  0x46   : > { %610 = vmatpush1.bf16.msra.mxu0 %v962_v44 }
  0x47   : > { %611 = vmatprep.subr.bf16.mxu0 %v966_v45 }
  0x4a   : > { %612 = vmatpush1.bf16.msra.mxu0 %v968_v46 }
  0x4b   : > { %613 = vmatprep.subr.bf16.mxu0 %v972_v47 }
  0x4e   : > { %614 = vmatpush1.bf16.msra.mxu0 %v974_v48 }
  0x4f   : > { %615 = vmatprep.subr.bf16.mxu0 %v978_v49 }
  0x52   : > { %616 = vmatpush1.bf16.msra.mxu0 %v980_v50 }
  0x53   : > { %617 = vmatprep.subr.bf16.mxu0 %v984_v51 }
  0x56   : > { %618 = vmatpush1.bf16.msra.mxu0 %v986_v52 }
  0x59   : > { %620 = vmatmul.mubr.bf16.vlgmr.msra.gmra.mrb[0].mxu0 %v830_v53 }
 0x10f   : > { %v662_v54 = vpop.f32.mrb[0].mxu1 }
 0x110   : > { %v664_v55 = vpop.f32.mrb[1].mxu1 }
 0x111   : > { %v666_v56 = vpop.f32.mrb[2].mxu1 }
 0x112   : > { %v667_v57 = vpop.f32.mrb[3].mxu1 }
 0x12c   : > { %v621_v59 = vpop.f32.mrb[0].mxu0  ;;  %676 = sbr.rel (%p881_p7) target bundleno = 321 (0x141), region = 40 }
 0x12d   : > { %v663_v60 = vadd.f32 %v662_v54, %v621_v59  ;;  %v623_v62 = vpop.f32.mrb[1].mxu0 }
 0x12e   : > { %v665_v63 = vadd.f32 %v664_v55, %v623_v62  ;;  %v625_v0 = vpop.f32.mrb[2].mxu0 }
 0x12f   : > { %v669_v1 = vadd.f32 %v663_v60, %v284_v58  ;;  %v626_v2 = vpop.f32.mrb[3].mxu0 }
 0x130   : > { %v670_v3 = vadd.f32 %v665_v63, %v285_v61 }
 0x131   : > { %671 = vst [vmem:[#allocation2] sm:$0xff] %v669_v1 }
 0x132   : > { %672 = vst [vmem:[#allocation2 + $0x8] sm:$0xff] %v670_v3 }
 0x138   : > { %v677_v9 = vld [vmem:[#allocation2] sm:$0xff] }
 0x139   : > { %v678_v10 = vld [vmem:[#allocation2 + $0x8] sm:$0xff]  ;;  %v691_v13 = vadd.f32 %v684_v11, %v677_v9 }
 0x13a   : > { %v692_v14 = vadd.f32 %v688_v12, %v678_v10 }
 0x13b   : > { %v693_v15 = vmax.f32 %v691_v13, 0.0 }
 0x13c   : > { %v694_v16 = vmax.f32 %v692_v14, 0.0 }
 0x13e   : > { %v888_v17 = vpack.c.bf16 %v694_v16, %v693_v15 }
 0x140   : > { %703 = vst [vmem:[%s1138_s3] sm:$0xff] %v888_v17 }
 0x141 PF: > { %s13_s14 = sadd.s32 1, %s1012_s14   ;;  %s1139_s12 = smov %s1008_s13 }
 0x142   : > { %p10_p8 = scmp.ge.s32.totalorder %s13_s14, 5   ;;  %s1140_s13 = smov %s1142_s15 }
 0x144   :  { %12 = sbr.rel (!%p10_p8) target bundleno = 2 (0x2), region = 76 }

// kernel: _lambda_.32
= control target key start
LH: loop header
LB: loop body
LE: loop exit
PB: predicated region body
PF: predicated region fallthrough
CT: control target
= control target key end

     0   :  { %v240_v1 = vmov 0   ;;  %v172_v18 = vlaneseq  ;;  %s318_s1 = inlined_call_operand.vmem [shape: bf16[128,256], index: 1, kind: input, shape index: {}]   ;;  %s319_s0 = inlined_call_operand.vmem [shape: bf16[8,128], index: 0, kind: input, shape index: {}]   ;;  %s320_s2 = inlined_call_operand.vmem [shape: f32[1,256], index: 2, kind: input, shape index: {}]   ;;  %s321_s3 = inlined_call_operand.vmem [shape: bf16[8,256], index: 3, kind: output, shape index: {}]  }
   0x1   :  { %v216_v0 = vld [vmem:[%s318_s1 + $0x4] ss:$8 sps:$4 sm:$0xff]   ;;  %152 = vmatprep.mubr.bf16.mxu0 %v240_v1  ;;  %v218_v2 = vld [vmem:[%s318_s1] ss:$8 sps:$4 sm:$0xff]   ;;  %v219_v3 = vld [vmem:[%s318_s1 + $0x14] ss:$8 sps:$4 sm:$0xff]  }
   0x2   :  { %120 = vmatprep.subr.bf16.mxu0 %v216_v0  ;;  %v221_v4 = vld [vmem:[%s318_s1 + $0x10] ss:$8 sps:$4 sm:$0xff]   ;;  %v222_v5 = vld [vmem:[%s318_s1 + $0x24] ss:$8 sps:$4 sm:$0xff]   ;;  %v224_v6 = vld [vmem:[%s318_s1 + $0x20] ss:$8 sps:$4 sm:$0xff]  }
   0x3   :  { %121 = vmatpush1.bf16.msra.mxu0 %v218_v2  ;;  %v225_v7 = vld [vmem:[%s318_s1 + $0x34] ss:$8 sps:$4 sm:$0xff]   ;;  %v227_v8 = vld [vmem:[%s318_s1 + $0x30] ss:$8 sps:$4 sm:$0xff]   ;;  %v228_v9 = vld [vmem:[%s318_s1 + $0x44] ss:$8 sps:$4 sm:$0xff]  }
   0x4   :  { %122 = vmatprep.subr.bf16.mxu0 %v219_v3  ;;  %v230_v10 = vld [vmem:[%s318_s1 + $0x40] ss:$8 sps:$4 sm:$0xff]   ;;  %v231_v11 = vld [vmem:[%s318_s1 + $0x54] ss:$8 sps:$4 sm:$0xff]   ;;  %v233_v12 = vld [vmem:[%s318_s1 + $0x50] ss:$8 sps:$4 sm:$0xff]  }
   0x5   :  { %v234_v13 = vld [vmem:[%s318_s1 + $0x64] ss:$8 sps:$4 sm:$0xff]   ;;  %v236_v14 = vld [vmem:[%s318_s1 + $0x60] ss:$8 sps:$4 sm:$0xff]   ;;  %v237_v15 = vld [vmem:[%s318_s1 + $0x74] ss:$8 sps:$4 sm:$0xff]  }
   0x6   :  { %v239_v16 = vld [vmem:[%s318_s1 + $0x70] ss:$8 sps:$4 sm:$0xff]   ;;  %v23_v17 = vld [vmem:[%s319_s0] sm:$0xf]  ;;  %v173_v19 = vshrl.u32 %v172_v18, 7 }
   0x7   :  { %123 = vmatpush1.bf16.msra.mxu0 %v221_v4  ;;  %v170_v21 = vld [vmem:[%s320_s2] sm:$0x3] }
   0x8   :  { %124 = vmatprep.subr.bf16.mxu0 %v222_v5  ;;  %v174_v20 = vsub.s32 0, %v173_v19  ;;  %v178_v22 = vsub.s32 1, %v173_v19 }
   0xa   :  { %v175_v23 = vrot.slane %v170_v21, %v174_v20  ;;  %v179_v24 = vrot.slane %v170_v21, %v178_v22 }
   0xb   :  { %125 = vmatpush1.bf16.msra.mxu0 %v224_v6 }
   0xc   :  { %126 = vmatprep.subr.bf16.mxu0 %v225_v7 }
   0xf   :  { %127 = vmatpush1.bf16.msra.mxu0 %v227_v8 }
  0x10   :  { %128 = vmatprep.subr.bf16.mxu0 %v228_v9 }
  0x13   :  { %129 = vmatpush1.bf16.msra.mxu0 %v230_v10 }
  0x14   :  { %130 = vmatprep.subr.bf16.mxu0 %v231_v11 }
  0x17   :  { %131 = vmatpush1.bf16.msra.mxu0 %v233_v12 }
  0x18   :  { %132 = vmatprep.subr.bf16.mxu0 %v234_v13 }
  0x1b   :  { %133 = vmatpush1.bf16.msra.mxu0 %v236_v14 }
  0x1c   :  { %134 = vmatprep.subr.bf16.mxu0 %v237_v15 }
  0x1f   :  { %135 = vmatpush1.bf16.msra.mxu0 %v239_v16 }
  0x22   :  { %153 = vmatmul.mubr.bf16.vlgmr.msra.gmra.mrb[0].mxu0 %v23_v17 }
  0xf5   :  { %v154_v25 = vpop.f32.mrb[0].mxu0 }
  0xf6   :  { %v182_v26 = vadd.f32 %v175_v23, %v154_v25  ;;  %v156_v27 = vpop.f32.mrb[1].mxu0 }
  0xf7   :  { %v183_v28 = vadd.f32 %v179_v24, %v156_v27  ;;  %v158_v29 = vpop.f32.mrb[2].mxu0 }
  0xf8   :  { %v159_v30 = vpop.f32.mrb[3].mxu0 }
  0xf9   :  { %v214_v31 = vpack.c.bf16 %v183_v28, %v182_v26 }
  0xfb   :  { %192 = vst [vmem:[%s321_s3] sm:$0xff] %v214_v31 }

// kernel: _lambda_.33
= control target key start
LH: loop header
LB: loop body
LE: loop exit
PB: predicated region body
PF: predicated region fallthrough
CT: control target
= control target key end

     0   :  { %s1594_s15 = smov 0   ;;  %s1596_s16 = smov 0   ;;  %s1751_s0 = inlined_call_operand.vmem [shape: bf16[8,2304], index: 0, kind: input, shape index: {}]   ;;  %s1752_s1 = inlined_call_operand.vmem [shape: bf16[2304,256], index: 1, kind: input, shape index: {}]   ;;  %s1753_s2 = inlined_call_operand.vmem [shape: f32[1,256], index: 2, kind: input, shape index: {}]   ;;  %s1754_s3 = inlined_call_operand.vmem [shape: bf16[8,256], index: 3, kind: input, shape index: {}]   ;;  %s1755_s4 = inlined_call_operand.vmem [shape: bf16[8,256], index: 4, kind: output, shape index: {}]  }
   0x1   :  { %s1598_s17 = smov 0  }
   0x2 LB: > { %s26_s18 = sadd.s32 1, %s1562_s16  ;;  %p1254_p0 = scmp.ge.s32.totalorder %s1566_s17, 1  ;;  %s1566_s17 = sphi %s1598_s17, %s14_s17   ;;  %s1562_s16 = sphi %s1596_s16, %s1757_s16   ;;  %s1558_s15 = sphi %s1594_s15, %s1756_s15  }
   0x3   : > { %p27_p1 = scmp.ge.s32.totalorder %s26_s18, 3  ;;  %p236_p2 = scmp.lt.s32.totalorder %s1566_s17, 4 }
   0x5   : > { %s1759_s18 = smov (%p27_p1, %s26_s18), 0  ;;  %p237_p3 = pnand %p1254_p0, %p236_p2 }
   0x6   : > { %s293_s19 = smul.u32 (!%p237_p3), 6, %s1558_s15  ;;  %p1258_p6 = scmp.ne.s32.totalorder (!%p237_p3), %s1558_s15, 0 }
   0x7   : > { %240 = sbr.rel (%p237_p3) target bundleno = 387 (0x183), region = 36 }
   0x8   : > { %s303_s20 = smul.u32 (!%p237_p3), 96, %s1558_s15  ;;  %p296_p4 = scmp.lt.s32.totalorder (!%p237_p3), %s293_s19, 17 }
   0xa   : > { %p305_p5 = scmp.lt.s32.totalorder (!%p237_p3), %s303_s20, 287 }
   0xe   : > { %s1761_s19 = smov (!%p296_p4, %s293_s19), 17  ;;  %s1763_s20 = smov (!%p305_p5, %s303_s20), 287 }
   0xf   : > { %s1255_s21 = sshll.u32 %s1761_s19, 2  ;;  %s1367_s25 = sshll.u32 %s1763_s20, 3  ;;  %v1568_v0 = vmov (!%p1258_p6), 0.0  }
  0x10   : > { %s1619_s24 = scalar_lea.vmem %s1751_s0, %s1255_s21  ;;  %s1624_s28 = scalar_lea.vmem %s1752_s1, %s1367_s25  ;;  %344 = vst [vmem:[#allocation2] sm:$0xff] (!%p1258_p6), %v1568_v0  ;;  %345 = vst [vmem:[#allocation2 + $0x8] sm:$0xff] (!%p1258_p6), %v1568_v0 }
  0x11   : > { %343 = sbr.rel (%p1258_p6) target bundleno = 24 (0x18), region = 40 }
  0x18 PF: > { %v1394_v1 = vld [vmem:[%s1624_s28 + $0x4] ss:$8 sps:$4 sm:$0xff]   ;;  %v1398_v3 = vld [vmem:[%s1624_s28] ss:$8 sps:$4 sm:$0xff]   ;;  %v1400_v5 = vld [vmem:[%s1624_s28 + $0x14] ss:$8 sps:$4 sm:$0xff]  }
  0x19   : > { %v1396_v2 = vld [vmem:[%s1624_s28 + $0x104] ss:$8 sps:$4 sm:$0xff]   ;;  %948 = vmatprep.subr.bf16.mxu0 %v1394_v1  ;;  %v1399_v4 = vld [vmem:[%s1624_s28 + $0x100] ss:$8 sps:$4 sm:$0xff]   ;;  %v1402_v6 = vld [vmem:[%s1624_s28 + $0x114] ss:$8 sps:$4 sm:$0xff]  }
  0x1a   : > { %989 = vmatprep.subr.bf16.mxu1 %v1396_v2  ;;  %949 = vmatpush1.bf16.msra.mxu0 %v1398_v3  ;;  %v1404_v7 = vld [vmem:[%s1624_s28 + $0x10] ss:$8 sps:$4 sm:$0xff]   ;;  %v1406_v9 = vld [vmem:[%s1624_s28 + $0x24] ss:$8 sps:$4 sm:$0xff]   ;;  %v1410_v11 = vld [vmem:[%s1624_s28 + $0x20] ss:$8 sps:$4 sm:$0xff]  }
  0x1b   : > { %990 = vmatpush1.bf16.msra.mxu1 %v1399_v4  ;;  %950 = vmatprep.subr.bf16.mxu0 %v1400_v5  ;;  %v1405_v8 = vld [vmem:[%s1624_s28 + $0x110] ss:$8 sps:$4 sm:$0xff]   ;;  %v1408_v10 = vld [vmem:[%s1624_s28 + $0x124] ss:$8 sps:$4 sm:$0xff]   ;;  %v1411_v12 = vld [vmem:[%s1624_s28 + $0x120] ss:$8 sps:$4 sm:$0xff]  }
  0x1c   : > { %991 = vmatprep.subr.bf16.mxu1 %v1402_v6  ;;  %v1412_v13 = vld [vmem:[%s1624_s28 + $0x34] ss:$8 sps:$4 sm:$0xff]   ;;  %v1416_v15 = vld [vmem:[%s1624_s28 + $0x30] ss:$8 sps:$4 sm:$0xff]   ;;  %v1418_v17 = vld [vmem:[%s1624_s28 + $0x44] ss:$8 sps:$4 sm:$0xff]  }
  0x1d   : > { %v1414_v14 = vld [vmem:[%s1624_s28 + $0x134] ss:$8 sps:$4 sm:$0xff]   ;;  %v1417_v16 = vld [vmem:[%s1624_s28 + $0x130] ss:$8 sps:$4 sm:$0xff]   ;;  %v1420_v18 = vld [vmem:[%s1624_s28 + $0x144] ss:$8 sps:$4 sm:$0xff]  }
  0x1e   : > { %951 = vmatpush1.bf16.msra.mxu0 %v1404_v7  ;;  %v1422_v19 = vld [vmem:[%s1624_s28 + $0x40] ss:$8 sps:$4 sm:$0xff]   ;;  %v1424_v21 = vld [vmem:[%s1624_s28 + $0x54] ss:$8 sps:$4 sm:$0xff]   ;;  %v1428_v23 = vld [vmem:[%s1624_s28 + $0x50] ss:$8 sps:$4 sm:$0xff]  }
  0x1f   : > { %992 = vmatpush1.bf16.msra.mxu1 %v1405_v8  ;;  %952 = vmatprep.subr.bf16.mxu0 %v1406_v9  ;;  %v1423_v20 = vld [vmem:[%s1624_s28 + $0x140] ss:$8 sps:$4 sm:$0xff]   ;;  %v1426_v22 = vld [vmem:[%s1624_s28 + $0x154] ss:$8 sps:$4 sm:$0xff]   ;;  %v1429_v24 = vld [vmem:[%s1624_s28 + $0x150] ss:$8 sps:$4 sm:$0xff]  }
  0x20   : > { %993 = vmatprep.subr.bf16.mxu1 %v1408_v10  ;;  %v1430_v25 = vld [vmem:[%s1624_s28 + $0x64] ss:$8 sps:$4 sm:$0xff]   ;;  %v1434_v27 = vld [vmem:[%s1624_s28 + $0x60] ss:$8 sps:$4 sm:$0xff]   ;;  %v1436_v29 = vld [vmem:[%s1624_s28 + $0x74] ss:$8 sps:$4 sm:$0xff]  }
  0x21   : > { %v1432_v26 = vld [vmem:[%s1624_s28 + $0x164] ss:$8 sps:$4 sm:$0xff]   ;;  %v1435_v28 = vld [vmem:[%s1624_s28 + $0x160] ss:$8 sps:$4 sm:$0xff]   ;;  %v1438_v30 = vld [vmem:[%s1624_s28 + $0x174] ss:$8 sps:$4 sm:$0xff]  }
  0x22   : > { %953 = vmatpush1.bf16.msra.mxu0 %v1410_v11  ;;  %v1440_v31 = vld [vmem:[%s1624_s28 + $0x70] ss:$8 sps:$4 sm:$0xff]   ;;  %v1442_v33 = vld [vmem:[%s1624_s28 + $0x84] ss:$8 sps:$4 sm:$0xff]   ;;  %v1446_v35 = vld [vmem:[%s1624_s28 + $0x80] ss:$8 sps:$4 sm:$0xff]  }
  0x23   : > { %994 = vmatpush1.bf16.msra.mxu1 %v1411_v12  ;;  %954 = vmatprep.subr.bf16.mxu0 %v1412_v13  ;;  %v1441_v32 = vld [vmem:[%s1624_s28 + $0x170] ss:$8 sps:$4 sm:$0xff]   ;;  %v1444_v34 = vld [vmem:[%s1624_s28 + $0x184] ss:$8 sps:$4 sm:$0xff]   ;;  %v1447_v36 = vld [vmem:[%s1624_s28 + $0x180] ss:$8 sps:$4 sm:$0xff]  }
  0x24   : > { %995 = vmatprep.subr.bf16.mxu1 %v1414_v14  ;;  %v1448_v37 = vld [vmem:[%s1624_s28 + $0x94] ss:$8 sps:$4 sm:$0xff]   ;;  %v1452_v39 = vld [vmem:[%s1624_s28 + $0x90] ss:$8 sps:$4 sm:$0xff]   ;;  %v1454_v41 = vld [vmem:[%s1624_s28 + $0xa4] ss:$8 sps:$4 sm:$0xff]  }
  0x25   : > { %v1450_v38 = vld [vmem:[%s1624_s28 + $0x194] ss:$8 sps:$4 sm:$0xff]   ;;  %v1453_v40 = vld [vmem:[%s1624_s28 + $0x190] ss:$8 sps:$4 sm:$0xff]   ;;  %v1456_v42 = vld [vmem:[%s1624_s28 + $0x1a4] ss:$8 sps:$4 sm:$0xff]  }
  0x26   : > { %955 = vmatpush1.bf16.msra.mxu0 %v1416_v15  ;;  %v1458_v43 = vld [vmem:[%s1624_s28 + $0xa0] ss:$8 sps:$4 sm:$0xff]   ;;  %v1460_v45 = vld [vmem:[%s1624_s28 + $0xb4] ss:$8 sps:$4 sm:$0xff]   ;;  %v1464_v50 = vld [vmem:[%s1624_s28 + $0xb0] ss:$8 sps:$4 sm:$0xff]  }
  0x27   : > { %996 = vmatpush1.bf16.msra.mxu1 %v1417_v16  ;;  %956 = vmatprep.subr.bf16.mxu0 %v1418_v17  ;;  %v1459_v44 = vld [vmem:[%s1624_s28 + $0x1a0] ss:$8 sps:$4 sm:$0xff]   ;;  %v1462_v46 = vld [vmem:[%s1624_s28 + $0x1b4] ss:$8 sps:$4 sm:$0xff]   ;;  %v1465_v51 = vld [vmem:[%s1624_s28 + $0x1b0] ss:$8 sps:$4 sm:$0xff]  }
  0x28   : > { %997 = vmatprep.subr.bf16.mxu1 %v1420_v18  ;;  %v348_v47 = vld [vmem:[%s1619_s24] sm:$0xff]  ;;  %v349_v49 = vld [vmem:[%s1619_s24 + $0x8] sm:$0xff]  ;;  %v1472_v57 = vld [vmem:[%s1624_s28 + $0xd4] ss:$8 sps:$4 sm:$0xff]   ;;  %p1361_p7 = scmp.ne.s32.totalorder %s1558_s15, 2 }
  0x29   : > { %v1260_v48 = vcombine.high %v348_v47, %v348_v47  ;;  %v1262_v52 = vcombine.high %v349_v49, %v349_v49  ;;  %v1466_v53 = vld [vmem:[%s1624_s28 + $0xc4] ss:$8 sps:$4 sm:$0xff]   ;;  %v1470_v55 = vld [vmem:[%s1624_s28 + $0xc0] ss:$8 sps:$4 sm:$0xff]   ;;  %v1474_v58 = vld [vmem:[%s1624_s28 + $0x1d4] ss:$8 sps:$4 sm:$0xff]   ;;  %v1259_v6 = vcombine.low %v348_v47, %v348_v47  ;;  %v1261_v7 = vcombine.low %v349_v49, %v349_v49 }
  0x2a   : > { %957 = vmatpush1.bf16.msra.mxu0 %v1422_v19  ;;  %v1468_v54 = vld [vmem:[%s1624_s28 + $0x1c4] ss:$8 sps:$4 sm:$0xff]   ;;  %v1471_v56 = vld [vmem:[%s1624_s28 + $0x1c0] ss:$8 sps:$4 sm:$0xff]   ;;  %v1476_v59 = vld [vmem:[%s1624_s28 + $0xd0] ss:$8 sps:$4 sm:$0xff]  }
  0x2b   : > { %998 = vmatpush1.bf16.msra.mxu1 %v1423_v20  ;;  %958 = vmatprep.subr.bf16.mxu0 %v1424_v21  ;;  %v1477_v60 = vld [vmem:[%s1624_s28 + $0x1d0] ss:$8 sps:$4 sm:$0xff]   ;;  %v1478_v61 = vld [vmem:[%s1624_s28 + $0xe4] ss:$8 sps:$4 sm:$0xff]   ;;  %v1482_v63 = vld [vmem:[%s1624_s28 + $0xe0] ss:$8 sps:$4 sm:$0xff]  }
  0x2c   : > { %999 = vmatprep.subr.bf16.mxu1 %v1426_v22  ;;  %980 = vmatprep.mubr.bf16.mxu0 %v1260_v48  ;;  %v1480_v62 = vld [vmem:[%s1624_s28 + $0x1e4] ss:$8 sps:$4 sm:$0xff]   ;;  %v1483_v0 = vld [vmem:[%s1624_s28 + $0x1e0] ss:$8 sps:$4 sm:$0xff]   ;;  %v1484_v1 = vld [vmem:[%s1624_s28 + $0xf4] ss:$8 sps:$4 sm:$0xff]  }
  0x2d   : > { %1021 = vmatprep.mubr.bf16.mxu1 %v1262_v52  ;;  %v1486_v2 = vld [vmem:[%s1624_s28 + $0x1f4] ss:$8 sps:$4 sm:$0xff]   ;;  %v1488_v3 = vld [vmem:[%s1624_s28 + $0xf0] ss:$8 sps:$4 sm:$0xff]   ;;  %v1496_v5 = vld [vmem:[%s1624_s28 + $0x204] ss:$8 sps:$4 sm:$0xff]  }
  0x2e   : > { %959 = vmatpush1.bf16.msra.mxu0 %v1428_v23  ;;  %v1489_v4 = vld [vmem:[%s1624_s28 + $0x1f0] ss:$8 sps:$4 sm:$0xff]   ;;  %v1494_v8 = vld [vmem:[%s1624_s28 + $0x200] ss:$8 sps:$4 sm:$0xff]   ;;  %v1499_v10 = vld [vmem:[%s1624_s28 + $0x214] ss:$8 sps:$4 sm:$0xff]  }
  0x2f   : > { %1000 = vmatpush1.bf16.msra.mxu1 %v1429_v24  ;;  %960 = vmatprep.subr.bf16.mxu0 %v1430_v25  ;;  %v1696_v9 = vld [vmem:[%s1619_s24 + $0x10] sm:$0xff]  ;;  %v1502_v13 = vld [vmem:[%s1624_s28 + $0x224] ss:$8 sps:$4 sm:$0xff]   ;;  %v1500_v14 = vld [vmem:[%s1624_s28 + $0x220] ss:$8 sps:$4 sm:$0xff]  }
  0x30   : > { %1001 = vmatprep.subr.bf16.mxu1 %v1432_v26  ;;  %v1264_v11 = vcombine.high %v1696_v9, %v1696_v9  ;;  %v1497_v12 = vld [vmem:[%s1624_s28 + $0x210] ss:$8 sps:$4 sm:$0xff]   ;;  %v1505_v15 = vld [vmem:[%s1624_s28 + $0x234] ss:$8 sps:$4 sm:$0xff]   ;;  %v1508_v17 = vld [vmem:[%s1624_s28 + $0x244] ss:$8 sps:$4 sm:$0xff]  }
  0x31   : > { %v1503_v16 = vld [vmem:[%s1624_s28 + $0x230] ss:$8 sps:$4 sm:$0xff]   ;;  %v1506_v18 = vld [vmem:[%s1624_s28 + $0x240] ss:$8 sps:$4 sm:$0xff]   ;;  %v1511_v19 = vld [vmem:[%s1624_s28 + $0x254] ss:$8 sps:$4 sm:$0xff]  }
  0x32   : > { %961 = vmatpush1.bf16.msra.mxu0 %v1434_v27  ;;  %v1509_v20 = vld [vmem:[%s1624_s28 + $0x250] ss:$8 sps:$4 sm:$0xff]   ;;  %v1514_v21 = vld [vmem:[%s1624_s28 + $0x264] ss:$8 sps:$4 sm:$0xff]   ;;  %v1512_v22 = vld [vmem:[%s1624_s28 + $0x260] ss:$8 sps:$4 sm:$0xff]  }
  0x33   : > { %1002 = vmatpush1.bf16.msra.mxu1 %v1435_v28  ;;  %962 = vmatprep.subr.bf16.mxu0 %v1436_v29  ;;  %v1517_v23 = vld [vmem:[%s1624_s28 + $0x274] ss:$8 sps:$4 sm:$0xff]   ;;  %v1515_v24 = vld [vmem:[%s1624_s28 + $0x270] ss:$8 sps:$4 sm:$0xff]   ;;  %v1520_v25 = vld [vmem:[%s1624_s28 + $0x284] ss:$8 sps:$4 sm:$0xff]  }
  0x34   : > { %1003 = vmatprep.subr.bf16.mxu1 %v1438_v30  ;;  %v1518_v26 = vld [vmem:[%s1624_s28 + $0x280] ss:$8 sps:$4 sm:$0xff]   ;;  %v1523_v27 = vld [vmem:[%s1624_s28 + $0x294] ss:$8 sps:$4 sm:$0xff]   ;;  %v1521_v28 = vld [vmem:[%s1624_s28 + $0x290] ss:$8 sps:$4 sm:$0xff]  }
  0x35   : > { %v1526_v29 = vld [vmem:[%s1624_s28 + $0x2a4] ss:$8 sps:$4 sm:$0xff]   ;;  %v1524_v30 = vld [vmem:[%s1624_s28 + $0x2a0] ss:$8 sps:$4 sm:$0xff]  }
  0x36   : > { %963 = vmatpush1.bf16.msra.mxu0 %v1440_v31  ;;  %v1529_v31 = vld [vmem:[%s1624_s28 + $0x2b4] ss:$8 sps:$4 sm:$0xff]   ;;  %v346_v52 = vld [vmem:[#allocation2] sm:$0xff] }
  0x37   : > { %1004 = vmatpush1.bf16.msra.mxu1 %v1441_v32  ;;  %964 = vmatprep.subr.bf16.mxu0 %v1442_v33  ;;  %v1527_v32 = vld [vmem:[%s1624_s28 + $0x2b0] ss:$8 sps:$4 sm:$0xff]   ;;  %v1532_v33 = vld [vmem:[%s1624_s28 + $0x2c4] ss:$8 sps:$4 sm:$0xff]  }
  0x38   : > { %1005 = vmatprep.subr.bf16.mxu1 %v1444_v34  ;;  %v1530_v34 = vld [vmem:[%s1624_s28 + $0x2c0] ss:$8 sps:$4 sm:$0xff]  }
  0x3a   : > { %965 = vmatpush1.bf16.msra.mxu0 %v1446_v35  ;;  %v1535_v35 = vld [vmem:[%s1624_s28 + $0x2d4] ss:$8 sps:$4 sm:$0xff]  }
  0x3b   : > { %1006 = vmatpush1.bf16.msra.mxu1 %v1447_v36  ;;  %966 = vmatprep.subr.bf16.mxu0 %v1448_v37  ;;  %v1533_v36 = vld [vmem:[%s1624_s28 + $0x2d0] ss:$8 sps:$4 sm:$0xff]   ;;  %v1538_v37 = vld [vmem:[%s1624_s28 + $0x2e4] ss:$8 sps:$4 sm:$0xff]  }
  0x3c   : > { %1007 = vmatprep.subr.bf16.mxu1 %v1450_v38  ;;  %v1536_v38 = vld [vmem:[%s1624_s28 + $0x2e0] ss:$8 sps:$4 sm:$0xff]  }
  0x3e   : > { %967 = vmatpush1.bf16.msra.mxu0 %v1452_v39  ;;  %v1541_v39 = vld [vmem:[%s1624_s28 + $0x2f4] ss:$8 sps:$4 sm:$0xff]  }
  0x3f   : > { %1008 = vmatpush1.bf16.msra.mxu1 %v1453_v40  ;;  %968 = vmatprep.subr.bf16.mxu0 %v1454_v41  ;;  %v1539_v40 = vld [vmem:[%s1624_s28 + $0x2f0] ss:$8 sps:$4 sm:$0xff]   ;;  %v1263_v41 = vcombine.low %v1696_v9, %v1696_v9 }
  0x40   : > { %1009 = vmatprep.subr.bf16.mxu1 %v1456_v42 }
  0x42   : > { %969 = vmatpush1.bf16.msra.mxu0 %v1458_v43 }
  0x43   : > { %1010 = vmatpush1.bf16.msra.mxu1 %v1459_v44  ;;  %970 = vmatprep.subr.bf16.mxu0 %v1460_v45 }
  0x44   : > { %1011 = vmatprep.subr.bf16.mxu1 %v1462_v46 }
  0x46   : > { %971 = vmatpush1.bf16.msra.mxu0 %v1464_v50 }
  0x47   : > { %1012 = vmatpush1.bf16.msra.mxu1 %v1465_v51  ;;  %972 = vmatprep.subr.bf16.mxu0 %v1466_v53 }
  0x48   : > { %1013 = vmatprep.subr.bf16.mxu1 %v1468_v54 }
  0x4a   : > { %973 = vmatpush1.bf16.msra.mxu0 %v1470_v55  ;;  %v347_v55 = vld [vmem:[#allocation2 + $0x8] sm:$0xff] }
  0x4b   : > { %1014 = vmatpush1.bf16.msra.mxu1 %v1471_v56  ;;  %974 = vmatprep.subr.bf16.mxu0 %v1472_v57 }
  0x4c   : > { %1015 = vmatprep.subr.bf16.mxu1 %v1474_v58 }
  0x4e   : > { %975 = vmatpush1.bf16.msra.mxu0 %v1476_v59 }
  0x4f   : > { %1016 = vmatpush1.bf16.msra.mxu1 %v1477_v60  ;;  %976 = vmatprep.subr.bf16.mxu0 %v1478_v61 }
  0x50   : > { %1017 = vmatprep.subr.bf16.mxu1 %v1480_v62  ;;  %v1083_v62 = vlaneseq (!%p1361_p7) }
  0x52   : > { %977 = vmatpush1.bf16.msra.mxu0 %v1482_v63  ;;  %v1084_v63 = vshrl.u32 (!%p1361_p7), %v1083_v62, 7 }
  0x53   : > { %1018 = vmatpush1.bf16.msra.mxu1 %v1483_v0  ;;  %978 = vmatprep.subr.bf16.mxu0 %v1484_v1  ;;  %v1081_v0 = vld [vmem:[%s1753_s2] sm:$0x3] (!%p1361_p7) }
  0x54   : > { %1019 = vmatprep.subr.bf16.mxu1 %v1486_v2  ;;  %v1095_v1 = vld [vmem:[%s1754_s3] sm:$0xff] (!%p1361_p7)  ;;  %v1085_v2 = vsub.s32 (!%p1361_p7), 0, %v1084_v63 }
  0x55   : > { %v1097_v9 = vunpack.c.h.bf16 (!%p1361_p7), %v1095_v1 }
  0x56   : > { %979 = vmatpush1.bf16.msra.mxu0 %v1488_v3  ;;  %v1089_v3 = vsub.s32 (!%p1361_p7), 1, %v1084_v63 }
  0x57   : > { %1020 = vmatpush1.bf16.msra.mxu1 %v1489_v4  ;;  %1030 = vmatprep.subr.bf16.mxu0 %v1496_v5 }
  0x59   : > { %981 = vmatmul.mubr.bf16.vlgmr.msra.gmra.mrb[0].mxu0 %v1259_v6  ;;  %v1086_v6 = vrot.slane (!%p1361_p7), %v1081_v0, %v1085_v2 }
  0x5a   : > { %1022 = vmatmul.mubr.bf16.vlgmr.msra.gmra.mrb[0].mxu1 %v1261_v7  ;;  %1031 = vmatpush1.bf16.msra.mxu0 %v1494_v8  ;;  %v1090_v7 = vrot.slane (!%p1361_p7), %v1081_v0, %v1089_v3  ;;  %v1096_v8 = vunpack.c.l.bf16 (!%p1361_p7), %v1095_v1 }
  0x5b   : > { %1062 = vmatprep.mubr.bf16.mxu0 %v1264_v11  ;;  %1032 = vmatprep.subr.bf16.mxu0 %v1499_v10 }
  0x5e   : > { %1033 = vmatpush1.bf16.msra.mxu0 %v1497_v12 }
  0x5f   : > { %1034 = vmatprep.subr.bf16.mxu0 %v1502_v13 }
  0x62   : > { %1035 = vmatpush1.bf16.msra.mxu0 %v1500_v14 }
  0x63   : > { %1036 = vmatprep.subr.bf16.mxu0 %v1505_v15 }
  0x66   : > { %1037 = vmatpush1.bf16.msra.mxu0 %v1503_v16 }
  0x67   : > { %1038 = vmatprep.subr.bf16.mxu0 %v1508_v17 }
  0x6a   : > { %1039 = vmatpush1.bf16.msra.mxu0 %v1506_v18 }
  0x6b   : > { %1040 = vmatprep.subr.bf16.mxu0 %v1511_v19 }
  0x6e   : > { %1041 = vmatpush1.bf16.msra.mxu0 %v1509_v20 }
  0x6f   : > { %1042 = vmatprep.subr.bf16.mxu0 %v1514_v21 }
  0x72   : > { %1043 = vmatpush1.bf16.msra.mxu0 %v1512_v22 }
  0x73   : > { %1044 = vmatprep.subr.bf16.mxu0 %v1517_v23 }
  0x76   : > { %1045 = vmatpush1.bf16.msra.mxu0 %v1515_v24 }
  0x77   : > { %1046 = vmatprep.subr.bf16.mxu0 %v1520_v25 }
  0x7a   : > { %1047 = vmatpush1.bf16.msra.mxu0 %v1518_v26 }
  0x7b   : > { %1048 = vmatprep.subr.bf16.mxu0 %v1523_v27 }
  0x7e   : > { %1049 = vmatpush1.bf16.msra.mxu0 %v1521_v28 }
  0x7f   : > { %1050 = vmatprep.subr.bf16.mxu0 %v1526_v29 }
  0x82   : > { %1051 = vmatpush1.bf16.msra.mxu0 %v1524_v30 }
  0x83   : > { %1052 = vmatprep.subr.bf16.mxu0 %v1529_v31 }
  0x86   : > { %1053 = vmatpush1.bf16.msra.mxu0 %v1527_v32 }
  0x87   : > { %1054 = vmatprep.subr.bf16.mxu0 %v1532_v33 }
  0x8a   : > { %1055 = vmatpush1.bf16.msra.mxu0 %v1530_v34 }
  0x8b   : > { %1056 = vmatprep.subr.bf16.mxu0 %v1535_v35 }
  0x8e   : > { %1057 = vmatpush1.bf16.msra.mxu0 %v1533_v36 }
  0x8f   : > { %1058 = vmatprep.subr.bf16.mxu0 %v1538_v37 }
  0x92   : > { %1059 = vmatpush1.bf16.msra.mxu0 %v1536_v38 }
  0x93   : > { %1060 = vmatprep.subr.bf16.mxu0 %v1541_v39 }
  0x96   : > { %1061 = vmatpush1.bf16.msra.mxu0 %v1539_v40 }
  0x99   : > { %1063 = vmatmul.mubr.bf16.vlgmr.msra.gmra.mrb[4].mxu0 %v1263_v41 }
 0x12c   : > { %v982_v42 = vpop.f32.mrb[0].mxu0 }
 0x12d   : > { %v1023_v43 = vpop.f32.mrb[0].mxu1  ;;  %v984_v45 = vpop.f32.mrb[1].mxu0 }
 0x12e   : > { %v1024_v44 = vadd.f32 %v1023_v43, %v982_v42  ;;  %v1025_v46 = vpop.f32.mrb[1].mxu1  ;;  %v986_v48 = vpop.f32.mrb[2].mxu0 }
 0x12f   : > { %v1026_v47 = vadd.f32 %v1025_v46, %v984_v45  ;;  %v1027_v49 = vpop.f32.mrb[2].mxu1  ;;  %v987_v50 = vpop.f32.mrb[3].mxu0 }
 0x130   : > { %v1028_v51 = vpop.f32.mrb[3].mxu1 }
 0x16c   : > { %v1064_v53 = vpop.f32.mrb[4].mxu0  ;;  %1078 = sbr.rel (%p1361_p7) target bundleno = 387 (0x183), region = 44 }
 0x16d   : > { %v1065_v54 = vadd.f32 %v1064_v53, %v1024_v44  ;;  %v1066_v56 = vpop.f32.mrb[5].mxu0 }
 0x16e   : > { %v1067_v57 = vadd.f32 %v1066_v56, %v1026_v47  ;;  %v1068_v58 = vpop.f32.mrb[6].mxu0 }
 0x16f   : > { %v1071_v59 = vadd.f32 %v1065_v54, %v346_v52  ;;  %v1069_v60 = vpop.f32.mrb[7].mxu0 }
 0x170   : > { %v1072_v61 = vadd.f32 %v1067_v57, %v347_v55 }
 0x171   : > { %1073 = vst [vmem:[#allocation2] sm:$0xff] %v1071_v59 }
 0x172   : > { %1074 = vst [vmem:[#allocation2 + $0x8] sm:$0xff] %v1072_v61 }
 0x178   : > { %v1079_v4 = vld [vmem:[#allocation2] sm:$0xff] }
 0x179   : > { %v1080_v5 = vld [vmem:[#allocation2 + $0x8] sm:$0xff]  ;;  %v1093_v10 = vadd.f32 %v1086_v6, %v1079_v4 }
 0x17a   : > { %v1094_v11 = vadd.f32 %v1090_v7, %v1080_v5 }
 0x17b   : > { %v1098_v12 = vadd.f32 %v1096_v8, %v1093_v10 }
 0x17c   : > { %v1099_v13 = vadd.f32 %v1097_v9, %v1094_v11 }
 0x17d   : > { %v1100_v14 = vmax.f32 %v1098_v12, 0.0 }
 0x17e   : > { %v1101_v15 = vmax.f32 %v1099_v13, 0.0 }
 0x180   : > { %v1368_v16 = vpack.c.bf16 %v1101_v15, %v1100_v14 }
 0x182   : > { %1110 = vst [vmem:[%s1755_s4] sm:$0xff] %v1368_v16 }
 0x183 PF: > { %s14_s17 = sadd.s32 1, %s1566_s17   ;;  %s1756_s15 = smov %s1562_s16 }
 0x184   : > { %p11_p8 = scmp.ge.s32.totalorder %s14_s17, 5   ;;  %s1757_s16 = smov %s1759_s18 }
 0x186   :  { %13 = sbr.rel (!%p11_p8) target bundleno = 2 (0x2), region = 83 }

// kernel: _lambda_.34
= control target key start
LH: loop header
LB: loop body
LE: loop exit
PB: predicated region body
PF: predicated region fallthrough
CT: control target
= control target key end

     0   :  { %s1499_s12 = smov 0   ;;  %s1501_s13 = smov 0   ;;  %s1653_s0 = inlined_call_operand.vmem [shape: bf16[8,2304], index: 0, kind: input, shape index: {}]   ;;  %s1654_s1 = inlined_call_operand.vmem [shape: bf16[2304,256], index: 1, kind: input, shape index: {}]   ;;  %s1655_s2 = inlined_call_operand.vmem [shape: f32[1,256], index: 2, kind: input, shape index: {}]   ;;  %s1656_s3 = inlined_call_operand.vmem [shape: bf16[8,256], index: 3, kind: output, shape index: {}]  }
   0x1   :  { %s1503_s14 = smov 0  }
   0x2 LB: > { %s25_s15 = sadd.s32 1, %s1472_s13  ;;  %p1164_p0 = scmp.ge.s32.totalorder %s1476_s14, 1  ;;  %s1476_s14 = sphi %s1503_s14, %s13_s14   ;;  %s1472_s13 = sphi %s1501_s13, %s1658_s13   ;;  %s1468_s12 = sphi %s1499_s12, %s1657_s12  }
   0x3   : > { %p26_p1 = scmp.ge.s32.totalorder %s25_s15, 3  ;;  %p194_p2 = scmp.lt.s32.totalorder %s1476_s14, 4 }
   0x5   : > { %s1660_s15 = smov (%p26_p1, %s25_s15), 0  ;;  %p195_p3 = pnand %p1164_p0, %p194_p2 }
   0x6   : > { %s240_s16 = smul.u32 (!%p195_p3), 6, %s1468_s12  ;;  %p1168_p6 = scmp.ne.s32.totalorder (!%p195_p3), %s1468_s12, 0 }
   0x7   : > { %198 = sbr.rel (%p195_p3) target bundleno = 385 (0x181), region = 32 }
   0x8   : > { %s250_s17 = smul.u32 (!%p195_p3), 96, %s1468_s12  ;;  %p243_p4 = scmp.lt.s32.totalorder (!%p195_p3), %s240_s16, 17 }
   0xa   : > { %p252_p5 = scmp.lt.s32.totalorder (!%p195_p3), %s250_s17, 287 }
   0xe   : > { %s1662_s16 = smov (!%p243_p4, %s240_s16), 17  ;;  %s1664_s17 = smov (!%p252_p5, %s250_s17), 287 }
   0xf   : > { %s1165_s18 = sshll.u32 %s1662_s16, 2  ;;  %s1277_s22 = sshll.u32 %s1664_s17, 3  ;;  %v1478_v0 = vmov (!%p1168_p6), 0.0  }
  0x10   : > { %s1524_s21 = scalar_lea.vmem %s1653_s0, %s1165_s18  ;;  %s1529_s25 = scalar_lea.vmem %s1654_s1, %s1277_s22  ;;  %281 = vst [vmem:[#allocation2] sm:$0xff] (!%p1168_p6), %v1478_v0  ;;  %282 = vst [vmem:[#allocation2 + $0x8] sm:$0xff] (!%p1168_p6), %v1478_v0 }
  0x11   : > { %280 = sbr.rel (%p1168_p6) target bundleno = 24 (0x18), region = 36 }
  0x18 PF: > { %v1304_v1 = vld [vmem:[%s1529_s25 + $0x4] ss:$8 sps:$4 sm:$0xff]   ;;  %v1308_v3 = vld [vmem:[%s1529_s25] ss:$8 sps:$4 sm:$0xff]   ;;  %v1310_v5 = vld [vmem:[%s1529_s25 + $0x14] ss:$8 sps:$4 sm:$0xff]  }
  0x19   : > { %v1306_v2 = vld [vmem:[%s1529_s25 + $0x104] ss:$8 sps:$4 sm:$0xff]   ;;  %885 = vmatprep.subr.bf16.mxu0 %v1304_v1  ;;  %v1309_v4 = vld [vmem:[%s1529_s25 + $0x100] ss:$8 sps:$4 sm:$0xff]   ;;  %v1312_v6 = vld [vmem:[%s1529_s25 + $0x114] ss:$8 sps:$4 sm:$0xff]  }
  0x1a   : > { %926 = vmatprep.subr.bf16.mxu1 %v1306_v2  ;;  %886 = vmatpush1.bf16.msra.mxu0 %v1308_v3  ;;  %v1314_v7 = vld [vmem:[%s1529_s25 + $0x10] ss:$8 sps:$4 sm:$0xff]   ;;  %v1316_v9 = vld [vmem:[%s1529_s25 + $0x24] ss:$8 sps:$4 sm:$0xff]   ;;  %v1320_v11 = vld [vmem:[%s1529_s25 + $0x20] ss:$8 sps:$4 sm:$0xff]  }
  0x1b   : > { %927 = vmatpush1.bf16.msra.mxu1 %v1309_v4  ;;  %887 = vmatprep.subr.bf16.mxu0 %v1310_v5  ;;  %v1315_v8 = vld [vmem:[%s1529_s25 + $0x110] ss:$8 sps:$4 sm:$0xff]   ;;  %v1318_v10 = vld [vmem:[%s1529_s25 + $0x124] ss:$8 sps:$4 sm:$0xff]   ;;  %v1321_v12 = vld [vmem:[%s1529_s25 + $0x120] ss:$8 sps:$4 sm:$0xff]  }
  0x1c   : > { %928 = vmatprep.subr.bf16.mxu1 %v1312_v6  ;;  %v1322_v13 = vld [vmem:[%s1529_s25 + $0x34] ss:$8 sps:$4 sm:$0xff]   ;;  %v1326_v15 = vld [vmem:[%s1529_s25 + $0x30] ss:$8 sps:$4 sm:$0xff]   ;;  %v1328_v17 = vld [vmem:[%s1529_s25 + $0x44] ss:$8 sps:$4 sm:$0xff]  }
  0x1d   : > { %v1324_v14 = vld [vmem:[%s1529_s25 + $0x134] ss:$8 sps:$4 sm:$0xff]   ;;  %v1327_v16 = vld [vmem:[%s1529_s25 + $0x130] ss:$8 sps:$4 sm:$0xff]   ;;  %v1330_v18 = vld [vmem:[%s1529_s25 + $0x144] ss:$8 sps:$4 sm:$0xff]  }
  0x1e   : > { %888 = vmatpush1.bf16.msra.mxu0 %v1314_v7  ;;  %v1332_v19 = vld [vmem:[%s1529_s25 + $0x40] ss:$8 sps:$4 sm:$0xff]   ;;  %v1334_v21 = vld [vmem:[%s1529_s25 + $0x54] ss:$8 sps:$4 sm:$0xff]   ;;  %v1338_v23 = vld [vmem:[%s1529_s25 + $0x50] ss:$8 sps:$4 sm:$0xff]  }
  0x1f   : > { %929 = vmatpush1.bf16.msra.mxu1 %v1315_v8  ;;  %889 = vmatprep.subr.bf16.mxu0 %v1316_v9  ;;  %v1333_v20 = vld [vmem:[%s1529_s25 + $0x140] ss:$8 sps:$4 sm:$0xff]   ;;  %v1336_v22 = vld [vmem:[%s1529_s25 + $0x154] ss:$8 sps:$4 sm:$0xff]   ;;  %v1339_v24 = vld [vmem:[%s1529_s25 + $0x150] ss:$8 sps:$4 sm:$0xff]  }
  0x20   : > { %930 = vmatprep.subr.bf16.mxu1 %v1318_v10  ;;  %v1340_v25 = vld [vmem:[%s1529_s25 + $0x64] ss:$8 sps:$4 sm:$0xff]   ;;  %v1344_v27 = vld [vmem:[%s1529_s25 + $0x60] ss:$8 sps:$4 sm:$0xff]   ;;  %v1346_v29 = vld [vmem:[%s1529_s25 + $0x74] ss:$8 sps:$4 sm:$0xff]  }
  0x21   : > { %v1342_v26 = vld [vmem:[%s1529_s25 + $0x164] ss:$8 sps:$4 sm:$0xff]   ;;  %v1345_v28 = vld [vmem:[%s1529_s25 + $0x160] ss:$8 sps:$4 sm:$0xff]   ;;  %v1348_v30 = vld [vmem:[%s1529_s25 + $0x174] ss:$8 sps:$4 sm:$0xff]  }
  0x22   : > { %890 = vmatpush1.bf16.msra.mxu0 %v1320_v11  ;;  %v1350_v31 = vld [vmem:[%s1529_s25 + $0x70] ss:$8 sps:$4 sm:$0xff]   ;;  %v1352_v33 = vld [vmem:[%s1529_s25 + $0x84] ss:$8 sps:$4 sm:$0xff]   ;;  %v1356_v35 = vld [vmem:[%s1529_s25 + $0x80] ss:$8 sps:$4 sm:$0xff]  }
  0x23   : > { %931 = vmatpush1.bf16.msra.mxu1 %v1321_v12  ;;  %891 = vmatprep.subr.bf16.mxu0 %v1322_v13  ;;  %v1351_v32 = vld [vmem:[%s1529_s25 + $0x170] ss:$8 sps:$4 sm:$0xff]   ;;  %v1354_v34 = vld [vmem:[%s1529_s25 + $0x184] ss:$8 sps:$4 sm:$0xff]   ;;  %v1357_v36 = vld [vmem:[%s1529_s25 + $0x180] ss:$8 sps:$4 sm:$0xff]  }
  0x24   : > { %932 = vmatprep.subr.bf16.mxu1 %v1324_v14  ;;  %v1358_v37 = vld [vmem:[%s1529_s25 + $0x94] ss:$8 sps:$4 sm:$0xff]   ;;  %v1362_v39 = vld [vmem:[%s1529_s25 + $0x90] ss:$8 sps:$4 sm:$0xff]   ;;  %v1364_v41 = vld [vmem:[%s1529_s25 + $0xa4] ss:$8 sps:$4 sm:$0xff]  }
  0x25   : > { %v1360_v38 = vld [vmem:[%s1529_s25 + $0x194] ss:$8 sps:$4 sm:$0xff]   ;;  %v1363_v40 = vld [vmem:[%s1529_s25 + $0x190] ss:$8 sps:$4 sm:$0xff]   ;;  %v1366_v42 = vld [vmem:[%s1529_s25 + $0x1a4] ss:$8 sps:$4 sm:$0xff]  }
  0x26   : > { %892 = vmatpush1.bf16.msra.mxu0 %v1326_v15  ;;  %v1368_v43 = vld [vmem:[%s1529_s25 + $0xa0] ss:$8 sps:$4 sm:$0xff]   ;;  %v1370_v45 = vld [vmem:[%s1529_s25 + $0xb4] ss:$8 sps:$4 sm:$0xff]   ;;  %v1374_v50 = vld [vmem:[%s1529_s25 + $0xb0] ss:$8 sps:$4 sm:$0xff]  }
  0x27   : > { %933 = vmatpush1.bf16.msra.mxu1 %v1327_v16  ;;  %893 = vmatprep.subr.bf16.mxu0 %v1328_v17  ;;  %v1369_v44 = vld [vmem:[%s1529_s25 + $0x1a0] ss:$8 sps:$4 sm:$0xff]   ;;  %v1372_v46 = vld [vmem:[%s1529_s25 + $0x1b4] ss:$8 sps:$4 sm:$0xff]   ;;  %v1375_v51 = vld [vmem:[%s1529_s25 + $0x1b0] ss:$8 sps:$4 sm:$0xff]  }
  0x28   : > { %934 = vmatprep.subr.bf16.mxu1 %v1330_v18  ;;  %v285_v47 = vld [vmem:[%s1524_s21] sm:$0xff]  ;;  %v286_v49 = vld [vmem:[%s1524_s21 + $0x8] sm:$0xff]  ;;  %v1382_v57 = vld [vmem:[%s1529_s25 + $0xd4] ss:$8 sps:$4 sm:$0xff]   ;;  %p1271_p7 = scmp.ne.s32.totalorder %s1468_s12, 2 }
  0x29   : > { %v1170_v48 = vcombine.high %v285_v47, %v285_v47  ;;  %v1172_v52 = vcombine.high %v286_v49, %v286_v49  ;;  %v1376_v53 = vld [vmem:[%s1529_s25 + $0xc4] ss:$8 sps:$4 sm:$0xff]   ;;  %v1380_v55 = vld [vmem:[%s1529_s25 + $0xc0] ss:$8 sps:$4 sm:$0xff]   ;;  %v1384_v58 = vld [vmem:[%s1529_s25 + $0x1d4] ss:$8 sps:$4 sm:$0xff]   ;;  %v1169_v6 = vcombine.low %v285_v47, %v285_v47  ;;  %v1171_v7 = vcombine.low %v286_v49, %v286_v49 }
  0x2a   : > { %894 = vmatpush1.bf16.msra.mxu0 %v1332_v19  ;;  %v1378_v54 = vld [vmem:[%s1529_s25 + $0x1c4] ss:$8 sps:$4 sm:$0xff]   ;;  %v1381_v56 = vld [vmem:[%s1529_s25 + $0x1c0] ss:$8 sps:$4 sm:$0xff]   ;;  %v1386_v59 = vld [vmem:[%s1529_s25 + $0xd0] ss:$8 sps:$4 sm:$0xff]  }
  0x2b   : > { %935 = vmatpush1.bf16.msra.mxu1 %v1333_v20  ;;  %895 = vmatprep.subr.bf16.mxu0 %v1334_v21  ;;  %v1387_v60 = vld [vmem:[%s1529_s25 + $0x1d0] ss:$8 sps:$4 sm:$0xff]   ;;  %v1388_v61 = vld [vmem:[%s1529_s25 + $0xe4] ss:$8 sps:$4 sm:$0xff]   ;;  %v1392_v63 = vld [vmem:[%s1529_s25 + $0xe0] ss:$8 sps:$4 sm:$0xff]  }
  0x2c   : > { %936 = vmatprep.subr.bf16.mxu1 %v1336_v22  ;;  %917 = vmatprep.mubr.bf16.mxu0 %v1170_v48  ;;  %v1390_v62 = vld [vmem:[%s1529_s25 + $0x1e4] ss:$8 sps:$4 sm:$0xff]   ;;  %v1393_v0 = vld [vmem:[%s1529_s25 + $0x1e0] ss:$8 sps:$4 sm:$0xff]   ;;  %v1394_v1 = vld [vmem:[%s1529_s25 + $0xf4] ss:$8 sps:$4 sm:$0xff]  }
  0x2d   : > { %958 = vmatprep.mubr.bf16.mxu1 %v1172_v52  ;;  %v1396_v2 = vld [vmem:[%s1529_s25 + $0x1f4] ss:$8 sps:$4 sm:$0xff]   ;;  %v1398_v3 = vld [vmem:[%s1529_s25 + $0xf0] ss:$8 sps:$4 sm:$0xff]   ;;  %v1406_v5 = vld [vmem:[%s1529_s25 + $0x204] ss:$8 sps:$4 sm:$0xff]  }
  0x2e   : > { %896 = vmatpush1.bf16.msra.mxu0 %v1338_v23  ;;  %v1399_v4 = vld [vmem:[%s1529_s25 + $0x1f0] ss:$8 sps:$4 sm:$0xff]   ;;  %v1404_v8 = vld [vmem:[%s1529_s25 + $0x200] ss:$8 sps:$4 sm:$0xff]   ;;  %v1409_v10 = vld [vmem:[%s1529_s25 + $0x214] ss:$8 sps:$4 sm:$0xff]  }
  0x2f   : > { %937 = vmatpush1.bf16.msra.mxu1 %v1339_v24  ;;  %897 = vmatprep.subr.bf16.mxu0 %v1340_v25  ;;  %v1601_v9 = vld [vmem:[%s1524_s21 + $0x10] sm:$0xff]  ;;  %v1412_v13 = vld [vmem:[%s1529_s25 + $0x224] ss:$8 sps:$4 sm:$0xff]   ;;  %v1410_v14 = vld [vmem:[%s1529_s25 + $0x220] ss:$8 sps:$4 sm:$0xff]  }
  0x30   : > { %938 = vmatprep.subr.bf16.mxu1 %v1342_v26  ;;  %v1174_v11 = vcombine.high %v1601_v9, %v1601_v9  ;;  %v1407_v12 = vld [vmem:[%s1529_s25 + $0x210] ss:$8 sps:$4 sm:$0xff]   ;;  %v1415_v15 = vld [vmem:[%s1529_s25 + $0x234] ss:$8 sps:$4 sm:$0xff]   ;;  %v1418_v17 = vld [vmem:[%s1529_s25 + $0x244] ss:$8 sps:$4 sm:$0xff]  }
  0x31   : > { %v1413_v16 = vld [vmem:[%s1529_s25 + $0x230] ss:$8 sps:$4 sm:$0xff]   ;;  %v1416_v18 = vld [vmem:[%s1529_s25 + $0x240] ss:$8 sps:$4 sm:$0xff]   ;;  %v1421_v19 = vld [vmem:[%s1529_s25 + $0x254] ss:$8 sps:$4 sm:$0xff]  }
  0x32   : > { %898 = vmatpush1.bf16.msra.mxu0 %v1344_v27  ;;  %v1419_v20 = vld [vmem:[%s1529_s25 + $0x250] ss:$8 sps:$4 sm:$0xff]   ;;  %v1424_v21 = vld [vmem:[%s1529_s25 + $0x264] ss:$8 sps:$4 sm:$0xff]   ;;  %v1422_v22 = vld [vmem:[%s1529_s25 + $0x260] ss:$8 sps:$4 sm:$0xff]  }
  0x33   : > { %939 = vmatpush1.bf16.msra.mxu1 %v1345_v28  ;;  %899 = vmatprep.subr.bf16.mxu0 %v1346_v29  ;;  %v1427_v23 = vld [vmem:[%s1529_s25 + $0x274] ss:$8 sps:$4 sm:$0xff]   ;;  %v1425_v24 = vld [vmem:[%s1529_s25 + $0x270] ss:$8 sps:$4 sm:$0xff]   ;;  %v1430_v25 = vld [vmem:[%s1529_s25 + $0x284] ss:$8 sps:$4 sm:$0xff]  }
  0x34   : > { %940 = vmatprep.subr.bf16.mxu1 %v1348_v30  ;;  %v1428_v26 = vld [vmem:[%s1529_s25 + $0x280] ss:$8 sps:$4 sm:$0xff]   ;;  %v1433_v27 = vld [vmem:[%s1529_s25 + $0x294] ss:$8 sps:$4 sm:$0xff]   ;;  %v1431_v28 = vld [vmem:[%s1529_s25 + $0x290] ss:$8 sps:$4 sm:$0xff]  }
  0x35   : > { %v1436_v29 = vld [vmem:[%s1529_s25 + $0x2a4] ss:$8 sps:$4 sm:$0xff]   ;;  %v1434_v30 = vld [vmem:[%s1529_s25 + $0x2a0] ss:$8 sps:$4 sm:$0xff]  }
  0x36   : > { %900 = vmatpush1.bf16.msra.mxu0 %v1350_v31  ;;  %v1439_v31 = vld [vmem:[%s1529_s25 + $0x2b4] ss:$8 sps:$4 sm:$0xff]   ;;  %v283_v52 = vld [vmem:[#allocation2] sm:$0xff] }
  0x37   : > { %941 = vmatpush1.bf16.msra.mxu1 %v1351_v32  ;;  %901 = vmatprep.subr.bf16.mxu0 %v1352_v33  ;;  %v1437_v32 = vld [vmem:[%s1529_s25 + $0x2b0] ss:$8 sps:$4 sm:$0xff]   ;;  %v1442_v33 = vld [vmem:[%s1529_s25 + $0x2c4] ss:$8 sps:$4 sm:$0xff]  }
  0x38   : > { %942 = vmatprep.subr.bf16.mxu1 %v1354_v34  ;;  %v1440_v34 = vld [vmem:[%s1529_s25 + $0x2c0] ss:$8 sps:$4 sm:$0xff]  }
  0x3a   : > { %902 = vmatpush1.bf16.msra.mxu0 %v1356_v35  ;;  %v1445_v35 = vld [vmem:[%s1529_s25 + $0x2d4] ss:$8 sps:$4 sm:$0xff]  }
  0x3b   : > { %943 = vmatpush1.bf16.msra.mxu1 %v1357_v36  ;;  %903 = vmatprep.subr.bf16.mxu0 %v1358_v37  ;;  %v1443_v36 = vld [vmem:[%s1529_s25 + $0x2d0] ss:$8 sps:$4 sm:$0xff]   ;;  %v1448_v37 = vld [vmem:[%s1529_s25 + $0x2e4] ss:$8 sps:$4 sm:$0xff]  }
  0x3c   : > { %944 = vmatprep.subr.bf16.mxu1 %v1360_v38  ;;  %v1446_v38 = vld [vmem:[%s1529_s25 + $0x2e0] ss:$8 sps:$4 sm:$0xff]  }
  0x3e   : > { %904 = vmatpush1.bf16.msra.mxu0 %v1362_v39  ;;  %v1451_v39 = vld [vmem:[%s1529_s25 + $0x2f4] ss:$8 sps:$4 sm:$0xff]  }
  0x3f   : > { %945 = vmatpush1.bf16.msra.mxu1 %v1363_v40  ;;  %905 = vmatprep.subr.bf16.mxu0 %v1364_v41  ;;  %v1449_v40 = vld [vmem:[%s1529_s25 + $0x2f0] ss:$8 sps:$4 sm:$0xff]   ;;  %v1173_v41 = vcombine.low %v1601_v9, %v1601_v9 }
  0x40   : > { %946 = vmatprep.subr.bf16.mxu1 %v1366_v42 }
  0x42   : > { %906 = vmatpush1.bf16.msra.mxu0 %v1368_v43 }
  0x43   : > { %947 = vmatpush1.bf16.msra.mxu1 %v1369_v44  ;;  %907 = vmatprep.subr.bf16.mxu0 %v1370_v45 }
  0x44   : > { %948 = vmatprep.subr.bf16.mxu1 %v1372_v46 }
  0x46   : > { %908 = vmatpush1.bf16.msra.mxu0 %v1374_v50 }
  0x47   : > { %949 = vmatpush1.bf16.msra.mxu1 %v1375_v51  ;;  %909 = vmatprep.subr.bf16.mxu0 %v1376_v53 }
  0x48   : > { %950 = vmatprep.subr.bf16.mxu1 %v1378_v54 }
  0x4a   : > { %910 = vmatpush1.bf16.msra.mxu0 %v1380_v55  ;;  %v284_v55 = vld [vmem:[#allocation2 + $0x8] sm:$0xff] }
  0x4b   : > { %951 = vmatpush1.bf16.msra.mxu1 %v1381_v56  ;;  %911 = vmatprep.subr.bf16.mxu0 %v1382_v57 }
  0x4c   : > { %952 = vmatprep.subr.bf16.mxu1 %v1384_v58 }
  0x4e   : > { %912 = vmatpush1.bf16.msra.mxu0 %v1386_v59 }
  0x4f   : > { %953 = vmatpush1.bf16.msra.mxu1 %v1387_v60  ;;  %913 = vmatprep.subr.bf16.mxu0 %v1388_v61 }
  0x50   : > { %954 = vmatprep.subr.bf16.mxu1 %v1390_v62  ;;  %v1020_v62 = vlaneseq (!%p1271_p7) }
  0x52   : > { %914 = vmatpush1.bf16.msra.mxu0 %v1392_v63  ;;  %v1021_v63 = vshrl.u32 (!%p1271_p7), %v1020_v62, 7 }
  0x53   : > { %955 = vmatpush1.bf16.msra.mxu1 %v1393_v0  ;;  %915 = vmatprep.subr.bf16.mxu0 %v1394_v1  ;;  %v1018_v0 = vld [vmem:[%s1655_s2] sm:$0x3] (!%p1271_p7) }
  0x54   : > { %956 = vmatprep.subr.bf16.mxu1 %v1396_v2  ;;  %v1022_v1 = vsub.s32 (!%p1271_p7), 0, %v1021_v63  ;;  %v1026_v2 = vsub.s32 (!%p1271_p7), 1, %v1021_v63 }
  0x56   : > { %916 = vmatpush1.bf16.msra.mxu0 %v1398_v3 }
  0x57   : > { %957 = vmatpush1.bf16.msra.mxu1 %v1399_v4  ;;  %967 = vmatprep.subr.bf16.mxu0 %v1406_v5  ;;  %v1023_v5 = vrot.slane (!%p1271_p7), %v1018_v0, %v1022_v1 }
  0x59   : > { %918 = vmatmul.mubr.bf16.vlgmr.msra.gmra.mrb[0].mxu0 %v1169_v6  ;;  %v1027_v6 = vrot.slane (!%p1271_p7), %v1018_v0, %v1026_v2 }
  0x5a   : > { %959 = vmatmul.mubr.bf16.vlgmr.msra.gmra.mrb[0].mxu1 %v1171_v7  ;;  %968 = vmatpush1.bf16.msra.mxu0 %v1404_v8 }
  0x5b   : > { %999 = vmatprep.mubr.bf16.mxu0 %v1174_v11  ;;  %969 = vmatprep.subr.bf16.mxu0 %v1409_v10 }
  0x5e   : > { %970 = vmatpush1.bf16.msra.mxu0 %v1407_v12 }
  0x5f   : > { %971 = vmatprep.subr.bf16.mxu0 %v1412_v13 }
  0x62   : > { %972 = vmatpush1.bf16.msra.mxu0 %v1410_v14 }
  0x63   : > { %973 = vmatprep.subr.bf16.mxu0 %v1415_v15 }
  0x66   : > { %974 = vmatpush1.bf16.msra.mxu0 %v1413_v16 }
  0x67   : > { %975 = vmatprep.subr.bf16.mxu0 %v1418_v17 }
  0x6a   : > { %976 = vmatpush1.bf16.msra.mxu0 %v1416_v18 }
  0x6b   : > { %977 = vmatprep.subr.bf16.mxu0 %v1421_v19 }
  0x6e   : > { %978 = vmatpush1.bf16.msra.mxu0 %v1419_v20 }
  0x6f   : > { %979 = vmatprep.subr.bf16.mxu0 %v1424_v21 }
  0x72   : > { %980 = vmatpush1.bf16.msra.mxu0 %v1422_v22 }
  0x73   : > { %981 = vmatprep.subr.bf16.mxu0 %v1427_v23 }
  0x76   : > { %982 = vmatpush1.bf16.msra.mxu0 %v1425_v24 }
  0x77   : > { %983 = vmatprep.subr.bf16.mxu0 %v1430_v25 }
  0x7a   : > { %984 = vmatpush1.bf16.msra.mxu0 %v1428_v26 }
  0x7b   : > { %985 = vmatprep.subr.bf16.mxu0 %v1433_v27 }
  0x7e   : > { %986 = vmatpush1.bf16.msra.mxu0 %v1431_v28 }
  0x7f   : > { %987 = vmatprep.subr.bf16.mxu0 %v1436_v29 }
  0x82   : > { %988 = vmatpush1.bf16.msra.mxu0 %v1434_v30 }
  0x83   : > { %989 = vmatprep.subr.bf16.mxu0 %v1439_v31 }
  0x86   : > { %990 = vmatpush1.bf16.msra.mxu0 %v1437_v32 }
  0x87   : > { %991 = vmatprep.subr.bf16.mxu0 %v1442_v33 }
  0x8a   : > { %992 = vmatpush1.bf16.msra.mxu0 %v1440_v34 }
  0x8b   : > { %993 = vmatprep.subr.bf16.mxu0 %v1445_v35 }
  0x8e   : > { %994 = vmatpush1.bf16.msra.mxu0 %v1443_v36 }
  0x8f   : > { %995 = vmatprep.subr.bf16.mxu0 %v1448_v37 }
  0x92   : > { %996 = vmatpush1.bf16.msra.mxu0 %v1446_v38 }
  0x93   : > { %997 = vmatprep.subr.bf16.mxu0 %v1451_v39 }
  0x96   : > { %998 = vmatpush1.bf16.msra.mxu0 %v1449_v40 }
  0x99   : > { %1000 = vmatmul.mubr.bf16.vlgmr.msra.gmra.mrb[4].mxu0 %v1173_v41 }
 0x12c   : > { %v919_v42 = vpop.f32.mrb[0].mxu0 }
 0x12d   : > { %v960_v43 = vpop.f32.mrb[0].mxu1  ;;  %v921_v45 = vpop.f32.mrb[1].mxu0 }
 0x12e   : > { %v961_v44 = vadd.f32 %v960_v43, %v919_v42  ;;  %v962_v46 = vpop.f32.mrb[1].mxu1  ;;  %v923_v48 = vpop.f32.mrb[2].mxu0 }
 0x12f   : > { %v963_v47 = vadd.f32 %v962_v46, %v921_v45  ;;  %v964_v49 = vpop.f32.mrb[2].mxu1  ;;  %v924_v50 = vpop.f32.mrb[3].mxu0 }
 0x130   : > { %v965_v51 = vpop.f32.mrb[3].mxu1 }
 0x16c   : > { %v1001_v53 = vpop.f32.mrb[4].mxu0  ;;  %1015 = sbr.rel (%p1271_p7) target bundleno = 385 (0x181), region = 40 }
 0x16d   : > { %v1002_v54 = vadd.f32 %v1001_v53, %v961_v44  ;;  %v1003_v56 = vpop.f32.mrb[5].mxu0 }
 0x16e   : > { %v1004_v57 = vadd.f32 %v1003_v56, %v963_v47  ;;  %v1005_v58 = vpop.f32.mrb[6].mxu0 }
 0x16f   : > { %v1008_v59 = vadd.f32 %v1002_v54, %v283_v52  ;;  %v1006_v60 = vpop.f32.mrb[7].mxu0 }
 0x170   : > { %v1009_v61 = vadd.f32 %v1004_v57, %v284_v55 }
 0x171   : > { %1010 = vst [vmem:[#allocation2] sm:$0xff] %v1008_v59 }
 0x172   : > { %1011 = vst [vmem:[#allocation2 + $0x8] sm:$0xff] %v1009_v61 }
 0x178   : > { %v1016_v3 = vld [vmem:[#allocation2] sm:$0xff] }
 0x179   : > { %v1017_v4 = vld [vmem:[#allocation2 + $0x8] sm:$0xff]  ;;  %v1030_v7 = vadd.f32 %v1023_v5, %v1016_v3 }
 0x17a   : > { %v1031_v8 = vadd.f32 %v1027_v6, %v1017_v4 }
 0x17b   : > { %v1032_v9 = vmax.f32 %v1030_v7, 0.0 }
 0x17c   : > { %v1033_v10 = vmax.f32 %v1031_v8, 0.0 }
 0x17e   : > { %v1278_v11 = vpack.c.bf16 %v1033_v10, %v1032_v9 }
 0x180   : > { %1042 = vst [vmem:[%s1656_s3] sm:$0xff] %v1278_v11 }
 0x181 PF: > { %s13_s14 = sadd.s32 1, %s1476_s14   ;;  %s1657_s12 = smov %s1472_s13 }
 0x182   : > { %p10_p8 = scmp.ge.s32.totalorder %s13_s14, 5   ;;  %s1658_s13 = smov %s1660_s15 }
 0x184   :  { %12 = sbr.rel (!%p10_p8) target bundleno = 2 (0x2), region = 76 }

// kernel: _lambda_.36
= control target key start
LH: loop header
LB: loop body
LE: loop exit
PB: predicated region body
PF: predicated region fallthrough
CT: control target
= control target key end

     0   :  { %s1974_s12 = smov 0   ;;  %s1976_s13 = smov 0   ;;  %s2388_s0 = inlined_call_operand.vmem [shape: bf16[8,2304], index: 0, kind: input, shape index: {}]   ;;  %s2389_s1 = inlined_call_operand.vmem [shape: bf16[2304,512], index: 1, kind: input, shape index: {}]   ;;  %s2390_s2 = inlined_call_operand.vmem [shape: f32[1,512], index: 2, kind: input, shape index: {}]   ;;  %s2391_s3 = inlined_call_operand.vmem [shape: bf16[8,512], index: 3, kind: output, shape index: {}]  }
   0x1   :  { %s1978_s14 = smov 0   ;;  %s1980_s15 = smov 0  }
   0x2   :  { %s1982_s16 = smov 0   ;;  %s1984_s17 = smov 0  }
   0x3   :  { %s1986_s18 = smov 0  }
   0x4 LB: > { %s25_s19 = sadd.s32 1, %s1943_s16  ;;  %s28_s20 = sadd.s32 1, %s1947_s17  ;;  %s1951_s18 = sphi %s1986_s18, %s13_s18   ;;  %s1947_s17 = sphi %s1984_s17, %s2397_s17   ;;  %s1943_s16 = sphi %s1982_s16, %s2396_s16   ;;  %s1939_s15 = sphi %s1980_s15, %s2395_s15   ;;  %s1935_s14 = sphi %s1978_s14, %s2394_s14   ;;  %s1931_s13 = sphi %s1976_s13, %s2393_s13   ;;  %s1927_s12 = sphi %s1974_s12, %s2392_s12  }
   0x5   : > { %p26_p0 = scmp.ge.s32.totalorder %s25_s19, 3  ;;  %p76_p1 = scmp.ne.s32.totalorder %s1931_s13, %s1927_s12 }
   0x6   : > { %p77_p2 = scmp.eq.s32.totalorder %s1951_s18, 0  ;;  %s69_s24 = sadd.s32 1, %s1931_s13 }
   0x7   : > { %s2399_s19 = smov (%p26_p0, %s25_s19), 0  ;;  %s2401_s20 = smov (!%p26_p0, %s28_s20), %s1947_s17 }
   0x8   : > { %p78_p3 = por %p77_p2, %p76_p1  ;;  %p30_p4 = scmp.ge.s32.totalorder %s2401_s20, 2 }
   0x9   : > { %s64_s21 = ssub.s32 %s1943_s16, %s2399_s19  ;;  %p1570_p6 = scmp.ge.s32.totalorder %s1951_s18, 6 }
   0xa   : > { %s2403_s20 = smov (%p30_p4, %s2401_s20), 0 }
   0xb   : > { %s65_s22 = ssub.s32 %s1947_s17, %s2403_s20  ;;  %156 = sbr.rel (%p1570_p6) target bundleno = 74 (0x4a), region = 16 }
   0xc   : > { %s66_s23 = sor.u32 %s65_s22, %s64_s21 }
   0xd   : > { %p67_p5 = scmp.eq.s32.totalorder %s66_s23, 0 }
   0xf   : > { %s2025_s25 = scalar_select %p67_p5, %s1931_s13, %s69_s24  }
  0x12   : > { %172 = sbr.rel (!%p78_p3) target bundleno = 74 (0x4a), region = 24  ;;  %s174_s26 = sand.u32 (%p78_p3), 1, %s1931_s13  }
  0x13   : > { %s1688_s27 = smul.u32 (%p78_p3), 768, %s174_s26  ;;  %s1571_s28 = sshll.u32 (%p78_p3), %s1947_s17, 1 }
  0x14   : > { %s1686_s29 = smul.u32 (%p78_p3), 384, %s1943_s16 }
  0x15   : > { %s2039_s8 = scalar_lea.vmem (%p78_p3), [#allocation3], %s1688_s27 }
  0x16   : > { %s180_s30 = sadd.s32 (%p78_p3), %s1686_s29, %s1571_s28 }
  0x17   : > { %s1573_s4 = sshll.u32 (%p78_p3), %s180_s30, 2 }
  0x18   : > { %s2034_s7 = scalar_lea.vmem (%p78_p3), %s2389_s1, %s1573_s4 }
  0x19   : > { %v400_v0 = vld [vmem:[%s2034_s7] sm:$0xff]  ;;  %v402_v1 = vld [vmem:[%s2034_s7 + $0x10] sm:$0xff] }
  0x1a   : > { %v404_v2 = vld [vmem:[%s2034_s7 + $0x20] sm:$0xff]  ;;  %401 = vst [vmem:[%s2039_s8] sm:$0xff] %v400_v0  ;;  %403 = vst [vmem:[%s2039_s8 + $0x8] sm:$0xff] %v402_v1  ;;  %v406_v3 = vld [vmem:[%s2034_s7 + $0x30] sm:$0xff] }
  0x1b   : > { %405 = vst [vmem:[%s2039_s8 + $0x10] sm:$0xff] %v404_v2  ;;  %v408_v4 = vld [vmem:[%s2034_s7 + $0x40] sm:$0xff]  ;;  %v410_v5 = vld [vmem:[%s2034_s7 + $0x50] sm:$0xff]  ;;  %407 = vst [vmem:[%s2039_s8 + $0x18] sm:$0xff] %v406_v3 }
  0x1c   : > { %409 = vst [vmem:[%s2039_s8 + $0x20] sm:$0xff] %v408_v4  ;;  %411 = vst [vmem:[%s2039_s8 + $0x28] sm:$0xff] %v410_v5  ;;  %v412_v6 = vld [vmem:[%s2034_s7 + $0x60] sm:$0xff]  ;;  %v414_v7 = vld [vmem:[%s2034_s7 + $0x70] sm:$0xff] }
  0x1d   : > { %v416_v8 = vld [vmem:[%s2034_s7 + $0x80] sm:$0xff]  ;;  %413 = vst [vmem:[%s2039_s8 + $0x30] sm:$0xff] %v412_v6  ;;  %415 = vst [vmem:[%s2039_s8 + $0x38] sm:$0xff] %v414_v7  ;;  %v418_v9 = vld [vmem:[%s2034_s7 + $0x90] sm:$0xff] }
  0x1e   : > { %417 = vst [vmem:[%s2039_s8 + $0x40] sm:$0xff] %v416_v8  ;;  %v420_v10 = vld [vmem:[%s2034_s7 + $0xa0] sm:$0xff]  ;;  %v422_v11 = vld [vmem:[%s2034_s7 + $0xb0] sm:$0xff]  ;;  %419 = vst [vmem:[%s2039_s8 + $0x48] sm:$0xff] %v418_v9 }
  0x1f   : > { %421 = vst [vmem:[%s2039_s8 + $0x50] sm:$0xff] %v420_v10  ;;  %423 = vst [vmem:[%s2039_s8 + $0x58] sm:$0xff] %v422_v11  ;;  %v424_v12 = vld [vmem:[%s2034_s7 + $0xc0] sm:$0xff]  ;;  %v426_v13 = vld [vmem:[%s2034_s7 + $0xd0] sm:$0xff] }
  0x20   : > { %v428_v14 = vld [vmem:[%s2034_s7 + $0xe0] sm:$0xff]  ;;  %425 = vst [vmem:[%s2039_s8 + $0x60] sm:$0xff] %v424_v12  ;;  %427 = vst [vmem:[%s2039_s8 + $0x68] sm:$0xff] %v426_v13  ;;  %v430_v15 = vld [vmem:[%s2034_s7 + $0xf0] sm:$0xff] }
  0x21   : > { %429 = vst [vmem:[%s2039_s8 + $0x70] sm:$0xff] %v428_v14  ;;  %v432_v16 = vld [vmem:[%s2034_s7 + $0x100] sm:$0xff]  ;;  %v434_v17 = vld [vmem:[%s2034_s7 + $0x110] sm:$0xff]  ;;  %431 = vst [vmem:[%s2039_s8 + $0x78] sm:$0xff] %v430_v15 }
  0x22   : > { %433 = vst [vmem:[%s2039_s8 + $0x80] sm:$0xff] %v432_v16  ;;  %435 = vst [vmem:[%s2039_s8 + $0x88] sm:$0xff] %v434_v17  ;;  %v436_v18 = vld [vmem:[%s2034_s7 + $0x120] sm:$0xff]  ;;  %v438_v19 = vld [vmem:[%s2034_s7 + $0x130] sm:$0xff] }
  0x23   : > { %v440_v20 = vld [vmem:[%s2034_s7 + $0x140] sm:$0xff]  ;;  %437 = vst [vmem:[%s2039_s8 + $0x90] sm:$0xff] %v436_v18  ;;  %439 = vst [vmem:[%s2039_s8 + $0x98] sm:$0xff] %v438_v19  ;;  %v442_v21 = vld [vmem:[%s2034_s7 + $0x150] sm:$0xff] }
  0x24   : > { %441 = vst [vmem:[%s2039_s8 + $0xa0] sm:$0xff] %v440_v20  ;;  %v444_v22 = vld [vmem:[%s2034_s7 + $0x160] sm:$0xff]  ;;  %v446_v23 = vld [vmem:[%s2034_s7 + $0x170] sm:$0xff]  ;;  %443 = vst [vmem:[%s2039_s8 + $0xa8] sm:$0xff] %v442_v21 }
  0x25   : > { %445 = vst [vmem:[%s2039_s8 + $0xb0] sm:$0xff] %v444_v22  ;;  %447 = vst [vmem:[%s2039_s8 + $0xb8] sm:$0xff] %v446_v23  ;;  %v448_v24 = vld [vmem:[%s2034_s7 + $0x180] sm:$0xff]  ;;  %v450_v25 = vld [vmem:[%s2034_s7 + $0x190] sm:$0xff] }
  0x26   : > { %v452_v26 = vld [vmem:[%s2034_s7 + $0x1a0] sm:$0xff]  ;;  %449 = vst [vmem:[%s2039_s8 + $0xc0] sm:$0xff] %v448_v24  ;;  %451 = vst [vmem:[%s2039_s8 + $0xc8] sm:$0xff] %v450_v25  ;;  %v454_v27 = vld [vmem:[%s2034_s7 + $0x1b0] sm:$0xff] }
  0x27   : > { %453 = vst [vmem:[%s2039_s8 + $0xd0] sm:$0xff] %v452_v26  ;;  %v456_v28 = vld [vmem:[%s2034_s7 + $0x1c0] sm:$0xff]  ;;  %v458_v29 = vld [vmem:[%s2034_s7 + $0x1d0] sm:$0xff]  ;;  %455 = vst [vmem:[%s2039_s8 + $0xd8] sm:$0xff] %v454_v27 }
  0x28   : > { %457 = vst [vmem:[%s2039_s8 + $0xe0] sm:$0xff] %v456_v28  ;;  %459 = vst [vmem:[%s2039_s8 + $0xe8] sm:$0xff] %v458_v29  ;;  %v460_v30 = vld [vmem:[%s2034_s7 + $0x1e0] sm:$0xff]  ;;  %v462_v31 = vld [vmem:[%s2034_s7 + $0x1f0] sm:$0xff] }
  0x29   : > { %v464_v32 = vld [vmem:[%s2034_s7 + $0x200] sm:$0xff]  ;;  %461 = vst [vmem:[%s2039_s8 + $0xf0] sm:$0xff] %v460_v30  ;;  %463 = vst [vmem:[%s2039_s8 + $0xf8] sm:$0xff] %v462_v31  ;;  %v466_v33 = vld [vmem:[%s2034_s7 + $0x210] sm:$0xff] }
  0x2a   : > { %465 = vst [vmem:[%s2039_s8 + $0x100] sm:$0xff] %v464_v32  ;;  %v468_v34 = vld [vmem:[%s2034_s7 + $0x220] sm:$0xff]  ;;  %v470_v35 = vld [vmem:[%s2034_s7 + $0x230] sm:$0xff]  ;;  %467 = vst [vmem:[%s2039_s8 + $0x108] sm:$0xff] %v466_v33 }
  0x2b   : > { %469 = vst [vmem:[%s2039_s8 + $0x110] sm:$0xff] %v468_v34  ;;  %471 = vst [vmem:[%s2039_s8 + $0x118] sm:$0xff] %v470_v35  ;;  %v472_v36 = vld [vmem:[%s2034_s7 + $0x240] sm:$0xff]  ;;  %v474_v37 = vld [vmem:[%s2034_s7 + $0x250] sm:$0xff] }
  0x2c   : > { %v476_v38 = vld [vmem:[%s2034_s7 + $0x260] sm:$0xff]  ;;  %473 = vst [vmem:[%s2039_s8 + $0x120] sm:$0xff] %v472_v36  ;;  %475 = vst [vmem:[%s2039_s8 + $0x128] sm:$0xff] %v474_v37  ;;  %v478_v39 = vld [vmem:[%s2034_s7 + $0x270] sm:$0xff] }
  0x2d   : > { %477 = vst [vmem:[%s2039_s8 + $0x130] sm:$0xff] %v476_v38  ;;  %v480_v40 = vld [vmem:[%s2034_s7 + $0x280] sm:$0xff]  ;;  %v482_v41 = vld [vmem:[%s2034_s7 + $0x290] sm:$0xff]  ;;  %479 = vst [vmem:[%s2039_s8 + $0x138] sm:$0xff] %v478_v39 }
  0x2e   : > { %481 = vst [vmem:[%s2039_s8 + $0x140] sm:$0xff] %v480_v40  ;;  %483 = vst [vmem:[%s2039_s8 + $0x148] sm:$0xff] %v482_v41  ;;  %v484_v42 = vld [vmem:[%s2034_s7 + $0x2a0] sm:$0xff]  ;;  %v486_v43 = vld [vmem:[%s2034_s7 + $0x2b0] sm:$0xff] }
  0x2f   : > { %v488_v44 = vld [vmem:[%s2034_s7 + $0x2c0] sm:$0xff]  ;;  %485 = vst [vmem:[%s2039_s8 + $0x150] sm:$0xff] %v484_v42  ;;  %487 = vst [vmem:[%s2039_s8 + $0x158] sm:$0xff] %v486_v43  ;;  %v490_v45 = vld [vmem:[%s2034_s7 + $0x2d0] sm:$0xff] }
  0x30   : > { %489 = vst [vmem:[%s2039_s8 + $0x160] sm:$0xff] %v488_v44  ;;  %v492_v46 = vld [vmem:[%s2034_s7 + $0x2e0] sm:$0xff]  ;;  %v494_v47 = vld [vmem:[%s2034_s7 + $0x2f0] sm:$0xff]  ;;  %491 = vst [vmem:[%s2039_s8 + $0x168] sm:$0xff] %v490_v45 }
  0x31   : > { %493 = vst [vmem:[%s2039_s8 + $0x170] sm:$0xff] %v492_v46  ;;  %495 = vst [vmem:[%s2039_s8 + $0x178] sm:$0xff] %v494_v47  ;;  %v496_v48 = vld [vmem:[%s2034_s7 + $0x300] sm:$0xff]  ;;  %v498_v49 = vld [vmem:[%s2034_s7 + $0x310] sm:$0xff] }
  0x32   : > { %v500_v50 = vld [vmem:[%s2034_s7 + $0x320] sm:$0xff]  ;;  %497 = vst [vmem:[%s2039_s8 + $0x180] sm:$0xff] %v496_v48  ;;  %499 = vst [vmem:[%s2039_s8 + $0x188] sm:$0xff] %v498_v49  ;;  %v502_v51 = vld [vmem:[%s2034_s7 + $0x330] sm:$0xff] }
  0x33   : > { %501 = vst [vmem:[%s2039_s8 + $0x190] sm:$0xff] %v500_v50  ;;  %v504_v52 = vld [vmem:[%s2034_s7 + $0x340] sm:$0xff]  ;;  %v506_v53 = vld [vmem:[%s2034_s7 + $0x350] sm:$0xff]  ;;  %503 = vst [vmem:[%s2039_s8 + $0x198] sm:$0xff] %v502_v51 }
  0x34   : > { %505 = vst [vmem:[%s2039_s8 + $0x1a0] sm:$0xff] %v504_v52  ;;  %507 = vst [vmem:[%s2039_s8 + $0x1a8] sm:$0xff] %v506_v53  ;;  %v508_v54 = vld [vmem:[%s2034_s7 + $0x360] sm:$0xff]  ;;  %v510_v55 = vld [vmem:[%s2034_s7 + $0x370] sm:$0xff] }
  0x35   : > { %v512_v56 = vld [vmem:[%s2034_s7 + $0x380] sm:$0xff]  ;;  %509 = vst [vmem:[%s2039_s8 + $0x1b0] sm:$0xff] %v508_v54  ;;  %511 = vst [vmem:[%s2039_s8 + $0x1b8] sm:$0xff] %v510_v55  ;;  %v514_v57 = vld [vmem:[%s2034_s7 + $0x390] sm:$0xff] }
  0x36   : > { %513 = vst [vmem:[%s2039_s8 + $0x1c0] sm:$0xff] %v512_v56  ;;  %v516_v58 = vld [vmem:[%s2034_s7 + $0x3a0] sm:$0xff]  ;;  %v518_v59 = vld [vmem:[%s2034_s7 + $0x3b0] sm:$0xff]  ;;  %515 = vst [vmem:[%s2039_s8 + $0x1c8] sm:$0xff] %v514_v57 }
  0x37   : > { %517 = vst [vmem:[%s2039_s8 + $0x1d0] sm:$0xff] %v516_v58  ;;  %519 = vst [vmem:[%s2039_s8 + $0x1d8] sm:$0xff] %v518_v59  ;;  %v520_v60 = vld [vmem:[%s2034_s7 + $0x3c0] sm:$0xff]  ;;  %v522_v61 = vld [vmem:[%s2034_s7 + $0x3d0] sm:$0xff] }
  0x38   : > { %v524_v62 = vld [vmem:[%s2034_s7 + $0x3e0] sm:$0xff]  ;;  %521 = vst [vmem:[%s2039_s8 + $0x1e0] sm:$0xff] %v520_v60  ;;  %523 = vst [vmem:[%s2039_s8 + $0x1e8] sm:$0xff] %v522_v61  ;;  %v526_v63 = vld [vmem:[%s2034_s7 + $0x3f0] sm:$0xff] }
  0x39   : > { %525 = vst [vmem:[%s2039_s8 + $0x1f0] sm:$0xff] %v524_v62  ;;  %v528_v0 = vld [vmem:[%s2034_s7 + $0x400] sm:$0xff]  ;;  %v530_v1 = vld [vmem:[%s2034_s7 + $0x410] sm:$0xff]  ;;  %527 = vst [vmem:[%s2039_s8 + $0x1f8] sm:$0xff] %v526_v63 }
  0x3a   : > { %529 = vst [vmem:[%s2039_s8 + $0x200] sm:$0xff] %v528_v0  ;;  %531 = vst [vmem:[%s2039_s8 + $0x208] sm:$0xff] %v530_v1  ;;  %v532_v2 = vld [vmem:[%s2034_s7 + $0x420] sm:$0xff]  ;;  %v534_v3 = vld [vmem:[%s2034_s7 + $0x430] sm:$0xff] }
  0x3b   : > { %v536_v4 = vld [vmem:[%s2034_s7 + $0x440] sm:$0xff]  ;;  %533 = vst [vmem:[%s2039_s8 + $0x210] sm:$0xff] %v532_v2  ;;  %535 = vst [vmem:[%s2039_s8 + $0x218] sm:$0xff] %v534_v3  ;;  %v538_v5 = vld [vmem:[%s2034_s7 + $0x450] sm:$0xff] }
  0x3c   : > { %537 = vst [vmem:[%s2039_s8 + $0x220] sm:$0xff] %v536_v4  ;;  %v540_v6 = vld [vmem:[%s2034_s7 + $0x460] sm:$0xff]  ;;  %v542_v7 = vld [vmem:[%s2034_s7 + $0x470] sm:$0xff]  ;;  %539 = vst [vmem:[%s2039_s8 + $0x228] sm:$0xff] %v538_v5 }
  0x3d   : > { %541 = vst [vmem:[%s2039_s8 + $0x230] sm:$0xff] %v540_v6  ;;  %543 = vst [vmem:[%s2039_s8 + $0x238] sm:$0xff] %v542_v7  ;;  %v544_v8 = vld [vmem:[%s2034_s7 + $0x480] sm:$0xff]  ;;  %v546_v9 = vld [vmem:[%s2034_s7 + $0x490] sm:$0xff] }
  0x3e   : > { %v548_v10 = vld [vmem:[%s2034_s7 + $0x4a0] sm:$0xff]  ;;  %545 = vst [vmem:[%s2039_s8 + $0x240] sm:$0xff] %v544_v8  ;;  %547 = vst [vmem:[%s2039_s8 + $0x248] sm:$0xff] %v546_v9  ;;  %v550_v11 = vld [vmem:[%s2034_s7 + $0x4b0] sm:$0xff] }
  0x3f   : > { %549 = vst [vmem:[%s2039_s8 + $0x250] sm:$0xff] %v548_v10  ;;  %v552_v12 = vld [vmem:[%s2034_s7 + $0x4c0] sm:$0xff]  ;;  %v554_v13 = vld [vmem:[%s2034_s7 + $0x4d0] sm:$0xff]  ;;  %551 = vst [vmem:[%s2039_s8 + $0x258] sm:$0xff] %v550_v11 }
  0x40   : > { %553 = vst [vmem:[%s2039_s8 + $0x260] sm:$0xff] %v552_v12  ;;  %555 = vst [vmem:[%s2039_s8 + $0x268] sm:$0xff] %v554_v13  ;;  %v556_v14 = vld [vmem:[%s2034_s7 + $0x4e0] sm:$0xff]  ;;  %v558_v15 = vld [vmem:[%s2034_s7 + $0x4f0] sm:$0xff] }
  0x41   : > { %v560_v16 = vld [vmem:[%s2034_s7 + $0x500] sm:$0xff]  ;;  %557 = vst [vmem:[%s2039_s8 + $0x270] sm:$0xff] %v556_v14  ;;  %559 = vst [vmem:[%s2039_s8 + $0x278] sm:$0xff] %v558_v15  ;;  %v562_v17 = vld [vmem:[%s2034_s7 + $0x510] sm:$0xff] }
  0x42   : > { %561 = vst [vmem:[%s2039_s8 + $0x280] sm:$0xff] %v560_v16  ;;  %v564_v18 = vld [vmem:[%s2034_s7 + $0x520] sm:$0xff]  ;;  %v566_v19 = vld [vmem:[%s2034_s7 + $0x530] sm:$0xff]  ;;  %563 = vst [vmem:[%s2039_s8 + $0x288] sm:$0xff] %v562_v17 }
  0x43   : > { %565 = vst [vmem:[%s2039_s8 + $0x290] sm:$0xff] %v564_v18  ;;  %567 = vst [vmem:[%s2039_s8 + $0x298] sm:$0xff] %v566_v19  ;;  %v568_v20 = vld [vmem:[%s2034_s7 + $0x540] sm:$0xff]  ;;  %v570_v21 = vld [vmem:[%s2034_s7 + $0x550] sm:$0xff] }
  0x44   : > { %v572_v22 = vld [vmem:[%s2034_s7 + $0x560] sm:$0xff]  ;;  %569 = vst [vmem:[%s2039_s8 + $0x2a0] sm:$0xff] %v568_v20  ;;  %571 = vst [vmem:[%s2039_s8 + $0x2a8] sm:$0xff] %v570_v21  ;;  %v574_v23 = vld [vmem:[%s2034_s7 + $0x570] sm:$0xff] }
  0x45   : > { %573 = vst [vmem:[%s2039_s8 + $0x2b0] sm:$0xff] %v572_v22  ;;  %v576_v24 = vld [vmem:[%s2034_s7 + $0x580] sm:$0xff]  ;;  %v578_v25 = vld [vmem:[%s2034_s7 + $0x590] sm:$0xff]  ;;  %575 = vst [vmem:[%s2039_s8 + $0x2b8] sm:$0xff] %v574_v23 }
  0x46   : > { %577 = vst [vmem:[%s2039_s8 + $0x2c0] sm:$0xff] %v576_v24  ;;  %579 = vst [vmem:[%s2039_s8 + $0x2c8] sm:$0xff] %v578_v25  ;;  %v580_v26 = vld [vmem:[%s2034_s7 + $0x5a0] sm:$0xff]  ;;  %v582_v27 = vld [vmem:[%s2034_s7 + $0x5b0] sm:$0xff] }
  0x47   : > { %v584_v28 = vld [vmem:[%s2034_s7 + $0x5c0] sm:$0xff]  ;;  %581 = vst [vmem:[%s2039_s8 + $0x2d0] sm:$0xff] %v580_v26  ;;  %583 = vst [vmem:[%s2039_s8 + $0x2d8] sm:$0xff] %v582_v27  ;;  %v586_v29 = vld [vmem:[%s2034_s7 + $0x5d0] sm:$0xff] }
  0x48   : > { %585 = vst [vmem:[%s2039_s8 + $0x2e0] sm:$0xff] %v584_v28  ;;  %v588_v30 = vld [vmem:[%s2034_s7 + $0x5e0] sm:$0xff]  ;;  %v590_v31 = vld [vmem:[%s2034_s7 + $0x5f0] sm:$0xff]  ;;  %587 = vst [vmem:[%s2039_s8 + $0x2e8] sm:$0xff] %v586_v29 }
  0x49   : > { %589 = vst [vmem:[%s2039_s8 + $0x2f0] sm:$0xff] %v588_v30  ;;  %591 = vst [vmem:[%s2039_s8 + $0x2f8] sm:$0xff] %v590_v31 }
  0x4a PF: > { %p1574_p7 = scmp.ge.s32.totalorder %s1951_s18, 1  ;;  %p604_p8 = scmp.lt.s32.totalorder %s1951_s18, 7 }
  0x4c   : > { %p605_p9 = pnand %p1574_p7, %p604_p8 }
  0x4d   : > { %s611_s9 = sand.u32 (!%p605_p9), 1, %s1927_s12   ;;  %s651_s10 = smul.u32 (!%p605_p9), 6, %s1935_s14 }
  0x4e   : > { %608 = sbr.rel (%p605_p9) target bundleno = 456 (0x1c8), region = 66  ;;  %s1576_s21 = sshll.u32 (!%p605_p9), %s1939_s15, 1 }
  0x4f   : > { %s1689_s11 = smul.u32 (!%p605_p9), 768, %s611_s9  ;;  %p654_p10 = scmp.lt.s32.totalorder (!%p605_p9), %s651_s10, 17 }
  0x50   : > { %p664_p11 = scmp.lt.s32.totalorder (!%p605_p9), %s1576_s21, 3  ;;  %p1579_p12 = scmp.ne.s32.totalorder (!%p605_p9), %s1935_s14, 0 }
  0x51   : > { %s2252_s5 = scalar_lea.vmem (!%p605_p9), [#allocation3], %s1689_s11 }
  0x55   : > { %s2405_s10 = smov (!%p654_p10, %s651_s10), 17  ;;  %s2407_s21 = smov (!%p664_p11, %s1576_s21), 3 }
  0x56   : > { %s1575_s22 = sshll.u32 %s2405_s10, 2  ;;  %s666_s12 = scalar_lea.vmem %s2390_s2, %s2407_s21  ;;  %v1953_v32 = vmov (!%p1579_p12), 0.0  }
  0x57   : > { %s2240_s26 = scalar_lea.vmem %s2388_s0, %s1575_s22  ;;  %s1578_s29 = sshll.u32 %s2407_s21, 2  ;;  %682 = vst [vmem:[#allocation2] sm:$0xff] (!%p1579_p12), %v1953_v32  ;;  %683 = vst [vmem:[#allocation2 + $0x8] sm:$0xff] (!%p1579_p12), %v1953_v32 }
  0x58   : > { %s2250_s4 = scalar_lea.vmem %s2391_s3, %s1578_s29  ;;  %681 = sbr.rel (%p1579_p12) target bundleno = 95 (0x5f), region = 74 }
  0x5f PF: > { %v1747_v33 = vld [vmem:[%s2252_s5 + $0x4] ss:$8 sps:$4 sm:$0xff]   ;;  %v1751_v35 = vld [vmem:[%s2252_s5] ss:$8 sps:$4 sm:$0xff]   ;;  %v1753_v37 = vld [vmem:[%s2252_s5 + $0x14] ss:$8 sps:$4 sm:$0xff]  }
  0x60   : > { %v1749_v34 = vld [vmem:[%s2252_s5 + $0x104] ss:$8 sps:$4 sm:$0xff]   ;;  %1286 = vmatprep.subr.bf16.mxu0 %v1747_v33  ;;  %v1752_v36 = vld [vmem:[%s2252_s5 + $0x100] ss:$8 sps:$4 sm:$0xff]   ;;  %v1755_v38 = vld [vmem:[%s2252_s5 + $0x114] ss:$8 sps:$4 sm:$0xff]  }
  0x61   : > { %1327 = vmatprep.subr.bf16.mxu1 %v1749_v34  ;;  %1287 = vmatpush1.bf16.msra.mxu0 %v1751_v35  ;;  %v1757_v39 = vld [vmem:[%s2252_s5 + $0x10] ss:$8 sps:$4 sm:$0xff]   ;;  %v1759_v41 = vld [vmem:[%s2252_s5 + $0x24] ss:$8 sps:$4 sm:$0xff]   ;;  %v1763_v43 = vld [vmem:[%s2252_s5 + $0x20] ss:$8 sps:$4 sm:$0xff]  }
  0x62   : > { %1328 = vmatpush1.bf16.msra.mxu1 %v1752_v36  ;;  %1288 = vmatprep.subr.bf16.mxu0 %v1753_v37  ;;  %v1758_v40 = vld [vmem:[%s2252_s5 + $0x110] ss:$8 sps:$4 sm:$0xff]   ;;  %v1761_v42 = vld [vmem:[%s2252_s5 + $0x124] ss:$8 sps:$4 sm:$0xff]   ;;  %v1764_v44 = vld [vmem:[%s2252_s5 + $0x120] ss:$8 sps:$4 sm:$0xff]  }
  0x63   : > { %1329 = vmatprep.subr.bf16.mxu1 %v1755_v38  ;;  %v1765_v45 = vld [vmem:[%s2252_s5 + $0x34] ss:$8 sps:$4 sm:$0xff]   ;;  %v1769_v47 = vld [vmem:[%s2252_s5 + $0x30] ss:$8 sps:$4 sm:$0xff]   ;;  %v1771_v49 = vld [vmem:[%s2252_s5 + $0x44] ss:$8 sps:$4 sm:$0xff]  }
  0x64   : > { %v1767_v46 = vld [vmem:[%s2252_s5 + $0x134] ss:$8 sps:$4 sm:$0xff]   ;;  %v1770_v48 = vld [vmem:[%s2252_s5 + $0x130] ss:$8 sps:$4 sm:$0xff]   ;;  %v1773_v50 = vld [vmem:[%s2252_s5 + $0x144] ss:$8 sps:$4 sm:$0xff]  }
  0x65   : > { %1289 = vmatpush1.bf16.msra.mxu0 %v1757_v39  ;;  %v1775_v51 = vld [vmem:[%s2252_s5 + $0x40] ss:$8 sps:$4 sm:$0xff]   ;;  %v1777_v53 = vld [vmem:[%s2252_s5 + $0x54] ss:$8 sps:$4 sm:$0xff]   ;;  %v1781_v55 = vld [vmem:[%s2252_s5 + $0x50] ss:$8 sps:$4 sm:$0xff]  }
  0x66   : > { %1330 = vmatpush1.bf16.msra.mxu1 %v1758_v40  ;;  %1290 = vmatprep.subr.bf16.mxu0 %v1759_v41  ;;  %v1776_v52 = vld [vmem:[%s2252_s5 + $0x140] ss:$8 sps:$4 sm:$0xff]   ;;  %v1779_v54 = vld [vmem:[%s2252_s5 + $0x154] ss:$8 sps:$4 sm:$0xff]   ;;  %v1782_v56 = vld [vmem:[%s2252_s5 + $0x150] ss:$8 sps:$4 sm:$0xff]  }
  0x67   : > { %1331 = vmatprep.subr.bf16.mxu1 %v1761_v42  ;;  %v1783_v57 = vld [vmem:[%s2252_s5 + $0x64] ss:$8 sps:$4 sm:$0xff]   ;;  %v1787_v59 = vld [vmem:[%s2252_s5 + $0x60] ss:$8 sps:$4 sm:$0xff]   ;;  %v1789_v61 = vld [vmem:[%s2252_s5 + $0x74] ss:$8 sps:$4 sm:$0xff]  }
  0x68   : > { %v1785_v58 = vld [vmem:[%s2252_s5 + $0x164] ss:$8 sps:$4 sm:$0xff]   ;;  %v1788_v60 = vld [vmem:[%s2252_s5 + $0x160] ss:$8 sps:$4 sm:$0xff]   ;;  %v1791_v62 = vld [vmem:[%s2252_s5 + $0x174] ss:$8 sps:$4 sm:$0xff]  }
  0x69   : > { %1291 = vmatpush1.bf16.msra.mxu0 %v1763_v43  ;;  %v1793_v63 = vld [vmem:[%s2252_s5 + $0x70] ss:$8 sps:$4 sm:$0xff]   ;;  %v1795_v1 = vld [vmem:[%s2252_s5 + $0x84] ss:$8 sps:$4 sm:$0xff]   ;;  %v1799_v3 = vld [vmem:[%s2252_s5 + $0x80] ss:$8 sps:$4 sm:$0xff]  }
  0x6a   : > { %1332 = vmatpush1.bf16.msra.mxu1 %v1764_v44  ;;  %1292 = vmatprep.subr.bf16.mxu0 %v1765_v45  ;;  %v1794_v0 = vld [vmem:[%s2252_s5 + $0x170] ss:$8 sps:$4 sm:$0xff]   ;;  %v1797_v2 = vld [vmem:[%s2252_s5 + $0x184] ss:$8 sps:$4 sm:$0xff]   ;;  %v1800_v4 = vld [vmem:[%s2252_s5 + $0x180] ss:$8 sps:$4 sm:$0xff]  }
  0x6b   : > { %1333 = vmatprep.subr.bf16.mxu1 %v1767_v46  ;;  %v1801_v5 = vld [vmem:[%s2252_s5 + $0x94] ss:$8 sps:$4 sm:$0xff]   ;;  %v1805_v7 = vld [vmem:[%s2252_s5 + $0x90] ss:$8 sps:$4 sm:$0xff]   ;;  %v1807_v9 = vld [vmem:[%s2252_s5 + $0xa4] ss:$8 sps:$4 sm:$0xff]  }
  0x6c   : > { %v1803_v6 = vld [vmem:[%s2252_s5 + $0x194] ss:$8 sps:$4 sm:$0xff]   ;;  %v1806_v8 = vld [vmem:[%s2252_s5 + $0x190] ss:$8 sps:$4 sm:$0xff]   ;;  %v1809_v10 = vld [vmem:[%s2252_s5 + $0x1a4] ss:$8 sps:$4 sm:$0xff]  }
  0x6d   : > { %1293 = vmatpush1.bf16.msra.mxu0 %v1769_v47  ;;  %v1811_v11 = vld [vmem:[%s2252_s5 + $0xa0] ss:$8 sps:$4 sm:$0xff]   ;;  %v1813_v13 = vld [vmem:[%s2252_s5 + $0xb4] ss:$8 sps:$4 sm:$0xff]   ;;  %v1817_v18 = vld [vmem:[%s2252_s5 + $0xb0] ss:$8 sps:$4 sm:$0xff]  }
  0x6e   : > { %1334 = vmatpush1.bf16.msra.mxu1 %v1770_v48  ;;  %1294 = vmatprep.subr.bf16.mxu0 %v1771_v49  ;;  %v1812_v12 = vld [vmem:[%s2252_s5 + $0x1a0] ss:$8 sps:$4 sm:$0xff]   ;;  %v1815_v14 = vld [vmem:[%s2252_s5 + $0x1b4] ss:$8 sps:$4 sm:$0xff]   ;;  %v1818_v19 = vld [vmem:[%s2252_s5 + $0x1b0] ss:$8 sps:$4 sm:$0xff]  }
  0x6f   : > { %1335 = vmatprep.subr.bf16.mxu1 %v1773_v50  ;;  %v686_v15 = vld [vmem:[%s2240_s26] sm:$0xff]  ;;  %v687_v17 = vld [vmem:[%s2240_s26 + $0x8] sm:$0xff]  ;;  %v1819_v21 = vld [vmem:[%s2252_s5 + $0xc4] ss:$8 sps:$4 sm:$0xff]   ;;  %p1682_p13 = scmp.ne.s32.totalorder %s1935_s14, 2 }
  0x70   : > { %v1581_v16 = vcombine.high %v686_v15, %v686_v15  ;;  %v1583_v20 = vcombine.high %v687_v17, %v687_v17  ;;  %v1821_v22 = vld [vmem:[%s2252_s5 + $0x1c4] ss:$8 sps:$4 sm:$0xff]   ;;  %v1823_v23 = vld [vmem:[%s2252_s5 + $0xc0] ss:$8 sps:$4 sm:$0xff]   ;;  %v1825_v25 = vld [vmem:[%s2252_s5 + $0xd4] ss:$8 sps:$4 sm:$0xff]   ;;  %v1580_v38 = vcombine.low %v686_v15, %v686_v15  ;;  %v1582_v39 = vcombine.low %v687_v17, %v687_v17 }
  0x71   : > { %1295 = vmatpush1.bf16.msra.mxu0 %v1775_v51  ;;  %v1824_v24 = vld [vmem:[%s2252_s5 + $0x1c0] ss:$8 sps:$4 sm:$0xff]   ;;  %v1827_v26 = vld [vmem:[%s2252_s5 + $0x1d4] ss:$8 sps:$4 sm:$0xff]   ;;  %v1829_v27 = vld [vmem:[%s2252_s5 + $0xd0] ss:$8 sps:$4 sm:$0xff]  }
  0x72   : > { %1336 = vmatpush1.bf16.msra.mxu1 %v1776_v52  ;;  %1296 = vmatprep.subr.bf16.mxu0 %v1777_v53  ;;  %v1830_v28 = vld [vmem:[%s2252_s5 + $0x1d0] ss:$8 sps:$4 sm:$0xff]   ;;  %v1831_v29 = vld [vmem:[%s2252_s5 + $0xe4] ss:$8 sps:$4 sm:$0xff]   ;;  %v1835_v31 = vld [vmem:[%s2252_s5 + $0xe0] ss:$8 sps:$4 sm:$0xff]  }
  0x73   : > { %1337 = vmatprep.subr.bf16.mxu1 %v1779_v54  ;;  %1318 = vmatprep.mubr.bf16.mxu0 %v1581_v16  ;;  %v1833_v30 = vld [vmem:[%s2252_s5 + $0x1e4] ss:$8 sps:$4 sm:$0xff]   ;;  %v1836_v32 = vld [vmem:[%s2252_s5 + $0x1e0] ss:$8 sps:$4 sm:$0xff]   ;;  %v1837_v33 = vld [vmem:[%s2252_s5 + $0xf4] ss:$8 sps:$4 sm:$0xff]  }
  0x74   : > { %1359 = vmatprep.mubr.bf16.mxu1 %v1583_v20  ;;  %v1839_v34 = vld [vmem:[%s2252_s5 + $0x1f4] ss:$8 sps:$4 sm:$0xff]   ;;  %v1841_v35 = vld [vmem:[%s2252_s5 + $0xf0] ss:$8 sps:$4 sm:$0xff]   ;;  %v1849_v37 = vld [vmem:[%s2252_s5 + $0x204] ss:$8 sps:$4 sm:$0xff]  }
  0x75   : > { %1297 = vmatpush1.bf16.msra.mxu0 %v1781_v55  ;;  %v1842_v36 = vld [vmem:[%s2252_s5 + $0x1f0] ss:$8 sps:$4 sm:$0xff]   ;;  %v1847_v40 = vld [vmem:[%s2252_s5 + $0x200] ss:$8 sps:$4 sm:$0xff]   ;;  %v1852_v42 = vld [vmem:[%s2252_s5 + $0x214] ss:$8 sps:$4 sm:$0xff]  }
  0x76   : > { %1338 = vmatpush1.bf16.msra.mxu1 %v1782_v56  ;;  %1298 = vmatprep.subr.bf16.mxu0 %v1783_v57  ;;  %v2324_v41 = vld [vmem:[%s2240_s26 + $0x10] sm:$0xff]  ;;  %v1850_v44 = vld [vmem:[%s2252_s5 + $0x210] ss:$8 sps:$4 sm:$0xff]   ;;  %v1858_v47 = vld [vmem:[%s2252_s5 + $0x234] ss:$8 sps:$4 sm:$0xff]  }
  0x77   : > { %1339 = vmatprep.subr.bf16.mxu1 %v1785_v58  ;;  %v1585_v43 = vcombine.high %v2324_v41, %v2324_v41  ;;  %v1855_v45 = vld [vmem:[%s2252_s5 + $0x224] ss:$8 sps:$4 sm:$0xff]   ;;  %v1853_v46 = vld [vmem:[%s2252_s5 + $0x220] ss:$8 sps:$4 sm:$0xff]   ;;  %v1856_v48 = vld [vmem:[%s2252_s5 + $0x230] ss:$8 sps:$4 sm:$0xff]  }
  0x78   : > { %v1861_v49 = vld [vmem:[%s2252_s5 + $0x244] ss:$8 sps:$4 sm:$0xff]   ;;  %v1859_v50 = vld [vmem:[%s2252_s5 + $0x240] ss:$8 sps:$4 sm:$0xff]   ;;  %v1864_v51 = vld [vmem:[%s2252_s5 + $0x254] ss:$8 sps:$4 sm:$0xff]  }
  0x79   : > { %1299 = vmatpush1.bf16.msra.mxu0 %v1787_v59  ;;  %v1862_v52 = vld [vmem:[%s2252_s5 + $0x250] ss:$8 sps:$4 sm:$0xff]   ;;  %v1867_v53 = vld [vmem:[%s2252_s5 + $0x264] ss:$8 sps:$4 sm:$0xff]   ;;  %v1865_v54 = vld [vmem:[%s2252_s5 + $0x260] ss:$8 sps:$4 sm:$0xff]  }
  0x7a   : > { %1340 = vmatpush1.bf16.msra.mxu1 %v1788_v60  ;;  %1300 = vmatprep.subr.bf16.mxu0 %v1789_v61  ;;  %v1870_v55 = vld [vmem:[%s2252_s5 + $0x274] ss:$8 sps:$4 sm:$0xff]   ;;  %v1868_v56 = vld [vmem:[%s2252_s5 + $0x270] ss:$8 sps:$4 sm:$0xff]   ;;  %v1873_v57 = vld [vmem:[%s2252_s5 + $0x284] ss:$8 sps:$4 sm:$0xff]  }
  0x7b   : > { %1341 = vmatprep.subr.bf16.mxu1 %v1791_v62  ;;  %v1871_v58 = vld [vmem:[%s2252_s5 + $0x280] ss:$8 sps:$4 sm:$0xff]   ;;  %v1876_v59 = vld [vmem:[%s2252_s5 + $0x294] ss:$8 sps:$4 sm:$0xff]   ;;  %v1874_v60 = vld [vmem:[%s2252_s5 + $0x290] ss:$8 sps:$4 sm:$0xff]  }
  0x7c   : > { %v1879_v61 = vld [vmem:[%s2252_s5 + $0x2a4] ss:$8 sps:$4 sm:$0xff]   ;;  %v1877_v62 = vld [vmem:[%s2252_s5 + $0x2a0] ss:$8 sps:$4 sm:$0xff]   ;;  %v684_v20 = vld [vmem:[#allocation2] sm:$0xff] }
  0x7d   : > { %1301 = vmatpush1.bf16.msra.mxu0 %v1793_v63  ;;  %v1882_v63 = vld [vmem:[%s2252_s5 + $0x2b4] ss:$8 sps:$4 sm:$0xff]  }
  0x7e   : > { %1342 = vmatpush1.bf16.msra.mxu1 %v1794_v0  ;;  %1302 = vmatprep.subr.bf16.mxu0 %v1795_v1  ;;  %v1880_v0 = vld [vmem:[%s2252_s5 + $0x2b0] ss:$8 sps:$4 sm:$0xff]   ;;  %v1885_v1 = vld [vmem:[%s2252_s5 + $0x2c4] ss:$8 sps:$4 sm:$0xff]  }
  0x7f   : > { %1343 = vmatprep.subr.bf16.mxu1 %v1797_v2  ;;  %v1883_v2 = vld [vmem:[%s2252_s5 + $0x2c0] ss:$8 sps:$4 sm:$0xff]  }
  0x81   : > { %1303 = vmatpush1.bf16.msra.mxu0 %v1799_v3  ;;  %v1888_v3 = vld [vmem:[%s2252_s5 + $0x2d4] ss:$8 sps:$4 sm:$0xff]  }
  0x82   : > { %1344 = vmatpush1.bf16.msra.mxu1 %v1800_v4  ;;  %1304 = vmatprep.subr.bf16.mxu0 %v1801_v5  ;;  %v1886_v4 = vld [vmem:[%s2252_s5 + $0x2d0] ss:$8 sps:$4 sm:$0xff]   ;;  %v1891_v5 = vld [vmem:[%s2252_s5 + $0x2e4] ss:$8 sps:$4 sm:$0xff]  }
  0x83   : > { %1345 = vmatprep.subr.bf16.mxu1 %v1803_v6  ;;  %v1889_v6 = vld [vmem:[%s2252_s5 + $0x2e0] ss:$8 sps:$4 sm:$0xff]  }
  0x85   : > { %1305 = vmatpush1.bf16.msra.mxu0 %v1805_v7  ;;  %v1894_v7 = vld [vmem:[%s2252_s5 + $0x2f4] ss:$8 sps:$4 sm:$0xff]  }
  0x86   : > { %1346 = vmatpush1.bf16.msra.mxu1 %v1806_v8  ;;  %1306 = vmatprep.subr.bf16.mxu0 %v1807_v9  ;;  %v1892_v8 = vld [vmem:[%s2252_s5 + $0x2f0] ss:$8 sps:$4 sm:$0xff]   ;;  %v1584_v9 = vcombine.low %v2324_v41, %v2324_v41 }
  0x87   : > { %1347 = vmatprep.subr.bf16.mxu1 %v1809_v10 }
  0x89   : > { %1307 = vmatpush1.bf16.msra.mxu0 %v1811_v11 }
  0x8a   : > { %1348 = vmatpush1.bf16.msra.mxu1 %v1812_v12  ;;  %1308 = vmatprep.subr.bf16.mxu0 %v1813_v13 }
  0x8b   : > { %1349 = vmatprep.subr.bf16.mxu1 %v1815_v14 }
  0x8d   : > { %1309 = vmatpush1.bf16.msra.mxu0 %v1817_v18 }
  0x8e   : > { %1350 = vmatpush1.bf16.msra.mxu1 %v1818_v19  ;;  %1310 = vmatprep.subr.bf16.mxu0 %v1819_v21 }
  0x8f   : > { %1351 = vmatprep.subr.bf16.mxu1 %v1821_v22 }
  0x91   : > { %1311 = vmatpush1.bf16.msra.mxu0 %v1823_v23  ;;  %v685_v23 = vld [vmem:[#allocation2 + $0x8] sm:$0xff] }
  0x92   : > { %1352 = vmatpush1.bf16.msra.mxu1 %v1824_v24  ;;  %1312 = vmatprep.subr.bf16.mxu0 %v1825_v25 }
  0x93   : > { %1353 = vmatprep.subr.bf16.mxu1 %v1827_v26 }
  0x95   : > { %1313 = vmatpush1.bf16.msra.mxu0 %v1829_v27 }
  0x96   : > { %1354 = vmatpush1.bf16.msra.mxu1 %v1830_v28  ;;  %1314 = vmatprep.subr.bf16.mxu0 %v1831_v29 }
  0x97   : > { %1355 = vmatprep.subr.bf16.mxu1 %v1833_v30  ;;  %v1421_v30 = vlaneseq (!%p1682_p13) }
  0x99   : > { %1315 = vmatpush1.bf16.msra.mxu0 %v1835_v31  ;;  %v1422_v31 = vshrl.u32 (!%p1682_p13), %v1421_v30, 7 }
  0x9a   : > { %1356 = vmatpush1.bf16.msra.mxu1 %v1836_v32  ;;  %1316 = vmatprep.subr.bf16.mxu0 %v1837_v33  ;;  %v1419_v32 = vld [vmem:[%s666_s12] sm:$0x3] (!%p1682_p13) }
  0x9b   : > { %1357 = vmatprep.subr.bf16.mxu1 %v1839_v34  ;;  %v1423_v33 = vsub.s32 (!%p1682_p13), 0, %v1422_v31  ;;  %v1427_v34 = vsub.s32 (!%p1682_p13), 1, %v1422_v31 }
  0x9d   : > { %1317 = vmatpush1.bf16.msra.mxu0 %v1841_v35 }
  0x9e   : > { %1358 = vmatpush1.bf16.msra.mxu1 %v1842_v36  ;;  %1368 = vmatprep.subr.bf16.mxu0 %v1849_v37  ;;  %v1424_v37 = vrot.slane (!%p1682_p13), %v1419_v32, %v1423_v33 }
  0xa0   : > { %1319 = vmatmul.mubr.bf16.vlgmr.msra.gmra.mrb[0].mxu0 %v1580_v38  ;;  %v1428_v38 = vrot.slane (!%p1682_p13), %v1419_v32, %v1427_v34 }
  0xa1   : > { %1360 = vmatmul.mubr.bf16.vlgmr.msra.gmra.mrb[0].mxu1 %v1582_v39  ;;  %1369 = vmatpush1.bf16.msra.mxu0 %v1847_v40 }
  0xa2   : > { %1400 = vmatprep.mubr.bf16.mxu0 %v1585_v43  ;;  %1370 = vmatprep.subr.bf16.mxu0 %v1852_v42 }
  0xa5   : > { %1371 = vmatpush1.bf16.msra.mxu0 %v1850_v44 }
  0xa6   : > { %1372 = vmatprep.subr.bf16.mxu0 %v1855_v45 }
  0xa9   : > { %1373 = vmatpush1.bf16.msra.mxu0 %v1853_v46 }
  0xaa   : > { %1374 = vmatprep.subr.bf16.mxu0 %v1858_v47 }
  0xad   : > { %1375 = vmatpush1.bf16.msra.mxu0 %v1856_v48 }
  0xae   : > { %1376 = vmatprep.subr.bf16.mxu0 %v1861_v49 }
  0xb1   : > { %1377 = vmatpush1.bf16.msra.mxu0 %v1859_v50 }
  0xb2   : > { %1378 = vmatprep.subr.bf16.mxu0 %v1864_v51 }
  0xb5   : > { %1379 = vmatpush1.bf16.msra.mxu0 %v1862_v52 }
  0xb6   : > { %1380 = vmatprep.subr.bf16.mxu0 %v1867_v53 }
  0xb9   : > { %1381 = vmatpush1.bf16.msra.mxu0 %v1865_v54 }
  0xba   : > { %1382 = vmatprep.subr.bf16.mxu0 %v1870_v55 }
  0xbd   : > { %1383 = vmatpush1.bf16.msra.mxu0 %v1868_v56 }
  0xbe   : > { %1384 = vmatprep.subr.bf16.mxu0 %v1873_v57 }
  0xc1   : > { %1385 = vmatpush1.bf16.msra.mxu0 %v1871_v58 }
  0xc2   : > { %1386 = vmatprep.subr.bf16.mxu0 %v1876_v59 }
  0xc5   : > { %1387 = vmatpush1.bf16.msra.mxu0 %v1874_v60 }
  0xc6   : > { %1388 = vmatprep.subr.bf16.mxu0 %v1879_v61 }
  0xc9   : > { %1389 = vmatpush1.bf16.msra.mxu0 %v1877_v62 }
  0xca   : > { %1390 = vmatprep.subr.bf16.mxu0 %v1882_v63 }
  0xcd   : > { %1391 = vmatpush1.bf16.msra.mxu0 %v1880_v0 }
  0xce   : > { %1392 = vmatprep.subr.bf16.mxu0 %v1885_v1 }
  0xd1   : > { %1393 = vmatpush1.bf16.msra.mxu0 %v1883_v2 }
  0xd2   : > { %1394 = vmatprep.subr.bf16.mxu0 %v1888_v3 }
  0xd5   : > { %1395 = vmatpush1.bf16.msra.mxu0 %v1886_v4 }
  0xd6   : > { %1396 = vmatprep.subr.bf16.mxu0 %v1891_v5 }
  0xd9   : > { %1397 = vmatpush1.bf16.msra.mxu0 %v1889_v6 }
  0xda   : > { %1398 = vmatprep.subr.bf16.mxu0 %v1894_v7 }
  0xdd   : > { %1399 = vmatpush1.bf16.msra.mxu0 %v1892_v8 }
  0xe0   : > { %1401 = vmatmul.mubr.bf16.vlgmr.msra.gmra.mrb[4].mxu0 %v1584_v9 }
 0x173   : > { %v1320_v10 = vpop.f32.mrb[0].mxu0 }
 0x174   : > { %v1361_v11 = vpop.f32.mrb[0].mxu1  ;;  %v1322_v13 = vpop.f32.mrb[1].mxu0 }
 0x175   : > { %v1362_v12 = vadd.f32 %v1361_v11, %v1320_v10  ;;  %v1363_v14 = vpop.f32.mrb[1].mxu1  ;;  %v1324_v16 = vpop.f32.mrb[2].mxu0 }
 0x176   : > { %v1364_v15 = vadd.f32 %v1363_v14, %v1322_v13  ;;  %v1365_v17 = vpop.f32.mrb[2].mxu1  ;;  %v1325_v18 = vpop.f32.mrb[3].mxu0 }
 0x177   : > { %v1366_v19 = vpop.f32.mrb[3].mxu1 }
 0x1b3   : > { %v1402_v21 = vpop.f32.mrb[4].mxu0  ;;  %1416 = sbr.rel (%p1682_p13) target bundleno = 456 (0x1c8), region = 78 }
 0x1b4   : > { %v1403_v22 = vadd.f32 %v1402_v21, %v1362_v12  ;;  %v1404_v24 = vpop.f32.mrb[5].mxu0 }
 0x1b5   : > { %v1405_v25 = vadd.f32 %v1404_v24, %v1364_v15  ;;  %v1406_v26 = vpop.f32.mrb[6].mxu0 }
 0x1b6   : > { %v1409_v27 = vadd.f32 %v1403_v22, %v684_v20  ;;  %v1407_v28 = vpop.f32.mrb[7].mxu0 }
 0x1b7   : > { %v1410_v29 = vadd.f32 %v1405_v25, %v685_v23 }
 0x1b8   : > { %1411 = vst [vmem:[#allocation2] sm:$0xff] %v1409_v27 }
 0x1b9   : > { %1412 = vst [vmem:[#allocation2 + $0x8] sm:$0xff] %v1410_v29 }
 0x1bf   : > { %v1417_v35 = vld [vmem:[#allocation2] sm:$0xff] }
 0x1c0   : > { %v1418_v36 = vld [vmem:[#allocation2 + $0x8] sm:$0xff]  ;;  %v1431_v39 = vadd.f32 %v1424_v37, %v1417_v35 }
 0x1c1   : > { %v1432_v40 = vadd.f32 %v1428_v38, %v1418_v36 }
 0x1c2   : > { %v1433_v41 = vmax.f32 %v1431_v39, 0.0 }
 0x1c3   : > { %v1434_v42 = vmax.f32 %v1432_v40, 0.0 }
 0x1c5   : > { %v1687_v43 = vpack.c.bf16 %v1434_v42, %v1433_v41 }
 0x1c7   : > { %1443 = vst [vmem:[%s2250_s4] sm:$0xff] %v1687_v43 }
 0x1c8 PF: > { %s13_s18 = sadd.s32 1, %s1951_s18   ;;  %s2392_s12 = smov %s1931_s13 }
 0x1c9   : > { %p10_p0 = scmp.ge.s32.totalorder %s13_s18, 8   ;;  %s2393_s13 = smov %s2025_s25 }
 0x1ca   : > { %s2394_s14 = smov %s1943_s16  ;;  %s2395_s15 = smov %s1947_s17 }
 0x1cb   : > { %s2396_s16 = smov %s2399_s19  ;;  %s2397_s17 = smov %s2403_s20 }
 0x1cc   :  { %12 = sbr.rel (!%p10_p0) target bundleno = 4 (0x4), region = 119 }

// kernel: _lambda_.37
= control target key start
LH: loop header
LB: loop body
LE: loop exit
PB: predicated region body
PF: predicated region fallthrough
CT: control target
= control target key end

     0   :  { %s1028_s12 = smov 0   ;;  %s1030_s13 = smov 0   ;;  %s1207_s0 = inlined_call_operand.vmem [shape: bf16[8,256], index: 0, kind: input, shape index: {}]   ;;  %s1208_s1 = inlined_call_operand.vmem [shape: bf16[256,512], index: 1, kind: input, shape index: {}]   ;;  %s1209_s2 = inlined_call_operand.vmem [shape: f32[1,512], index: 2, kind: input, shape index: {}]   ;;  %s1210_s3 = inlined_call_operand.vmem [shape: bf16[8,512], index: 3, kind: output, shape index: {}]  }
   0x1   :  { %s1032_s14 = smov 0   ;;  %s1034_s15 = smov 0  }
   0x2   :  { %s1036_s16 = smov 0  }
   0x3 LB: > { %s28_s17 = sadd.s32 1, %s1002_s15  ;;  %p76_p1 = scmp.ne.s32.totalorder %s994_s13, %s990_s12  ;;  %s1006_s16 = sphi %s1036_s16, %s13_s16   ;;  %s1002_s15 = sphi %s1034_s15, %s1214_s15   ;;  %s998_s14 = sphi %s1032_s14, %s1213_s14   ;;  %s994_s13 = sphi %s1030_s13, %s1212_s13   ;;  %s990_s12 = sphi %s1028_s12, %s1211_s12  }
   0x4   : > { %p30_p0 = scmp.ge.s32.totalorder %s28_s17, 2  ;;  %p77_p2 = scmp.eq.s32.totalorder %s1006_s16, 0 }
   0x5   : > { %s69_s19 = sadd.s32 1, %s994_s13  ;;  %p830_p5 = scmp.ge.s32.totalorder %s1006_s16, 2 }
   0x6   : > { %s1216_s17 = smov (%p30_p0, %s28_s17), 0  ;;  %p78_p3 = por %p77_p2, %p76_p1 }
   0x7   : > { %s65_s18 = ssub.s32 %s1002_s15, %s1216_s17  ;;  %169 = sbr.rel (%p830_p5) target bundleno = 34 (0x22), region = 20 }
   0x8   : > { %p67_p4 = scmp.eq.s32.totalorder %s65_s18, 0 }
   0xa   : > { %s1063_s20 = scalar_select %p67_p4, %s994_s13, %s69_s19  }
   0xe   : > { %172 = sbr.rel (!%p78_p3) target bundleno = 34 (0x22), region = 24  ;;  %s174_s21 = sand.u32 (%p78_p3), 1, %s994_s13  }
   0xf   : > { %s876_s22 = sshll.u32 (%p78_p3), %s1002_s15, 3  ;;  %s831_s23 = sshll.u32 (%p78_p3), %s174_s21, 8 }
  0x10   : > { %s1071_s26 = scalar_lea.vmem (%p78_p3), %s1208_s1, %s876_s22  ;;  %s1076_s27 = scalar_lea.vmem (%p78_p3), [#allocation3], %s831_s23 }
  0x11   : > { %v272_v0 = vld [vmem:[%s1071_s26] sm:$0xff] (%p78_p3)  ;;  %v274_v1 = vld [vmem:[%s1071_s26 + $0x10] sm:$0xff] (%p78_p3) }
  0x12   : > { %v276_v2 = vld [vmem:[%s1071_s26 + $0x20] sm:$0xff] (%p78_p3)  ;;  %273 = vst [vmem:[%s1076_s27] sm:$0xff] (%p78_p3), %v272_v0  ;;  %275 = vst [vmem:[%s1076_s27 + $0x8] sm:$0xff] (%p78_p3), %v274_v1  ;;  %v278_v3 = vld [vmem:[%s1071_s26 + $0x30] sm:$0xff] (%p78_p3) }
  0x13   : > { %277 = vst [vmem:[%s1076_s27 + $0x10] sm:$0xff] (%p78_p3), %v276_v2  ;;  %v280_v4 = vld [vmem:[%s1071_s26 + $0x40] sm:$0xff] (%p78_p3)  ;;  %v282_v5 = vld [vmem:[%s1071_s26 + $0x50] sm:$0xff] (%p78_p3)  ;;  %279 = vst [vmem:[%s1076_s27 + $0x18] sm:$0xff] (%p78_p3), %v278_v3 }
  0x14   : > { %281 = vst [vmem:[%s1076_s27 + $0x20] sm:$0xff] (%p78_p3), %v280_v4  ;;  %283 = vst [vmem:[%s1076_s27 + $0x28] sm:$0xff] (%p78_p3), %v282_v5  ;;  %v284_v6 = vld [vmem:[%s1071_s26 + $0x60] sm:$0xff] (%p78_p3)  ;;  %v286_v7 = vld [vmem:[%s1071_s26 + $0x70] sm:$0xff] (%p78_p3) }
  0x15   : > { %v288_v8 = vld [vmem:[%s1071_s26 + $0x80] sm:$0xff]  ;;  %285 = vst [vmem:[%s1076_s27 + $0x30] sm:$0xff] %v284_v6  ;;  %287 = vst [vmem:[%s1076_s27 + $0x38] sm:$0xff] %v286_v7  ;;  %v290_v9 = vld [vmem:[%s1071_s26 + $0x90] sm:$0xff] }
  0x16   : > { %289 = vst [vmem:[%s1076_s27 + $0x40] sm:$0xff] %v288_v8  ;;  %v292_v10 = vld [vmem:[%s1071_s26 + $0xa0] sm:$0xff]  ;;  %v294_v11 = vld [vmem:[%s1071_s26 + $0xb0] sm:$0xff]  ;;  %291 = vst [vmem:[%s1076_s27 + $0x48] sm:$0xff] %v290_v9 }
  0x17   : > { %293 = vst [vmem:[%s1076_s27 + $0x50] sm:$0xff] %v292_v10  ;;  %295 = vst [vmem:[%s1076_s27 + $0x58] sm:$0xff] %v294_v11  ;;  %v296_v12 = vld [vmem:[%s1071_s26 + $0xc0] sm:$0xff]  ;;  %v298_v13 = vld [vmem:[%s1071_s26 + $0xd0] sm:$0xff] }
  0x18   : > { %v300_v14 = vld [vmem:[%s1071_s26 + $0xe0] sm:$0xff]  ;;  %297 = vst [vmem:[%s1076_s27 + $0x60] sm:$0xff] %v296_v12  ;;  %299 = vst [vmem:[%s1076_s27 + $0x68] sm:$0xff] %v298_v13  ;;  %v302_v15 = vld [vmem:[%s1071_s26 + $0xf0] sm:$0xff] }
  0x19   : > { %301 = vst [vmem:[%s1076_s27 + $0x70] sm:$0xff] %v300_v14  ;;  %v304_v16 = vld [vmem:[%s1071_s26 + $0x100] sm:$0xff]  ;;  %v306_v17 = vld [vmem:[%s1071_s26 + $0x110] sm:$0xff]  ;;  %303 = vst [vmem:[%s1076_s27 + $0x78] sm:$0xff] %v302_v15 }
  0x1a   : > { %305 = vst [vmem:[%s1076_s27 + $0x80] sm:$0xff] %v304_v16  ;;  %307 = vst [vmem:[%s1076_s27 + $0x88] sm:$0xff] %v306_v17  ;;  %v308_v18 = vld [vmem:[%s1071_s26 + $0x120] sm:$0xff]  ;;  %v310_v19 = vld [vmem:[%s1071_s26 + $0x130] sm:$0xff] }
  0x1b   : > { %v312_v20 = vld [vmem:[%s1071_s26 + $0x140] sm:$0xff]  ;;  %309 = vst [vmem:[%s1076_s27 + $0x90] sm:$0xff] %v308_v18  ;;  %311 = vst [vmem:[%s1076_s27 + $0x98] sm:$0xff] %v310_v19  ;;  %v314_v21 = vld [vmem:[%s1071_s26 + $0x150] sm:$0xff] }
  0x1c   : > { %313 = vst [vmem:[%s1076_s27 + $0xa0] sm:$0xff] %v312_v20  ;;  %v316_v22 = vld [vmem:[%s1071_s26 + $0x160] sm:$0xff]  ;;  %v318_v23 = vld [vmem:[%s1071_s26 + $0x170] sm:$0xff]  ;;  %315 = vst [vmem:[%s1076_s27 + $0xa8] sm:$0xff] %v314_v21 }
  0x1d   : > { %317 = vst [vmem:[%s1076_s27 + $0xb0] sm:$0xff] %v316_v22  ;;  %319 = vst [vmem:[%s1076_s27 + $0xb8] sm:$0xff] %v318_v23  ;;  %v320_v24 = vld [vmem:[%s1071_s26 + $0x180] sm:$0xff]  ;;  %v322_v25 = vld [vmem:[%s1071_s26 + $0x190] sm:$0xff] }
  0x1e   : > { %v324_v26 = vld [vmem:[%s1071_s26 + $0x1a0] sm:$0xff]  ;;  %321 = vst [vmem:[%s1076_s27 + $0xc0] sm:$0xff] %v320_v24  ;;  %323 = vst [vmem:[%s1076_s27 + $0xc8] sm:$0xff] %v322_v25  ;;  %v326_v27 = vld [vmem:[%s1071_s26 + $0x1b0] sm:$0xff] }
  0x1f   : > { %325 = vst [vmem:[%s1076_s27 + $0xd0] sm:$0xff] %v324_v26  ;;  %v328_v28 = vld [vmem:[%s1071_s26 + $0x1c0] sm:$0xff]  ;;  %v330_v29 = vld [vmem:[%s1071_s26 + $0x1d0] sm:$0xff]  ;;  %327 = vst [vmem:[%s1076_s27 + $0xd8] sm:$0xff] %v326_v27 }
  0x20   : > { %329 = vst [vmem:[%s1076_s27 + $0xe0] sm:$0xff] %v328_v28  ;;  %331 = vst [vmem:[%s1076_s27 + $0xe8] sm:$0xff] %v330_v29  ;;  %v332_v30 = vld [vmem:[%s1071_s26 + $0x1e0] sm:$0xff]  ;;  %v334_v31 = vld [vmem:[%s1071_s26 + $0x1f0] sm:$0xff] }
  0x21   : > { %333 = vst [vmem:[%s1076_s27 + $0xf0] sm:$0xff] %v332_v30  ;;  %335 = vst [vmem:[%s1076_s27 + $0xf8] sm:$0xff] %v334_v31 }
  0x22 PF: > { %p834_p6 = scmp.ge.s32.totalorder %s1006_s16, 1  ;;  %p348_p7 = scmp.lt.s32.totalorder %s1006_s16, 3 }
  0x24   : > { %p349_p8 = pnand %p834_p6, %p348_p7 }
  0x25   : > { %s355_s28 = sand.u32 (!%p349_p8), 1, %s990_s12   ;;  %v1145_v32 = vld [vmem:[%s1207_s0] sm:$0xff] (!%p349_p8)  ;;  %s836_s6 = sshll.u32 (!%p349_p8), %s998_s14, 1  ;;  %v682_v3 = vlaneseq (!%p349_p8) }
  0x26   : > { %352 = sbr.rel (%p349_p8) target bundleno = 323 (0x143), region = 66  ;;  %s835_s4 = sshll.u32 (!%p349_p8), %s355_s28, 8  ;;  %v840_v33 = vcombine.high (!%p349_p8), %v1145_v32, %v1145_v32  ;;  %v839_v2 = vcombine.low (!%p349_p8), %v1145_v32, %v1145_v32 }
  0x27   : > { %s1149_s5 = scalar_lea.vmem (!%p349_p8), [#allocation3], %s835_s4  ;;  %p408_p9 = scmp.lt.s32.totalorder (!%p349_p8), %s836_s6, 3  ;;  %v683_v4 = vshrl.u32 (!%p349_p8), %v682_v3, 7 }
  0x28   : > { %v918_v34 = vld [vmem:[%s1149_s5 + $0x4] ss:$8 sps:$4 sm:$0xff] (!%p349_p8)   ;;  %662 = vmatprep.mubr.bf16.mxu0 (!%p349_p8), %v840_v33  ;;  %v920_v35 = vld [vmem:[%s1149_s5] ss:$8 sps:$4 sm:$0xff] (!%p349_p8)   ;;  %v921_v36 = vld [vmem:[%s1149_s5 + $0x14] ss:$8 sps:$4 sm:$0xff] (!%p349_p8)  }
  0x29   : > { %630 = vmatprep.subr.bf16.mxu0 (!%p349_p8), %v918_v34  ;;  %v923_v37 = vld [vmem:[%s1149_s5 + $0x10] ss:$8 sps:$4 sm:$0xff] (!%p349_p8)   ;;  %v924_v38 = vld [vmem:[%s1149_s5 + $0x24] ss:$8 sps:$4 sm:$0xff] (!%p349_p8)   ;;  %v926_v39 = vld [vmem:[%s1149_s5 + $0x20] ss:$8 sps:$4 sm:$0xff] (!%p349_p8)  }
  0x2a   : > { %631 = vmatpush1.bf16.msra.mxu0 (!%p349_p8), %v920_v35  ;;  %v927_v40 = vld [vmem:[%s1149_s5 + $0x34] ss:$8 sps:$4 sm:$0xff] (!%p349_p8)   ;;  %v929_v41 = vld [vmem:[%s1149_s5 + $0x30] ss:$8 sps:$4 sm:$0xff] (!%p349_p8)   ;;  %v930_v42 = vld [vmem:[%s1149_s5 + $0x44] ss:$8 sps:$4 sm:$0xff] (!%p349_p8)  }
  0x2b   : > { %632 = vmatprep.subr.bf16.mxu0 (!%p349_p8), %v921_v36  ;;  %v932_v43 = vld [vmem:[%s1149_s5 + $0x40] ss:$8 sps:$4 sm:$0xff] (!%p349_p8)   ;;  %v933_v44 = vld [vmem:[%s1149_s5 + $0x54] ss:$8 sps:$4 sm:$0xff] (!%p349_p8)   ;;  %v935_v45 = vld [vmem:[%s1149_s5 + $0x50] ss:$8 sps:$4 sm:$0xff] (!%p349_p8)  }
  0x2c   : > { %v936_v46 = vld [vmem:[%s1149_s5 + $0x64] ss:$8 sps:$4 sm:$0xff] (!%p349_p8)   ;;  %v938_v47 = vld [vmem:[%s1149_s5 + $0x60] ss:$8 sps:$4 sm:$0xff] (!%p349_p8)   ;;  %v939_v48 = vld [vmem:[%s1149_s5 + $0x74] ss:$8 sps:$4 sm:$0xff] (!%p349_p8)  }
  0x2d   : > { %v941_v49 = vld [vmem:[%s1149_s5 + $0x70] ss:$8 sps:$4 sm:$0xff]   ;;  %v942_v50 = vld [vmem:[%s1149_s5 + $0x84] ss:$8 sps:$4 sm:$0xff]   ;;  %v944_v51 = vld [vmem:[%s1149_s5 + $0x80] ss:$8 sps:$4 sm:$0xff]  }
  0x2e   : > { %633 = vmatpush1.bf16.msra.mxu0 %v923_v37  ;;  %v945_v52 = vld [vmem:[%s1149_s5 + $0x94] ss:$8 sps:$4 sm:$0xff]   ;;  %v947_v53 = vld [vmem:[%s1149_s5 + $0x90] ss:$8 sps:$4 sm:$0xff]   ;;  %v948_v54 = vld [vmem:[%s1149_s5 + $0xa4] ss:$8 sps:$4 sm:$0xff]  }
  0x2f   : > { %634 = vmatprep.subr.bf16.mxu0 %v924_v38  ;;  %v950_v55 = vld [vmem:[%s1149_s5 + $0xa0] ss:$8 sps:$4 sm:$0xff]   ;;  %v951_v56 = vld [vmem:[%s1149_s5 + $0xb4] ss:$8 sps:$4 sm:$0xff]   ;;  %v953_v57 = vld [vmem:[%s1149_s5 + $0xb0] ss:$8 sps:$4 sm:$0xff]  }
  0x30   : > { %v954_v58 = vld [vmem:[%s1149_s5 + $0xc4] ss:$8 sps:$4 sm:$0xff]   ;;  %v956_v59 = vld [vmem:[%s1149_s5 + $0xc0] ss:$8 sps:$4 sm:$0xff]   ;;  %v957_v60 = vld [vmem:[%s1149_s5 + $0xd4] ss:$8 sps:$4 sm:$0xff]  }
  0x31   : > { %v959_v61 = vld [vmem:[%s1149_s5 + $0xd0] ss:$8 sps:$4 sm:$0xff]   ;;  %v960_v62 = vld [vmem:[%s1149_s5 + $0xe4] ss:$8 sps:$4 sm:$0xff]   ;;  %v962_v63 = vld [vmem:[%s1149_s5 + $0xe0] ss:$8 sps:$4 sm:$0xff]  }
  0x32   : > { %635 = vmatpush1.bf16.msra.mxu0 %v926_v39  ;;  %v963_v0 = vld [vmem:[%s1149_s5 + $0xf4] ss:$8 sps:$4 sm:$0xff]   ;;  %v965_v1 = vld [vmem:[%s1149_s5 + $0xf0] ss:$8 sps:$4 sm:$0xff]   ;;  %s1218_s6 = smov (!%p408_p9, %s836_s6), 3  ;;  %v684_v5 = vsub.s32 0, %v683_v4 }
  0x33   : > { %636 = vmatprep.subr.bf16.mxu0 %v927_v40  ;;  %s410_s9 = scalar_lea.vmem %s1209_s2, %s1218_s6  ;;  %v688_v7 = vsub.s32 1, %v683_v4  ;;  %s838_s10 = sshll.u32 %s1218_s6, 2 }
  0x34   : > { %v680_v6 = vld [vmem:[%s410_s9] sm:$0x3]  ;;  %s420_s14 = scalar_lea.vmem %s1210_s3, %s838_s10 }
  0x35   : > { %v685_v8 = vrot.slane %v680_v6, %v684_v5  ;;  %v689_v9 = vrot.slane %v680_v6, %v688_v7 }
  0x36   : > { %637 = vmatpush1.bf16.msra.mxu0 %v929_v41 }
  0x37   : > { %638 = vmatprep.subr.bf16.mxu0 %v930_v42 }
  0x3a   : > { %639 = vmatpush1.bf16.msra.mxu0 %v932_v43 }
  0x3b   : > { %640 = vmatprep.subr.bf16.mxu0 %v933_v44 }
  0x3e   : > { %641 = vmatpush1.bf16.msra.mxu0 %v935_v45 }
  0x3f   : > { %642 = vmatprep.subr.bf16.mxu0 %v936_v46 }
  0x42   : > { %643 = vmatpush1.bf16.msra.mxu0 %v938_v47 }
  0x43   : > { %644 = vmatprep.subr.bf16.mxu0 %v939_v48 }
  0x46   : > { %645 = vmatpush1.bf16.msra.mxu0 %v941_v49 }
  0x47   : > { %646 = vmatprep.subr.bf16.mxu0 %v942_v50 }
  0x4a   : > { %647 = vmatpush1.bf16.msra.mxu0 %v944_v51 }
  0x4b   : > { %648 = vmatprep.subr.bf16.mxu0 %v945_v52 }
  0x4e   : > { %649 = vmatpush1.bf16.msra.mxu0 %v947_v53 }
  0x4f   : > { %650 = vmatprep.subr.bf16.mxu0 %v948_v54 }
  0x52   : > { %651 = vmatpush1.bf16.msra.mxu0 %v950_v55 }
  0x53   : > { %652 = vmatprep.subr.bf16.mxu0 %v951_v56 }
  0x56   : > { %653 = vmatpush1.bf16.msra.mxu0 %v953_v57 }
  0x57   : > { %654 = vmatprep.subr.bf16.mxu0 %v954_v58 }
  0x5a   : > { %655 = vmatpush1.bf16.msra.mxu0 %v956_v59 }
  0x5b   : > { %656 = vmatprep.subr.bf16.mxu0 %v957_v60 }
  0x5e   : > { %657 = vmatpush1.bf16.msra.mxu0 %v959_v61 }
  0x5f   : > { %658 = vmatprep.subr.bf16.mxu0 %v960_v62 }
  0x62   : > { %659 = vmatpush1.bf16.msra.mxu0 %v962_v63 }
  0x63   : > { %660 = vmatprep.subr.bf16.mxu0 %v963_v0 }
  0x66   : > { %661 = vmatpush1.bf16.msra.mxu0 %v965_v1 }
  0x69   : > { %663 = vmatmul.mubr.bf16.vlgmr.msra.gmra.mrb[0].mxu0 %v839_v2 }
 0x13c   : > { %v664_v10 = vpop.f32.mrb[0].mxu0 }
 0x13d   : > { %v692_v11 = vadd.f32 %v685_v8, %v664_v10  ;;  %v666_v12 = vpop.f32.mrb[1].mxu0 }
 0x13e   : > { %v693_v13 = vadd.f32 %v689_v9, %v666_v12  ;;  %v668_v14 = vpop.f32.mrb[2].mxu0 }
 0x13f   : > { %v669_v15 = vpop.f32.mrb[3].mxu0 }
 0x140   : > { %v877_v16 = vpack.c.bf16 %v693_v13, %v692_v11 }
 0x142   : > { %702 = vst [vmem:[%s420_s14] sm:$0xff] %v877_v16 }
 0x143 PF: > { %s13_s16 = sadd.s32 1, %s1006_s16   ;;  %s1211_s12 = smov %s994_s13 }
 0x144   : > { %p10_p10 = scmp.ge.s32.totalorder %s13_s16, 4   ;;  %s1212_s13 = smov %s1063_s20 }
 0x145   : > { %s1213_s14 = smov %s1002_s15  ;;  %s1214_s15 = smov %s1216_s17 }
 0x146   :  { %12 = sbr.rel (!%p10_p10) target bundleno = 3 (0x3), region = 119 }

// kernel: _lambda_.38
= control target key start
LH: loop header
LB: loop body
LE: loop exit
PB: predicated region body
PF: predicated region fallthrough
CT: control target
= control target key end

     0   :  { %s2067_s15 = smov 0   ;;  %s2069_s16 = smov 0   ;;  %s2487_s0 = inlined_call_operand.vmem [shape: bf16[8,4608], index: 0, kind: input, shape index: {}]   ;;  %s2488_s1 = inlined_call_operand.vmem [shape: bf16[4608,512], index: 1, kind: input, shape index: {}]   ;;  %s2489_s2 = inlined_call_operand.vmem [shape: f32[1,512], index: 2, kind: input, shape index: {}]   ;;  %s2490_s3 = inlined_call_operand.vmem [shape: bf16[8,512], index: 3, kind: input, shape index: {}]   ;;  %s2491_s4 = inlined_call_operand.vmem [shape: bf16[8,512], index: 4, kind: output, shape index: {}]  }
   0x1   :  { %s2071_s17 = smov 0   ;;  %s2073_s18 = smov 0  }
   0x2   :  { %s2075_s19 = smov 0   ;;  %s2077_s20 = smov 0  }
   0x3   :  { %s2079_s21 = smov 0  }
   0x4 LB: > { %s26_s22 = sadd.s32 1, %s2031_s19  ;;  %s29_s23 = sadd.s32 1, %s2035_s20  ;;  %s2039_s21 = sphi %s2079_s21, %s14_s21   ;;  %s2035_s20 = sphi %s2077_s20, %s2497_s20   ;;  %s2031_s19 = sphi %s2075_s19, %s2496_s19   ;;  %s2027_s18 = sphi %s2073_s18, %s2495_s18   ;;  %s2023_s17 = sphi %s2071_s17, %s2494_s17   ;;  %s2019_s16 = sphi %s2069_s16, %s2493_s16   ;;  %s2015_s15 = sphi %s2067_s15, %s2492_s15  }
   0x5   : > { %p27_p0 = scmp.ge.s32.totalorder %s26_s22, 6  ;;  %p77_p1 = scmp.ne.s32.totalorder %s2019_s16, %s2015_s15 }
   0x6   : > { %p78_p2 = scmp.eq.s32.totalorder %s2039_s21, 0  ;;  %s70_s27 = sadd.s32 1, %s2019_s16 }
   0x7   : > { %s2499_s22 = smov (%p27_p0, %s26_s22), 0  ;;  %s2501_s23 = smov (!%p27_p0, %s29_s23), %s2035_s20 }
   0x8   : > { %p79_p3 = por %p78_p2, %p77_p1  ;;  %p31_p4 = scmp.ge.s32.totalorder %s2501_s23, 2 }
   0x9   : > { %s65_s24 = ssub.s32 %s2031_s19, %s2499_s22  ;;  %p1656_p6 = scmp.ge.s32.totalorder %s2039_s21, 12 }
   0xa   : > { %s2503_s23 = smov (%p31_p4, %s2501_s23), 0 }
   0xb   : > { %s66_s25 = ssub.s32 %s2035_s20, %s2503_s23  ;;  %185 = sbr.rel (%p1656_p6) target bundleno = 74 (0x4a), region = 16 }
   0xc   : > { %s67_s26 = sor.u32 %s66_s25, %s65_s24 }
   0xd   : > { %p68_p5 = scmp.eq.s32.totalorder %s67_s26, 0 }
   0xf   : > { %s2118_s28 = scalar_select %p68_p5, %s2019_s16, %s70_s27  }
  0x12   : > { %201 = sbr.rel (!%p79_p3) target bundleno = 74 (0x4a), region = 24  ;;  %s203_s29 = sand.u32 (%p79_p3), 1, %s2019_s16  }
  0x13   : > { %s1776_s30 = smul.u32 (%p79_p3), 768, %s203_s29  ;;  %s1657_s5 = sshll.u32 (%p79_p3), %s2035_s20, 1 }
  0x14   : > { %s1774_s6 = smul.u32 (%p79_p3), 384, %s2031_s19 }
  0x15   : > { %s2132_s12 = scalar_lea.vmem (%p79_p3), [#allocation3], %s1776_s30 }
  0x16   : > { %s209_s7 = sadd.s32 (%p79_p3), %s1774_s6, %s1657_s5 }
  0x17   : > { %s1659_s8 = sshll.u32 (%p79_p3), %s209_s7, 2 }
  0x18   : > { %s2127_s11 = scalar_lea.vmem (%p79_p3), %s2488_s1, %s1659_s8 }
  0x19   : > { %v429_v0 = vld [vmem:[%s2127_s11] sm:$0xff]  ;;  %v431_v1 = vld [vmem:[%s2127_s11 + $0x10] sm:$0xff] }
  0x1a   : > { %v433_v2 = vld [vmem:[%s2127_s11 + $0x20] sm:$0xff]  ;;  %430 = vst [vmem:[%s2132_s12] sm:$0xff] %v429_v0  ;;  %432 = vst [vmem:[%s2132_s12 + $0x8] sm:$0xff] %v431_v1  ;;  %v435_v3 = vld [vmem:[%s2127_s11 + $0x30] sm:$0xff] }
  0x1b   : > { %434 = vst [vmem:[%s2132_s12 + $0x10] sm:$0xff] %v433_v2  ;;  %v437_v4 = vld [vmem:[%s2127_s11 + $0x40] sm:$0xff]  ;;  %v439_v5 = vld [vmem:[%s2127_s11 + $0x50] sm:$0xff]  ;;  %436 = vst [vmem:[%s2132_s12 + $0x18] sm:$0xff] %v435_v3 }
  0x1c   : > { %438 = vst [vmem:[%s2132_s12 + $0x20] sm:$0xff] %v437_v4  ;;  %440 = vst [vmem:[%s2132_s12 + $0x28] sm:$0xff] %v439_v5  ;;  %v441_v6 = vld [vmem:[%s2127_s11 + $0x60] sm:$0xff]  ;;  %v443_v7 = vld [vmem:[%s2127_s11 + $0x70] sm:$0xff] }
  0x1d   : > { %v445_v8 = vld [vmem:[%s2127_s11 + $0x80] sm:$0xff]  ;;  %442 = vst [vmem:[%s2132_s12 + $0x30] sm:$0xff] %v441_v6  ;;  %444 = vst [vmem:[%s2132_s12 + $0x38] sm:$0xff] %v443_v7  ;;  %v447_v9 = vld [vmem:[%s2127_s11 + $0x90] sm:$0xff] }
  0x1e   : > { %446 = vst [vmem:[%s2132_s12 + $0x40] sm:$0xff] %v445_v8  ;;  %v449_v10 = vld [vmem:[%s2127_s11 + $0xa0] sm:$0xff]  ;;  %v451_v11 = vld [vmem:[%s2127_s11 + $0xb0] sm:$0xff]  ;;  %448 = vst [vmem:[%s2132_s12 + $0x48] sm:$0xff] %v447_v9 }
  0x1f   : > { %450 = vst [vmem:[%s2132_s12 + $0x50] sm:$0xff] %v449_v10  ;;  %452 = vst [vmem:[%s2132_s12 + $0x58] sm:$0xff] %v451_v11  ;;  %v453_v12 = vld [vmem:[%s2127_s11 + $0xc0] sm:$0xff]  ;;  %v455_v13 = vld [vmem:[%s2127_s11 + $0xd0] sm:$0xff] }
  0x20   : > { %v457_v14 = vld [vmem:[%s2127_s11 + $0xe0] sm:$0xff]  ;;  %454 = vst [vmem:[%s2132_s12 + $0x60] sm:$0xff] %v453_v12  ;;  %456 = vst [vmem:[%s2132_s12 + $0x68] sm:$0xff] %v455_v13  ;;  %v459_v15 = vld [vmem:[%s2127_s11 + $0xf0] sm:$0xff] }
  0x21   : > { %458 = vst [vmem:[%s2132_s12 + $0x70] sm:$0xff] %v457_v14  ;;  %v461_v16 = vld [vmem:[%s2127_s11 + $0x100] sm:$0xff]  ;;  %v463_v17 = vld [vmem:[%s2127_s11 + $0x110] sm:$0xff]  ;;  %460 = vst [vmem:[%s2132_s12 + $0x78] sm:$0xff] %v459_v15 }
  0x22   : > { %462 = vst [vmem:[%s2132_s12 + $0x80] sm:$0xff] %v461_v16  ;;  %464 = vst [vmem:[%s2132_s12 + $0x88] sm:$0xff] %v463_v17  ;;  %v465_v18 = vld [vmem:[%s2127_s11 + $0x120] sm:$0xff]  ;;  %v467_v19 = vld [vmem:[%s2127_s11 + $0x130] sm:$0xff] }
  0x23   : > { %v469_v20 = vld [vmem:[%s2127_s11 + $0x140] sm:$0xff]  ;;  %466 = vst [vmem:[%s2132_s12 + $0x90] sm:$0xff] %v465_v18  ;;  %468 = vst [vmem:[%s2132_s12 + $0x98] sm:$0xff] %v467_v19  ;;  %v471_v21 = vld [vmem:[%s2127_s11 + $0x150] sm:$0xff] }
  0x24   : > { %470 = vst [vmem:[%s2132_s12 + $0xa0] sm:$0xff] %v469_v20  ;;  %v473_v22 = vld [vmem:[%s2127_s11 + $0x160] sm:$0xff]  ;;  %v475_v23 = vld [vmem:[%s2127_s11 + $0x170] sm:$0xff]  ;;  %472 = vst [vmem:[%s2132_s12 + $0xa8] sm:$0xff] %v471_v21 }
  0x25   : > { %474 = vst [vmem:[%s2132_s12 + $0xb0] sm:$0xff] %v473_v22  ;;  %476 = vst [vmem:[%s2132_s12 + $0xb8] sm:$0xff] %v475_v23  ;;  %v477_v24 = vld [vmem:[%s2127_s11 + $0x180] sm:$0xff]  ;;  %v479_v25 = vld [vmem:[%s2127_s11 + $0x190] sm:$0xff] }
  0x26   : > { %v481_v26 = vld [vmem:[%s2127_s11 + $0x1a0] sm:$0xff]  ;;  %478 = vst [vmem:[%s2132_s12 + $0xc0] sm:$0xff] %v477_v24  ;;  %480 = vst [vmem:[%s2132_s12 + $0xc8] sm:$0xff] %v479_v25  ;;  %v483_v27 = vld [vmem:[%s2127_s11 + $0x1b0] sm:$0xff] }
  0x27   : > { %482 = vst [vmem:[%s2132_s12 + $0xd0] sm:$0xff] %v481_v26  ;;  %v485_v28 = vld [vmem:[%s2127_s11 + $0x1c0] sm:$0xff]  ;;  %v487_v29 = vld [vmem:[%s2127_s11 + $0x1d0] sm:$0xff]  ;;  %484 = vst [vmem:[%s2132_s12 + $0xd8] sm:$0xff] %v483_v27 }
  0x28   : > { %486 = vst [vmem:[%s2132_s12 + $0xe0] sm:$0xff] %v485_v28  ;;  %488 = vst [vmem:[%s2132_s12 + $0xe8] sm:$0xff] %v487_v29  ;;  %v489_v30 = vld [vmem:[%s2127_s11 + $0x1e0] sm:$0xff]  ;;  %v491_v31 = vld [vmem:[%s2127_s11 + $0x1f0] sm:$0xff] }
  0x29   : > { %v493_v32 = vld [vmem:[%s2127_s11 + $0x200] sm:$0xff]  ;;  %490 = vst [vmem:[%s2132_s12 + $0xf0] sm:$0xff] %v489_v30  ;;  %492 = vst [vmem:[%s2132_s12 + $0xf8] sm:$0xff] %v491_v31  ;;  %v495_v33 = vld [vmem:[%s2127_s11 + $0x210] sm:$0xff] }
  0x2a   : > { %494 = vst [vmem:[%s2132_s12 + $0x100] sm:$0xff] %v493_v32  ;;  %v497_v34 = vld [vmem:[%s2127_s11 + $0x220] sm:$0xff]  ;;  %v499_v35 = vld [vmem:[%s2127_s11 + $0x230] sm:$0xff]  ;;  %496 = vst [vmem:[%s2132_s12 + $0x108] sm:$0xff] %v495_v33 }
  0x2b   : > { %498 = vst [vmem:[%s2132_s12 + $0x110] sm:$0xff] %v497_v34  ;;  %500 = vst [vmem:[%s2132_s12 + $0x118] sm:$0xff] %v499_v35  ;;  %v501_v36 = vld [vmem:[%s2127_s11 + $0x240] sm:$0xff]  ;;  %v503_v37 = vld [vmem:[%s2127_s11 + $0x250] sm:$0xff] }
  0x2c   : > { %v505_v38 = vld [vmem:[%s2127_s11 + $0x260] sm:$0xff]  ;;  %502 = vst [vmem:[%s2132_s12 + $0x120] sm:$0xff] %v501_v36  ;;  %504 = vst [vmem:[%s2132_s12 + $0x128] sm:$0xff] %v503_v37  ;;  %v507_v39 = vld [vmem:[%s2127_s11 + $0x270] sm:$0xff] }
  0x2d   : > { %506 = vst [vmem:[%s2132_s12 + $0x130] sm:$0xff] %v505_v38  ;;  %v509_v40 = vld [vmem:[%s2127_s11 + $0x280] sm:$0xff]  ;;  %v511_v41 = vld [vmem:[%s2127_s11 + $0x290] sm:$0xff]  ;;  %508 = vst [vmem:[%s2132_s12 + $0x138] sm:$0xff] %v507_v39 }
  0x2e   : > { %510 = vst [vmem:[%s2132_s12 + $0x140] sm:$0xff] %v509_v40  ;;  %512 = vst [vmem:[%s2132_s12 + $0x148] sm:$0xff] %v511_v41  ;;  %v513_v42 = vld [vmem:[%s2127_s11 + $0x2a0] sm:$0xff]  ;;  %v515_v43 = vld [vmem:[%s2127_s11 + $0x2b0] sm:$0xff] }
  0x2f   : > { %v517_v44 = vld [vmem:[%s2127_s11 + $0x2c0] sm:$0xff]  ;;  %514 = vst [vmem:[%s2132_s12 + $0x150] sm:$0xff] %v513_v42  ;;  %516 = vst [vmem:[%s2132_s12 + $0x158] sm:$0xff] %v515_v43  ;;  %v519_v45 = vld [vmem:[%s2127_s11 + $0x2d0] sm:$0xff] }
  0x30   : > { %518 = vst [vmem:[%s2132_s12 + $0x160] sm:$0xff] %v517_v44  ;;  %v521_v46 = vld [vmem:[%s2127_s11 + $0x2e0] sm:$0xff]  ;;  %v523_v47 = vld [vmem:[%s2127_s11 + $0x2f0] sm:$0xff]  ;;  %520 = vst [vmem:[%s2132_s12 + $0x168] sm:$0xff] %v519_v45 }
  0x31   : > { %522 = vst [vmem:[%s2132_s12 + $0x170] sm:$0xff] %v521_v46  ;;  %524 = vst [vmem:[%s2132_s12 + $0x178] sm:$0xff] %v523_v47  ;;  %v525_v48 = vld [vmem:[%s2127_s11 + $0x300] sm:$0xff]  ;;  %v527_v49 = vld [vmem:[%s2127_s11 + $0x310] sm:$0xff] }
  0x32   : > { %v529_v50 = vld [vmem:[%s2127_s11 + $0x320] sm:$0xff]  ;;  %526 = vst [vmem:[%s2132_s12 + $0x180] sm:$0xff] %v525_v48  ;;  %528 = vst [vmem:[%s2132_s12 + $0x188] sm:$0xff] %v527_v49  ;;  %v531_v51 = vld [vmem:[%s2127_s11 + $0x330] sm:$0xff] }
  0x33   : > { %530 = vst [vmem:[%s2132_s12 + $0x190] sm:$0xff] %v529_v50  ;;  %v533_v52 = vld [vmem:[%s2127_s11 + $0x340] sm:$0xff]  ;;  %v535_v53 = vld [vmem:[%s2127_s11 + $0x350] sm:$0xff]  ;;  %532 = vst [vmem:[%s2132_s12 + $0x198] sm:$0xff] %v531_v51 }
  0x34   : > { %534 = vst [vmem:[%s2132_s12 + $0x1a0] sm:$0xff] %v533_v52  ;;  %536 = vst [vmem:[%s2132_s12 + $0x1a8] sm:$0xff] %v535_v53  ;;  %v537_v54 = vld [vmem:[%s2127_s11 + $0x360] sm:$0xff]  ;;  %v539_v55 = vld [vmem:[%s2127_s11 + $0x370] sm:$0xff] }
  0x35   : > { %v541_v56 = vld [vmem:[%s2127_s11 + $0x380] sm:$0xff]  ;;  %538 = vst [vmem:[%s2132_s12 + $0x1b0] sm:$0xff] %v537_v54  ;;  %540 = vst [vmem:[%s2132_s12 + $0x1b8] sm:$0xff] %v539_v55  ;;  %v543_v57 = vld [vmem:[%s2127_s11 + $0x390] sm:$0xff] }
  0x36   : > { %542 = vst [vmem:[%s2132_s12 + $0x1c0] sm:$0xff] %v541_v56  ;;  %v545_v58 = vld [vmem:[%s2127_s11 + $0x3a0] sm:$0xff]  ;;  %v547_v59 = vld [vmem:[%s2127_s11 + $0x3b0] sm:$0xff]  ;;  %544 = vst [vmem:[%s2132_s12 + $0x1c8] sm:$0xff] %v543_v57 }
  0x37   : > { %546 = vst [vmem:[%s2132_s12 + $0x1d0] sm:$0xff] %v545_v58  ;;  %548 = vst [vmem:[%s2132_s12 + $0x1d8] sm:$0xff] %v547_v59  ;;  %v549_v60 = vld [vmem:[%s2127_s11 + $0x3c0] sm:$0xff]  ;;  %v551_v61 = vld [vmem:[%s2127_s11 + $0x3d0] sm:$0xff] }
  0x38   : > { %v553_v62 = vld [vmem:[%s2127_s11 + $0x3e0] sm:$0xff]  ;;  %550 = vst [vmem:[%s2132_s12 + $0x1e0] sm:$0xff] %v549_v60  ;;  %552 = vst [vmem:[%s2132_s12 + $0x1e8] sm:$0xff] %v551_v61  ;;  %v555_v63 = vld [vmem:[%s2127_s11 + $0x3f0] sm:$0xff] }
  0x39   : > { %554 = vst [vmem:[%s2132_s12 + $0x1f0] sm:$0xff] %v553_v62  ;;  %v557_v0 = vld [vmem:[%s2127_s11 + $0x400] sm:$0xff]  ;;  %v559_v1 = vld [vmem:[%s2127_s11 + $0x410] sm:$0xff]  ;;  %556 = vst [vmem:[%s2132_s12 + $0x1f8] sm:$0xff] %v555_v63 }
  0x3a   : > { %558 = vst [vmem:[%s2132_s12 + $0x200] sm:$0xff] %v557_v0  ;;  %560 = vst [vmem:[%s2132_s12 + $0x208] sm:$0xff] %v559_v1  ;;  %v561_v2 = vld [vmem:[%s2127_s11 + $0x420] sm:$0xff]  ;;  %v563_v3 = vld [vmem:[%s2127_s11 + $0x430] sm:$0xff] }
  0x3b   : > { %v565_v4 = vld [vmem:[%s2127_s11 + $0x440] sm:$0xff]  ;;  %562 = vst [vmem:[%s2132_s12 + $0x210] sm:$0xff] %v561_v2  ;;  %564 = vst [vmem:[%s2132_s12 + $0x218] sm:$0xff] %v563_v3  ;;  %v567_v5 = vld [vmem:[%s2127_s11 + $0x450] sm:$0xff] }
  0x3c   : > { %566 = vst [vmem:[%s2132_s12 + $0x220] sm:$0xff] %v565_v4  ;;  %v569_v6 = vld [vmem:[%s2127_s11 + $0x460] sm:$0xff]  ;;  %v571_v7 = vld [vmem:[%s2127_s11 + $0x470] sm:$0xff]  ;;  %568 = vst [vmem:[%s2132_s12 + $0x228] sm:$0xff] %v567_v5 }
  0x3d   : > { %570 = vst [vmem:[%s2132_s12 + $0x230] sm:$0xff] %v569_v6  ;;  %572 = vst [vmem:[%s2132_s12 + $0x238] sm:$0xff] %v571_v7  ;;  %v573_v8 = vld [vmem:[%s2127_s11 + $0x480] sm:$0xff]  ;;  %v575_v9 = vld [vmem:[%s2127_s11 + $0x490] sm:$0xff] }
  0x3e   : > { %v577_v10 = vld [vmem:[%s2127_s11 + $0x4a0] sm:$0xff]  ;;  %574 = vst [vmem:[%s2132_s12 + $0x240] sm:$0xff] %v573_v8  ;;  %576 = vst [vmem:[%s2132_s12 + $0x248] sm:$0xff] %v575_v9  ;;  %v579_v11 = vld [vmem:[%s2127_s11 + $0x4b0] sm:$0xff] }
  0x3f   : > { %578 = vst [vmem:[%s2132_s12 + $0x250] sm:$0xff] %v577_v10  ;;  %v581_v12 = vld [vmem:[%s2127_s11 + $0x4c0] sm:$0xff]  ;;  %v583_v13 = vld [vmem:[%s2127_s11 + $0x4d0] sm:$0xff]  ;;  %580 = vst [vmem:[%s2132_s12 + $0x258] sm:$0xff] %v579_v11 }
  0x40   : > { %582 = vst [vmem:[%s2132_s12 + $0x260] sm:$0xff] %v581_v12  ;;  %584 = vst [vmem:[%s2132_s12 + $0x268] sm:$0xff] %v583_v13  ;;  %v585_v14 = vld [vmem:[%s2127_s11 + $0x4e0] sm:$0xff]  ;;  %v587_v15 = vld [vmem:[%s2127_s11 + $0x4f0] sm:$0xff] }
  0x41   : > { %v589_v16 = vld [vmem:[%s2127_s11 + $0x500] sm:$0xff]  ;;  %586 = vst [vmem:[%s2132_s12 + $0x270] sm:$0xff] %v585_v14  ;;  %588 = vst [vmem:[%s2132_s12 + $0x278] sm:$0xff] %v587_v15  ;;  %v591_v17 = vld [vmem:[%s2127_s11 + $0x510] sm:$0xff] }
  0x42   : > { %590 = vst [vmem:[%s2132_s12 + $0x280] sm:$0xff] %v589_v16  ;;  %v593_v18 = vld [vmem:[%s2127_s11 + $0x520] sm:$0xff]  ;;  %v595_v19 = vld [vmem:[%s2127_s11 + $0x530] sm:$0xff]  ;;  %592 = vst [vmem:[%s2132_s12 + $0x288] sm:$0xff] %v591_v17 }
  0x43   : > { %594 = vst [vmem:[%s2132_s12 + $0x290] sm:$0xff] %v593_v18  ;;  %596 = vst [vmem:[%s2132_s12 + $0x298] sm:$0xff] %v595_v19  ;;  %v597_v20 = vld [vmem:[%s2127_s11 + $0x540] sm:$0xff]  ;;  %v599_v21 = vld [vmem:[%s2127_s11 + $0x550] sm:$0xff] }
  0x44   : > { %v601_v22 = vld [vmem:[%s2127_s11 + $0x560] sm:$0xff]  ;;  %598 = vst [vmem:[%s2132_s12 + $0x2a0] sm:$0xff] %v597_v20  ;;  %600 = vst [vmem:[%s2132_s12 + $0x2a8] sm:$0xff] %v599_v21  ;;  %v603_v23 = vld [vmem:[%s2127_s11 + $0x570] sm:$0xff] }
  0x45   : > { %602 = vst [vmem:[%s2132_s12 + $0x2b0] sm:$0xff] %v601_v22  ;;  %v605_v24 = vld [vmem:[%s2127_s11 + $0x580] sm:$0xff]  ;;  %v607_v25 = vld [vmem:[%s2127_s11 + $0x590] sm:$0xff]  ;;  %604 = vst [vmem:[%s2132_s12 + $0x2b8] sm:$0xff] %v603_v23 }
  0x46   : > { %606 = vst [vmem:[%s2132_s12 + $0x2c0] sm:$0xff] %v605_v24  ;;  %608 = vst [vmem:[%s2132_s12 + $0x2c8] sm:$0xff] %v607_v25  ;;  %v609_v26 = vld [vmem:[%s2127_s11 + $0x5a0] sm:$0xff]  ;;  %v611_v27 = vld [vmem:[%s2127_s11 + $0x5b0] sm:$0xff] }
  0x47   : > { %v613_v28 = vld [vmem:[%s2127_s11 + $0x5c0] sm:$0xff]  ;;  %610 = vst [vmem:[%s2132_s12 + $0x2d0] sm:$0xff] %v609_v26  ;;  %612 = vst [vmem:[%s2132_s12 + $0x2d8] sm:$0xff] %v611_v27  ;;  %v615_v29 = vld [vmem:[%s2127_s11 + $0x5d0] sm:$0xff] }
  0x48   : > { %614 = vst [vmem:[%s2132_s12 + $0x2e0] sm:$0xff] %v613_v28  ;;  %v617_v30 = vld [vmem:[%s2127_s11 + $0x5e0] sm:$0xff]  ;;  %v619_v31 = vld [vmem:[%s2127_s11 + $0x5f0] sm:$0xff]  ;;  %616 = vst [vmem:[%s2132_s12 + $0x2e8] sm:$0xff] %v615_v29 }
  0x49   : > { %618 = vst [vmem:[%s2132_s12 + $0x2f0] sm:$0xff] %v617_v30  ;;  %620 = vst [vmem:[%s2132_s12 + $0x2f8] sm:$0xff] %v619_v31 }
  0x4a PF: > { %p1660_p7 = scmp.ge.s32.totalorder %s2039_s21, 1  ;;  %p646_p8 = scmp.lt.s32.totalorder %s2039_s21, 13 }
  0x4c   : > { %p647_p9 = pnand %p1660_p7, %p646_p8 }
  0x4d   : > { %s653_s13 = sand.u32 (!%p647_p9), 1, %s2015_s15   ;;  %s704_s14 = smul.u32 (!%p647_p9), 6, %s2023_s17 }
  0x4e   : > { %650 = sbr.rel (%p647_p9) target bundleno = 459 (0x1cb), region = 70  ;;  %s1662_s25 = sshll.u32 (!%p647_p9), %s2027_s18, 1 }
  0x4f   : > { %s1777_s24 = smul.u32 (!%p647_p9), 768, %s653_s13  ;;  %p707_p10 = scmp.lt.s32.totalorder (!%p647_p9), %s704_s14, 35 }
  0x50   : > { %p717_p11 = scmp.lt.s32.totalorder (!%p647_p9), %s1662_s25, 3  ;;  %p1667_p12 = scmp.ne.s32.totalorder (!%p647_p9), %s2023_s17, 0 }
  0x51   : > { %s2350_s13 = scalar_lea.vmem (!%p647_p9), [#allocation3], %s1777_s24 }
  0x55   : > { %s2505_s14 = smov (!%p707_p10, %s704_s14), 35  ;;  %s2507_s25 = smov (!%p717_p11, %s1662_s25), 3 }
  0x56   : > { %s1661_s26 = sshll.u32 %s2505_s14, 2  ;;  %s719_s15 = scalar_lea.vmem %s2489_s2, %s2507_s25  ;;  %v2041_v32 = vmov (!%p1667_p12), 0.0  }
  0x57   : > { %s2333_s30 = scalar_lea.vmem %s2487_s0, %s1661_s26  ;;  %s1664_s7 = sshll.u32 %s2507_s25, 2  ;;  %745 = vst [vmem:[#allocation2] sm:$0xff] (!%p1667_p12), %v2041_v32  ;;  %746 = vst [vmem:[#allocation2 + $0x8] sm:$0xff] (!%p1667_p12), %v2041_v32 }
  0x58   : > { %s2343_s9 = scalar_lea.vmem %s2490_s3, %s1664_s7  ;;  %s2348_s12 = scalar_lea.vmem %s2491_s4, %s1664_s7 }
  0x59   : > { %744 = sbr.rel (%p1667_p12) target bundleno = 96 (0x60), region = 78 }
  0x60 PF: > { %v1835_v33 = vld [vmem:[%s2350_s13 + $0x4] ss:$8 sps:$4 sm:$0xff]   ;;  %v1839_v35 = vld [vmem:[%s2350_s13] ss:$8 sps:$4 sm:$0xff]   ;;  %v1841_v37 = vld [vmem:[%s2350_s13 + $0x14] ss:$8 sps:$4 sm:$0xff]  }
  0x61   : > { %v1837_v34 = vld [vmem:[%s2350_s13 + $0x104] ss:$8 sps:$4 sm:$0xff]   ;;  %1349 = vmatprep.subr.bf16.mxu0 %v1835_v33  ;;  %v1840_v36 = vld [vmem:[%s2350_s13 + $0x100] ss:$8 sps:$4 sm:$0xff]   ;;  %v1843_v38 = vld [vmem:[%s2350_s13 + $0x114] ss:$8 sps:$4 sm:$0xff]  }
  0x62   : > { %1390 = vmatprep.subr.bf16.mxu1 %v1837_v34  ;;  %1350 = vmatpush1.bf16.msra.mxu0 %v1839_v35  ;;  %v1845_v39 = vld [vmem:[%s2350_s13 + $0x10] ss:$8 sps:$4 sm:$0xff]   ;;  %v1847_v41 = vld [vmem:[%s2350_s13 + $0x24] ss:$8 sps:$4 sm:$0xff]   ;;  %v1851_v43 = vld [vmem:[%s2350_s13 + $0x20] ss:$8 sps:$4 sm:$0xff]  }
  0x63   : > { %1391 = vmatpush1.bf16.msra.mxu1 %v1840_v36  ;;  %1351 = vmatprep.subr.bf16.mxu0 %v1841_v37  ;;  %v1846_v40 = vld [vmem:[%s2350_s13 + $0x110] ss:$8 sps:$4 sm:$0xff]   ;;  %v1849_v42 = vld [vmem:[%s2350_s13 + $0x124] ss:$8 sps:$4 sm:$0xff]   ;;  %v1852_v44 = vld [vmem:[%s2350_s13 + $0x120] ss:$8 sps:$4 sm:$0xff]  }
  0x64   : > { %1392 = vmatprep.subr.bf16.mxu1 %v1843_v38  ;;  %v1853_v45 = vld [vmem:[%s2350_s13 + $0x34] ss:$8 sps:$4 sm:$0xff]   ;;  %v1857_v47 = vld [vmem:[%s2350_s13 + $0x30] ss:$8 sps:$4 sm:$0xff]   ;;  %v1859_v49 = vld [vmem:[%s2350_s13 + $0x44] ss:$8 sps:$4 sm:$0xff]  }
  0x65   : > { %v1855_v46 = vld [vmem:[%s2350_s13 + $0x134] ss:$8 sps:$4 sm:$0xff]   ;;  %v1858_v48 = vld [vmem:[%s2350_s13 + $0x130] ss:$8 sps:$4 sm:$0xff]   ;;  %v1861_v50 = vld [vmem:[%s2350_s13 + $0x144] ss:$8 sps:$4 sm:$0xff]  }
  0x66   : > { %1352 = vmatpush1.bf16.msra.mxu0 %v1845_v39  ;;  %v1863_v51 = vld [vmem:[%s2350_s13 + $0x40] ss:$8 sps:$4 sm:$0xff]   ;;  %v1865_v53 = vld [vmem:[%s2350_s13 + $0x54] ss:$8 sps:$4 sm:$0xff]   ;;  %v1869_v55 = vld [vmem:[%s2350_s13 + $0x50] ss:$8 sps:$4 sm:$0xff]  }
  0x67   : > { %1393 = vmatpush1.bf16.msra.mxu1 %v1846_v40  ;;  %1353 = vmatprep.subr.bf16.mxu0 %v1847_v41  ;;  %v1864_v52 = vld [vmem:[%s2350_s13 + $0x140] ss:$8 sps:$4 sm:$0xff]   ;;  %v1867_v54 = vld [vmem:[%s2350_s13 + $0x154] ss:$8 sps:$4 sm:$0xff]   ;;  %v1870_v56 = vld [vmem:[%s2350_s13 + $0x150] ss:$8 sps:$4 sm:$0xff]  }
  0x68   : > { %1394 = vmatprep.subr.bf16.mxu1 %v1849_v42  ;;  %v1871_v57 = vld [vmem:[%s2350_s13 + $0x64] ss:$8 sps:$4 sm:$0xff]   ;;  %v1875_v59 = vld [vmem:[%s2350_s13 + $0x60] ss:$8 sps:$4 sm:$0xff]   ;;  %v1877_v61 = vld [vmem:[%s2350_s13 + $0x74] ss:$8 sps:$4 sm:$0xff]  }
  0x69   : > { %v1873_v58 = vld [vmem:[%s2350_s13 + $0x164] ss:$8 sps:$4 sm:$0xff]   ;;  %v1876_v60 = vld [vmem:[%s2350_s13 + $0x160] ss:$8 sps:$4 sm:$0xff]   ;;  %v1879_v62 = vld [vmem:[%s2350_s13 + $0x174] ss:$8 sps:$4 sm:$0xff]  }
  0x6a   : > { %1354 = vmatpush1.bf16.msra.mxu0 %v1851_v43  ;;  %v1881_v63 = vld [vmem:[%s2350_s13 + $0x70] ss:$8 sps:$4 sm:$0xff]   ;;  %v1883_v1 = vld [vmem:[%s2350_s13 + $0x84] ss:$8 sps:$4 sm:$0xff]   ;;  %v1887_v3 = vld [vmem:[%s2350_s13 + $0x80] ss:$8 sps:$4 sm:$0xff]  }
  0x6b   : > { %1395 = vmatpush1.bf16.msra.mxu1 %v1852_v44  ;;  %1355 = vmatprep.subr.bf16.mxu0 %v1853_v45  ;;  %v1882_v0 = vld [vmem:[%s2350_s13 + $0x170] ss:$8 sps:$4 sm:$0xff]   ;;  %v1885_v2 = vld [vmem:[%s2350_s13 + $0x184] ss:$8 sps:$4 sm:$0xff]   ;;  %v1888_v4 = vld [vmem:[%s2350_s13 + $0x180] ss:$8 sps:$4 sm:$0xff]  }
  0x6c   : > { %1396 = vmatprep.subr.bf16.mxu1 %v1855_v46  ;;  %v1889_v5 = vld [vmem:[%s2350_s13 + $0x94] ss:$8 sps:$4 sm:$0xff]   ;;  %v1893_v7 = vld [vmem:[%s2350_s13 + $0x90] ss:$8 sps:$4 sm:$0xff]   ;;  %v1895_v9 = vld [vmem:[%s2350_s13 + $0xa4] ss:$8 sps:$4 sm:$0xff]  }
  0x6d   : > { %v1891_v6 = vld [vmem:[%s2350_s13 + $0x194] ss:$8 sps:$4 sm:$0xff]   ;;  %v1894_v8 = vld [vmem:[%s2350_s13 + $0x190] ss:$8 sps:$4 sm:$0xff]   ;;  %v1897_v10 = vld [vmem:[%s2350_s13 + $0x1a4] ss:$8 sps:$4 sm:$0xff]  }
  0x6e   : > { %1356 = vmatpush1.bf16.msra.mxu0 %v1857_v47  ;;  %v1899_v11 = vld [vmem:[%s2350_s13 + $0xa0] ss:$8 sps:$4 sm:$0xff]   ;;  %v1901_v13 = vld [vmem:[%s2350_s13 + $0xb4] ss:$8 sps:$4 sm:$0xff]   ;;  %v1905_v18 = vld [vmem:[%s2350_s13 + $0xb0] ss:$8 sps:$4 sm:$0xff]  }
  0x6f   : > { %1397 = vmatpush1.bf16.msra.mxu1 %v1858_v48  ;;  %1357 = vmatprep.subr.bf16.mxu0 %v1859_v49  ;;  %v1900_v12 = vld [vmem:[%s2350_s13 + $0x1a0] ss:$8 sps:$4 sm:$0xff]   ;;  %v1903_v14 = vld [vmem:[%s2350_s13 + $0x1b4] ss:$8 sps:$4 sm:$0xff]   ;;  %v1906_v19 = vld [vmem:[%s2350_s13 + $0x1b0] ss:$8 sps:$4 sm:$0xff]  }
  0x70   : > { %1398 = vmatprep.subr.bf16.mxu1 %v1861_v50  ;;  %v749_v15 = vld [vmem:[%s2333_s30] sm:$0xff]  ;;  %v750_v17 = vld [vmem:[%s2333_s30 + $0x8] sm:$0xff]  ;;  %v1907_v21 = vld [vmem:[%s2350_s13 + $0xc4] ss:$8 sps:$4 sm:$0xff]   ;;  %p1770_p13 = scmp.ne.s32.totalorder %s2023_s17, 5 }
  0x71   : > { %v1669_v16 = vcombine.high %v749_v15, %v749_v15  ;;  %v1671_v20 = vcombine.high %v750_v17, %v750_v17  ;;  %v1909_v22 = vld [vmem:[%s2350_s13 + $0x1c4] ss:$8 sps:$4 sm:$0xff]   ;;  %v1911_v23 = vld [vmem:[%s2350_s13 + $0xc0] ss:$8 sps:$4 sm:$0xff]   ;;  %v1913_v25 = vld [vmem:[%s2350_s13 + $0xd4] ss:$8 sps:$4 sm:$0xff]   ;;  %v1668_v38 = vcombine.low %v749_v15, %v749_v15  ;;  %v1670_v39 = vcombine.low %v750_v17, %v750_v17 }
  0x72   : > { %1358 = vmatpush1.bf16.msra.mxu0 %v1863_v51  ;;  %v1912_v24 = vld [vmem:[%s2350_s13 + $0x1c0] ss:$8 sps:$4 sm:$0xff]   ;;  %v1915_v26 = vld [vmem:[%s2350_s13 + $0x1d4] ss:$8 sps:$4 sm:$0xff]   ;;  %v1917_v27 = vld [vmem:[%s2350_s13 + $0xd0] ss:$8 sps:$4 sm:$0xff]  }
  0x73   : > { %1399 = vmatpush1.bf16.msra.mxu1 %v1864_v52  ;;  %1359 = vmatprep.subr.bf16.mxu0 %v1865_v53  ;;  %v1918_v28 = vld [vmem:[%s2350_s13 + $0x1d0] ss:$8 sps:$4 sm:$0xff]   ;;  %v1919_v29 = vld [vmem:[%s2350_s13 + $0xe4] ss:$8 sps:$4 sm:$0xff]   ;;  %v1923_v31 = vld [vmem:[%s2350_s13 + $0xe0] ss:$8 sps:$4 sm:$0xff]  }
  0x74   : > { %1400 = vmatprep.subr.bf16.mxu1 %v1867_v54  ;;  %1381 = vmatprep.mubr.bf16.mxu0 %v1669_v16  ;;  %v1921_v30 = vld [vmem:[%s2350_s13 + $0x1e4] ss:$8 sps:$4 sm:$0xff]   ;;  %v1924_v32 = vld [vmem:[%s2350_s13 + $0x1e0] ss:$8 sps:$4 sm:$0xff]   ;;  %v1925_v33 = vld [vmem:[%s2350_s13 + $0xf4] ss:$8 sps:$4 sm:$0xff]  }
  0x75   : > { %1422 = vmatprep.mubr.bf16.mxu1 %v1671_v20  ;;  %v1927_v34 = vld [vmem:[%s2350_s13 + $0x1f4] ss:$8 sps:$4 sm:$0xff]   ;;  %v1929_v35 = vld [vmem:[%s2350_s13 + $0xf0] ss:$8 sps:$4 sm:$0xff]   ;;  %v1937_v37 = vld [vmem:[%s2350_s13 + $0x204] ss:$8 sps:$4 sm:$0xff]  }
  0x76   : > { %1360 = vmatpush1.bf16.msra.mxu0 %v1869_v55  ;;  %v1930_v36 = vld [vmem:[%s2350_s13 + $0x1f0] ss:$8 sps:$4 sm:$0xff]   ;;  %v1935_v40 = vld [vmem:[%s2350_s13 + $0x200] ss:$8 sps:$4 sm:$0xff]   ;;  %v1940_v42 = vld [vmem:[%s2350_s13 + $0x214] ss:$8 sps:$4 sm:$0xff]  }
  0x77   : > { %1401 = vmatpush1.bf16.msra.mxu1 %v1870_v56  ;;  %1361 = vmatprep.subr.bf16.mxu0 %v1871_v57  ;;  %v2422_v41 = vld [vmem:[%s2333_s30 + $0x10] sm:$0xff]  ;;  %v1938_v44 = vld [vmem:[%s2350_s13 + $0x210] ss:$8 sps:$4 sm:$0xff]   ;;  %v1946_v47 = vld [vmem:[%s2350_s13 + $0x234] ss:$8 sps:$4 sm:$0xff]  }
  0x78   : > { %1402 = vmatprep.subr.bf16.mxu1 %v1873_v58  ;;  %v1673_v43 = vcombine.high %v2422_v41, %v2422_v41  ;;  %v1943_v45 = vld [vmem:[%s2350_s13 + $0x224] ss:$8 sps:$4 sm:$0xff]   ;;  %v1941_v46 = vld [vmem:[%s2350_s13 + $0x220] ss:$8 sps:$4 sm:$0xff]   ;;  %v1944_v48 = vld [vmem:[%s2350_s13 + $0x230] ss:$8 sps:$4 sm:$0xff]  }
  0x79   : > { %v1949_v49 = vld [vmem:[%s2350_s13 + $0x244] ss:$8 sps:$4 sm:$0xff]   ;;  %v1947_v50 = vld [vmem:[%s2350_s13 + $0x240] ss:$8 sps:$4 sm:$0xff]   ;;  %v1952_v51 = vld [vmem:[%s2350_s13 + $0x254] ss:$8 sps:$4 sm:$0xff]  }
  0x7a   : > { %1362 = vmatpush1.bf16.msra.mxu0 %v1875_v59  ;;  %v1950_v52 = vld [vmem:[%s2350_s13 + $0x250] ss:$8 sps:$4 sm:$0xff]   ;;  %v1955_v53 = vld [vmem:[%s2350_s13 + $0x264] ss:$8 sps:$4 sm:$0xff]   ;;  %v1953_v54 = vld [vmem:[%s2350_s13 + $0x260] ss:$8 sps:$4 sm:$0xff]  }
  0x7b   : > { %1403 = vmatpush1.bf16.msra.mxu1 %v1876_v60  ;;  %1363 = vmatprep.subr.bf16.mxu0 %v1877_v61  ;;  %v1958_v55 = vld [vmem:[%s2350_s13 + $0x274] ss:$8 sps:$4 sm:$0xff]   ;;  %v1956_v56 = vld [vmem:[%s2350_s13 + $0x270] ss:$8 sps:$4 sm:$0xff]   ;;  %v1961_v57 = vld [vmem:[%s2350_s13 + $0x284] ss:$8 sps:$4 sm:$0xff]  }
  0x7c   : > { %1404 = vmatprep.subr.bf16.mxu1 %v1879_v62  ;;  %v1959_v58 = vld [vmem:[%s2350_s13 + $0x280] ss:$8 sps:$4 sm:$0xff]   ;;  %v1964_v59 = vld [vmem:[%s2350_s13 + $0x294] ss:$8 sps:$4 sm:$0xff]   ;;  %v1962_v60 = vld [vmem:[%s2350_s13 + $0x290] ss:$8 sps:$4 sm:$0xff]  }
  0x7d   : > { %v1967_v61 = vld [vmem:[%s2350_s13 + $0x2a4] ss:$8 sps:$4 sm:$0xff]   ;;  %v1965_v62 = vld [vmem:[%s2350_s13 + $0x2a0] ss:$8 sps:$4 sm:$0xff]   ;;  %v747_v20 = vld [vmem:[#allocation2] sm:$0xff] }
  0x7e   : > { %1364 = vmatpush1.bf16.msra.mxu0 %v1881_v63  ;;  %v1970_v63 = vld [vmem:[%s2350_s13 + $0x2b4] ss:$8 sps:$4 sm:$0xff]  }
  0x7f   : > { %1405 = vmatpush1.bf16.msra.mxu1 %v1882_v0  ;;  %1365 = vmatprep.subr.bf16.mxu0 %v1883_v1  ;;  %v1968_v0 = vld [vmem:[%s2350_s13 + $0x2b0] ss:$8 sps:$4 sm:$0xff]   ;;  %v1973_v1 = vld [vmem:[%s2350_s13 + $0x2c4] ss:$8 sps:$4 sm:$0xff]  }
  0x80   : > { %1406 = vmatprep.subr.bf16.mxu1 %v1885_v2  ;;  %v1971_v2 = vld [vmem:[%s2350_s13 + $0x2c0] ss:$8 sps:$4 sm:$0xff]  }
  0x82   : > { %1366 = vmatpush1.bf16.msra.mxu0 %v1887_v3  ;;  %v1976_v3 = vld [vmem:[%s2350_s13 + $0x2d4] ss:$8 sps:$4 sm:$0xff]  }
  0x83   : > { %1407 = vmatpush1.bf16.msra.mxu1 %v1888_v4  ;;  %1367 = vmatprep.subr.bf16.mxu0 %v1889_v5  ;;  %v1974_v4 = vld [vmem:[%s2350_s13 + $0x2d0] ss:$8 sps:$4 sm:$0xff]   ;;  %v1979_v5 = vld [vmem:[%s2350_s13 + $0x2e4] ss:$8 sps:$4 sm:$0xff]  }
  0x84   : > { %1408 = vmatprep.subr.bf16.mxu1 %v1891_v6  ;;  %v1977_v6 = vld [vmem:[%s2350_s13 + $0x2e0] ss:$8 sps:$4 sm:$0xff]  }
  0x86   : > { %1368 = vmatpush1.bf16.msra.mxu0 %v1893_v7  ;;  %v1982_v7 = vld [vmem:[%s2350_s13 + $0x2f4] ss:$8 sps:$4 sm:$0xff]  }
  0x87   : > { %1409 = vmatpush1.bf16.msra.mxu1 %v1894_v8  ;;  %1369 = vmatprep.subr.bf16.mxu0 %v1895_v9  ;;  %v1980_v8 = vld [vmem:[%s2350_s13 + $0x2f0] ss:$8 sps:$4 sm:$0xff]   ;;  %v1672_v9 = vcombine.low %v2422_v41, %v2422_v41 }
  0x88   : > { %1410 = vmatprep.subr.bf16.mxu1 %v1897_v10 }
  0x8a   : > { %1370 = vmatpush1.bf16.msra.mxu0 %v1899_v11 }
  0x8b   : > { %1411 = vmatpush1.bf16.msra.mxu1 %v1900_v12  ;;  %1371 = vmatprep.subr.bf16.mxu0 %v1901_v13 }
  0x8c   : > { %1412 = vmatprep.subr.bf16.mxu1 %v1903_v14 }
  0x8e   : > { %1372 = vmatpush1.bf16.msra.mxu0 %v1905_v18 }
  0x8f   : > { %1413 = vmatpush1.bf16.msra.mxu1 %v1906_v19  ;;  %1373 = vmatprep.subr.bf16.mxu0 %v1907_v21 }
  0x90   : > { %1414 = vmatprep.subr.bf16.mxu1 %v1909_v22 }
  0x92   : > { %1374 = vmatpush1.bf16.msra.mxu0 %v1911_v23  ;;  %v748_v23 = vld [vmem:[#allocation2 + $0x8] sm:$0xff] }
  0x93   : > { %1415 = vmatpush1.bf16.msra.mxu1 %v1912_v24  ;;  %1375 = vmatprep.subr.bf16.mxu0 %v1913_v25 }
  0x94   : > { %1416 = vmatprep.subr.bf16.mxu1 %v1915_v26 }
  0x96   : > { %1376 = vmatpush1.bf16.msra.mxu0 %v1917_v27 }
  0x97   : > { %1417 = vmatpush1.bf16.msra.mxu1 %v1918_v28  ;;  %1377 = vmatprep.subr.bf16.mxu0 %v1919_v29 }
  0x98   : > { %1418 = vmatprep.subr.bf16.mxu1 %v1921_v30  ;;  %v1484_v30 = vlaneseq (!%p1770_p13) }
  0x9a   : > { %1378 = vmatpush1.bf16.msra.mxu0 %v1923_v31  ;;  %v1485_v31 = vshrl.u32 (!%p1770_p13), %v1484_v30, 7 }
  0x9b   : > { %1419 = vmatpush1.bf16.msra.mxu1 %v1924_v32  ;;  %1379 = vmatprep.subr.bf16.mxu0 %v1925_v33  ;;  %v1482_v32 = vld [vmem:[%s719_s15] sm:$0x3] (!%p1770_p13) }
  0x9c   : > { %1420 = vmatprep.subr.bf16.mxu1 %v1927_v34  ;;  %v1496_v33 = vld [vmem:[%s2343_s9] sm:$0xff] (!%p1770_p13)  ;;  %v1486_v34 = vsub.s32 (!%p1770_p13), 0, %v1485_v31 }
  0x9d   : > { %v1498_v41 = vunpack.c.h.bf16 (!%p1770_p13), %v1496_v33 }
  0x9e   : > { %1380 = vmatpush1.bf16.msra.mxu0 %v1929_v35  ;;  %v1490_v35 = vsub.s32 (!%p1770_p13), 1, %v1485_v31 }
  0x9f   : > { %1421 = vmatpush1.bf16.msra.mxu1 %v1930_v36  ;;  %1431 = vmatprep.subr.bf16.mxu0 %v1937_v37 }
  0xa1   : > { %1382 = vmatmul.mubr.bf16.vlgmr.msra.gmra.mrb[0].mxu0 %v1668_v38  ;;  %v1487_v38 = vrot.slane (!%p1770_p13), %v1482_v32, %v1486_v34 }
  0xa2   : > { %1423 = vmatmul.mubr.bf16.vlgmr.msra.gmra.mrb[0].mxu1 %v1670_v39  ;;  %1432 = vmatpush1.bf16.msra.mxu0 %v1935_v40  ;;  %v1491_v39 = vrot.slane (!%p1770_p13), %v1482_v32, %v1490_v35  ;;  %v1497_v40 = vunpack.c.l.bf16 (!%p1770_p13), %v1496_v33 }
  0xa3   : > { %1463 = vmatprep.mubr.bf16.mxu0 %v1673_v43  ;;  %1433 = vmatprep.subr.bf16.mxu0 %v1940_v42 }
  0xa6   : > { %1434 = vmatpush1.bf16.msra.mxu0 %v1938_v44 }
  0xa7   : > { %1435 = vmatprep.subr.bf16.mxu0 %v1943_v45 }
  0xaa   : > { %1436 = vmatpush1.bf16.msra.mxu0 %v1941_v46 }
  0xab   : > { %1437 = vmatprep.subr.bf16.mxu0 %v1946_v47 }
  0xae   : > { %1438 = vmatpush1.bf16.msra.mxu0 %v1944_v48 }
  0xaf   : > { %1439 = vmatprep.subr.bf16.mxu0 %v1949_v49 }
  0xb2   : > { %1440 = vmatpush1.bf16.msra.mxu0 %v1947_v50 }
  0xb3   : > { %1441 = vmatprep.subr.bf16.mxu0 %v1952_v51 }
  0xb6   : > { %1442 = vmatpush1.bf16.msra.mxu0 %v1950_v52 }
  0xb7   : > { %1443 = vmatprep.subr.bf16.mxu0 %v1955_v53 }
  0xba   : > { %1444 = vmatpush1.bf16.msra.mxu0 %v1953_v54 }
  0xbb   : > { %1445 = vmatprep.subr.bf16.mxu0 %v1958_v55 }
  0xbe   : > { %1446 = vmatpush1.bf16.msra.mxu0 %v1956_v56 }
  0xbf   : > { %1447 = vmatprep.subr.bf16.mxu0 %v1961_v57 }
  0xc2   : > { %1448 = vmatpush1.bf16.msra.mxu0 %v1959_v58 }
  0xc3   : > { %1449 = vmatprep.subr.bf16.mxu0 %v1964_v59 }
  0xc6   : > { %1450 = vmatpush1.bf16.msra.mxu0 %v1962_v60 }
  0xc7   : > { %1451 = vmatprep.subr.bf16.mxu0 %v1967_v61 }
  0xca   : > { %1452 = vmatpush1.bf16.msra.mxu0 %v1965_v62 }
  0xcb   : > { %1453 = vmatprep.subr.bf16.mxu0 %v1970_v63 }
  0xce   : > { %1454 = vmatpush1.bf16.msra.mxu0 %v1968_v0 }
  0xcf   : > { %1455 = vmatprep.subr.bf16.mxu0 %v1973_v1 }
  0xd2   : > { %1456 = vmatpush1.bf16.msra.mxu0 %v1971_v2 }
  0xd3   : > { %1457 = vmatprep.subr.bf16.mxu0 %v1976_v3 }
  0xd6   : > { %1458 = vmatpush1.bf16.msra.mxu0 %v1974_v4 }
  0xd7   : > { %1459 = vmatprep.subr.bf16.mxu0 %v1979_v5 }
  0xda   : > { %1460 = vmatpush1.bf16.msra.mxu0 %v1977_v6 }
  0xdb   : > { %1461 = vmatprep.subr.bf16.mxu0 %v1982_v7 }
  0xde   : > { %1462 = vmatpush1.bf16.msra.mxu0 %v1980_v8 }
  0xe1   : > { %1464 = vmatmul.mubr.bf16.vlgmr.msra.gmra.mrb[4].mxu0 %v1672_v9 }
 0x174   : > { %v1383_v10 = vpop.f32.mrb[0].mxu0 }
 0x175   : > { %v1424_v11 = vpop.f32.mrb[0].mxu1  ;;  %v1385_v13 = vpop.f32.mrb[1].mxu0 }
 0x176   : > { %v1425_v12 = vadd.f32 %v1424_v11, %v1383_v10  ;;  %v1426_v14 = vpop.f32.mrb[1].mxu1  ;;  %v1387_v16 = vpop.f32.mrb[2].mxu0 }
 0x177   : > { %v1427_v15 = vadd.f32 %v1426_v14, %v1385_v13  ;;  %v1428_v17 = vpop.f32.mrb[2].mxu1  ;;  %v1388_v18 = vpop.f32.mrb[3].mxu0 }
 0x178   : > { %v1429_v19 = vpop.f32.mrb[3].mxu1 }
 0x1b4   : > { %v1465_v21 = vpop.f32.mrb[4].mxu0  ;;  %1479 = sbr.rel (%p1770_p13) target bundleno = 459 (0x1cb), region = 82 }
 0x1b5   : > { %v1466_v22 = vadd.f32 %v1465_v21, %v1425_v12  ;;  %v1467_v24 = vpop.f32.mrb[5].mxu0 }
 0x1b6   : > { %v1468_v25 = vadd.f32 %v1467_v24, %v1427_v15  ;;  %v1469_v26 = vpop.f32.mrb[6].mxu0 }
 0x1b7   : > { %v1472_v27 = vadd.f32 %v1466_v22, %v747_v20  ;;  %v1470_v28 = vpop.f32.mrb[7].mxu0 }
 0x1b8   : > { %v1473_v29 = vadd.f32 %v1468_v25, %v748_v23 }
 0x1b9   : > { %1474 = vst [vmem:[#allocation2] sm:$0xff] %v1472_v27 }
 0x1ba   : > { %1475 = vst [vmem:[#allocation2 + $0x8] sm:$0xff] %v1473_v29 }
 0x1c0   : > { %v1480_v36 = vld [vmem:[#allocation2] sm:$0xff] }
 0x1c1   : > { %v1481_v37 = vld [vmem:[#allocation2 + $0x8] sm:$0xff]  ;;  %v1494_v42 = vadd.f32 %v1487_v38, %v1480_v36 }
 0x1c2   : > { %v1495_v43 = vadd.f32 %v1491_v39, %v1481_v37 }
 0x1c3   : > { %v1499_v44 = vadd.f32 %v1497_v40, %v1494_v42 }
 0x1c4   : > { %v1500_v45 = vadd.f32 %v1498_v41, %v1495_v43 }
 0x1c5   : > { %v1501_v46 = vmax.f32 %v1499_v44, 0.0 }
 0x1c6   : > { %v1502_v47 = vmax.f32 %v1500_v45, 0.0 }
 0x1c8   : > { %v1775_v48 = vpack.c.bf16 %v1502_v47, %v1501_v46 }
 0x1ca   : > { %1511 = vst [vmem:[%s2348_s12] sm:$0xff] %v1775_v48 }
 0x1cb PF: > { %s14_s21 = sadd.s32 1, %s2039_s21   ;;  %s2492_s15 = smov %s2019_s16 }
 0x1cc   : > { %p11_p0 = scmp.ge.s32.totalorder %s14_s21, 14   ;;  %s2493_s16 = smov %s2118_s28 }
 0x1cd   : > { %s2494_s17 = smov %s2031_s19  ;;  %s2495_s18 = smov %s2035_s20 }
 0x1ce   : > { %s2496_s19 = smov %s2499_s22  ;;  %s2497_s20 = smov %s2503_s23 }
 0x1cf   :  { %13 = sbr.rel (!%p11_p0) target bundleno = 4 (0x4), region = 126 }

// kernel: _lambda_.39
= control target key start
LH: loop header
LB: loop body
LE: loop exit
PB: predicated region body
PF: predicated region fallthrough
CT: control target
= control target key end

     0   :  { %s1974_s12 = smov 0   ;;  %s1976_s13 = smov 0   ;;  %s2388_s0 = inlined_call_operand.vmem [shape: bf16[8,4608], index: 0, kind: input, shape index: {}]   ;;  %s2389_s1 = inlined_call_operand.vmem [shape: bf16[4608,512], index: 1, kind: input, shape index: {}]   ;;  %s2390_s2 = inlined_call_operand.vmem [shape: f32[1,512], index: 2, kind: input, shape index: {}]   ;;  %s2391_s3 = inlined_call_operand.vmem [shape: bf16[8,512], index: 3, kind: output, shape index: {}]  }
   0x1   :  { %s1978_s14 = smov 0   ;;  %s1980_s15 = smov 0  }
   0x2   :  { %s1982_s16 = smov 0   ;;  %s1984_s17 = smov 0  }
   0x3   :  { %s1986_s18 = smov 0  }
   0x4 LB: > { %s25_s19 = sadd.s32 1, %s1943_s16  ;;  %s28_s20 = sadd.s32 1, %s1947_s17  ;;  %s1951_s18 = sphi %s1986_s18, %s13_s18   ;;  %s1947_s17 = sphi %s1984_s17, %s2397_s17   ;;  %s1943_s16 = sphi %s1982_s16, %s2396_s16   ;;  %s1939_s15 = sphi %s1980_s15, %s2395_s15   ;;  %s1935_s14 = sphi %s1978_s14, %s2394_s14   ;;  %s1931_s13 = sphi %s1976_s13, %s2393_s13   ;;  %s1927_s12 = sphi %s1974_s12, %s2392_s12  }
   0x5   : > { %p26_p0 = scmp.ge.s32.totalorder %s25_s19, 6  ;;  %p76_p1 = scmp.ne.s32.totalorder %s1931_s13, %s1927_s12 }
   0x6   : > { %p77_p2 = scmp.eq.s32.totalorder %s1951_s18, 0  ;;  %s69_s24 = sadd.s32 1, %s1931_s13 }
   0x7   : > { %s2399_s19 = smov (%p26_p0, %s25_s19), 0  ;;  %s2401_s20 = smov (!%p26_p0, %s28_s20), %s1947_s17 }
   0x8   : > { %p78_p3 = por %p77_p2, %p76_p1  ;;  %p30_p4 = scmp.ge.s32.totalorder %s2401_s20, 2 }
   0x9   : > { %s64_s21 = ssub.s32 %s1943_s16, %s2399_s19  ;;  %p1570_p6 = scmp.ge.s32.totalorder %s1951_s18, 12 }
   0xa   : > { %s2403_s20 = smov (%p30_p4, %s2401_s20), 0 }
   0xb   : > { %s65_s22 = ssub.s32 %s1947_s17, %s2403_s20  ;;  %156 = sbr.rel (%p1570_p6) target bundleno = 74 (0x4a), region = 16 }
   0xc   : > { %s66_s23 = sor.u32 %s65_s22, %s64_s21 }
   0xd   : > { %p67_p5 = scmp.eq.s32.totalorder %s66_s23, 0 }
   0xf   : > { %s2025_s25 = scalar_select %p67_p5, %s1931_s13, %s69_s24  }
  0x12   : > { %172 = sbr.rel (!%p78_p3) target bundleno = 74 (0x4a), region = 24  ;;  %s174_s26 = sand.u32 (%p78_p3), 1, %s1931_s13  }
  0x13   : > { %s1688_s27 = smul.u32 (%p78_p3), 768, %s174_s26  ;;  %s1571_s28 = sshll.u32 (%p78_p3), %s1947_s17, 1 }
  0x14   : > { %s1686_s29 = smul.u32 (%p78_p3), 384, %s1943_s16 }
  0x15   : > { %s2039_s8 = scalar_lea.vmem (%p78_p3), [#allocation3], %s1688_s27 }
  0x16   : > { %s180_s30 = sadd.s32 (%p78_p3), %s1686_s29, %s1571_s28 }
  0x17   : > { %s1573_s4 = sshll.u32 (%p78_p3), %s180_s30, 2 }
  0x18   : > { %s2034_s7 = scalar_lea.vmem (%p78_p3), %s2389_s1, %s1573_s4 }
  0x19   : > { %v400_v0 = vld [vmem:[%s2034_s7] sm:$0xff]  ;;  %v402_v1 = vld [vmem:[%s2034_s7 + $0x10] sm:$0xff] }
  0x1a   : > { %v404_v2 = vld [vmem:[%s2034_s7 + $0x20] sm:$0xff]  ;;  %401 = vst [vmem:[%s2039_s8] sm:$0xff] %v400_v0  ;;  %403 = vst [vmem:[%s2039_s8 + $0x8] sm:$0xff] %v402_v1  ;;  %v406_v3 = vld [vmem:[%s2034_s7 + $0x30] sm:$0xff] }
  0x1b   : > { %405 = vst [vmem:[%s2039_s8 + $0x10] sm:$0xff] %v404_v2  ;;  %v408_v4 = vld [vmem:[%s2034_s7 + $0x40] sm:$0xff]  ;;  %v410_v5 = vld [vmem:[%s2034_s7 + $0x50] sm:$0xff]  ;;  %407 = vst [vmem:[%s2039_s8 + $0x18] sm:$0xff] %v406_v3 }
  0x1c   : > { %409 = vst [vmem:[%s2039_s8 + $0x20] sm:$0xff] %v408_v4  ;;  %411 = vst [vmem:[%s2039_s8 + $0x28] sm:$0xff] %v410_v5  ;;  %v412_v6 = vld [vmem:[%s2034_s7 + $0x60] sm:$0xff]  ;;  %v414_v7 = vld [vmem:[%s2034_s7 + $0x70] sm:$0xff] }
  0x1d   : > { %v416_v8 = vld [vmem:[%s2034_s7 + $0x80] sm:$0xff]  ;;  %413 = vst [vmem:[%s2039_s8 + $0x30] sm:$0xff] %v412_v6  ;;  %415 = vst [vmem:[%s2039_s8 + $0x38] sm:$0xff] %v414_v7  ;;  %v418_v9 = vld [vmem:[%s2034_s7 + $0x90] sm:$0xff] }
  0x1e   : > { %417 = vst [vmem:[%s2039_s8 + $0x40] sm:$0xff] %v416_v8  ;;  %v420_v10 = vld [vmem:[%s2034_s7 + $0xa0] sm:$0xff]  ;;  %v422_v11 = vld [vmem:[%s2034_s7 + $0xb0] sm:$0xff]  ;;  %419 = vst [vmem:[%s2039_s8 + $0x48] sm:$0xff] %v418_v9 }
  0x1f   : > { %421 = vst [vmem:[%s2039_s8 + $0x50] sm:$0xff] %v420_v10  ;;  %423 = vst [vmem:[%s2039_s8 + $0x58] sm:$0xff] %v422_v11  ;;  %v424_v12 = vld [vmem:[%s2034_s7 + $0xc0] sm:$0xff]  ;;  %v426_v13 = vld [vmem:[%s2034_s7 + $0xd0] sm:$0xff] }
  0x20   : > { %v428_v14 = vld [vmem:[%s2034_s7 + $0xe0] sm:$0xff]  ;;  %425 = vst [vmem:[%s2039_s8 + $0x60] sm:$0xff] %v424_v12  ;;  %427 = vst [vmem:[%s2039_s8 + $0x68] sm:$0xff] %v426_v13  ;;  %v430_v15 = vld [vmem:[%s2034_s7 + $0xf0] sm:$0xff] }
  0x21   : > { %429 = vst [vmem:[%s2039_s8 + $0x70] sm:$0xff] %v428_v14  ;;  %v432_v16 = vld [vmem:[%s2034_s7 + $0x100] sm:$0xff]  ;;  %v434_v17 = vld [vmem:[%s2034_s7 + $0x110] sm:$0xff]  ;;  %431 = vst [vmem:[%s2039_s8 + $0x78] sm:$0xff] %v430_v15 }
  0x22   : > { %433 = vst [vmem:[%s2039_s8 + $0x80] sm:$0xff] %v432_v16  ;;  %435 = vst [vmem:[%s2039_s8 + $0x88] sm:$0xff] %v434_v17  ;;  %v436_v18 = vld [vmem:[%s2034_s7 + $0x120] sm:$0xff]  ;;  %v438_v19 = vld [vmem:[%s2034_s7 + $0x130] sm:$0xff] }
  0x23   : > { %v440_v20 = vld [vmem:[%s2034_s7 + $0x140] sm:$0xff]  ;;  %437 = vst [vmem:[%s2039_s8 + $0x90] sm:$0xff] %v436_v18  ;;  %439 = vst [vmem:[%s2039_s8 + $0x98] sm:$0xff] %v438_v19  ;;  %v442_v21 = vld [vmem:[%s2034_s7 + $0x150] sm:$0xff] }
  0x24   : > { %441 = vst [vmem:[%s2039_s8 + $0xa0] sm:$0xff] %v440_v20  ;;  %v444_v22 = vld [vmem:[%s2034_s7 + $0x160] sm:$0xff]  ;;  %v446_v23 = vld [vmem:[%s2034_s7 + $0x170] sm:$0xff]  ;;  %443 = vst [vmem:[%s2039_s8 + $0xa8] sm:$0xff] %v442_v21 }
  0x25   : > { %445 = vst [vmem:[%s2039_s8 + $0xb0] sm:$0xff] %v444_v22  ;;  %447 = vst [vmem:[%s2039_s8 + $0xb8] sm:$0xff] %v446_v23  ;;  %v448_v24 = vld [vmem:[%s2034_s7 + $0x180] sm:$0xff]  ;;  %v450_v25 = vld [vmem:[%s2034_s7 + $0x190] sm:$0xff] }
  0x26   : > { %v452_v26 = vld [vmem:[%s2034_s7 + $0x1a0] sm:$0xff]  ;;  %449 = vst [vmem:[%s2039_s8 + $0xc0] sm:$0xff] %v448_v24  ;;  %451 = vst [vmem:[%s2039_s8 + $0xc8] sm:$0xff] %v450_v25  ;;  %v454_v27 = vld [vmem:[%s2034_s7 + $0x1b0] sm:$0xff] }
  0x27   : > { %453 = vst [vmem:[%s2039_s8 + $0xd0] sm:$0xff] %v452_v26  ;;  %v456_v28 = vld [vmem:[%s2034_s7 + $0x1c0] sm:$0xff]  ;;  %v458_v29 = vld [vmem:[%s2034_s7 + $0x1d0] sm:$0xff]  ;;  %455 = vst [vmem:[%s2039_s8 + $0xd8] sm:$0xff] %v454_v27 }
  0x28   : > { %457 = vst [vmem:[%s2039_s8 + $0xe0] sm:$0xff] %v456_v28  ;;  %459 = vst [vmem:[%s2039_s8 + $0xe8] sm:$0xff] %v458_v29  ;;  %v460_v30 = vld [vmem:[%s2034_s7 + $0x1e0] sm:$0xff]  ;;  %v462_v31 = vld [vmem:[%s2034_s7 + $0x1f0] sm:$0xff] }
  0x29   : > { %v464_v32 = vld [vmem:[%s2034_s7 + $0x200] sm:$0xff]  ;;  %461 = vst [vmem:[%s2039_s8 + $0xf0] sm:$0xff] %v460_v30  ;;  %463 = vst [vmem:[%s2039_s8 + $0xf8] sm:$0xff] %v462_v31  ;;  %v466_v33 = vld [vmem:[%s2034_s7 + $0x210] sm:$0xff] }
  0x2a   : > { %465 = vst [vmem:[%s2039_s8 + $0x100] sm:$0xff] %v464_v32  ;;  %v468_v34 = vld [vmem:[%s2034_s7 + $0x220] sm:$0xff]  ;;  %v470_v35 = vld [vmem:[%s2034_s7 + $0x230] sm:$0xff]  ;;  %467 = vst [vmem:[%s2039_s8 + $0x108] sm:$0xff] %v466_v33 }
  0x2b   : > { %469 = vst [vmem:[%s2039_s8 + $0x110] sm:$0xff] %v468_v34  ;;  %471 = vst [vmem:[%s2039_s8 + $0x118] sm:$0xff] %v470_v35  ;;  %v472_v36 = vld [vmem:[%s2034_s7 + $0x240] sm:$0xff]  ;;  %v474_v37 = vld [vmem:[%s2034_s7 + $0x250] sm:$0xff] }
  0x2c   : > { %v476_v38 = vld [vmem:[%s2034_s7 + $0x260] sm:$0xff]  ;;  %473 = vst [vmem:[%s2039_s8 + $0x120] sm:$0xff] %v472_v36  ;;  %475 = vst [vmem:[%s2039_s8 + $0x128] sm:$0xff] %v474_v37  ;;  %v478_v39 = vld [vmem:[%s2034_s7 + $0x270] sm:$0xff] }
  0x2d   : > { %477 = vst [vmem:[%s2039_s8 + $0x130] sm:$0xff] %v476_v38  ;;  %v480_v40 = vld [vmem:[%s2034_s7 + $0x280] sm:$0xff]  ;;  %v482_v41 = vld [vmem:[%s2034_s7 + $0x290] sm:$0xff]  ;;  %479 = vst [vmem:[%s2039_s8 + $0x138] sm:$0xff] %v478_v39 }
  0x2e   : > { %481 = vst [vmem:[%s2039_s8 + $0x140] sm:$0xff] %v480_v40  ;;  %483 = vst [vmem:[%s2039_s8 + $0x148] sm:$0xff] %v482_v41  ;;  %v484_v42 = vld [vmem:[%s2034_s7 + $0x2a0] sm:$0xff]  ;;  %v486_v43 = vld [vmem:[%s2034_s7 + $0x2b0] sm:$0xff] }
  0x2f   : > { %v488_v44 = vld [vmem:[%s2034_s7 + $0x2c0] sm:$0xff]  ;;  %485 = vst [vmem:[%s2039_s8 + $0x150] sm:$0xff] %v484_v42  ;;  %487 = vst [vmem:[%s2039_s8 + $0x158] sm:$0xff] %v486_v43  ;;  %v490_v45 = vld [vmem:[%s2034_s7 + $0x2d0] sm:$0xff] }
  0x30   : > { %489 = vst [vmem:[%s2039_s8 + $0x160] sm:$0xff] %v488_v44  ;;  %v492_v46 = vld [vmem:[%s2034_s7 + $0x2e0] sm:$0xff]  ;;  %v494_v47 = vld [vmem:[%s2034_s7 + $0x2f0] sm:$0xff]  ;;  %491 = vst [vmem:[%s2039_s8 + $0x168] sm:$0xff] %v490_v45 }
  0x31   : > { %493 = vst [vmem:[%s2039_s8 + $0x170] sm:$0xff] %v492_v46  ;;  %495 = vst [vmem:[%s2039_s8 + $0x178] sm:$0xff] %v494_v47  ;;  %v496_v48 = vld [vmem:[%s2034_s7 + $0x300] sm:$0xff]  ;;  %v498_v49 = vld [vmem:[%s2034_s7 + $0x310] sm:$0xff] }
  0x32   : > { %v500_v50 = vld [vmem:[%s2034_s7 + $0x320] sm:$0xff]  ;;  %497 = vst [vmem:[%s2039_s8 + $0x180] sm:$0xff] %v496_v48  ;;  %499 = vst [vmem:[%s2039_s8 + $0x188] sm:$0xff] %v498_v49  ;;  %v502_v51 = vld [vmem:[%s2034_s7 + $0x330] sm:$0xff] }
  0x33   : > { %501 = vst [vmem:[%s2039_s8 + $0x190] sm:$0xff] %v500_v50  ;;  %v504_v52 = vld [vmem:[%s2034_s7 + $0x340] sm:$0xff]  ;;  %v506_v53 = vld [vmem:[%s2034_s7 + $0x350] sm:$0xff]  ;;  %503 = vst [vmem:[%s2039_s8 + $0x198] sm:$0xff] %v502_v51 }
  0x34   : > { %505 = vst [vmem:[%s2039_s8 + $0x1a0] sm:$0xff] %v504_v52  ;;  %507 = vst [vmem:[%s2039_s8 + $0x1a8] sm:$0xff] %v506_v53  ;;  %v508_v54 = vld [vmem:[%s2034_s7 + $0x360] sm:$0xff]  ;;  %v510_v55 = vld [vmem:[%s2034_s7 + $0x370] sm:$0xff] }
  0x35   : > { %v512_v56 = vld [vmem:[%s2034_s7 + $0x380] sm:$0xff]  ;;  %509 = vst [vmem:[%s2039_s8 + $0x1b0] sm:$0xff] %v508_v54  ;;  %511 = vst [vmem:[%s2039_s8 + $0x1b8] sm:$0xff] %v510_v55  ;;  %v514_v57 = vld [vmem:[%s2034_s7 + $0x390] sm:$0xff] }
  0x36   : > { %513 = vst [vmem:[%s2039_s8 + $0x1c0] sm:$0xff] %v512_v56  ;;  %v516_v58 = vld [vmem:[%s2034_s7 + $0x3a0] sm:$0xff]  ;;  %v518_v59 = vld [vmem:[%s2034_s7 + $0x3b0] sm:$0xff]  ;;  %515 = vst [vmem:[%s2039_s8 + $0x1c8] sm:$0xff] %v514_v57 }
  0x37   : > { %517 = vst [vmem:[%s2039_s8 + $0x1d0] sm:$0xff] %v516_v58  ;;  %519 = vst [vmem:[%s2039_s8 + $0x1d8] sm:$0xff] %v518_v59  ;;  %v520_v60 = vld [vmem:[%s2034_s7 + $0x3c0] sm:$0xff]  ;;  %v522_v61 = vld [vmem:[%s2034_s7 + $0x3d0] sm:$0xff] }
  0x38   : > { %v524_v62 = vld [vmem:[%s2034_s7 + $0x3e0] sm:$0xff]  ;;  %521 = vst [vmem:[%s2039_s8 + $0x1e0] sm:$0xff] %v520_v60  ;;  %523 = vst [vmem:[%s2039_s8 + $0x1e8] sm:$0xff] %v522_v61  ;;  %v526_v63 = vld [vmem:[%s2034_s7 + $0x3f0] sm:$0xff] }
  0x39   : > { %525 = vst [vmem:[%s2039_s8 + $0x1f0] sm:$0xff] %v524_v62  ;;  %v528_v0 = vld [vmem:[%s2034_s7 + $0x400] sm:$0xff]  ;;  %v530_v1 = vld [vmem:[%s2034_s7 + $0x410] sm:$0xff]  ;;  %527 = vst [vmem:[%s2039_s8 + $0x1f8] sm:$0xff] %v526_v63 }
  0x3a   : > { %529 = vst [vmem:[%s2039_s8 + $0x200] sm:$0xff] %v528_v0  ;;  %531 = vst [vmem:[%s2039_s8 + $0x208] sm:$0xff] %v530_v1  ;;  %v532_v2 = vld [vmem:[%s2034_s7 + $0x420] sm:$0xff]  ;;  %v534_v3 = vld [vmem:[%s2034_s7 + $0x430] sm:$0xff] }
  0x3b   : > { %v536_v4 = vld [vmem:[%s2034_s7 + $0x440] sm:$0xff]  ;;  %533 = vst [vmem:[%s2039_s8 + $0x210] sm:$0xff] %v532_v2  ;;  %535 = vst [vmem:[%s2039_s8 + $0x218] sm:$0xff] %v534_v3  ;;  %v538_v5 = vld [vmem:[%s2034_s7 + $0x450] sm:$0xff] }
  0x3c   : > { %537 = vst [vmem:[%s2039_s8 + $0x220] sm:$0xff] %v536_v4  ;;  %v540_v6 = vld [vmem:[%s2034_s7 + $0x460] sm:$0xff]  ;;  %v542_v7 = vld [vmem:[%s2034_s7 + $0x470] sm:$0xff]  ;;  %539 = vst [vmem:[%s2039_s8 + $0x228] sm:$0xff] %v538_v5 }
  0x3d   : > { %541 = vst [vmem:[%s2039_s8 + $0x230] sm:$0xff] %v540_v6  ;;  %543 = vst [vmem:[%s2039_s8 + $0x238] sm:$0xff] %v542_v7  ;;  %v544_v8 = vld [vmem:[%s2034_s7 + $0x480] sm:$0xff]  ;;  %v546_v9 = vld [vmem:[%s2034_s7 + $0x490] sm:$0xff] }
  0x3e   : > { %v548_v10 = vld [vmem:[%s2034_s7 + $0x4a0] sm:$0xff]  ;;  %545 = vst [vmem:[%s2039_s8 + $0x240] sm:$0xff] %v544_v8  ;;  %547 = vst [vmem:[%s2039_s8 + $0x248] sm:$0xff] %v546_v9  ;;  %v550_v11 = vld [vmem:[%s2034_s7 + $0x4b0] sm:$0xff] }
  0x3f   : > { %549 = vst [vmem:[%s2039_s8 + $0x250] sm:$0xff] %v548_v10  ;;  %v552_v12 = vld [vmem:[%s2034_s7 + $0x4c0] sm:$0xff]  ;;  %v554_v13 = vld [vmem:[%s2034_s7 + $0x4d0] sm:$0xff]  ;;  %551 = vst [vmem:[%s2039_s8 + $0x258] sm:$0xff] %v550_v11 }
  0x40   : > { %553 = vst [vmem:[%s2039_s8 + $0x260] sm:$0xff] %v552_v12  ;;  %555 = vst [vmem:[%s2039_s8 + $0x268] sm:$0xff] %v554_v13  ;;  %v556_v14 = vld [vmem:[%s2034_s7 + $0x4e0] sm:$0xff]  ;;  %v558_v15 = vld [vmem:[%s2034_s7 + $0x4f0] sm:$0xff] }
  0x41   : > { %v560_v16 = vld [vmem:[%s2034_s7 + $0x500] sm:$0xff]  ;;  %557 = vst [vmem:[%s2039_s8 + $0x270] sm:$0xff] %v556_v14  ;;  %559 = vst [vmem:[%s2039_s8 + $0x278] sm:$0xff] %v558_v15  ;;  %v562_v17 = vld [vmem:[%s2034_s7 + $0x510] sm:$0xff] }
  0x42   : > { %561 = vst [vmem:[%s2039_s8 + $0x280] sm:$0xff] %v560_v16  ;;  %v564_v18 = vld [vmem:[%s2034_s7 + $0x520] sm:$0xff]  ;;  %v566_v19 = vld [vmem:[%s2034_s7 + $0x530] sm:$0xff]  ;;  %563 = vst [vmem:[%s2039_s8 + $0x288] sm:$0xff] %v562_v17 }
  0x43   : > { %565 = vst [vmem:[%s2039_s8 + $0x290] sm:$0xff] %v564_v18  ;;  %567 = vst [vmem:[%s2039_s8 + $0x298] sm:$0xff] %v566_v19  ;;  %v568_v20 = vld [vmem:[%s2034_s7 + $0x540] sm:$0xff]  ;;  %v570_v21 = vld [vmem:[%s2034_s7 + $0x550] sm:$0xff] }
  0x44   : > { %v572_v22 = vld [vmem:[%s2034_s7 + $0x560] sm:$0xff]  ;;  %569 = vst [vmem:[%s2039_s8 + $0x2a0] sm:$0xff] %v568_v20  ;;  %571 = vst [vmem:[%s2039_s8 + $0x2a8] sm:$0xff] %v570_v21  ;;  %v574_v23 = vld [vmem:[%s2034_s7 + $0x570] sm:$0xff] }
  0x45   : > { %573 = vst [vmem:[%s2039_s8 + $0x2b0] sm:$0xff] %v572_v22  ;;  %v576_v24 = vld [vmem:[%s2034_s7 + $0x580] sm:$0xff]  ;;  %v578_v25 = vld [vmem:[%s2034_s7 + $0x590] sm:$0xff]  ;;  %575 = vst [vmem:[%s2039_s8 + $0x2b8] sm:$0xff] %v574_v23 }
  0x46   : > { %577 = vst [vmem:[%s2039_s8 + $0x2c0] sm:$0xff] %v576_v24  ;;  %579 = vst [vmem:[%s2039_s8 + $0x2c8] sm:$0xff] %v578_v25  ;;  %v580_v26 = vld [vmem:[%s2034_s7 + $0x5a0] sm:$0xff]  ;;  %v582_v27 = vld [vmem:[%s2034_s7 + $0x5b0] sm:$0xff] }
  0x47   : > { %v584_v28 = vld [vmem:[%s2034_s7 + $0x5c0] sm:$0xff]  ;;  %581 = vst [vmem:[%s2039_s8 + $0x2d0] sm:$0xff] %v580_v26  ;;  %583 = vst [vmem:[%s2039_s8 + $0x2d8] sm:$0xff] %v582_v27  ;;  %v586_v29 = vld [vmem:[%s2034_s7 + $0x5d0] sm:$0xff] }
  0x48   : > { %585 = vst [vmem:[%s2039_s8 + $0x2e0] sm:$0xff] %v584_v28  ;;  %v588_v30 = vld [vmem:[%s2034_s7 + $0x5e0] sm:$0xff]  ;;  %v590_v31 = vld [vmem:[%s2034_s7 + $0x5f0] sm:$0xff]  ;;  %587 = vst [vmem:[%s2039_s8 + $0x2e8] sm:$0xff] %v586_v29 }
  0x49   : > { %589 = vst [vmem:[%s2039_s8 + $0x2f0] sm:$0xff] %v588_v30  ;;  %591 = vst [vmem:[%s2039_s8 + $0x2f8] sm:$0xff] %v590_v31 }
  0x4a PF: > { %p1574_p7 = scmp.ge.s32.totalorder %s1951_s18, 1  ;;  %p604_p8 = scmp.lt.s32.totalorder %s1951_s18, 13 }
  0x4c   : > { %p605_p9 = pnand %p1574_p7, %p604_p8 }
  0x4d   : > { %s611_s9 = sand.u32 (!%p605_p9), 1, %s1927_s12   ;;  %s651_s10 = smul.u32 (!%p605_p9), 6, %s1935_s14 }
  0x4e   : > { %608 = sbr.rel (%p605_p9) target bundleno = 456 (0x1c8), region = 66  ;;  %s1576_s21 = sshll.u32 (!%p605_p9), %s1939_s15, 1 }
  0x4f   : > { %s1689_s11 = smul.u32 (!%p605_p9), 768, %s611_s9  ;;  %p654_p10 = scmp.lt.s32.totalorder (!%p605_p9), %s651_s10, 35 }
  0x50   : > { %p664_p11 = scmp.lt.s32.totalorder (!%p605_p9), %s1576_s21, 3  ;;  %p1579_p12 = scmp.ne.s32.totalorder (!%p605_p9), %s1935_s14, 0 }
  0x51   : > { %s2252_s5 = scalar_lea.vmem (!%p605_p9), [#allocation3], %s1689_s11 }
  0x55   : > { %s2405_s10 = smov (!%p654_p10, %s651_s10), 35  ;;  %s2407_s21 = smov (!%p664_p11, %s1576_s21), 3 }
  0x56   : > { %s1575_s22 = sshll.u32 %s2405_s10, 2  ;;  %s666_s12 = scalar_lea.vmem %s2390_s2, %s2407_s21  ;;  %v1953_v32 = vmov (!%p1579_p12), 0.0  }
  0x57   : > { %s2240_s26 = scalar_lea.vmem %s2388_s0, %s1575_s22  ;;  %s1578_s29 = sshll.u32 %s2407_s21, 2  ;;  %682 = vst [vmem:[#allocation2] sm:$0xff] (!%p1579_p12), %v1953_v32  ;;  %683 = vst [vmem:[#allocation2 + $0x8] sm:$0xff] (!%p1579_p12), %v1953_v32 }
  0x58   : > { %s2250_s4 = scalar_lea.vmem %s2391_s3, %s1578_s29  ;;  %681 = sbr.rel (%p1579_p12) target bundleno = 95 (0x5f), region = 74 }
  0x5f PF: > { %v1747_v33 = vld [vmem:[%s2252_s5 + $0x4] ss:$8 sps:$4 sm:$0xff]   ;;  %v1751_v35 = vld [vmem:[%s2252_s5] ss:$8 sps:$4 sm:$0xff]   ;;  %v1753_v37 = vld [vmem:[%s2252_s5 + $0x14] ss:$8 sps:$4 sm:$0xff]  }
  0x60   : > { %v1749_v34 = vld [vmem:[%s2252_s5 + $0x104] ss:$8 sps:$4 sm:$0xff]   ;;  %1286 = vmatprep.subr.bf16.mxu0 %v1747_v33  ;;  %v1752_v36 = vld [vmem:[%s2252_s5 + $0x100] ss:$8 sps:$4 sm:$0xff]   ;;  %v1755_v38 = vld [vmem:[%s2252_s5 + $0x114] ss:$8 sps:$4 sm:$0xff]  }
  0x61   : > { %1327 = vmatprep.subr.bf16.mxu1 %v1749_v34  ;;  %1287 = vmatpush1.bf16.msra.mxu0 %v1751_v35  ;;  %v1757_v39 = vld [vmem:[%s2252_s5 + $0x10] ss:$8 sps:$4 sm:$0xff]   ;;  %v1759_v41 = vld [vmem:[%s2252_s5 + $0x24] ss:$8 sps:$4 sm:$0xff]   ;;  %v1763_v43 = vld [vmem:[%s2252_s5 + $0x20] ss:$8 sps:$4 sm:$0xff]  }
  0x62   : > { %1328 = vmatpush1.bf16.msra.mxu1 %v1752_v36  ;;  %1288 = vmatprep.subr.bf16.mxu0 %v1753_v37  ;;  %v1758_v40 = vld [vmem:[%s2252_s5 + $0x110] ss:$8 sps:$4 sm:$0xff]   ;;  %v1761_v42 = vld [vmem:[%s2252_s5 + $0x124] ss:$8 sps:$4 sm:$0xff]   ;;  %v1764_v44 = vld [vmem:[%s2252_s5 + $0x120] ss:$8 sps:$4 sm:$0xff]  }
  0x63   : > { %1329 = vmatprep.subr.bf16.mxu1 %v1755_v38  ;;  %v1765_v45 = vld [vmem:[%s2252_s5 + $0x34] ss:$8 sps:$4 sm:$0xff]   ;;  %v1769_v47 = vld [vmem:[%s2252_s5 + $0x30] ss:$8 sps:$4 sm:$0xff]   ;;  %v1771_v49 = vld [vmem:[%s2252_s5 + $0x44] ss:$8 sps:$4 sm:$0xff]  }
  0x64   : > { %v1767_v46 = vld [vmem:[%s2252_s5 + $0x134] ss:$8 sps:$4 sm:$0xff]   ;;  %v1770_v48 = vld [vmem:[%s2252_s5 + $0x130] ss:$8 sps:$4 sm:$0xff]   ;;  %v1773_v50 = vld [vmem:[%s2252_s5 + $0x144] ss:$8 sps:$4 sm:$0xff]  }
  0x65   : > { %1289 = vmatpush1.bf16.msra.mxu0 %v1757_v39  ;;  %v1775_v51 = vld [vmem:[%s2252_s5 + $0x40] ss:$8 sps:$4 sm:$0xff]   ;;  %v1777_v53 = vld [vmem:[%s2252_s5 + $0x54] ss:$8 sps:$4 sm:$0xff]   ;;  %v1781_v55 = vld [vmem:[%s2252_s5 + $0x50] ss:$8 sps:$4 sm:$0xff]  }
  0x66   : > { %1330 = vmatpush1.bf16.msra.mxu1 %v1758_v40  ;;  %1290 = vmatprep.subr.bf16.mxu0 %v1759_v41  ;;  %v1776_v52 = vld [vmem:[%s2252_s5 + $0x140] ss:$8 sps:$4 sm:$0xff]   ;;  %v1779_v54 = vld [vmem:[%s2252_s5 + $0x154] ss:$8 sps:$4 sm:$0xff]   ;;  %v1782_v56 = vld [vmem:[%s2252_s5 + $0x150] ss:$8 sps:$4 sm:$0xff]  }
  0x67   : > { %1331 = vmatprep.subr.bf16.mxu1 %v1761_v42  ;;  %v1783_v57 = vld [vmem:[%s2252_s5 + $0x64] ss:$8 sps:$4 sm:$0xff]   ;;  %v1787_v59 = vld [vmem:[%s2252_s5 + $0x60] ss:$8 sps:$4 sm:$0xff]   ;;  %v1789_v61 = vld [vmem:[%s2252_s5 + $0x74] ss:$8 sps:$4 sm:$0xff]  }
  0x68   : > { %v1785_v58 = vld [vmem:[%s2252_s5 + $0x164] ss:$8 sps:$4 sm:$0xff]   ;;  %v1788_v60 = vld [vmem:[%s2252_s5 + $0x160] ss:$8 sps:$4 sm:$0xff]   ;;  %v1791_v62 = vld [vmem:[%s2252_s5 + $0x174] ss:$8 sps:$4 sm:$0xff]  }
  0x69   : > { %1291 = vmatpush1.bf16.msra.mxu0 %v1763_v43  ;;  %v1793_v63 = vld [vmem:[%s2252_s5 + $0x70] ss:$8 sps:$4 sm:$0xff]   ;;  %v1795_v1 = vld [vmem:[%s2252_s5 + $0x84] ss:$8 sps:$4 sm:$0xff]   ;;  %v1799_v3 = vld [vmem:[%s2252_s5 + $0x80] ss:$8 sps:$4 sm:$0xff]  }
  0x6a   : > { %1332 = vmatpush1.bf16.msra.mxu1 %v1764_v44  ;;  %1292 = vmatprep.subr.bf16.mxu0 %v1765_v45  ;;  %v1794_v0 = vld [vmem:[%s2252_s5 + $0x170] ss:$8 sps:$4 sm:$0xff]   ;;  %v1797_v2 = vld [vmem:[%s2252_s5 + $0x184] ss:$8 sps:$4 sm:$0xff]   ;;  %v1800_v4 = vld [vmem:[%s2252_s5 + $0x180] ss:$8 sps:$4 sm:$0xff]  }
  0x6b   : > { %1333 = vmatprep.subr.bf16.mxu1 %v1767_v46  ;;  %v1801_v5 = vld [vmem:[%s2252_s5 + $0x94] ss:$8 sps:$4 sm:$0xff]   ;;  %v1805_v7 = vld [vmem:[%s2252_s5 + $0x90] ss:$8 sps:$4 sm:$0xff]   ;;  %v1807_v9 = vld [vmem:[%s2252_s5 + $0xa4] ss:$8 sps:$4 sm:$0xff]  }
  0x6c   : > { %v1803_v6 = vld [vmem:[%s2252_s5 + $0x194] ss:$8 sps:$4 sm:$0xff]   ;;  %v1806_v8 = vld [vmem:[%s2252_s5 + $0x190] ss:$8 sps:$4 sm:$0xff]   ;;  %v1809_v10 = vld [vmem:[%s2252_s5 + $0x1a4] ss:$8 sps:$4 sm:$0xff]  }
  0x6d   : > { %1293 = vmatpush1.bf16.msra.mxu0 %v1769_v47  ;;  %v1811_v11 = vld [vmem:[%s2252_s5 + $0xa0] ss:$8 sps:$4 sm:$0xff]   ;;  %v1813_v13 = vld [vmem:[%s2252_s5 + $0xb4] ss:$8 sps:$4 sm:$0xff]   ;;  %v1817_v18 = vld [vmem:[%s2252_s5 + $0xb0] ss:$8 sps:$4 sm:$0xff]  }
  0x6e   : > { %1334 = vmatpush1.bf16.msra.mxu1 %v1770_v48  ;;  %1294 = vmatprep.subr.bf16.mxu0 %v1771_v49  ;;  %v1812_v12 = vld [vmem:[%s2252_s5 + $0x1a0] ss:$8 sps:$4 sm:$0xff]   ;;  %v1815_v14 = vld [vmem:[%s2252_s5 + $0x1b4] ss:$8 sps:$4 sm:$0xff]   ;;  %v1818_v19 = vld [vmem:[%s2252_s5 + $0x1b0] ss:$8 sps:$4 sm:$0xff]  }
  0x6f   : > { %1335 = vmatprep.subr.bf16.mxu1 %v1773_v50  ;;  %v686_v15 = vld [vmem:[%s2240_s26] sm:$0xff]  ;;  %v687_v17 = vld [vmem:[%s2240_s26 + $0x8] sm:$0xff]  ;;  %v1819_v21 = vld [vmem:[%s2252_s5 + $0xc4] ss:$8 sps:$4 sm:$0xff]   ;;  %p1682_p13 = scmp.ne.s32.totalorder %s1935_s14, 5 }
  0x70   : > { %v1581_v16 = vcombine.high %v686_v15, %v686_v15  ;;  %v1583_v20 = vcombine.high %v687_v17, %v687_v17  ;;  %v1821_v22 = vld [vmem:[%s2252_s5 + $0x1c4] ss:$8 sps:$4 sm:$0xff]   ;;  %v1823_v23 = vld [vmem:[%s2252_s5 + $0xc0] ss:$8 sps:$4 sm:$0xff]   ;;  %v1825_v25 = vld [vmem:[%s2252_s5 + $0xd4] ss:$8 sps:$4 sm:$0xff]   ;;  %v1580_v38 = vcombine.low %v686_v15, %v686_v15  ;;  %v1582_v39 = vcombine.low %v687_v17, %v687_v17 }
  0x71   : > { %1295 = vmatpush1.bf16.msra.mxu0 %v1775_v51  ;;  %v1824_v24 = vld [vmem:[%s2252_s5 + $0x1c0] ss:$8 sps:$4 sm:$0xff]   ;;  %v1827_v26 = vld [vmem:[%s2252_s5 + $0x1d4] ss:$8 sps:$4 sm:$0xff]   ;;  %v1829_v27 = vld [vmem:[%s2252_s5 + $0xd0] ss:$8 sps:$4 sm:$0xff]  }
  0x72   : > { %1336 = vmatpush1.bf16.msra.mxu1 %v1776_v52  ;;  %1296 = vmatprep.subr.bf16.mxu0 %v1777_v53  ;;  %v1830_v28 = vld [vmem:[%s2252_s5 + $0x1d0] ss:$8 sps:$4 sm:$0xff]   ;;  %v1831_v29 = vld [vmem:[%s2252_s5 + $0xe4] ss:$8 sps:$4 sm:$0xff]   ;;  %v1835_v31 = vld [vmem:[%s2252_s5 + $0xe0] ss:$8 sps:$4 sm:$0xff]  }
  0x73   : > { %1337 = vmatprep.subr.bf16.mxu1 %v1779_v54  ;;  %1318 = vmatprep.mubr.bf16.mxu0 %v1581_v16  ;;  %v1833_v30 = vld [vmem:[%s2252_s5 + $0x1e4] ss:$8 sps:$4 sm:$0xff]   ;;  %v1836_v32 = vld [vmem:[%s2252_s5 + $0x1e0] ss:$8 sps:$4 sm:$0xff]   ;;  %v1837_v33 = vld [vmem:[%s2252_s5 + $0xf4] ss:$8 sps:$4 sm:$0xff]  }
  0x74   : > { %1359 = vmatprep.mubr.bf16.mxu1 %v1583_v20  ;;  %v1839_v34 = vld [vmem:[%s2252_s5 + $0x1f4] ss:$8 sps:$4 sm:$0xff]   ;;  %v1841_v35 = vld [vmem:[%s2252_s5 + $0xf0] ss:$8 sps:$4 sm:$0xff]   ;;  %v1849_v37 = vld [vmem:[%s2252_s5 + $0x204] ss:$8 sps:$4 sm:$0xff]  }
  0x75   : > { %1297 = vmatpush1.bf16.msra.mxu0 %v1781_v55  ;;  %v1842_v36 = vld [vmem:[%s2252_s5 + $0x1f0] ss:$8 sps:$4 sm:$0xff]   ;;  %v1847_v40 = vld [vmem:[%s2252_s5 + $0x200] ss:$8 sps:$4 sm:$0xff]   ;;  %v1852_v42 = vld [vmem:[%s2252_s5 + $0x214] ss:$8 sps:$4 sm:$0xff]  }
  0x76   : > { %1338 = vmatpush1.bf16.msra.mxu1 %v1782_v56  ;;  %1298 = vmatprep.subr.bf16.mxu0 %v1783_v57  ;;  %v2324_v41 = vld [vmem:[%s2240_s26 + $0x10] sm:$0xff]  ;;  %v1850_v44 = vld [vmem:[%s2252_s5 + $0x210] ss:$8 sps:$4 sm:$0xff]   ;;  %v1858_v47 = vld [vmem:[%s2252_s5 + $0x234] ss:$8 sps:$4 sm:$0xff]  }
  0x77   : > { %1339 = vmatprep.subr.bf16.mxu1 %v1785_v58  ;;  %v1585_v43 = vcombine.high %v2324_v41, %v2324_v41  ;;  %v1855_v45 = vld [vmem:[%s2252_s5 + $0x224] ss:$8 sps:$4 sm:$0xff]   ;;  %v1853_v46 = vld [vmem:[%s2252_s5 + $0x220] ss:$8 sps:$4 sm:$0xff]   ;;  %v1856_v48 = vld [vmem:[%s2252_s5 + $0x230] ss:$8 sps:$4 sm:$0xff]  }
  0x78   : > { %v1861_v49 = vld [vmem:[%s2252_s5 + $0x244] ss:$8 sps:$4 sm:$0xff]   ;;  %v1859_v50 = vld [vmem:[%s2252_s5 + $0x240] ss:$8 sps:$4 sm:$0xff]   ;;  %v1864_v51 = vld [vmem:[%s2252_s5 + $0x254] ss:$8 sps:$4 sm:$0xff]  }
  0x79   : > { %1299 = vmatpush1.bf16.msra.mxu0 %v1787_v59  ;;  %v1862_v52 = vld [vmem:[%s2252_s5 + $0x250] ss:$8 sps:$4 sm:$0xff]   ;;  %v1867_v53 = vld [vmem:[%s2252_s5 + $0x264] ss:$8 sps:$4 sm:$0xff]   ;;  %v1865_v54 = vld [vmem:[%s2252_s5 + $0x260] ss:$8 sps:$4 sm:$0xff]  }
  0x7a   : > { %1340 = vmatpush1.bf16.msra.mxu1 %v1788_v60  ;;  %1300 = vmatprep.subr.bf16.mxu0 %v1789_v61  ;;  %v1870_v55 = vld [vmem:[%s2252_s5 + $0x274] ss:$8 sps:$4 sm:$0xff]   ;;  %v1868_v56 = vld [vmem:[%s2252_s5 + $0x270] ss:$8 sps:$4 sm:$0xff]   ;;  %v1873_v57 = vld [vmem:[%s2252_s5 + $0x284] ss:$8 sps:$4 sm:$0xff]  }
  0x7b   : > { %1341 = vmatprep.subr.bf16.mxu1 %v1791_v62  ;;  %v1871_v58 = vld [vmem:[%s2252_s5 + $0x280] ss:$8 sps:$4 sm:$0xff]   ;;  %v1876_v59 = vld [vmem:[%s2252_s5 + $0x294] ss:$8 sps:$4 sm:$0xff]   ;;  %v1874_v60 = vld [vmem:[%s2252_s5 + $0x290] ss:$8 sps:$4 sm:$0xff]  }
  0x7c   : > { %v1879_v61 = vld [vmem:[%s2252_s5 + $0x2a4] ss:$8 sps:$4 sm:$0xff]   ;;  %v1877_v62 = vld [vmem:[%s2252_s5 + $0x2a0] ss:$8 sps:$4 sm:$0xff]   ;;  %v684_v20 = vld [vmem:[#allocation2] sm:$0xff] }
  0x7d   : > { %1301 = vmatpush1.bf16.msra.mxu0 %v1793_v63  ;;  %v1882_v63 = vld [vmem:[%s2252_s5 + $0x2b4] ss:$8 sps:$4 sm:$0xff]  }
  0x7e   : > { %1342 = vmatpush1.bf16.msra.mxu1 %v1794_v0  ;;  %1302 = vmatprep.subr.bf16.mxu0 %v1795_v1  ;;  %v1880_v0 = vld [vmem:[%s2252_s5 + $0x2b0] ss:$8 sps:$4 sm:$0xff]   ;;  %v1885_v1 = vld [vmem:[%s2252_s5 + $0x2c4] ss:$8 sps:$4 sm:$0xff]  }
  0x7f   : > { %1343 = vmatprep.subr.bf16.mxu1 %v1797_v2  ;;  %v1883_v2 = vld [vmem:[%s2252_s5 + $0x2c0] ss:$8 sps:$4 sm:$0xff]  }
  0x81   : > { %1303 = vmatpush1.bf16.msra.mxu0 %v1799_v3  ;;  %v1888_v3 = vld [vmem:[%s2252_s5 + $0x2d4] ss:$8 sps:$4 sm:$0xff]  }
  0x82   : > { %1344 = vmatpush1.bf16.msra.mxu1 %v1800_v4  ;;  %1304 = vmatprep.subr.bf16.mxu0 %v1801_v5  ;;  %v1886_v4 = vld [vmem:[%s2252_s5 + $0x2d0] ss:$8 sps:$4 sm:$0xff]   ;;  %v1891_v5 = vld [vmem:[%s2252_s5 + $0x2e4] ss:$8 sps:$4 sm:$0xff]  }
  0x83   : > { %1345 = vmatprep.subr.bf16.mxu1 %v1803_v6  ;;  %v1889_v6 = vld [vmem:[%s2252_s5 + $0x2e0] ss:$8 sps:$4 sm:$0xff]  }
  0x85   : > { %1305 = vmatpush1.bf16.msra.mxu0 %v1805_v7  ;;  %v1894_v7 = vld [vmem:[%s2252_s5 + $0x2f4] ss:$8 sps:$4 sm:$0xff]  }
  0x86   : > { %1346 = vmatpush1.bf16.msra.mxu1 %v1806_v8  ;;  %1306 = vmatprep.subr.bf16.mxu0 %v1807_v9  ;;  %v1892_v8 = vld [vmem:[%s2252_s5 + $0x2f0] ss:$8 sps:$4 sm:$0xff]   ;;  %v1584_v9 = vcombine.low %v2324_v41, %v2324_v41 }
  0x87   : > { %1347 = vmatprep.subr.bf16.mxu1 %v1809_v10 }
  0x89   : > { %1307 = vmatpush1.bf16.msra.mxu0 %v1811_v11 }
  0x8a   : > { %1348 = vmatpush1.bf16.msra.mxu1 %v1812_v12  ;;  %1308 = vmatprep.subr.bf16.mxu0 %v1813_v13 }
  0x8b   : > { %1349 = vmatprep.subr.bf16.mxu1 %v1815_v14 }
  0x8d   : > { %1309 = vmatpush1.bf16.msra.mxu0 %v1817_v18 }
  0x8e   : > { %1350 = vmatpush1.bf16.msra.mxu1 %v1818_v19  ;;  %1310 = vmatprep.subr.bf16.mxu0 %v1819_v21 }
  0x8f   : > { %1351 = vmatprep.subr.bf16.mxu1 %v1821_v22 }
  0x91   : > { %1311 = vmatpush1.bf16.msra.mxu0 %v1823_v23  ;;  %v685_v23 = vld [vmem:[#allocation2 + $0x8] sm:$0xff] }
  0x92   : > { %1352 = vmatpush1.bf16.msra.mxu1 %v1824_v24  ;;  %1312 = vmatprep.subr.bf16.mxu0 %v1825_v25 }
  0x93   : > { %1353 = vmatprep.subr.bf16.mxu1 %v1827_v26 }
  0x95   : > { %1313 = vmatpush1.bf16.msra.mxu0 %v1829_v27 }
  0x96   : > { %1354 = vmatpush1.bf16.msra.mxu1 %v1830_v28  ;;  %1314 = vmatprep.subr.bf16.mxu0 %v1831_v29 }
  0x97   : > { %1355 = vmatprep.subr.bf16.mxu1 %v1833_v30  ;;  %v1421_v30 = vlaneseq (!%p1682_p13) }
  0x99   : > { %1315 = vmatpush1.bf16.msra.mxu0 %v1835_v31  ;;  %v1422_v31 = vshrl.u32 (!%p1682_p13), %v1421_v30, 7 }
  0x9a   : > { %1356 = vmatpush1.bf16.msra.mxu1 %v1836_v32  ;;  %1316 = vmatprep.subr.bf16.mxu0 %v1837_v33  ;;  %v1419_v32 = vld [vmem:[%s666_s12] sm:$0x3] (!%p1682_p13) }
  0x9b   : > { %1357 = vmatprep.subr.bf16.mxu1 %v1839_v34  ;;  %v1423_v33 = vsub.s32 (!%p1682_p13), 0, %v1422_v31  ;;  %v1427_v34 = vsub.s32 (!%p1682_p13), 1, %v1422_v31 }
  0x9d   : > { %1317 = vmatpush1.bf16.msra.mxu0 %v1841_v35 }
  0x9e   : > { %1358 = vmatpush1.bf16.msra.mxu1 %v1842_v36  ;;  %1368 = vmatprep.subr.bf16.mxu0 %v1849_v37  ;;  %v1424_v37 = vrot.slane (!%p1682_p13), %v1419_v32, %v1423_v33 }
  0xa0   : > { %1319 = vmatmul.mubr.bf16.vlgmr.msra.gmra.mrb[0].mxu0 %v1580_v38  ;;  %v1428_v38 = vrot.slane (!%p1682_p13), %v1419_v32, %v1427_v34 }
  0xa1   : > { %1360 = vmatmul.mubr.bf16.vlgmr.msra.gmra.mrb[0].mxu1 %v1582_v39  ;;  %1369 = vmatpush1.bf16.msra.mxu0 %v1847_v40 }
  0xa2   : > { %1400 = vmatprep.mubr.bf16.mxu0 %v1585_v43  ;;  %1370 = vmatprep.subr.bf16.mxu0 %v1852_v42 }
  0xa5   : > { %1371 = vmatpush1.bf16.msra.mxu0 %v1850_v44 }
  0xa6   : > { %1372 = vmatprep.subr.bf16.mxu0 %v1855_v45 }
  0xa9   : > { %1373 = vmatpush1.bf16.msra.mxu0 %v1853_v46 }
  0xaa   : > { %1374 = vmatprep.subr.bf16.mxu0 %v1858_v47 }
  0xad   : > { %1375 = vmatpush1.bf16.msra.mxu0 %v1856_v48 }
  0xae   : > { %1376 = vmatprep.subr.bf16.mxu0 %v1861_v49 }
  0xb1   : > { %1377 = vmatpush1.bf16.msra.mxu0 %v1859_v50 }
  0xb2   : > { %1378 = vmatprep.subr.bf16.mxu0 %v1864_v51 }
  0xb5   : > { %1379 = vmatpush1.bf16.msra.mxu0 %v1862_v52 }
  0xb6   : > { %1380 = vmatprep.subr.bf16.mxu0 %v1867_v53 }
  0xb9   : > { %1381 = vmatpush1.bf16.msra.mxu0 %v1865_v54 }
  0xba   : > { %1382 = vmatprep.subr.bf16.mxu0 %v1870_v55 }
  0xbd   : > { %1383 = vmatpush1.bf16.msra.mxu0 %v1868_v56 }
  0xbe   : > { %1384 = vmatprep.subr.bf16.mxu0 %v1873_v57 }
  0xc1   : > { %1385 = vmatpush1.bf16.msra.mxu0 %v1871_v58 }
  0xc2   : > { %1386 = vmatprep.subr.bf16.mxu0 %v1876_v59 }
  0xc5   : > { %1387 = vmatpush1.bf16.msra.mxu0 %v1874_v60 }
  0xc6   : > { %1388 = vmatprep.subr.bf16.mxu0 %v1879_v61 }
  0xc9   : > { %1389 = vmatpush1.bf16.msra.mxu0 %v1877_v62 }
  0xca   : > { %1390 = vmatprep.subr.bf16.mxu0 %v1882_v63 }
  0xcd   : > { %1391 = vmatpush1.bf16.msra.mxu0 %v1880_v0 }
  0xce   : > { %1392 = vmatprep.subr.bf16.mxu0 %v1885_v1 }
  0xd1   : > { %1393 = vmatpush1.bf16.msra.mxu0 %v1883_v2 }
  0xd2   : > { %1394 = vmatprep.subr.bf16.mxu0 %v1888_v3 }
  0xd5   : > { %1395 = vmatpush1.bf16.msra.mxu0 %v1886_v4 }
  0xd6   : > { %1396 = vmatprep.subr.bf16.mxu0 %v1891_v5 }
  0xd9   : > { %1397 = vmatpush1.bf16.msra.mxu0 %v1889_v6 }
  0xda   : > { %1398 = vmatprep.subr.bf16.mxu0 %v1894_v7 }
  0xdd   : > { %1399 = vmatpush1.bf16.msra.mxu0 %v1892_v8 }
  0xe0   : > { %1401 = vmatmul.mubr.bf16.vlgmr.msra.gmra.mrb[4].mxu0 %v1584_v9 }
 0x173   : > { %v1320_v10 = vpop.f32.mrb[0].mxu0 }
 0x174   : > { %v1361_v11 = vpop.f32.mrb[0].mxu1  ;;  %v1322_v13 = vpop.f32.mrb[1].mxu0 }
 0x175   : > { %v1362_v12 = vadd.f32 %v1361_v11, %v1320_v10  ;;  %v1363_v14 = vpop.f32.mrb[1].mxu1  ;;  %v1324_v16 = vpop.f32.mrb[2].mxu0 }
 0x176   : > { %v1364_v15 = vadd.f32 %v1363_v14, %v1322_v13  ;;  %v1365_v17 = vpop.f32.mrb[2].mxu1  ;;  %v1325_v18 = vpop.f32.mrb[3].mxu0 }
 0x177   : > { %v1366_v19 = vpop.f32.mrb[3].mxu1 }
 0x1b3   : > { %v1402_v21 = vpop.f32.mrb[4].mxu0  ;;  %1416 = sbr.rel (%p1682_p13) target bundleno = 456 (0x1c8), region = 78 }
 0x1b4   : > { %v1403_v22 = vadd.f32 %v1402_v21, %v1362_v12  ;;  %v1404_v24 = vpop.f32.mrb[5].mxu0 }
 0x1b5   : > { %v1405_v25 = vadd.f32 %v1404_v24, %v1364_v15  ;;  %v1406_v26 = vpop.f32.mrb[6].mxu0 }
 0x1b6   : > { %v1409_v27 = vadd.f32 %v1403_v22, %v684_v20  ;;  %v1407_v28 = vpop.f32.mrb[7].mxu0 }
 0x1b7   : > { %v1410_v29 = vadd.f32 %v1405_v25, %v685_v23 }
 0x1b8   : > { %1411 = vst [vmem:[#allocation2] sm:$0xff] %v1409_v27 }
 0x1b9   : > { %1412 = vst [vmem:[#allocation2 + $0x8] sm:$0xff] %v1410_v29 }
 0x1bf   : > { %v1417_v35 = vld [vmem:[#allocation2] sm:$0xff] }
 0x1c0   : > { %v1418_v36 = vld [vmem:[#allocation2 + $0x8] sm:$0xff]  ;;  %v1431_v39 = vadd.f32 %v1424_v37, %v1417_v35 }
 0x1c1   : > { %v1432_v40 = vadd.f32 %v1428_v38, %v1418_v36 }
 0x1c2   : > { %v1433_v41 = vmax.f32 %v1431_v39, 0.0 }
 0x1c3   : > { %v1434_v42 = vmax.f32 %v1432_v40, 0.0 }
 0x1c5   : > { %v1687_v43 = vpack.c.bf16 %v1434_v42, %v1433_v41 }
 0x1c7   : > { %1443 = vst [vmem:[%s2250_s4] sm:$0xff] %v1687_v43 }
 0x1c8 PF: > { %s13_s18 = sadd.s32 1, %s1951_s18   ;;  %s2392_s12 = smov %s1931_s13 }
 0x1c9   : > { %p10_p0 = scmp.ge.s32.totalorder %s13_s18, 14   ;;  %s2393_s13 = smov %s2025_s25 }
 0x1ca   : > { %s2394_s14 = smov %s1943_s16  ;;  %s2395_s15 = smov %s1947_s17 }
 0x1cb   : > { %s2396_s16 = smov %s2399_s19  ;;  %s2397_s17 = smov %s2403_s20 }
 0x1cc   :  { %12 = sbr.rel (!%p10_p0) target bundleno = 4 (0x4), region = 119 }

// kernel: _lambda_.41
= control target key start
LH: loop header
LB: loop body
LE: loop exit
PB: predicated region body
PF: predicated region fallthrough
CT: control target
= control target key end

     0   :  { %s637_s1 = inlined_call_operand.vmem [shape: bf16[512,128], index: 1, kind: input, shape index: {}]   ;;  %s638_s0 = inlined_call_operand.vmem [shape: bf16[8,512], index: 0, kind: input, shape index: {}]   ;;  %s639_s2 = inlined_call_operand.vmem [shape: f32[1,128], index: 2, kind: input, shape index: {}]   ;;  %s640_s3 = inlined_call_operand.vmem [shape: f32[8,128], index: 3, kind: output, shape index: {}]  }
   0x1   :  { %v473_v0 = vld [vmem:[%s637_s1 + $0x40] sm:$0xff]   ;;  %v477_v4 = vld [vmem:[%s637_s1 + $0x48] sm:$0xff]   ;;  %v481_v8 = vld [vmem:[%s637_s1 + $0x50] sm:$0xff]  }
   0x2   :  { %v474_v1 = vld [vmem:[%s637_s1 + $0xc0] sm:$0xff]   ;;  %429 = vmatprep.subr.bf16.mxu0 %v473_v0  ;;  %v478_v5 = vld [vmem:[%s637_s1 + $0xc8] sm:$0xff]   ;;  %v482_v9 = vld [vmem:[%s637_s1 + $0xd0] sm:$0xff]  }
   0x3   :  { %v475_v2 = vld [vmem:[%s637_s1] sm:$0xff]   ;;  %451 = vmatprep.subr.bf16.mxu1 %v474_v1  ;;  %v479_v6 = vld [vmem:[%s637_s1 + $0x8] sm:$0xff]   ;;  %v483_v10 = vld [vmem:[%s637_s1 + $0x10] sm:$0xff]  }
   0x4   :  { %v476_v3 = vld [vmem:[%s637_s1 + $0x80] sm:$0xff]   ;;  %430 = vmatpush3.bf16.msra.mxu0 %v475_v2  ;;  %v480_v7 = vld [vmem:[%s637_s1 + $0x88] sm:$0xff]   ;;  %v484_v11 = vld [vmem:[%s637_s1 + $0x90] sm:$0xff]  }
   0x5   :  { %452 = vmatpush3.bf16.msra.mxu1 %v476_v3  ;;  %431 = vmatprep.subr.bf16.mxu0 %v477_v4  ;;  %v485_v12 = vld [vmem:[%s637_s1 + $0x58] sm:$0xff]   ;;  %v489_v16 = vld [vmem:[%s637_s1 + $0x60] sm:$0xff]   ;;  %v493_v20 = vld [vmem:[%s637_s1 + $0x68] sm:$0xff]  }
   0x6   :  { %453 = vmatprep.subr.bf16.mxu1 %v478_v5  ;;  %v486_v13 = vld [vmem:[%s637_s1 + $0xd8] sm:$0xff]   ;;  %v490_v17 = vld [vmem:[%s637_s1 + $0xe0] sm:$0xff]   ;;  %v494_v21 = vld [vmem:[%s637_s1 + $0xe8] sm:$0xff]  }
   0x7   :  { %v487_v14 = vld [vmem:[%s637_s1 + $0x18] sm:$0xff]   ;;  %v491_v18 = vld [vmem:[%s637_s1 + $0x20] sm:$0xff]   ;;  %v495_v22 = vld [vmem:[%s637_s1 + $0x28] sm:$0xff]  }
   0x8   :  { %432 = vmatpush3.bf16.msra.mxu0 %v479_v6  ;;  %v488_v15 = vld [vmem:[%s637_s1 + $0x98] sm:$0xff]   ;;  %v492_v19 = vld [vmem:[%s637_s1 + $0xa0] sm:$0xff]   ;;  %v496_v23 = vld [vmem:[%s637_s1 + $0xa8] sm:$0xff]  }
   0x9   :  { %454 = vmatpush3.bf16.msra.mxu1 %v480_v7  ;;  %433 = vmatprep.subr.bf16.mxu0 %v481_v8  ;;  %v497_v24 = vld [vmem:[%s637_s1 + $0x70] sm:$0xff]   ;;  %v501_v28 = vld [vmem:[%s637_s1 + $0x78] sm:$0xff]   ;;  %v21_v32 = vld [vmem:[%s638_s0] sm:$0xff] }
   0xa   :  { %455 = vmatprep.subr.bf16.mxu1 %v482_v9  ;;  %v498_v25 = vld [vmem:[%s637_s1 + $0xf0] sm:$0xff]   ;;  %v502_v29 = vld [vmem:[%s637_s1 + $0xf8] sm:$0xff]   ;;  %v22_v33 = vld [vmem:[%s638_s0 + $0x8] sm:$0xff]  ;;  %v392_v34 = vcombine.low %v21_v32, %v21_v32  ;;  %v393_v35 = vcombine.high %v21_v32, %v21_v32 }
   0xb   :  { %v499_v26 = vld [vmem:[%s637_s1 + $0x30] sm:$0xff]   ;;  %v503_v30 = vld [vmem:[%s637_s1 + $0x38] sm:$0xff]   ;;  %v394_v36 = vcombine.low %v22_v33, %v22_v33  ;;  %v395_v37 = vcombine.high %v22_v33, %v22_v33  ;;  %v428_v46 = vld [vmem:[%s639_s2] ss:$0 sm:$0xff] }
   0xc   :  { %434 = vmatpush3.bf16.msra.mxu0 %v483_v10  ;;  %v500_v27 = vld [vmem:[%s637_s1 + $0xb0] sm:$0xff]   ;;  %v504_v31 = vld [vmem:[%s637_s1 + $0xb8] sm:$0xff]   ;;  %325 = vmatprep.mubr.bf16.mxu0 %v393_v35 }
   0xd   :  { %456 = vmatpush3.bf16.msra.mxu1 %v484_v11  ;;  %435 = vmatprep.subr.bf16.mxu0 %v485_v12 }
   0xe   :  { %457 = vmatprep.subr.bf16.mxu1 %v486_v13  ;;  %365 = vmatprep.mubr.bf16.mxu1 %v395_v37 }
  0x10   :  { %436 = vmatpush3.bf16.msra.mxu0 %v487_v14 }
  0x11   :  { %458 = vmatpush3.bf16.msra.mxu1 %v488_v15  ;;  %437 = vmatprep.subr.bf16.mxu0 %v489_v16 }
  0x12   :  { %459 = vmatprep.subr.bf16.mxu1 %v490_v17 }
  0x14   :  { %438 = vmatpush3.bf16.msra.mxu0 %v491_v18 }
  0x15   :  { %460 = vmatpush3.bf16.msra.mxu1 %v492_v19  ;;  %439 = vmatprep.subr.bf16.mxu0 %v493_v20 }
  0x16   :  { %461 = vmatprep.subr.bf16.mxu1 %v494_v21 }
  0x18   :  { %440 = vmatpush3.bf16.msra.mxu0 %v495_v22 }
  0x19   :  { %462 = vmatpush3.bf16.msra.mxu1 %v496_v23  ;;  %441 = vmatprep.subr.bf16.mxu0 %v497_v24 }
  0x1a   :  { %463 = vmatprep.subr.bf16.mxu1 %v498_v25 }
  0x1c   :  { %442 = vmatpush3.bf16.msra.mxu0 %v499_v26 }
  0x1d   :  { %464 = vmatpush3.bf16.msra.mxu1 %v500_v27  ;;  %443 = vmatprep.subr.bf16.mxu0 %v501_v28 }
  0x1e   :  { %465 = vmatprep.subr.bf16.mxu1 %v502_v29 }
  0x20   :  { %444 = vmatpush3.bf16.msra.mxu0 %v503_v30 }
  0x21   :  { %466 = vmatpush3.bf16.msra.mxu1 %v504_v31 }
  0x23   :  { %326 = vmatmul.mubr.bf16.vlgmr.msra.gmra.mrb[0].mxu0 %v392_v34 }
  0x24   :  { %366 = vmatmul.mubr.bf16.vlgmr.msra.gmra.mrb[0].mxu1 %v394_v36 }
  0xf6   :  { %v445_v38 = vpop.f32.mrb[0].mxu0 }
  0xf7   :  { %v467_v39 = vpop.f32.mrb[0].mxu1  ;;  %v446_v40 = vpop.f32.mrb[1].mxu0 }
  0xf8   :  { %v468_v41 = vpop.f32.mrb[1].mxu1  ;;  %v447_v42 = vadd.f32 %v446_v40, %v445_v38  ;;  %v448_v44 = vpop.f32.mrb[2].mxu0 }
  0xf9   :  { %v469_v43 = vadd.f32 %v468_v41, %v467_v39  ;;  %v470_v45 = vpop.f32.mrb[2].mxu1  ;;  %v449_v47 = vpop.f32.mrb[3].mxu0 }
  0xfa   :  { %v471_v48 = vpop.f32.mrb[3].mxu1 }
  0xfb   :  { %v368_v49 = vadd.f32 %v469_v43, %v447_v42 }
  0xfd   :  { %v386_v50 = vadd.f32 %v428_v46, %v368_v49 }
  0xff   :  { %387 = vst [vmem:[%s640_s3] sm:$0xff] %v386_v50 }

</bundles_post_ra>
